<compile_context>
chip_gen: v7x
topology: tpu7x:2x2x1
jax: 0.10.0
libtpu: 0.0.40
codegen_flags: <defaults>
</compile_context>

<pallas_src>
import functools

import jax
import jax.numpy as jnp
from jax.experimental import pallas as pl
from jax.experimental.pallas import tpu as pltpu

# ----------------------------- model config ---------------------------------
BATCH = 2
SEQ = 128        # stands in for max_length=512
HIDDEN = 128     # stands in for bert hidden_size=768
NHEADS = 4
DH = HIDDEN // NHEADS
INTER = 512      # stands in for intermediate_size=3072
NLAYERS = 2      # stands in for 12 encoder layers
VOCAB = 1000
LN_EPS = 1e-12   # BERT LayerNorm eps
MXU_DTYPE = jnp.bfloat16

# ----------------------------- in-kernel helpers ----------------------------


def _layernorm(x, g, b):
    mean = jnp.mean(x, axis=-1, keepdims=True)
    var = jnp.mean(jnp.square(x - mean), axis=-1, keepdims=True)
    return (x - mean) * jax.lax.rsqrt(var + LN_EPS) * g + b


def _gelu_exact(x):
    # BERT uses exact (erf) gelu.
    return 0.5 * x * (1.0 + jax.lax.erf(x * 0.7071067811865476))


def _full_spec(a):
    shape = a.shape
    return pl.BlockSpec(shape, lambda *_: (0,) * len(shape))


# ----------------------------- Pallas kernels -------------------------------


def _emb_layernorm_kernel(x_ref, g_ref, b_ref, o_ref):
    o_ref[...] = _layernorm(x_ref[...], g_ref[...], b_ref[...]).astype(o_ref.dtype)


def _encoder_layer_kernel(x_ref, mask_ref,
                          wqkv_ref, bqkv_ref, wo_ref, bo_ref,
                          ln1_g_ref, ln1_b_ref,
                          w1_ref, b1_ref, w2_ref, b2_ref,
                          ln2_g_ref, ln2_b_ref,
                          o_ref, *, batch, seq):
    x = x_ref[...]                                              # (B*S, H) f32
    h3 = NHEADS * DH

    # Fused QKV projection: single lane-dense (H, 3H) matmul.
    qkv = (jnp.dot(x.astype(MXU_DTYPE), wqkv_ref[...],
                   preferred_element_type=jnp.float32) + bqkv_ref[...])
    q, k, v = qkv[:, :h3], qkv[:, h3:2 * h3], qkv[:, 2 * h3:]

    # Additive attention mask built in-kernel from the (B, S) float mask.
    bias = (1.0 - mask_ref[...]) * -10000.0                     # (B, Sk)
    bias = bias[:, None, :]                                     # (B, 1, Sk)

    scale = DH ** -0.5
    ctx_heads = []
    for h in range(NHEADS):                                     # unrolled
        sl = slice(h * DH, (h + 1) * DH)
        qh = q[:, sl].reshape(batch, seq, DH).astype(MXU_DTYPE)
        kh = k[:, sl].reshape(batch, seq, DH).astype(MXU_DTYPE)
        vh = v[:, sl].reshape(batch, seq, DH).astype(MXU_DTYPE)
        s = jnp.einsum("bqd,bkd->bqk", qh, kh,
                       preferred_element_type=jnp.float32) * scale + bias
        m = jnp.max(s, axis=-1, keepdims=True)
        p = jnp.exp(s - m)
        p = p * pl.reciprocal(jnp.sum(p, axis=-1, keepdims=True), approx=True)
        ctx = jnp.einsum("bqk,bkd->bqd", p.astype(MXU_DTYPE), vh,
                         preferred_element_type=jnp.float32)
        ctx_heads.append(ctx.reshape(batch * seq, DH))
    ctx = jnp.concatenate(ctx_heads, axis=-1)                   # (B*S, H)

    # Output projection + residual + LN1.
    attn_out = (jnp.dot(ctx.astype(MXU_DTYPE), wo_ref[...],
                        preferred_element_type=jnp.float32) + bo_ref[...])
    x1 = _layernorm(attn_out + x, ln1_g_ref[...], ln1_b_ref[...])

    # FFN (gelu) + residual + LN2.
    inter = (jnp.dot(x1.astype(MXU_DTYPE), w1_ref[...],
                     preferred_element_type=jnp.float32) + b1_ref[...])
    inter = _gelu_exact(inter)
    ffn = (jnp.dot(inter.astype(MXU_DTYPE), w2_ref[...],
                   preferred_element_type=jnp.float32) + b2_ref[...])
    o_ref[...] = _layernorm(ffn + x1, ln2_g_ref[...],
                            ln2_b_ref[...]).astype(o_ref.dtype)


def _head_kernel(cls_ref, pw_ref, pb_ref, rw_ref, rb_ref, o_ref):
    # BERT pooler ([CLS] -> dense -> tanh) fused with the Linear(H, 1) regressor.
    pooled = jnp.tanh(jnp.dot(cls_ref[...].astype(MXU_DTYPE), pw_ref[...],
                              preferred_element_type=jnp.float32) + pb_ref[...])
    pred = (jnp.dot(pooled.astype(MXU_DTYPE), rw_ref[...],
                    preferred_element_type=jnp.float32) + rb_ref[...])
    o_ref[...] = pred.astype(o_ref.dtype)


# ----------------------------- pallas_call wrappers --------------------------


def emb_layernorm(x, g, b):
    args = (x, g, b)
    return pl.pallas_call(
        _emb_layernorm_kernel,
        grid=(1,),
        out_shape=jax.ShapeDtypeStruct(x.shape, jnp.float32),
        in_specs=[_full_spec(a) for a in args],
        out_specs=_full_spec(x),
        compiler_params=pltpu.CompilerParams(dimension_semantics=("arbitrary",)),
    )(*args)


def encoder_layer(x2d, mask_f32, p, batch, seq):
    args = (x2d, mask_f32,
            p["wqkv"], p["bqkv"], p["wo"], p["bo"],
            p["ln1_g"], p["ln1_b"],
            p["w1"], p["b1"], p["w2"], p["b2"],
            p["ln2_g"], p["ln2_b"])
    return pl.pallas_call(
        functools.partial(_encoder_layer_kernel, batch=batch, seq=seq),
        grid=(1,),
        out_shape=jax.ShapeDtypeStruct((batch * seq, HIDDEN), jnp.float32),
        in_specs=[_full_spec(a) for a in args],
        out_specs=pl.BlockSpec((batch * seq, HIDDEN), lambda i: (0, 0)),
        compiler_params=pltpu.CompilerParams(dimension_semantics=("arbitrary",)),
    )(*args)


def pooler_regressor(cls_tok, pw, pb, rw, rb):
    args = (cls_tok, pw, pb, rw, rb)
    return pl.pallas_call(
        _head_kernel,
        grid=(1,),
        out_shape=jax.ShapeDtypeStruct((cls_tok.shape[0], 1), jnp.float32),
        in_specs=[_full_spec(a) for a in args],
        out_specs=pl.BlockSpec((cls_tok.shape[0], 1), lambda i: (0, 0)),
        compiler_params=pltpu.CompilerParams(dimension_semantics=("arbitrary",)),
    )(*args)


# ----------------------------- parameters -----------------------------------


def init_params(key):
    def normal(k, shape, dtype=jnp.float32):
        return (0.02 * jax.random.normal(k, shape)).astype(dtype)

    keys = iter(jax.random.split(key, 8 + NLAYERS * 4))
    params = {
        "word_emb": normal(next(keys), (VOCAB, HIDDEN)),
        "pos_emb": normal(next(keys), (SEQ, HIDDEN)),
        "type_emb": normal(next(keys), (2, HIDDEN)),
        "emb_ln_g": jnp.ones((1, HIDDEN), jnp.float32),
        "emb_ln_b": jnp.zeros((1, HIDDEN), jnp.float32),
        "pooler_w": normal(next(keys), (HIDDEN, HIDDEN), MXU_DTYPE),
        "pooler_b": jnp.zeros((1, HIDDEN), jnp.float32),
        "reg_w": normal(next(keys), (HIDDEN, 1), MXU_DTYPE),
        "reg_b": jnp.zeros((1, 1), jnp.float32),
        "layers": [],
    }
    for _ in range(NLAYERS):
        params["layers"].append({
            # q|k|v fused into one (H, 3H) weight / (1, 3H) bias.
            "wqkv": normal(next(keys), (HIDDEN, 3 * HIDDEN), MXU_DTYPE),
            "bqkv": jnp.zeros((1, 3 * HIDDEN), jnp.float32),
            "wo": normal(next(keys), (HIDDEN, HIDDEN), MXU_DTYPE),
            "bo": jnp.zeros((1, HIDDEN), jnp.float32),
            "ln1_g": jnp.ones((1, HIDDEN), jnp.float32),
            "ln1_b": jnp.zeros((1, HIDDEN), jnp.float32),
            "w1": normal(next(keys), (HIDDEN, INTER), MXU_DTYPE),
            "b1": jnp.zeros((1, INTER), jnp.float32),
            "w2": normal(next(keys), (INTER, HIDDEN), MXU_DTYPE),
            "b2": jnp.zeros((1, HIDDEN), jnp.float32),
            "ln2_g": jnp.ones((1, HIDDEN), jnp.float32),
            "ln2_b": jnp.zeros((1, HIDDEN), jnp.float32),
        })
    return params


# ----------------------------- forward pass ----------------------------------


def model_forward(params, input_ids, attention_mask):
    B, S = input_ids.shape
    # Embedding gather + sum stays in plain JAX glue.
    # TODO(synk): no Pallas gather used for the embedding lookup at this scale.
    emb = (params["word_emb"][input_ids]
           + params["pos_emb"][None, :S, :]
           + params["type_emb"][0][None, None, :])          # token_type_ids == 0
    x = emb_layernorm(emb.reshape(B * S, HIDDEN),
                      params["emb_ln_g"], params["emb_ln_b"])

    mask_f32 = attention_mask.astype(jnp.float32)            # (B, S)
    for layer in params["layers"]:
        x = encoder_layer(x, mask_f32, layer, B, S)

    cls_tok = x.reshape(B, S, HIDDEN)[:, 0, :]                # [CLS] token
    predicted = pooler_regressor(cls_tok, params["pooler_w"], params["pooler_b"],
                                 params["reg_w"], params["reg_b"])
    return predicted                                          # (B, 1)


# ----------------------------- main ------------------------------------------

if __name__ == "__main__":
    key = jax.random.PRNGKey(0)
    pkey, ikey = jax.random.split(key)
    params = init_params(pkey)

    input_ids = jax.random.randint(ikey, (BATCH, SEQ), 0, VOCAB, dtype=jnp.int32)
    lengths = jnp.array([SEQ, SEQ - 48], dtype=jnp.int32)     # second seq padded
    attention_mask = (jnp.arange(SEQ)[None, :] < lengths[:, None]).astype(jnp.int32)

    out = jax.jit(model_forward)(params, input_ids, attention_mask)
    out = jax.block_until_ready(out)
    assert out.shape == (BATCH, 1) and out.dtype == jnp.float32
    print("KERNEL_OK")
</pallas_src>

<mosaic_0001>
module attributes {stable_mosaic.version = 11 : i64} {
  func.func @_emb_layernorm_kernel(%arg0: i32, %arg1: memref<256x128xf32, #tpu.memory_space<vmem>>, %arg2: memref<1x128xf32, #tpu.memory_space<vmem>>, %arg3: memref<1x128xf32, #tpu.memory_space<vmem>>, %arg4: memref<256x128xf32, #tpu.memory_space<vmem>>) attributes {dimension_semantics = [#tpu.dimension_semantics<arbitrary>], iteration_bounds = array<i64: 1>, scalar_prefetch = 0 : i64, scratch_operands = 0 : i64, tpu.core_type = #tpu.core_type<tc>, window_params = [{pipeline_mode = #tpu.pipeline_mode<synchronous>, transform_indices = @transform_0, window_bounds = array<i64: 256, 128>}, {pipeline_mode = #tpu.pipeline_mode<synchronous>, transform_indices = @transform_1, window_bounds = array<i64: 1, 128>}, {pipeline_mode = #tpu.pipeline_mode<synchronous>, transform_indices = @transform_2, window_bounds = array<i64: 1, 128>}, {pipeline_mode = #tpu.pipeline_mode<synchronous>, transform_indices = @transform_3, window_bounds = array<i64: 256, 128>}]} {
    %c0 = arith.constant 0 : index
    %c0_0 = arith.constant 0 : index
    %0 = vector.load %arg1[%c0, %c0_0] : memref<256x128xf32, #tpu.memory_space<vmem>>, vector<256x128xf32>
    %c0_1 = arith.constant 0 : index
    %c0_2 = arith.constant 0 : index
    %1 = vector.load %arg2[%c0_1, %c0_2] : memref<1x128xf32, #tpu.memory_space<vmem>>, vector<1x128xf32>
    %c0_3 = arith.constant 0 : index
    %c0_4 = arith.constant 0 : index
    %2 = vector.load %arg3[%c0_3, %c0_4] : memref<1x128xf32, #tpu.memory_space<vmem>>, vector<1x128xf32>
    %cst = arith.constant dense<0.000000e+00> : vector<256xf32>
    %3 = vector.multi_reduction <add>, %0, %cst [1] : vector<256x128xf32> to vector<256xf32>
    %4 = vector.shape_cast %3 : vector<256xf32> to vector<256x1xf32>
    %cst_5 = arith.constant 1.280000e+02 : f32
    %5 = vector.broadcast %cst_5 : f32 to vector<256x1xf32>
    %6 = arith.divf %4, %5 : vector<256x1xf32>
    %7 = vector.broadcast %6 : vector<256x1xf32> to vector<256x128xf32>
    %8 = arith.subf %0, %7 : vector<256x128xf32>
    %9 = arith.mulf %8, %8 : vector<256x128xf32>
    %cst_6 = arith.constant dense<0.000000e+00> : vector<256xf32>
    %10 = vector.multi_reduction <add>, %9, %cst_6 [1] : vector<256x128xf32> to vector<256xf32>
    %11 = vector.shape_cast %10 : vector<256xf32> to vector<256x1xf32>
    %cst_7 = arith.constant 1.280000e+02 : f32
    %12 = vector.broadcast %cst_7 : f32 to vector<256x1xf32>
    %13 = arith.divf %11, %12 : vector<256x1xf32>
    %14 = vector.broadcast %6 : vector<256x1xf32> to vector<256x128xf32>
    %15 = arith.subf %0, %14 : vector<256x128xf32>
    %cst_8 = arith.constant 9.99999996E-13 : f32
    %16 = vector.broadcast %cst_8 : f32 to vector<256x1xf32>
    %17 = arith.addf %13, %16 : vector<256x1xf32>
    %18 = math.rsqrt %17 : vector<256x1xf32>
    %19 = vector.broadcast %18 : vector<256x1xf32> to vector<256x128xf32>
    %20 = arith.mulf %15, %19 : vector<256x128xf32>
    %21 = vector.broadcast %1 : vector<1x128xf32> to vector<256x128xf32>
    %22 = arith.mulf %20, %21 : vector<256x128xf32>
    %23 = vector.broadcast %2 : vector<1x128xf32> to vector<256x128xf32>
    %24 = arith.addf %22, %23 : vector<256x128xf32>
    %c0_9 = arith.constant 0 : index
    %c0_10 = arith.constant 0 : index
    %25 = vector.load %arg4[%c0_9, %c0_10] : memref<256x128xf32, #tpu.memory_space<vmem>>, vector<256x128xf32>
    tpu.vector_store %arg4[%c0_9, %c0_10], %24 {strides = array<i32>} : memref<256x128xf32, #tpu.memory_space<vmem>>, vector<256x128xf32>,
    return
  }
  func.func @transform_0(%arg0: i32) -> (i32, i32) {
    %c0_i32 = arith.constant 0 : i32
    %c0_i32_0 = arith.constant 0 : i32
    %c0_i32_1 = arith.constant 0 : i32
    return %c0_i32, %c0_i32_0 : i32, i32
  }
  func.func @transform_1(%arg0: i32) -> (i32, i32) {
    %c0_i32 = arith.constant 0 : i32
    %c0_i32_0 = arith.constant 0 : i32
    %c0_i32_1 = arith.constant 0 : i32
    return %c0_i32, %c0_i32_0 : i32, i32
  }
  func.func @transform_2(%arg0: i32) -> (i32, i32) {
    %c0_i32 = arith.constant 0 : i32
    %c0_i32_0 = arith.constant 0 : i32
    %c0_i32_1 = arith.constant 0 : i32
    return %c0_i32, %c0_i32_0 : i32, i32
  }
  func.func @transform_3(%arg0: i32) -> (i32, i32) {
    %c0_i32 = arith.constant 0 : i32
    %c0_i32_0 = arith.constant 0 : i32
    %c0_i32_1 = arith.constant 0 : i32
    return %c0_i32, %c0_i32_0 : i32, i32
  }
}

module attributes {stable_mosaic.version = 11 : i64} {
  func.func @_encoder_layer_kernel(%arg0: i32, %arg1: memref<256x128xf32, #tpu.memory_space<vmem>>, %arg2: memref<2x128xf32, #tpu.memory_space<vmem>>, %arg3: memref<128x384xbf16, #tpu.memory_space<vmem>>, %arg4: memref<1x384xf32, #tpu.memory_space<vmem>>, %arg5: memref<128x128xbf16, #tpu.memory_space<vmem>>, %arg6: memref<1x128xf32, #tpu.memory_space<vmem>>, %arg7: memref<1x128xf32, #tpu.memory_space<vmem>>, %arg8: memref<1x128xf32, #tpu.memory_space<vmem>>, %arg9: memref<128x512xbf16, #tpu.memory_space<vmem>>, %arg10: memref<1x512xf32, #tpu.memory_space<vmem>>, %arg11: memref<512x128xbf16, #tpu.memory_space<vmem>>, %arg12: memref<1x128xf32, #tpu.memory_space<vmem>>, %arg13: memref<1x128xf32, #tpu.memory_space<vmem>>, %arg14: memref<1x128xf32, #tpu.memory_space<vmem>>, %arg15: memref<256x128xf32, #tpu.memory_space<vmem>>) attributes {dimension_semantics = [#tpu.dimension_semantics<arbitrary>], iteration_bounds = array<i64: 1>, scalar_prefetch = 0 : i64, scratch_operands = 0 : i64, tpu.core_type = #tpu.core_type<tc>, window_params = [{pipeline_mode = #tpu.pipeline_mode<synchronous>, transform_indices = @transform_0, window_bounds = array<i64: 256, 128>}, {pipeline_mode = #tpu.pipeline_mode<synchronous>, transform_indices = @transform_1, window_bounds = array<i64: 2, 128>}, {pipeline_mode = #tpu.pipeline_mode<synchronous>, transform_indices = @transform_2, window_bounds = array<i64: 128, 384>}, {pipeline_mode = #tpu.pipeline_mode<synchronous>, transform_indices = @transform_3, window_bounds = array<i64: 1, 384>}, {pipeline_mode = #tpu.pipeline_mode<synchronous>, transform_indices = @transform_4, window_bounds = array<i64: 128, 128>}, {pipeline_mode = #tpu.pipeline_mode<synchronous>, transform_indices = @transform_5, window_bounds = array<i64: 1, 128>}, {pipeline_mode = #tpu.pipeline_mode<synchronous>, transform_indices = @transform_6, window_bounds = array<i64: 1, 128>}, {pipeline_mode = #tpu.pipeline_mode<synchronous>, transform_indices = @transform_7, window_bounds = array<i64: 1, 128>}, {pipeline_mode = #tpu.pipeline_mode<synchronous>, transform_indices = @transform_8, window_bounds = array<i64: 128, 512>}, {pipeline_mode = #tpu.pipeline_mode<synchronous>, transform_indices = @transform_9, window_bounds = array<i64: 1, 512>}, {pipeline_mode = #tpu.pipeline_mode<synchronous>, transform_indices = @transform_10, window_bounds = array<i64: 512, 128>}, {pipeline_mode = #tpu.pipeline_mode<synchronous>, transform_indices = @transform_11, window_bounds = array<i64: 1, 128>}, {pipeline_mode = #tpu.pipeline_mode<synchronous>, transform_indices = @transform_12, window_bounds = array<i64: 1, 128>}, {pipeline_mode = #tpu.pipeline_mode<synchronous>, transform_indices = @transform_13, window_bounds = array<i64: 1, 128>}, {pipeline_mode = #tpu.pipeline_mode<synchronous>, transform_indices = @transform_14, window_bounds = array<i64: 256, 128>}]} {
    %c0 = arith.constant 0 : index
    %c0_0 = arith.constant 0 : index
    %0 = vector.load %arg1[%c0, %c0_0] : memref<256x128xf32, #tpu.memory_space<vmem>>, vector<256x128xf32>
    %1 = arith.truncf %0 : vector<256x128xf32> to vector<256x128xbf16>
    %c0_1 = arith.constant 0 : index
    %c0_2 = arith.constant 0 : index
    %2 = vector.load %arg3[%c0_1, %c0_2] : memref<128x384xbf16, #tpu.memory_space<vmem>>, vector<128x384xbf16>
    %cst = arith.constant dense<0.000000e+00> : vector<256x384xf32>
    %3 = tpu.matmul %1, %2, %cst {dimension_numbers = #tpu.dot_dimension_numbers<[1], [0], [0], [1], [0, 0, 1, 1], [], []>} : vector<256x128xbf16>, vector<128x384xbf16>, vector<256x384xf32> -> vector<256x384xf32>
    %c0_3 = arith.constant 0 : index
    %c0_4 = arith.constant 0 : index
    %4 = vector.load %arg4[%c0_3, %c0_4] : memref<1x384xf32, #tpu.memory_space<vmem>>, vector<1x384xf32>
    %5 = vector.broadcast %4 : vector<1x384xf32> to vector<256x384xf32>
    %6 = arith.addf %3, %5 : vector<256x384xf32>
    %7 = vector.extract_strided_slice %6 {offsets = [0, 0], sizes = [256, 128], strides = [1, 1]} : vector<256x384xf32> to vector<256x128xf32>
    %8 = vector.extract_strided_slice %6 {offsets = [0, 128], sizes = [256, 128], strides = [1, 1]} : vector<256x384xf32> to vector<256x128xf32>
    %9 = vector.extract_strided_slice %6 {offsets = [0, 256], sizes = [256, 128], strides = [1, 1]} : vector<256x384xf32> to vector<256x128xf32>
    %c0_5 = arith.constant 0 : index
    %c0_6 = arith.constant 0 : index
    %10 = vector.load %arg2[%c0_5, %c0_6] : memref<2x128xf32, #tpu.memory_space<vmem>>, vector<2x128xf32>
    %cst_7 = arith.constant 1.000000e+00 : f32
    %11 = vector.broadcast %cst_7 : f32 to vector<2x128xf32>
    %12 = arith.subf %11, %10 : vector<2x128xf32>
    %cst_8 = arith.constant -1.000000e+04 : f32
    %13 = vector.broadcast %cst_8 : f32 to vector<2x128xf32>
    %14 = arith.mulf %12, %13 : vector<2x128xf32>
    %15 = vector.shape_cast %14 : vector<2x128xf32> to vector<2x1x128xf32>
    %16 = vector.extract_strided_slice %7 {offsets = [0, 0], sizes = [256, 32], strides = [1, 1]} : vector<256x128xf32> to vector<256x32xf32>
    %17 = vector.shape_cast %16 : vector<256x32xf32> to vector<2x128x32xf32>
    %18 = arith.truncf %17 : vector<2x128x32xf32> to vector<2x128x32xbf16>
    %19 = vector.extract_strided_slice %8 {offsets = [0, 0], sizes = [256, 32], strides = [1, 1]} : vector<256x128xf32> to vector<256x32xf32>
    %20 = vector.shape_cast %19 : vector<256x32xf32> to vector<2x128x32xf32>
    %21 = arith.truncf %20 : vector<2x128x32xf32> to vector<2x128x32xbf16>
    %22 = vector.extract_strided_slice %9 {offsets = [0, 0], sizes = [256, 32], strides = [1, 1]} : vector<256x128xf32> to vector<256x32xf32>
    %23 = vector.shape_cast %22 : vector<256x32xf32> to vector<2x128x32xf32>
    %24 = arith.truncf %23 : vector<2x128x32xf32> to vector<2x128x32xbf16>
    "tpu.trace_start"() <{level = 10 : i32, message = "bqd,bkd->bqk"}> : () -> ()
    %cst_9 = arith.constant dense<0.000000e+00> : vector<2x128x128xf32>
    %25 = tpu.matmul %18, %21, %cst_9 {dimension_numbers = #tpu.dot_dimension_numbers<[2], [2], [1], [1], [0, 0, 0, 1, 1, 1], [0], [0]>} : vector<2x128x32xbf16>, vector<2x128x32xbf16>, vector<2x128x128xf32> -> vector<2x128x128xf32>
    "tpu.trace_stop"() : () -> ()
    %cst_10 = arith.constant 0.176776692 : f32
    %26 = vector.broadcast %cst_10 : f32 to vector<2x128x128xf32>
    %27 = arith.mulf %25, %26 : vector<2x128x128xf32>
    %28 = vector.broadcast %15 : vector<2x1x128xf32> to vector<2x128x128xf32>
    %29 = arith.addf %27, %28 : vector<2x128x128xf32>
    %cst_11 = arith.constant dense<0xFF800000> : vector<2x128xf32>
    %30 = vector.multi_reduction <maximumf>, %29, %cst_11 [2] : vector<2x128x128xf32> to vector<2x128xf32>
    %31 = vector.shape_cast %30 : vector<2x128xf32> to vector<2x128x1xf32>
    %32 = vector.broadcast %31 : vector<2x128x1xf32> to vector<2x128x128xf32>
    %33 = arith.subf %29, %32 : vector<2x128x128xf32>
    %34 = math.exp %33 : vector<2x128x128xf32>
    %cst_12 = arith.constant dense<0.000000e+00> : vector<2x128xf32>
    %35 = vector.multi_reduction <add>, %34, %cst_12 [2] : vector<2x128x128xf32> to vector<2x128xf32>
    %36 = vector.shape_cast %35 : vector<2x128xf32> to vector<2x128x1xf32>
    %37 = tpu.reciprocal %36 {approx = true} : vector<2x128x1xf32> -> vector<2x128x1xf32>
    %38 = vector.broadcast %37 : vector<2x128x1xf32> to vector<2x128x128xf32>
    %39 = arith.mulf %34, %38 : vector<2x128x128xf32>
    %40 = arith.truncf %39 : vector<2x128x128xf32> to vector<2x128x128xbf16>
    "tpu.trace_start"() <{level = 10 : i32, message = "bqk,bkd->bqd"}> : () -> ()
    %cst_13 = arith.constant dense<0.000000e+00> : vector<2x128x32xf32>
    %41 = tpu.matmul %40, %24, %cst_13 {dimension_numbers = #tpu.dot_dimension_numbers<[2], [1], [1], [2], [0, 0, 0, 1, 1, 2], [0], [0]>} : vector<2x128x128xbf16>, vector<2x128x32xbf16>, vector<2x128x32xf32> -> vector<2x128x32xf32>
    "tpu.trace_stop"() : () -> ()
    %42 = vector.shape_cast %41 : vector<2x128x32xf32> to vector<256x32xf32>
    %43 = vector.extract_strided_slice %7 {offsets = [0, 32], sizes = [256, 32], strides = [1, 1]} : vector<256x128xf32> to vector<256x32xf32>
    %44 = vector.shape_cast %43 : vector<256x32xf32> to vector<2x128x32xf32>
    %45 = arith.truncf %44 : vector<2x128x32xf32> to vector<2x128x32xbf16>
    %46 = vector.extract_strided_slice %8 {offsets = [0, 32], sizes = [256, 32], strides = [1, 1]} : vector<256x128xf32> to vector<256x32xf32>
    %47 = vector.shape_cast %46 : vector<256x32xf32> to vector<2x128x32xf32>
    %48 = arith.truncf %47 : vector<2x128x32xf32> to vector<2x128x32xbf16>
    %49 = vector.extract_strided_slice %9 {offsets = [0, 32], sizes = [256, 32], strides = [1, 1]} : vector<256x128xf32> to vector<256x32xf32>
    %50 = vector.shape_cast %49 : vector<256x32xf32> to vector<2x128x32xf32>
    %51 = arith.truncf %50 : vector<2x128x32xf32> to vector<2x128x32xbf16>
    "tpu.trace_start"() <{level = 10 : i32, message = "bqd,bkd->bqk"}> : () -> ()
    %cst_14 = arith.constant dense<0.000000e+00> : vector<2x128x128xf32>
    %52 = tpu.matmul %45, %48, %cst_14 {dimension_numbers = #tpu.dot_dimension_numbers<[2], [2], [1], [1], [0, 0, 0, 1, 1, 1], [0], [0]>} : vector<2x128x32xbf16>, vector<2x128x32xbf16>, vector<2x128x128xf32> -> vector<2x128x128xf32>
    "tpu.trace_stop"() : () -> ()
    %cst_15 = arith.constant 0.176776692 : f32
    %53 = vector.broadcast %cst_15 : f32 to vector<2x128x128xf32>
    %54 = arith.mulf %52, %53 : vector<2x128x128xf32>
    %55 = vector.broadcast %15 : vector<2x1x128xf32> to vector<2x128x128xf32>
    %56 = arith.addf %54, %55 : vector<2x128x128xf32>
    %cst_16 = arith.constant dense<0xFF800000> : vector<2x128xf32>
    %57 = vector.multi_reduction <maximumf>, %56, %cst_16 [2] : vector<2x128x128xf32> to vector<2x128xf32>
    %58 = vector.shape_cast %57 : vector<2x128xf32> to vector<2x128x1xf32>
    %59 = vector.broadcast %58 : vector<2x128x1xf32> to vector<2x128x128xf32>
    %60 = arith.subf %56, %59 : vector<2x128x128xf32>
    %61 = math.exp %60 : vector<2x128x128xf32>
    %cst_17 = arith.constant dense<0.000000e+00> : vector<2x128xf32>
    %62 = vector.multi_reduction <add>, %61, %cst_17 [2] : vector<2x128x128xf32> to vector<2x128xf32>
    %63 = vector.shape_cast %62 : vector<2x128xf32> to vector<2x128x1xf32>
    %64 = tpu.reciprocal %63 {approx = true} : vector<2x128x1xf32> -> vector<2x128x1xf32>
    %65 = vector.broadcast %64 : vector<2x128x1xf32> to vector<2x128x128xf32>
    %66 = arith.mulf %61, %65 : vector<2x128x128xf32>
    %67 = arith.truncf %66 : vector<2x128x128xf32> to vector<2x128x128xbf16>
    "tpu.trace_start"() <{level = 10 : i32, message = "bqk,bkd->bqd"}> : () -> ()
    %cst_18 = arith.constant dense<0.000000e+00> : vector<2x128x32xf32>
    %68 = tpu.matmul %67, %51, %cst_18 {dimension_numbers = #tpu.dot_dimension_numbers<[2], [1], [1], [2], [0, 0, 0, 1, 1, 2], [0], [0]>} : vector<2x128x128xbf16>, vector<2x128x32xbf16>, vector<2x128x32xf32> -> vector<2x128x32xf32>
    "tpu.trace_stop"() : () -> ()
    %69 = vector.shape_cast %68 : vector<2x128x32xf32> to vector<256x32xf32>
    %70 = vector.extract_strided_slice %7 {offsets = [0, 64], sizes = [256, 32], strides = [1, 1]} : vector<256x128xf32> to vector<256x32xf32>
    %71 = vector.shape_cast %70 : vector<256x32xf32> to vector<2x128x32xf32>
    %72 = arith.truncf %71 : vector<2x128x32xf32> to vector<2x128x32xbf16>
    %73 = vector.extract_strided_slice %8 {offsets = [0, 64], sizes = [256, 32], strides = [1, 1]} : vector<256x128xf32> to vector<256x32xf32>
    %74 = vector.shape_cast %73 : vector<256x32xf32> to vector<2x128x32xf32>
    %75 = arith.truncf %74 : vector<2x128x32xf32> to vector<2x128x32xbf16>
    %76 = vector.extract_strided_slice %9 {offsets = [0, 64], sizes = [256, 32], strides = [1, 1]} : vector<256x128xf32> to vector<256x32xf32>
    %77 = vector.shape_cast %76 : vector<256x32xf32> to vector<2x128x32xf32>
    %78 = arith.truncf %77 : vector<2x128x32xf32> to vector<2x128x32xbf16>
    "tpu.trace_start"() <{level = 10 : i32, message = "bqd,bkd->bqk"}> : () -> ()
    %cst_19 = arith.constant dense<0.000000e+00> : vector<2x128x128xf32>
    %79 = tpu.matmul %72, %75, %cst_19 {dimension_numbers = #tpu.dot_dimension_numbers<[2], [2], [1], [1], [0, 0, 0, 1, 1, 1], [0], [0]>} : vector<2x128x32xbf16>, vector<2x128x32xbf16>, vector<2x128x128xf32> -> vector<2x128x128xf32>
    "tpu.trace_stop"() : () -> ()
    %cst_20 = arith.constant 0.176776692 : f32
    %80 = vector.broadcast %cst_20 : f32 to vector<2x128x128xf32>
    %81 = arith.mulf %79, %80 : vector<2x128x128xf32>
    %82 = vector.broadcast %15 : vector<2x1x128xf32> to vector<2x128x128xf32>
    %83 = arith.addf %81, %82 : vector<2x128x128xf32>
    %cst_21 = arith.constant dense<0xFF800000> : vector<2x128xf32>
    %84 = vector.multi_reduction <maximumf>, %83, %cst_21 [2] : vector<2x128x128xf32> to vector<2x128xf32>
    %85 = vector.shape_cast %84 : vector<2x128xf32> to vector<2x128x1xf32>
    %86 = vector.broadcast %85 : vector<2x128x1xf32> to vector<2x128x128xf32>
    %87 = arith.subf %83, %86 : vector<2x128x128xf32>
    %88 = math.exp %87 : vector<2x128x128xf32>
    %cst_22 = arith.constant dense<0.000000e+00> : vector<2x128xf32>
    %89 = vector.multi_reduction <add>, %88, %cst_22 [2] : vector<2x128x128xf32> to vector<2x128xf32>
    %90 = vector.shape_cast %89 : vector<2x128xf32> to vector<2x128x1xf32>
    %91 = tpu.reciprocal %90 {approx = true} : vector<2x128x1xf32> -> vector<2x128x1xf32>
    %92 = vector.broadcast %91 : vector<2x128x1xf32> to vector<2x128x128xf32>
    %93 = arith.mulf %88, %92 : vector<2x128x128xf32>
    %94 = arith.truncf %93 : vector<2x128x128xf32> to vector<2x128x128xbf16>
    "tpu.trace_start"() <{level = 10 : i32, message = "bqk,bkd->bqd"}> : () -> ()
    %cst_23 = arith.constant dense<0.000000e+00> : vector<2x128x32xf32>
    %95 = tpu.matmul %94, %78, %cst_23 {dimension_numbers = #tpu.dot_dimension_numbers<[2], [1], [1], [2], [0, 0, 0, 1, 1, 2], [0], [0]>} : vector<2x128x128xbf16>, vector<2x128x32xbf16>, vector<2x128x32xf32> -> vector<2x128x32xf32>
    "tpu.trace_stop"() : () -> ()
    %96 = vector.shape_cast %95 : vector<2x128x32xf32> to vector<256x32xf32>
    %97 = vector.extract_strided_slice %7 {offsets = [0, 96], sizes = [256, 32], strides = [1, 1]} : vector<256x128xf32> to vector<256x32xf32>
    %98 = vector.shape_cast %97 : vector<256x32xf32> to vector<2x128x32xf32>
    %99 = arith.truncf %98 : vector<2x128x32xf32> to vector<2x128x32xbf16>
    %100 = vector.extract_strided_slice %8 {offsets = [0, 96], sizes = [256, 32], strides = [1, 1]} : vector<256x128xf32> to vector<256x32xf32>
    %101 = vector.shape_cast %100 : vector<256x32xf32> to vector<2x128x32xf32>
    %102 = arith.truncf %101 : vector<2x128x32xf32> to vector<2x128x32xbf16>
    %103 = vector.extract_strided_slice %9 {offsets = [0, 96], sizes = [256, 32], strides = [1, 1]} : vector<256x128xf32> to vector<256x32xf32>
    %104 = vector.shape_cast %103 : vector<256x32xf32> to vector<2x128x32xf32>
    %105 = arith.truncf %104 : vector<2x128x32xf32> to vector<2x128x32xbf16>
    "tpu.trace_start"() <{level = 10 : i32, message = "bqd,bkd->bqk"}> : () -> ()
    %cst_24 = arith.constant dense<0.000000e+00> : vector<2x128x128xf32>
    %106 = tpu.matmul %99, %102, %cst_24 {dimension_numbers = #tpu.dot_dimension_numbers<[2], [2], [1], [1], [0, 0, 0, 1, 1, 1], [0], [0]>} : vector<2x128x32xbf16>, vector<2x128x32xbf16>, vector<2x128x128xf32> -> vector<2x128x128xf32>
    "tpu.trace_stop"() : () -> ()
    %cst_25 = arith.constant 0.176776692 : f32
    %107 = vector.broadcast %cst_25 : f32 to vector<2x128x128xf32>
    %108 = arith.mulf %106, %107 : vector<2x128x128xf32>
    %109 = vector.broadcast %15 : vector<2x1x128xf32> to vector<2x128x128xf32>
    %110 = arith.addf %108, %109 : vector<2x128x128xf32>
    %cst_26 = arith.constant dense<0xFF800000> : vector<2x128xf32>
    %111 = vector.multi_reduction <maximumf>, %110, %cst_26 [2] : vector<2x128x128xf32> to vector<2x128xf32>
    %112 = vector.shape_cast %111 : vector<2x128xf32> to vector<2x128x1xf32>
    %113 = vector.broadcast %112 : vector<2x128x1xf32> to vector<2x128x128xf32>
    %114 = arith.subf %110, %113 : vector<2x128x128xf32>
    %115 = math.exp %114 : vector<2x128x128xf32>
    %cst_27 = arith.constant dense<0.000000e+00> : vector<2x128xf32>
    %116 = vector.multi_reduction <add>, %115, %cst_27 [2] : vector<2x128x128xf32> to vector<2x128xf32>
    %117 = vector.shape_cast %116 : vector<2x128xf32> to vector<2x128x1xf32>
    %118 = tpu.reciprocal %117 {approx = true} : vector<2x128x1xf32> -> vector<2x128x1xf32>
    %119 = vector.broadcast %118 : vector<2x128x1xf32> to vector<2x128x128xf32>
    %120 = arith.mulf %115, %119 : vector<2x128x128xf32>
    %121 = arith.truncf %120 : vector<2x128x128xf32> to vector<2x128x128xbf16>
    "tpu.trace_start"() <{level = 10 : i32, message = "bqk,bkd->bqd"}> : () -> ()
    %cst_28 = arith.constant dense<0.000000e+00> : vector<2x128x32xf32>
    %122 = tpu.matmul %121, %105, %cst_28 {dimension_numbers = #tpu.dot_dimension_numbers<[2], [1], [1], [2], [0, 0, 0, 1, 1, 2], [0], [0]>} : vector<2x128x128xbf16>, vector<2x128x32xbf16>, vector<2x128x32xf32> -> vector<2x128x32xf32>
    "tpu.trace_stop"() : () -> ()
    %123 = vector.shape_cast %122 : vector<2x128x32xf32> to vector<256x32xf32>
    %124 = tpu.concatenate %42, %69, %96, %123 in 1 : vector<256x32xf32>, vector<256x32xf32>, vector<256x32xf32>, vector<256x32xf32> -> vector<256x128xf32>
    %125 = arith.truncf %124 : vector<256x128xf32> to vector<256x128xbf16>
    %c0_29 = arith.constant 0 : index
    %c0_30 = arith.constant 0 : index
    %126 = vector.load %arg5[%c0_29, %c0_30] : memref<128x128xbf16, #tpu.memory_space<vmem>>, vector<128x128xbf16>
    %cst_31 = arith.constant dense<0.000000e+00> : vector<256x128xf32>
    %127 = tpu.matmul %125, %126, %cst_31 {dimension_numbers = #tpu.dot_dimension_numbers<[1], [0], [0], [1], [0, 0, 1, 1], [], []>} : vector<256x128xbf16>, vector<128x128xbf16>, vector<256x128xf32> -> vector<256x128xf32>
    %c0_32 = arith.constant 0 : index
    %c0_33 = arith.constant 0 : index
    %128 = vector.load %arg6[%c0_32, %c0_33] : memref<1x128xf32, #tpu.memory_space<vmem>>, vector<1x128xf32>
    %129 = vector.broadcast %128 : vector<1x128xf32> to vector<256x128xf32>
    %130 = arith.addf %127, %129 : vector<256x128xf32>
    %131 = arith.addf %130, %0 : vector<256x128xf32>
    %c0_34 = arith.constant 0 : index
    %c0_35 = arith.constant 0 : index
    %132 = vector.load %arg7[%c0_34, %c0_35] : memref<1x128xf32, #tpu.memory_space<vmem>>, vector<1x128xf32>
    %c0_36 = arith.constant 0 : index
    %c0_37 = arith.constant 0 : index
    %133 = vector.load %arg8[%c0_36, %c0_37] : memref<1x128xf32, #tpu.memory_space<vmem>>, vector<1x128xf32>
    %cst_38 = arith.constant dense<0.000000e+00> : vector<256xf32>
    %134 = vector.multi_reduction <add>, %131, %cst_38 [1] : vector<256x128xf32> to vector<256xf32>
    %135 = vector.shape_cast %134 : vector<256xf32> to vector<256x1xf32>
    %cst_39 = arith.constant 1.280000e+02 : f32
    %136 = vector.broadcast %cst_39 : f32 to vector<256x1xf32>
    %137 = arith.divf %135, %136 : vector<256x1xf32>
    %138 = vector.broadcast %137 : vector<256x1xf32> to vector<256x128xf32>
    %139 = arith.subf %131, %138 : vector<256x128xf32>
    %140 = arith.mulf %139, %139 : vector<256x128xf32>
    %cst_40 = arith.constant dense<0.000000e+00> : vector<256xf32>
    %141 = vector.multi_reduction <add>, %140, %cst_40 [1] : vector<256x128xf32> to vector<256xf32>
    %142 = vector.shape_cast %141 : vector<256xf32> to vector<256x1xf32>
    %cst_41 = arith.constant 1.280000e+02 : f32
    %143 = vector.broadcast %cst_41 : f32 to vector<256x1xf32>
    %144 = arith.divf %142, %143 : vector<256x1xf32>
    %145 = vector.broadcast %137 : vector<256x1xf32> to vector<256x128xf32>
    %146 = arith.subf %131, %145 : vector<256x128xf32>
    %cst_42 = arith.constant 9.99999996E-13 : f32
    %147 = vector.broadcast %cst_42 : f32 to vector<256x1xf32>
    %148 = arith.addf %144, %147 : vector<256x1xf32>
    %149 = math.rsqrt %148 : vector<256x1xf32>
    %150 = vector.broadcast %149 : vector<256x1xf32> to vector<256x128xf32>
    %151 = arith.mulf %146, %150 : vector<256x128xf32>
    %152 = vector.broadcast %132 : vector<1x128xf32> to vector<256x128xf32>
    %153 = arith.mulf %151, %152 : vector<256x128xf32>
    %154 = vector.broadcast %133 : vector<1x128xf32> to vector<256x128xf32>
    %155 = arith.addf %153, %154 : vector<256x128xf32>
    %156 = arith.truncf %155 : vector<256x128xf32> to vector<256x128xbf16>
    %c0_43 = arith.constant 0 : index
    %c0_44 = arith.constant 0 : index
    %157 = vector.load %arg9[%c0_43, %c0_44] : memref<128x512xbf16, #tpu.memory_space<vmem>>, vector<128x512xbf16>
    %cst_45 = arith.constant dense<0.000000e+00> : vector<256x512xf32>
    %158 = tpu.matmul %156, %157, %cst_45 {dimension_numbers = #tpu.dot_dimension_numbers<[1], [0], [0], [1], [0, 0, 1, 1], [], []>} : vector<256x128xbf16>, vector<128x512xbf16>, vector<256x512xf32> -> vector<256x512xf32>
    %c0_46 = arith.constant 0 : index
    %c0_47 = arith.constant 0 : index
    %159 = vector.load %arg10[%c0_46, %c0_47] : memref<1x512xf32, #tpu.memory_space<vmem>>, vector<1x512xf32>
    %160 = vector.broadcast %159 : vector<1x512xf32> to vector<256x512xf32>
    %161 = arith.addf %158, %160 : vector<256x512xf32>
    %cst_48 = arith.constant 5.000000e-01 : f32
    %162 = vector.broadcast %cst_48 : f32 to vector<256x512xf32>
    %163 = arith.mulf %162, %161 : vector<256x512xf32>
    %cst_49 = arith.constant 0.707106769 : f32
    %164 = vector.broadcast %cst_49 : f32 to vector<256x512xf32>
    %165 = arith.mulf %161, %164 : vector<256x512xf32>
    %166 = math.erf %165 : vector<256x512xf32>
    %cst_50 = arith.constant 1.000000e+00 : f32
    %167 = vector.broadcast %cst_50 : f32 to vector<256x512xf32>
    %168 = arith.addf %167, %166 : vector<256x512xf32>
    %169 = arith.mulf %163, %168 : vector<256x512xf32>
    %170 = arith.truncf %169 : vector<256x512xf32> to vector<256x512xbf16>
    %c0_51 = arith.constant 0 : index
    %c0_52 = arith.constant 0 : index
    %171 = vector.load %arg11[%c0_51, %c0_52] : memref<512x128xbf16, #tpu.memory_space<vmem>>, vector<512x128xbf16>
    %cst_53 = arith.constant dense<0.000000e+00> : vector<256x128xf32>
    %172 = tpu.matmul %170, %171, %cst_53 {dimension_numbers = #tpu.dot_dimension_numbers<[1], [0], [0], [1], [0, 0, 1, 1], [], []>} : vector<256x512xbf16>, vector<512x128xbf16>, vector<256x128xf32> -> vector<256x128xf32>
    %c0_54 = arith.constant 0 : index
    %c0_55 = arith.constant 0 : index
    %173 = vector.load %arg12[%c0_54, %c0_55] : memref<1x128xf32, #tpu.memory_space<vmem>>, vector<1x128xf32>
    %174 = vector.broadcast %173 : vector<1x128xf32> to vector<256x128xf32>
    %175 = arith.addf %172, %174 : vector<256x128xf32>
    %176 = arith.addf %175, %155 : vector<256x128xf32>
    %c0_56 = arith.constant 0 : index
    %c0_57 = arith.constant 0 : index
    %177 = vector.load %arg13[%c0_56, %c0_57] : memref<1x128xf32, #tpu.memory_space<vmem>>, vector<1x128xf32>
    %c0_58 = arith.constant 0 : index
    %c0_59 = arith.constant 0 : index
    %178 = vector.load %arg14[%c0_58, %c0_59] : memref<1x128xf32, #tpu.memory_space<vmem>>, vector<1x128xf32>
    %cst_60 = arith.constant dense<0.000000e+00> : vector<256xf32>
    %179 = vector.multi_reduction <add>, %176, %cst_60 [1] : vector<256x128xf32> to vector<256xf32>
    %180 = vector.shape_cast %179 : vector<256xf32> to vector<256x1xf32>
    %cst_61 = arith.constant 1.280000e+02 : f32
    %181 = vector.broadcast %cst_61 : f32 to vector<256x1xf32>
    %182 = arith.divf %180, %181 : vector<256x1xf32>
    %183 = vector.broadcast %182 : vector<256x1xf32> to vector<256x128xf32>
    %184 = arith.subf %176, %183 : vector<256x128xf32>
    %185 = arith.mulf %184, %184 : vector<256x128xf32>
    %cst_62 = arith.constant dense<0.000000e+00> : vector<256xf32>
    %186 = vector.multi_reduction <add>, %185, %cst_62 [1] : vector<256x128xf32> to vector<256xf32>
    %187 = vector.shape_cast %186 : vector<256xf32> to vector<256x1xf32>
    %cst_63 = arith.constant 1.280000e+02 : f32
    %188 = vector.broadcast %cst_63 : f32 to vector<256x1xf32>
    %189 = arith.divf %187, %188 : vector<256x1xf32>
    %190 = vector.broadcast %182 : vector<256x1xf32> to vector<256x128xf32>
    %191 = arith.subf %176, %190 : vector<256x128xf32>
    %cst_64 = arith.constant 9.99999996E-13 : f32
    %192 = vector.broadcast %cst_64 : f32 to vector<256x1xf32>
    %193 = arith.addf %189, %192 : vector<256x1xf32>
    %194 = math.rsqrt %193 : vector<256x1xf32>
    %195 = vector.broadcast %194 : vector<256x1xf32> to vector<256x128xf32>
    %196 = arith.mulf %191, %195 : vector<256x128xf32>
    %197 = vector.broadcast %177 : vector<1x128xf32> to vector<256x128xf32>
    %198 = arith.mulf %196, %197 : vector<256x128xf32>
    %199 = vector.broadcast %178 : vector<1x128xf32> to vector<256x128xf32>
    %200 = arith.addf %198, %199 : vector<256x128xf32>
    %c0_65 = arith.constant 0 : index
    %c0_66 = arith.constant 0 : index
    %201 = vector.load %arg15[%c0_65, %c0_66] : memref<256x128xf32, #tpu.memory_space<vmem>>, vector<256x128xf32>
    tpu.vector_store %arg15[%c0_65, %c0_66], %200 {strides = array<i32>} : memref<256x128xf32, #tpu.memory_space<vmem>>, vector<256x128xf32>,
    return
  }
  func.func @transform_0(%arg0: i32) -> (i32, i32) {
    %c0_i32 = arith.constant 0 : i32
    %c0_i32_0 = arith.constant 0 : i32
    %c0_i32_1 = arith.constant 0 : i32
    return %c0_i32, %c0_i32_0 : i32, i32
  }
  func.func @transform_1(%arg0: i32) -> (i32, i32) {
    %c0_i32 = arith.constant 0 : i32
    %c0_i32_0 = arith.constant 0 : i32
    %c0_i32_1 = arith.constant 0 : i32
    return %c0_i32, %c0_i32_0 : i32, i32
  }
  func.func @transform_2(%arg0: i32) -> (i32, i32) {
    %c0_i32 = arith.constant 0 : i32
    %c0_i32_0 = arith.constant 0 : i32
    %c0_i32_1 = arith.constant 0 : i32
    return %c0_i32, %c0_i32_0 : i32, i32
  }
  func.func @transform_3(%arg0: i32) -> (i32, i32) {
    %c0_i32 = arith.constant 0 : i32
    %c0_i32_0 = arith.constant 0 : i32
    %c0_i32_1 = arith.constant 0 : i32
    return %c0_i32, %c0_i32_0 : i32, i32
  }
  func.func @transform_4(%arg0: i32) -> (i32, i32) {
    %c0_i32 = arith.constant 0 : i32
    %c0_i32_0 = arith.constant 0 : i32
    %c0_i32_1 = arith.constant 0 : i32
    return %c0_i32, %c0_i32_0 : i32, i32
  }
  func.func @transform_5(%arg0: i32) -> (i32, i32) {
    %c0_i32 = arith.constant 0 : i32
    %c0_i32_0 = arith.constant 0 : i32
    %c0_i32_1 = arith.constant 0 : i32
    return %c0_i32, %c0_i32_0 : i32, i32
  }
  func.func @transform_6(%arg0: i32) -> (i32, i32) {
    %c0_i32 = arith.constant 0 : i32
    %c0_i32_0 = arith.constant 0 : i32
    %c0_i32_1 = arith.constant 0 : i32
    return %c0_i32, %c0_i32_0 : i32, i32
  }
  func.func @transform_7(%arg0: i32) -> (i32, i32) {
    %c0_i32 = arith.constant 0 : i32
    %c0_i32_0 = arith.constant 0 : i32
    %c0_i32_1 = arith.constant 0 : i32
    return %c0_i32, %c0_i32_0 : i32, i32
  }
  func.func @transform_8(%arg0: i32) -> (i32, i32) {
    %c0_i32 = arith.constant 0 : i32
    %c0_i32_0 = arith.constant 0 : i32
    %c0_i32_1 = arith.constant 0 : i32
    return %c0_i32, %c0_i32_0 : i32, i32
  }
  func.func @transform_9(%arg0: i32) -> (i32, i32) {
    %c0_i32 = arith.constant 0 : i32
    %c0_i32_0 = arith.constant 0 : i32
    %c0_i32_1 = arith.constant 0 : i32
    return %c0_i32, %c0_i32_0 : i32, i32
  }
  func.func @transform_10(%arg0: i32) -> (i32, i32) {
    %c0_i32 = arith.constant 0 : i32
    %c0_i32_0 = arith.constant 0 : i32
    %c0_i32_1 = arith.constant 0 : i32
    return %c0_i32, %c0_i32_0 : i32, i32
  }
  func.func @transform_11(%arg0: i32) -> (i32, i32) {
    %c0_i32 = arith.constant 0 : i32
    %c0_i32_0 = arith.constant 0 : i32
    %c0_i32_1 = arith.constant 0 : i32
    return %c0_i32, %c0_i32_0 : i32, i32
  }
  func.func @transform_12(%arg0: i32) -> (i32, i32) {
    %c0_i32 = arith.constant 0 : i32
    %c0_i32_0 = arith.constant 0 : i32
    %c0_i32_1 = arith.constant 0 : i32
    return %c0_i32, %c0_i32_0 : i32, i32
  }
  func.func @transform_13(%arg0: i32) -> (i32, i32) {
    %c0_i32 = arith.constant 0 : i32
    %c0_i32_0 = arith.constant 0 : i32
    %c0_i32_1 = arith.constant 0 : i32
    return %c0_i32, %c0_i32_0 : i32, i32
  }
  func.func @transform_14(%arg0: i32) -> (i32, i32) {
    %c0_i32 = arith.constant 0 : i32
    %c0_i32_0 = arith.constant 0 : i32
    %c0_i32_1 = arith.constant 0 : i32
    return %c0_i32, %c0_i32_0 : i32, i32
  }
}

module attributes {stable_mosaic.version = 11 : i64} {
  func.func @_head_kernel(%arg0: i32, %arg1: memref<2x128xf32, #tpu.memory_space<vmem>>, %arg2: memref<128x128xbf16, #tpu.memory_space<vmem>>, %arg3: memref<1x128xf32, #tpu.memory_space<vmem>>, %arg4: memref<128x1xbf16, #tpu.memory_space<vmem>>, %arg5: memref<1x1xf32, #tpu.memory_space<vmem>>, %arg6: memref<2x1xf32, #tpu.memory_space<vmem>>) attributes {dimension_semantics = [#tpu.dimension_semantics<arbitrary>], iteration_bounds = array<i64: 1>, scalar_prefetch = 0 : i64, scratch_operands = 0 : i64, tpu.core_type = #tpu.core_type<tc>, window_params = [{pipeline_mode = #tpu.pipeline_mode<synchronous>, transform_indices = @transform_0, window_bounds = array<i64: 2, 128>}, {pipeline_mode = #tpu.pipeline_mode<synchronous>, transform_indices = @transform_1, window_bounds = array<i64: 128, 128>}, {pipeline_mode = #tpu.pipeline_mode<synchronous>, transform_indices = @transform_2, window_bounds = array<i64: 1, 128>}, {pipeline_mode = #tpu.pipeline_mode<synchronous>, transform_indices = @transform_3, window_bounds = array<i64: 128, 1>}, {pipeline_mode = #tpu.pipeline_mode<synchronous>, transform_indices = @transform_4, window_bounds = array<i64: 1, 1>}, {pipeline_mode = #tpu.pipeline_mode<synchronous>, transform_indices = @transform_5, window_bounds = array<i64: 2, 1>}]} {
    %c0 = arith.constant 0 : index
    %c0_0 = arith.constant 0 : index
    %0 = vector.load %arg1[%c0, %c0_0] : memref<2x128xf32, #tpu.memory_space<vmem>>, vector<2x128xf32>
    %1 = arith.truncf %0 : vector<2x128xf32> to vector<2x128xbf16>
    %c0_1 = arith.constant 0 : index
    %c0_2 = arith.constant 0 : index
    %2 = vector.load %arg2[%c0_1, %c0_2] : memref<128x128xbf16, #tpu.memory_space<vmem>>, vector<128x128xbf16>
    %cst = arith.constant dense<0.000000e+00> : vector<2x128xf32>
    %3 = tpu.matmul %1, %2, %cst {dimension_numbers = #tpu.dot_dimension_numbers<[1], [0], [0], [1], [0, 0, 1, 1], [], []>} : vector<2x128xbf16>, vector<128x128xbf16>, vector<2x128xf32> -> vector<2x128xf32>
    %c0_3 = arith.constant 0 : index
    %c0_4 = arith.constant 0 : index
    %4 = vector.load %arg3[%c0_3, %c0_4] : memref<1x128xf32, #tpu.memory_space<vmem>>, vector<1x128xf32>
    %5 = vector.broadcast %4 : vector<1x128xf32> to vector<2x128xf32>
    %6 = arith.addf %3, %5 : vector<2x128xf32>
    %7 = math.tanh %6 : vector<2x128xf32>
    %8 = arith.truncf %7 : vector<2x128xf32> to vector<2x128xbf16>
    %c0_5 = arith.constant 0 : index
    %c0_6 = arith.constant 0 : index
    %9 = vector.load %arg4[%c0_5, %c0_6] : memref<128x1xbf16, #tpu.memory_space<vmem>>, vector<128x1xbf16>
    %cst_7 = arith.constant dense<0.000000e+00> : vector<2x1xf32>
    %10 = tpu.matmul %8, %9, %cst_7 {dimension_numbers = #tpu.dot_dimension_numbers<[1], [0], [0], [1], [0, 0, 1, 1], [], []>} : vector<2x128xbf16>, vector<128x1xbf16>, vector<2x1xf32> -> vector<2x1xf32>
    %c0_8 = arith.constant 0 : index
    %c0_9 = arith.constant 0 : index
    %11 = vector.load %arg5[%c0_8, %c0_9] : memref<1x1xf32, #tpu.memory_space<vmem>>, vector<1x1xf32>
    %12 = vector.broadcast %11 : vector<1x1xf32> to vector<2x1xf32>
    %13 = arith.addf %10, %12 : vector<2x1xf32>
    %c0_10 = arith.constant 0 : index
    %c0_11 = arith.constant 0 : index
    %14 = vector.load %arg6[%c0_10, %c0_11] : memref<2x1xf32, #tpu.memory_space<vmem>>, vector<2x1xf32>
    tpu.vector_store %arg6[%c0_10, %c0_11], %13 {strides = array<i32>} : memref<2x1xf32, #tpu.memory_space<vmem>>, vector<2x1xf32>,
    return
  }
  func.func @transform_0(%arg0: i32) -> (i32, i32) {
    %c0_i32 = arith.constant 0 : i32
    %c0_i32_0 = arith.constant 0 : i32
    %c0_i32_1 = arith.constant 0 : i32
    return %c0_i32, %c0_i32_0 : i32, i32
  }
  func.func @transform_1(%arg0: i32) -> (i32, i32) {
    %c0_i32 = arith.constant 0 : i32
    %c0_i32_0 = arith.constant 0 : i32
    %c0_i32_1 = arith.constant 0 : i32
    return %c0_i32, %c0_i32_0 : i32, i32
  }
  func.func @transform_2(%arg0: i32) -> (i32, i32) {
    %c0_i32 = arith.constant 0 : i32
    %c0_i32_0 = arith.constant 0 : i32
    %c0_i32_1 = arith.constant 0 : i32
    return %c0_i32, %c0_i32_0 : i32, i32
  }
  func.func @transform_3(%arg0: i32) -> (i32, i32) {
    %c0_i32 = arith.constant 0 : i32
    %c0_i32_0 = arith.constant 0 : i32
    %c0_i32_1 = arith.constant 0 : i32
    return %c0_i32, %c0_i32_0 : i32, i32
  }
  func.func @transform_4(%arg0: i32) -> (i32, i32) {
    %c0_i32 = arith.constant 0 : i32
    %c0_i32_0 = arith.constant 0 : i32
    %c0_i32_1 = arith.constant 0 : i32
    return %c0_i32, %c0_i32_0 : i32, i32
  }
  func.func @transform_5(%arg0: i32) -> (i32, i32) {
    %c0_i32 = arith.constant 0 : i32
    %c0_i32_0 = arith.constant 0 : i32
    %c0_i32_1 = arith.constant 0 : i32
    return %c0_i32, %c0_i32_0 : i32, i32
  }
}

</mosaic_0001>

<bundles_post_ra>
// kernel: model_forward.4
= control target key start
LH: loop header
LB: loop body
LE: loop exit
PB: predicated region body
PF: predicated region fallthrough
CT: control target
= control target key end

     0   :  { %s1153_s0 = inlined_call_operand.vmem [shape: f32[256,128], index: 0, kind: input, shape index: {}]   ;;  %s1154_s1 = inlined_call_operand.vmem [shape: f32[1,128], index: 1, kind: input, shape index: {}]   ;;  %s1155_s2 = inlined_call_operand.vmem [shape: f32[1,128], index: 2, kind: input, shape index: {}]   ;;  %s1156_s3 = inlined_call_operand.vmem [shape: f32[256,128], index: 3, kind: output, shape index: {}]  }
   0x1   :  { %v602_v0 = vld [vmem:[%s1153_s0] sm:$0xff]  ;;  %v607_v1 = vld [vmem:[%s1153_s0 + $0x10] sm:$0xff]  ;;  %v614_v2 = vld [vmem:[%s1153_s0 + $0x8] sm:$0xff] }
   0x2   :  { %48 = vadd.xlane.f32.xlu0 %v602_v0  ;;  %52 = vadd.xlane.f32.xlu1 %v607_v1  ;;  %v619_v3 = vld [vmem:[%s1153_s0 + $0x18] sm:$0xff]  ;;  %v626_v4 = vld [vmem:[%s1153_s0 + $0x20] sm:$0xff]  ;;  %v631_v5 = vld [vmem:[%s1153_s0 + $0x28] sm:$0xff] }
   0x3   :  { %v638_v6 = vld [vmem:[%s1153_s0 + $0x30] sm:$0xff]  ;;  %v643_v7 = vld [vmem:[%s1153_s0 + $0x38] sm:$0xff]  ;;  %v650_v8 = vld [vmem:[%s1153_s0 + $0x40] sm:$0xff] }
   0x4   :  { %v655_v9 = vld [vmem:[%s1153_s0 + $0x48] sm:$0xff]  ;;  %v662_v10 = vld [vmem:[%s1153_s0 + $0x50] sm:$0xff]  ;;  %v667_v11 = vld [vmem:[%s1153_s0 + $0x58] sm:$0xff] }
   0x5   :  { %v674_v12 = vld [vmem:[%s1153_s0 + $0x60] sm:$0xff]  ;;  %v679_v13 = vld [vmem:[%s1153_s0 + $0x68] sm:$0xff]  ;;  %v686_v14 = vld [vmem:[%s1153_s0 + $0x70] sm:$0xff] }
   0x6   :  { %50 = vadd.xlane.f32.xlu0 %v614_v2  ;;  %54 = vadd.xlane.f32.xlu1 %v619_v3  ;;  %v691_v15 = vld [vmem:[%s1153_s0 + $0x78] sm:$0xff]  ;;  %v698_v16 = vld [vmem:[%s1153_s0 + $0x80] sm:$0xff]  ;;  %v703_v17 = vld [vmem:[%s1153_s0 + $0x88] sm:$0xff] }
   0x7   :  { %v710_v18 = vld [vmem:[%s1153_s0 + $0x90] sm:$0xff]  ;;  %v715_v19 = vld [vmem:[%s1153_s0 + $0x98] sm:$0xff]  ;;  %v722_v20 = vld [vmem:[%s1153_s0 + $0xa0] sm:$0xff] }
   0x8   :  { %v727_v21 = vld [vmem:[%s1153_s0 + $0xa8] sm:$0xff]  ;;  %v734_v22 = vld [vmem:[%s1153_s0 + $0xb0] sm:$0xff]  ;;  %v739_v23 = vld [vmem:[%s1153_s0 + $0xb8] sm:$0xff] }
   0x9   :  { %v746_v24 = vld [vmem:[%s1153_s0 + $0xc0] sm:$0xff]  ;;  %v751_v25 = vld [vmem:[%s1153_s0 + $0xc8] sm:$0xff]  ;;  %v758_v26 = vld [vmem:[%s1153_s0 + $0xd0] sm:$0xff] }
   0xa   :  { %56 = vadd.xlane.f32.xlu0 %v626_v4  ;;  %58 = vadd.xlane.f32.xlu1 %v631_v5  ;;  %v763_v27 = vld [vmem:[%s1153_s0 + $0xd8] sm:$0xff]  ;;  %v770_v28 = vld [vmem:[%s1153_s0 + $0xe0] sm:$0xff]  ;;  %v775_v29 = vld [vmem:[%s1153_s0 + $0xe8] sm:$0xff] }
   0xb   :  { %v782_v30 = vld [vmem:[%s1153_s0 + $0xf0] sm:$0xff]  ;;  %v787_v31 = vld [vmem:[%s1153_s0 + $0xf8] sm:$0xff] }
   0xe   :  { %60 = vadd.xlane.f32.xlu0 %v638_v6  ;;  %62 = vadd.xlane.f32.xlu1 %v643_v7 }
  0x12   :  { %64 = vadd.xlane.f32.xlu0 %v650_v8  ;;  %66 = vadd.xlane.f32.xlu1 %v655_v9 }
  0x16   :  { %68 = vadd.xlane.f32.xlu0 %v662_v10  ;;  %70 = vadd.xlane.f32.xlu1 %v667_v11 }
  0x1a   :  { %72 = vadd.xlane.f32.xlu0 %v674_v12  ;;  %74 = vadd.xlane.f32.xlu1 %v679_v13 }
  0x1e   :  { %76 = vadd.xlane.f32.xlu0 %v686_v14  ;;  %78 = vadd.xlane.f32.xlu1 %v691_v15 }
  0x22   :  { %80 = vadd.xlane.f32.xlu0 %v698_v16  ;;  %82 = vadd.xlane.f32.xlu1 %v703_v17 }
  0x26   :  { %84 = vadd.xlane.f32.xlu0 %v710_v18  ;;  %86 = vadd.xlane.f32.xlu1 %v715_v19 }
  0x2a   :  { %88 = vadd.xlane.f32.xlu0 %v722_v20  ;;  %90 = vadd.xlane.f32.xlu1 %v727_v21 }
  0x2e   :  { %92 = vadd.xlane.f32.xlu0 %v734_v22  ;;  %94 = vadd.xlane.f32.xlu1 %v739_v23 }
  0x32   :  { %96 = vadd.xlane.f32.xlu0 %v746_v24  ;;  %98 = vadd.xlane.f32.xlu1 %v751_v25 }
  0x36   :  { %100 = vadd.xlane.f32.xlu0 %v758_v26  ;;  %102 = vadd.xlane.f32.xlu1 %v763_v27 }
  0x3a   :  { %104 = vadd.xlane.f32.xlu0 %v770_v28  ;;  %106 = vadd.xlane.f32.xlu1 %v775_v29 }
  0x3e   :  { %108 = vadd.xlane.f32.xlu0 %v782_v30  ;;  %110 = vadd.xlane.f32.xlu1 %v787_v31 }
  0x8f   :  { %v49_v32 = vpop.xlane.xlu0 %48  ;;  %v53_v33 = vpop.xlane.xlu1 %52 }
  0x90   :  { %v113_v34 = vmul.f32 0.0078125, %v49_v32  ;;  %v115_v35 = vmul.f32 0.0078125, %v53_v33 }
  0x92   :  { %v792_v36 = vsub.f32 %v602_v0, %v113_v34  ;;  %v795_v37 = vsub.f32 %v607_v1, %v115_v35 }
  0x93   :  { %v51_v38 = vpop.xlane.xlu0 %50  ;;  %v55_v39 = vpop.xlane.xlu1 %54 }
  0x94   :  { %v114_v40 = vmul.f32 0.0078125, %v51_v38  ;;  %v177_v41 = vmul.f32 %v792_v36, %v792_v36  ;;  %v116_v42 = vmul.f32 0.0078125, %v55_v39  ;;  %v179_v45 = vmul.f32 %v795_v37, %v795_v37 }
  0x96   :  { %v800_v43 = vsub.f32 %v614_v2, %v114_v40  ;;  %209 = vadd.xlane.f32.xlu0 %v177_v41  ;;  %v803_v44 = vsub.f32 %v619_v3, %v116_v42 }
  0x97   :  { %v57_v46 = vpop.xlane.xlu0 %56  ;;  %v59_v47 = vpop.xlane.xlu1 %58 }
  0x98   :  { %v117_v48 = vmul.f32 0.0078125, %v57_v46  ;;  %v178_v49 = vmul.f32 %v800_v43, %v800_v43  ;;  %v118_v50 = vmul.f32 0.0078125, %v59_v47  ;;  %v180_v53 = vmul.f32 %v803_v44, %v803_v44 }
  0x9a   :  { %v810_v51 = vsub.f32 %v626_v4, %v117_v48  ;;  %213 = vadd.xlane.f32.xlu0 %v179_v45  ;;  %211 = vadd.xlane.f32.xlu1 %v178_v49  ;;  %v813_v52 = vsub.f32 %v631_v5, %v118_v50 }
  0x9b   :  { %v61_v54 = vpop.xlane.xlu0 %60  ;;  %v63_v55 = vpop.xlane.xlu1 %62 }
  0x9c   :  { %v119_v56 = vmul.f32 0.0078125, %v61_v54  ;;  %v181_v57 = vmul.f32 %v810_v51, %v810_v51  ;;  %v120_v58 = vmul.f32 0.0078125, %v63_v55  ;;  %v182_v61 = vmul.f32 %v813_v52, %v813_v52 }
  0x9e   :  { %v820_v59 = vsub.f32 %v638_v6, %v119_v56  ;;  %215 = vadd.xlane.f32.xlu1 %v180_v53  ;;  %217 = vadd.xlane.f32.xlu0 %v181_v57  ;;  %v823_v60 = vsub.f32 %v643_v7, %v120_v58 }
  0x9f   :  { %v65_v62 = vpop.xlane.xlu0 %64  ;;  %v67_v63 = vpop.xlane.xlu1 %66 }
  0xa0   :  { %v121_v0 = vmul.f32 0.0078125, %v65_v62  ;;  %v183_v1 = vmul.f32 %v820_v59, %v820_v59  ;;  %v122_v2 = vmul.f32 0.0078125, %v67_v63  ;;  %v184_v5 = vmul.f32 %v823_v60, %v823_v60 }
  0xa2   :  { %v830_v3 = vsub.f32 %v650_v8, %v121_v0  ;;  %219 = vadd.xlane.f32.xlu1 %v182_v61  ;;  %221 = vadd.xlane.f32.xlu0 %v183_v1  ;;  %v833_v4 = vsub.f32 %v655_v9, %v122_v2 }
  0xa3   :  { %v69_v6 = vpop.xlane.xlu0 %68  ;;  %v71_v7 = vpop.xlane.xlu1 %70 }
  0xa4   :  { %v123_v32 = vmul.f32 0.0078125, %v69_v6  ;;  %v185_v33 = vmul.f32 %v830_v3, %v830_v3  ;;  %v124_v34 = vmul.f32 0.0078125, %v71_v7  ;;  %v186_v9 = vmul.f32 %v833_v4, %v833_v4 }
  0xa6   :  { %v840_v35 = vsub.f32 %v662_v10, %v123_v32  ;;  %223 = vadd.xlane.f32.xlu1 %v184_v5  ;;  %225 = vadd.xlane.f32.xlu0 %v185_v33  ;;  %v843_v8 = vsub.f32 %v667_v11, %v124_v34 }
  0xa7   :  { %v73_v38 = vpop.xlane.xlu0 %72  ;;  %v75_v39 = vpop.xlane.xlu1 %74 }
  0xa8   :  { %v125_v40 = vmul.f32 0.0078125, %v73_v38  ;;  %v187_v41 = vmul.f32 %v840_v35, %v840_v35  ;;  %v126_v42 = vmul.f32 0.0078125, %v75_v39  ;;  %v188_v11 = vmul.f32 %v843_v8, %v843_v8 }
  0xaa   :  { %v850_v45 = vsub.f32 %v674_v12, %v125_v40  ;;  %227 = vadd.xlane.f32.xlu1 %v186_v9  ;;  %229 = vadd.xlane.f32.xlu0 %v187_v41  ;;  %v853_v10 = vsub.f32 %v679_v13, %v126_v42 }
  0xab   :  { %v77_v46 = vpop.xlane.xlu0 %76  ;;  %v79_v47 = vpop.xlane.xlu1 %78 }
  0xac   :  { %v127_v48 = vmul.f32 0.0078125, %v77_v46  ;;  %v189_v49 = vmul.f32 %v850_v45, %v850_v45  ;;  %v128_v50 = vmul.f32 0.0078125, %v79_v47  ;;  %v190_v13 = vmul.f32 %v853_v10, %v853_v10 }
  0xae   :  { %v860_v53 = vsub.f32 %v686_v14, %v127_v48  ;;  %231 = vadd.xlane.f32.xlu1 %v188_v11  ;;  %233 = vadd.xlane.f32.xlu0 %v189_v49  ;;  %v863_v12 = vsub.f32 %v691_v15, %v128_v50 }
  0xaf   :  { %v81_v54 = vpop.xlane.xlu0 %80  ;;  %v83_v55 = vpop.xlane.xlu1 %82 }
  0xb0   :  { %v129_v56 = vmul.f32 0.0078125, %v81_v54  ;;  %v191_v57 = vmul.f32 %v860_v53, %v860_v53  ;;  %v130_v58 = vmul.f32 0.0078125, %v83_v55  ;;  %v192_v15 = vmul.f32 %v863_v12, %v863_v12 }
  0xb2   :  { %v870_v61 = vsub.f32 %v698_v16, %v129_v56  ;;  %235 = vadd.xlane.f32.xlu1 %v190_v13  ;;  %237 = vadd.xlane.f32.xlu0 %v191_v57  ;;  %v873_v14 = vsub.f32 %v703_v17, %v130_v58 }
  0xb3   :  { %v85_v62 = vpop.xlane.xlu0 %84  ;;  %v87_v63 = vpop.xlane.xlu1 %86 }
  0xb4   :  { %v131_v0 = vmul.f32 0.0078125, %v85_v62  ;;  %v193_v1 = vmul.f32 %v870_v61, %v870_v61  ;;  %v132_v2 = vmul.f32 0.0078125, %v87_v63  ;;  %v194_v17 = vmul.f32 %v873_v14, %v873_v14 }
  0xb6   :  { %v880_v5 = vsub.f32 %v710_v18, %v131_v0  ;;  %239 = vadd.xlane.f32.xlu1 %v192_v15  ;;  %241 = vadd.xlane.f32.xlu0 %v193_v1  ;;  %v883_v16 = vsub.f32 %v715_v19, %v132_v2 }
  0xb7   :  { %v89_v6 = vpop.xlane.xlu0 %88  ;;  %v91_v7 = vpop.xlane.xlu1 %90 }
  0xb8   :  { %v133_v32 = vmul.f32 0.0078125, %v89_v6  ;;  %v195_v33 = vmul.f32 %v880_v5, %v880_v5  ;;  %v134_v34 = vmul.f32 0.0078125, %v91_v7  ;;  %v196_v19 = vmul.f32 %v883_v16, %v883_v16 }
  0xba   :  { %v890_v9 = vsub.f32 %v722_v20, %v133_v32  ;;  %243 = vadd.xlane.f32.xlu1 %v194_v17  ;;  %245 = vadd.xlane.f32.xlu0 %v195_v33  ;;  %v893_v18 = vsub.f32 %v727_v21, %v134_v34 }
  0xbb   :  { %v93_v38 = vpop.xlane.xlu0 %92  ;;  %v95_v39 = vpop.xlane.xlu1 %94 }
  0xbc   :  { %v135_v40 = vmul.f32 0.0078125, %v93_v38  ;;  %v197_v41 = vmul.f32 %v890_v9, %v890_v9  ;;  %v136_v42 = vmul.f32 0.0078125, %v95_v39  ;;  %v198_v21 = vmul.f32 %v893_v18, %v893_v18 }
  0xbe   :  { %v900_v11 = vsub.f32 %v734_v22, %v135_v40  ;;  %247 = vadd.xlane.f32.xlu1 %v196_v19  ;;  %249 = vadd.xlane.f32.xlu0 %v197_v41  ;;  %v903_v20 = vsub.f32 %v739_v23, %v136_v42 }
  0xbf   :  { %v97_v46 = vpop.xlane.xlu0 %96  ;;  %v99_v47 = vpop.xlane.xlu1 %98 }
  0xc0   :  { %v137_v48 = vmul.f32 0.0078125, %v97_v46  ;;  %v199_v49 = vmul.f32 %v900_v11, %v900_v11  ;;  %v138_v50 = vmul.f32 0.0078125, %v99_v47  ;;  %v200_v23 = vmul.f32 %v903_v20, %v903_v20 }
  0xc2   :  { %v910_v13 = vsub.f32 %v746_v24, %v137_v48  ;;  %251 = vadd.xlane.f32.xlu1 %v198_v21  ;;  %253 = vadd.xlane.f32.xlu0 %v199_v49  ;;  %v913_v22 = vsub.f32 %v751_v25, %v138_v50 }
  0xc3   :  { %v101_v54 = vpop.xlane.xlu0 %100  ;;  %v103_v55 = vpop.xlane.xlu1 %102 }
  0xc4   :  { %v139_v56 = vmul.f32 0.0078125, %v101_v54  ;;  %v201_v57 = vmul.f32 %v910_v13, %v910_v13  ;;  %v140_v58 = vmul.f32 0.0078125, %v103_v55  ;;  %v202_v25 = vmul.f32 %v913_v22, %v913_v22 }
  0xc6   :  { %v920_v15 = vsub.f32 %v758_v26, %v139_v56  ;;  %255 = vadd.xlane.f32.xlu1 %v200_v23  ;;  %257 = vadd.xlane.f32.xlu0 %v201_v57  ;;  %v923_v24 = vsub.f32 %v763_v27, %v140_v58 }
  0xc7   :  { %v105_v62 = vpop.xlane.xlu0 %104  ;;  %v107_v63 = vpop.xlane.xlu1 %106 }
  0xc8   :  { %v141_v0 = vmul.f32 0.0078125, %v105_v62  ;;  %v203_v1 = vmul.f32 %v920_v15, %v920_v15  ;;  %v142_v2 = vmul.f32 0.0078125, %v107_v63  ;;  %v204_v27 = vmul.f32 %v923_v24, %v923_v24 }
  0xca   :  { %v930_v17 = vsub.f32 %v770_v28, %v141_v0  ;;  %259 = vadd.xlane.f32.xlu1 %v202_v25  ;;  %261 = vadd.xlane.f32.xlu0 %v203_v1  ;;  %v933_v26 = vsub.f32 %v775_v29, %v142_v2  ;;  %v954_v0 = vld [vmem:[%s1154_s1] ss:$0 sm:$0xff] }
  0xcb   :  { %v109_v6 = vpop.xlane.xlu0 %108  ;;  %v111_v7 = vpop.xlane.xlu1 %110 }
  0xcc   :  { %v143_v32 = vmul.f32 0.0078125, %v109_v6  ;;  %v205_v33 = vmul.f32 %v930_v17, %v930_v17  ;;  %v144_v34 = vmul.f32 0.0078125, %v111_v7  ;;  %v206_v29 = vmul.f32 %v933_v26, %v933_v26 }
  0xce   :  { %v940_v19 = vsub.f32 %v782_v30, %v143_v32  ;;  %263 = vadd.xlane.f32.xlu1 %v204_v27  ;;  %265 = vadd.xlane.f32.xlu0 %v205_v33  ;;  %v943_v28 = vsub.f32 %v787_v31, %v144_v34  ;;  %v960_v32 = vld [vmem:[%s1155_s2] ss:$0 sm:$0xff] }
  0xd0   :  { %v207_v38 = vmul.f32 %v940_v19, %v940_v19  ;;  %v208_v39 = vmul.f32 %v943_v28, %v943_v28 }
  0xd2   :  { %267 = vadd.xlane.f32.xlu1 %v206_v29  ;;  %269 = vadd.xlane.f32.xlu0 %v207_v38 }
  0xd6   :  { %271 = vadd.xlane.f32.xlu1 %v208_v39 }
 0x123   :  { %v210_v40 = vpop.xlane.xlu0 %209 }
 0x124   :  { %v273_v30 = vmul.f32 0.0078125, %v210_v40 }
 0x126   :  { %v305_v41 = vadd.f32 1e-12, %v273_v30 }
 0x127   :  { %v212_v42 = vpop.xlane.xlu1 %211  ;;  %v214_v21 = vpop.xlane.xlu0 %213 }
 0x128   :  { %515 = vrsqrt.f32 %v305_v41  ;;  %v274_v31 = vmul.f32 0.0078125, %v212_v42  ;;  %v275_v46 = vmul.f32 0.0078125, %v214_v21 }
 0x12a   :  { %v306_v47 = vadd.f32 1e-12, %v274_v31  ;;  %v307_v48 = vadd.f32 1e-12, %v275_v46 }
 0x12b   :  { %v216_v49 = vpop.xlane.xlu1 %215  ;;  %v218_v50 = vpop.xlane.xlu0 %217 }
 0x12c   :  { %517 = vrsqrt.f32 %v306_v47  ;;  %v276_v23 = vmul.f32 0.0078125, %v216_v49  ;;  %v277_v54 = vmul.f32 0.0078125, %v218_v50 }
 0x12d   :  { %519 = vrsqrt.f32 %v307_v48 }
 0x12e   :  { %v308_v55 = vadd.f32 1e-12, %v276_v23  ;;  %v309_v56 = vadd.f32 1e-12, %v277_v54 }
 0x12f   :  { %v220_v57 = vpop.xlane.xlu1 %219  ;;  %v222_v58 = vpop.xlane.xlu0 %221 }
 0x130   :  { %521 = vrsqrt.f32 %v308_v55  ;;  %v278_v25 = vmul.f32 0.0078125, %v220_v57  ;;  %v279_v62 = vmul.f32 0.0078125, %v222_v58 }
 0x131   :  { %523 = vrsqrt.f32 %v309_v56 }
 0x132   :  { %v516_v63 = vpop.eup %515  ;;  %v310_v1 = vadd.f32 1e-12, %v278_v25  ;;  %v311_v2 = vadd.f32 1e-12, %v279_v62 }
 0x133   :  { %v369_v27 = vmul.f32 %v516_v63, %v792_v36  ;;  %v224_v6 = vpop.xlane.xlu1 %223  ;;  %v226_v7 = vpop.xlane.xlu0 %225 }
 0x134   :  { %525 = vrsqrt.f32 %v310_v1  ;;  %v280_v33 = vmul.f32 0.0078125, %v224_v6  ;;  %v281_v34 = vmul.f32 0.0078125, %v226_v7 }
 0x135   :  { %v407_v29 = vmul.f32 %v954_v0, %v369_v27  ;;  %527 = vrsqrt.f32 %v311_v2 }
 0x136   :  { %v518_v38 = vpop.eup %517  ;;  %v312_v39 = vadd.f32 1e-12, %v280_v33  ;;  %v313_v40 = vadd.f32 1e-12, %v281_v34 }
 0x137   :  { %v520_v30 = vpop.eup %519  ;;  %v445_v41 = vadd.f32 %v960_v32, %v407_v29  ;;  %v370_v36 = vmul.f32 %v518_v38, %v800_v43  ;;  %v228_v42 = vpop.xlane.xlu1 %227 }
 0x138   :  { %v230_v21 = vpop.xlane.xlu0 %229  ;;  %v371_v31 = vmul.f32 %v520_v30, %v795_v37  ;;  %529 = vrsqrt.f32 %v312_v39  ;;  %v282_v46 = vmul.f32 0.0078125, %v228_v42 }
 0x139   :  { %v283_v47 = vmul.f32 0.0078125, %v230_v21  ;;  %477 = vst [vmem:[%s1156_s3] sm:$0xff] %v445_v41  ;;  %v408_v48 = vmul.f32 %v954_v0, %v370_v36  ;;  %531 = vrsqrt.f32 %v313_v40 }
 0x13a   :  { %v522_v49 = vpop.eup %521  ;;  %v409_v50 = vmul.f32 %v954_v0, %v371_v31  ;;  %v314_v23 = vadd.f32 1e-12, %v282_v46 }
 0x13b   :  { %v315_v54 = vadd.f32 1e-12, %v283_v47  ;;  %v524_v43 = vpop.eup %523  ;;  %v446_v55 = vadd.f32 %v960_v32, %v408_v48  ;;  %v372_v37 = vmul.f32 %v522_v49, %v803_v44  ;;  %v232_v56 = vpop.xlane.xlu1 %231 }
 0x13c   :  { %v234_v57 = vpop.xlane.xlu0 %233  ;;  %v447_v58 = vadd.f32 %v960_v32, %v409_v50  ;;  %v373_v25 = vmul.f32 %v524_v43, %v810_v51  ;;  %533 = vrsqrt.f32 %v314_v23  ;;  %v284_v62 = vmul.f32 0.0078125, %v232_v56 }
 0x13d   :  { %478 = vst [vmem:[%s1156_s3 + $0x8] sm:$0xff] %v446_v55  ;;  %v410_v63 = vmul.f32 %v954_v0, %v372_v37  ;;  %535 = vrsqrt.f32 %v315_v54  ;;  %v285_v1 = vmul.f32 0.0078125, %v234_v57 }
 0x13e   :  { %v526_v2 = vpop.eup %525  ;;  %479 = vst [vmem:[%s1156_s3 + $0x10] sm:$0xff] %v447_v58  ;;  %v411_v44 = vmul.f32 %v954_v0, %v373_v25  ;;  %v316_v27 = vadd.f32 1e-12, %v284_v62 }
 0x13f   :  { %v528_v6 = vpop.eup %527  ;;  %v448_v51 = vadd.f32 %v960_v32, %v410_v63  ;;  %v374_v7 = vmul.f32 %v526_v2, %v813_v52  ;;  %v317_v33 = vadd.f32 1e-12, %v285_v1  ;;  %v236_v34 = vpop.xlane.xlu1 %235 }
 0x140   :  { %v238_v29 = vpop.xlane.xlu0 %237  ;;  %v449_v38 = vadd.f32 %v960_v32, %v411_v44  ;;  %v375_v39 = vmul.f32 %v528_v6, %v820_v59  ;;  %537 = vrsqrt.f32 %v316_v27  ;;  %v286_v40 = vmul.f32 0.0078125, %v236_v34 }
 0x141   :  { %480 = vst [vmem:[%s1156_s3 + $0x18] sm:$0xff] %v448_v51  ;;  %v412_v30 = vmul.f32 %v954_v0, %v374_v7  ;;  %539 = vrsqrt.f32 %v317_v33  ;;  %v287_v41 = vmul.f32 0.0078125, %v238_v29 }
 0x142   :  { %v530_v36 = vpop.eup %529  ;;  %481 = vst [vmem:[%s1156_s3 + $0x20] sm:$0xff] %v449_v38  ;;  %v413_v52 = vmul.f32 %v954_v0, %v375_v39  ;;  %v318_v42 = vadd.f32 1e-12, %v286_v40 }
 0x143   :  { %v532_v21 = vpop.eup %531  ;;  %v450_v59 = vadd.f32 %v960_v32, %v412_v30  ;;  %v376_v31 = vmul.f32 %v530_v36, %v823_v60  ;;  %v319_v46 = vadd.f32 1e-12, %v287_v41  ;;  %v240_v47 = vpop.xlane.xlu1 %239 }
 0x144   :  { %v242_v48 = vpop.xlane.xlu0 %241  ;;  %v451_v49 = vadd.f32 %v960_v32, %v413_v52  ;;  %v377_v50 = vmul.f32 %v532_v21, %v830_v3  ;;  %541 = vrsqrt.f32 %v318_v42  ;;  %v288_v23 = vmul.f32 0.0078125, %v240_v47 }
 0x145   :  { %482 = vst [vmem:[%s1156_s3 + $0x28] sm:$0xff] %v450_v59  ;;  %v414_v54 = vmul.f32 %v954_v0, %v376_v31  ;;  %543 = vrsqrt.f32 %v319_v46  ;;  %v289_v43 = vmul.f32 0.0078125, %v242_v48 }
 0x146   :  { %v534_v55 = vpop.eup %533  ;;  %483 = vst [vmem:[%s1156_s3 + $0x30] sm:$0xff] %v451_v49  ;;  %v415_v60 = vmul.f32 %v954_v0, %v377_v50  ;;  %v320_v37 = vadd.f32 1e-12, %v288_v23 }
 0x147   :  { %v536_v56 = vpop.eup %535  ;;  %v452_v3 = vadd.f32 %v960_v32, %v414_v54  ;;  %v378_v57 = vmul.f32 %v534_v55, %v833_v4  ;;  %v321_v58 = vadd.f32 1e-12, %v289_v43  ;;  %v244_v25 = vpop.xlane.xlu1 %243 }
 0x148   :  { %v246_v62 = vpop.xlane.xlu0 %245  ;;  %v453_v63 = vadd.f32 %v960_v32, %v415_v60  ;;  %v379_v1 = vmul.f32 %v536_v56, %v840_v35  ;;  %545 = vrsqrt.f32 %v320_v37  ;;  %v290_v2 = vmul.f32 0.0078125, %v244_v25 }
 0x149   :  { %484 = vst [vmem:[%s1156_s3 + $0x38] sm:$0xff] %v452_v3  ;;  %v416_v44 = vmul.f32 %v954_v0, %v378_v57  ;;  %547 = vrsqrt.f32 %v321_v58  ;;  %v291_v27 = vmul.f32 0.0078125, %v246_v62 }
 0x14a   :  { %v538_v6 = vpop.eup %537  ;;  %485 = vst [vmem:[%s1156_s3 + $0x40] sm:$0xff] %v453_v63  ;;  %v417_v4 = vmul.f32 %v954_v0, %v379_v1  ;;  %v322_v51 = vadd.f32 1e-12, %v290_v2 }
 0x14b   :  { %v540_v7 = vpop.eup %539  ;;  %v454_v35 = vadd.f32 %v960_v32, %v416_v44  ;;  %v380_v33 = vmul.f32 %v538_v6, %v843_v8  ;;  %v323_v34 = vadd.f32 1e-12, %v291_v27  ;;  %v248_v29 = vpop.xlane.xlu1 %247 }
 0x14c   :  { %v250_v38 = vpop.xlane.xlu0 %249  ;;  %v455_v39 = vadd.f32 %v960_v32, %v417_v4  ;;  %v381_v40 = vmul.f32 %v540_v7, %v850_v45  ;;  %549 = vrsqrt.f32 %v322_v51  ;;  %v292_v30 = vmul.f32 0.0078125, %v248_v29 }
 0x14d   :  { %486 = vst [vmem:[%s1156_s3 + $0x48] sm:$0xff] %v454_v35  ;;  %v418_v41 = vmul.f32 %v954_v0, %v380_v33  ;;  %551 = vrsqrt.f32 %v323_v34  ;;  %v293_v36 = vmul.f32 0.0078125, %v250_v38 }
 0x14e   :  { %v542_v52 = vpop.eup %541  ;;  %487 = vst [vmem:[%s1156_s3 + $0x50] sm:$0xff] %v455_v39  ;;  %v419_v8 = vmul.f32 %v954_v0, %v381_v40  ;;  %v324_v42 = vadd.f32 1e-12, %v292_v30 }
 0x14f   :  { %v544_v21 = vpop.eup %543  ;;  %v456_v45 = vadd.f32 %v960_v32, %v418_v41  ;;  %v382_v59 = vmul.f32 %v542_v52, %v853_v10  ;;  %v325_v31 = vadd.f32 1e-12, %v293_v36  ;;  %v252_v46 = vpop.xlane.xlu1 %251 }
 0x150   :  { %v254_v47 = vpop.xlane.xlu0 %253  ;;  %v457_v48 = vadd.f32 %v960_v32, %v419_v8  ;;  %v383_v49 = vmul.f32 %v544_v21, %v860_v53  ;;  %553 = vrsqrt.f32 %v324_v42  ;;  %v294_v50 = vmul.f32 0.0078125, %v252_v46 }
 0x151   :  { %488 = vst [vmem:[%s1156_s3 + $0x58] sm:$0xff] %v456_v45  ;;  %v420_v23 = vmul.f32 %v954_v0, %v382_v59  ;;  %555 = vrsqrt.f32 %v325_v31  ;;  %v295_v54 = vmul.f32 0.0078125, %v254_v47 }
 0x152   :  { %v546_v43 = vpop.eup %545  ;;  %489 = vst [vmem:[%s1156_s3 + $0x60] sm:$0xff] %v457_v48  ;;  %v421_v10 = vmul.f32 %v954_v0, %v383_v49  ;;  %v326_v55 = vadd.f32 1e-12, %v294_v50 }
 0x153   :  { %v548_v60 = vpop.eup %547  ;;  %v458_v53 = vadd.f32 %v960_v32, %v420_v23  ;;  %v384_v37 = vmul.f32 %v546_v43, %v863_v12  ;;  %v327_v56 = vadd.f32 1e-12, %v295_v54  ;;  %v256_v3 = vpop.xlane.xlu1 %255 }
 0x154   :  { %v258_v57 = vpop.xlane.xlu0 %257  ;;  %v459_v58 = vadd.f32 %v960_v32, %v421_v10  ;;  %v385_v25 = vmul.f32 %v548_v60, %v870_v61  ;;  %557 = vrsqrt.f32 %v326_v55  ;;  %v296_v62 = vmul.f32 0.0078125, %v256_v3 }
 0x155   :  { %490 = vst [vmem:[%s1156_s3 + $0x68] sm:$0xff] %v458_v53  ;;  %v422_v63 = vmul.f32 %v954_v0, %v384_v37  ;;  %559 = vrsqrt.f32 %v327_v56  ;;  %v297_v1 = vmul.f32 0.0078125, %v258_v57 }
 0x156   :  { %v550_v2 = vpop.eup %549  ;;  %491 = vst [vmem:[%s1156_s3 + $0x70] sm:$0xff] %v459_v58  ;;  %v423_v12 = vmul.f32 %v954_v0, %v385_v25  ;;  %v328_v44 = vadd.f32 1e-12, %v296_v62 }
 0x157   :  { %v552_v27 = vpop.eup %551  ;;  %v460_v61 = vadd.f32 %v960_v32, %v422_v63  ;;  %v386_v6 = vmul.f32 %v550_v2, %v873_v14  ;;  %v329_v4 = vadd.f32 1e-12, %v297_v1  ;;  %v260_v51 = vpop.xlane.xlu1 %259 }
 0x158   :  { %v262_v7 = vpop.xlane.xlu0 %261  ;;  %v461_v35 = vadd.f32 %v960_v32, %v423_v12  ;;  %v387_v33 = vmul.f32 %v552_v27, %v880_v5  ;;  %561 = vrsqrt.f32 %v328_v44  ;;  %v298_v34 = vmul.f32 0.0078125, %v260_v51 }
 0x159   :  { %492 = vst [vmem:[%s1156_s3 + $0x78] sm:$0xff] %v460_v61  ;;  %v424_v29 = vmul.f32 %v954_v0, %v386_v6  ;;  %563 = vrsqrt.f32 %v329_v4  ;;  %v299_v38 = vmul.f32 0.0078125, %v262_v7 }
 0x15a   :  { %v554_v39 = vpop.eup %553  ;;  %493 = vst [vmem:[%s1156_s3 + $0x80] sm:$0xff] %v461_v35  ;;  %v425_v14 = vmul.f32 %v954_v0, %v387_v33  ;;  %v330_v40 = vadd.f32 1e-12, %v298_v34 }
 0x15b   :  { %v556_v30 = vpop.eup %555  ;;  %v462_v5 = vadd.f32 %v960_v32, %v424_v29  ;;  %v388_v41 = vmul.f32 %v554_v39, %v883_v16  ;;  %v331_v36 = vadd.f32 1e-12, %v299_v38  ;;  %v264_v52 = vpop.xlane.xlu1 %263 }
 0x15c   :  { %v266_v8 = vpop.xlane.xlu0 %265  ;;  %v463_v42 = vadd.f32 %v960_v32, %v425_v14  ;;  %v389_v21 = vmul.f32 %v556_v30, %v890_v9  ;;  %565 = vrsqrt.f32 %v330_v40  ;;  %v300_v45 = vmul.f32 0.0078125, %v264_v52 }
 0x15d   :  { %494 = vst [vmem:[%s1156_s3 + $0x88] sm:$0xff] %v462_v5  ;;  %v426_v59 = vmul.f32 %v954_v0, %v388_v41  ;;  %567 = vrsqrt.f32 %v331_v36  ;;  %v301_v31 = vmul.f32 0.0078125, %v266_v8 }
 0x15e   :  { %v558_v46 = vpop.eup %557  ;;  %495 = vst [vmem:[%s1156_s3 + $0x90] sm:$0xff] %v463_v42  ;;  %v427_v16 = vmul.f32 %v954_v0, %v389_v21  ;;  %v332_v47 = vadd.f32 1e-12, %v300_v45 }
 0x15f   :  { %v560_v48 = vpop.eup %559  ;;  %v464_v9 = vadd.f32 %v960_v32, %v426_v59  ;;  %v390_v49 = vmul.f32 %v558_v46, %v893_v18  ;;  %v333_v50 = vadd.f32 1e-12, %v301_v31  ;;  %v268_v23 = vpop.xlane.xlu1 %267 }
 0x160   :  { %v270_v54 = vpop.xlane.xlu0 %269  ;;  %v465_v43 = vadd.f32 %v960_v32, %v427_v16  ;;  %v391_v10 = vmul.f32 %v560_v48, %v900_v11  ;;  %569 = vrsqrt.f32 %v332_v47  ;;  %v302_v55 = vmul.f32 0.0078125, %v268_v23 }
 0x161   :  { %496 = vst [vmem:[%s1156_s3 + $0x98] sm:$0xff] %v464_v9  ;;  %v428_v60 = vmul.f32 %v954_v0, %v390_v49  ;;  %571 = vrsqrt.f32 %v333_v50  ;;  %v303_v53 = vmul.f32 0.0078125, %v270_v54 }
 0x162   :  { %v562_v37 = vpop.eup %561  ;;  %497 = vst [vmem:[%s1156_s3 + $0xa0] sm:$0xff] %v465_v43  ;;  %v429_v18 = vmul.f32 %v954_v0, %v391_v10  ;;  %v334_v56 = vadd.f32 1e-12, %v302_v55 }
 0x163   :  { %v564_v3 = vpop.eup %563  ;;  %v466_v11 = vadd.f32 %v960_v32, %v428_v60  ;;  %v392_v57 = vmul.f32 %v562_v37, %v903_v20  ;;  %v335_v58 = vadd.f32 1e-12, %v303_v53  ;;  %v272_v25 = vpop.xlane.xlu1 %271 }
 0x164   :  { %v467_v62 = vadd.f32 %v960_v32, %v429_v18  ;;  %v393_v63 = vmul.f32 %v564_v3, %v910_v13  ;;  %573 = vrsqrt.f32 %v334_v56  ;;  %v304_v1 = vmul.f32 0.0078125, %v272_v25 }
 0x165   :  { %498 = vst [vmem:[%s1156_s3 + $0xa8] sm:$0xff] %v466_v11  ;;  %v430_v2 = vmul.f32 %v954_v0, %v392_v57  ;;  %575 = vrsqrt.f32 %v335_v58 }
 0x166   :  { %v566_v12 = vpop.eup %565  ;;  %499 = vst [vmem:[%s1156_s3 + $0xb0] sm:$0xff] %v467_v62  ;;  %v431_v20 = vmul.f32 %v954_v0, %v393_v63  ;;  %v336_v44 = vadd.f32 1e-12, %v304_v1 }
 0x167   :  { %v568_v27 = vpop.eup %567  ;;  %v468_v13 = vadd.f32 %v960_v32, %v430_v2  ;;  %v394_v61 = vmul.f32 %v566_v12, %v913_v22 }
 0x168   :  { %v469_v6 = vadd.f32 %v960_v32, %v431_v20  ;;  %v395_v4 = vmul.f32 %v568_v27, %v920_v15  ;;  %577 = vrsqrt.f32 %v336_v44 }
 0x169   :  { %500 = vst [vmem:[%s1156_s3 + $0xb8] sm:$0xff] %v468_v13  ;;  %v432_v51 = vmul.f32 %v954_v0, %v394_v61 }
 0x16a   :  { %v570_v7 = vpop.eup %569  ;;  %501 = vst [vmem:[%s1156_s3 + $0xc0] sm:$0xff] %v469_v6  ;;  %v433_v35 = vmul.f32 %v954_v0, %v395_v4 }
 0x16b   :  { %v572_v33 = vpop.eup %571  ;;  %v470_v22 = vadd.f32 %v960_v32, %v432_v51  ;;  %v396_v34 = vmul.f32 %v570_v7, %v923_v24 }
 0x16c   :  { %v471_v15 = vadd.f32 %v960_v32, %v433_v35  ;;  %v397_v29 = vmul.f32 %v572_v33, %v930_v17 }
 0x16d   :  { %502 = vst [vmem:[%s1156_s3 + $0xc8] sm:$0xff] %v470_v22  ;;  %v434_v38 = vmul.f32 %v954_v0, %v396_v34 }
 0x16e   :  { %v574_v39 = vpop.eup %573  ;;  %503 = vst [vmem:[%s1156_s3 + $0xd0] sm:$0xff] %v471_v15  ;;  %v435_v14 = vmul.f32 %v954_v0, %v397_v29 }
 0x16f   :  { %v576_v40 = vpop.eup %575  ;;  %v472_v24 = vadd.f32 %v960_v32, %v434_v38  ;;  %v398_v30 = vmul.f32 %v574_v39, %v933_v26 }
 0x170   :  { %v473_v17 = vadd.f32 %v960_v32, %v435_v14  ;;  %v399_v5 = vmul.f32 %v576_v40, %v940_v19 }
 0x171   :  { %504 = vst [vmem:[%s1156_s3 + $0xd8] sm:$0xff] %v472_v24  ;;  %v436_v41 = vmul.f32 %v954_v0, %v398_v30 }
 0x172   :  { %v578_v36 = vpop.eup %577  ;;  %505 = vst [vmem:[%s1156_s3 + $0xe0] sm:$0xff] %v473_v17  ;;  %v437_v52 = vmul.f32 %v954_v0, %v399_v5 }
 0x173   :  { %v474_v8 = vadd.f32 %v960_v32, %v436_v41  ;;  %v400_v26 = vmul.f32 %v578_v36, %v943_v28 }
 0x174   :  { %v475_v42 = vadd.f32 %v960_v32, %v437_v52 }
 0x175   :  { %506 = vst [vmem:[%s1156_s3 + $0xe8] sm:$0xff] %v474_v8  ;;  %v438_v19 = vmul.f32 %v954_v0, %v400_v26 }
 0x176   :  { %507 = vst [vmem:[%s1156_s3 + $0xf0] sm:$0xff] %v475_v42 }
 0x177   :  { %v476_v21 = vadd.f32 %v960_v32, %v438_v19 }
 0x179   :  { %508 = vst [vmem:[%s1156_s3 + $0xf8] sm:$0xff] %v476_v21 }

// kernel: model_forward.7
= control target key start
LH: loop header
LB: loop body
LE: loop exit
PB: predicated region body
PF: predicated region fallthrough
CT: control target
= control target key end

     0   :  { %v351_v0 = vmov 0.0   ;;  %vm352_vm0 = vmmov 0   ;;  %vm249_vm1 = vcmask 1024   ;;  %s443_s1 = inlined_call_operand.vmem [shape: bf16[128,128], index: 1, kind: input, shape index: {}]   ;;  %s444_s3 = inlined_call_operand.vmem [shape: bf16[128,1], index: 3, kind: input, shape index: {}]   ;;  %s445_s0 = inlined_call_operand.vmem [shape: f32[2,128], index: 0, kind: input, shape index: {}]   ;;  %s446_s4 = inlined_call_operand.<no memory space> [shape: f32[1,1], index: 4, kind: input, shape index: {}]   ;;  %s447_s2 = inlined_call_operand.vmem [shape: f32[1,128], index: 2, kind: input, shape index: {}]   ;;  %s448_s5 = inlined_call_operand.vmem [shape: f32[2,1], index: 5, kind: output, shape index: {}]  }
   0x1   :  { %291 = vmatprep.subr.bf16.mxu0 %v351_v0  ;;  %v333_v1 = vld [vmem:[%s443_s1] sm:$0xff]   ;;  %307 = vmatprep.mubr.msk.bf16.mxu0 %vm352_vm0, %v351_v0  ;;  %v334_v2 = vld [vmem:[%s443_s1 + $0x8] sm:$0xff]   ;;  %v335_v3 = vld [vmem:[%s443_s1 + $0x10] sm:$0xff]   ;;  %v10_v19 = vstv %s446_s4 }
   0x2   :  { %311 = vmatprep.subr.bf16.mxu1 %v351_v0  ;;  %327 = vmatprep.mubr.msk.bf16.mxu1 %vm352_vm0, %v351_v0  ;;  %v341_v4 = vld [vmem:[%s444_s3] sm:$0xff]   ;;  %v336_v5 = vld [vmem:[%s443_s1 + $0x18] sm:$0xff]   ;;  %v342_v6 = vld [vmem:[%s444_s3 + $0x8] sm:$0xff]   ;;  %11 = vst [vmem:[#allocation2] sm:$0x1] %v10_v19 }
   0x3   :  { %292 = vmatpush3.bf16.msra.mxu0 %v333_v1  ;;  %312 = vmatpush3.bf16.msra.mxu1 %v341_v4  ;;  %v337_v7 = vld [vmem:[%s443_s1 + $0x20] sm:$0xff]   ;;  %v343_v8 = vld [vmem:[%s444_s3 + $0x10] sm:$0xff]   ;;  %v338_v9 = vld [vmem:[%s443_s1 + $0x28] sm:$0xff]  }
   0x4   :  { %293 = vmatprep.subr.bf16.mxu0 %v351_v0  ;;  %313 = vmatprep.subr.bf16.mxu1 %v351_v0  ;;  %v344_v10 = vld [vmem:[%s444_s3 + $0x18] sm:$0xff]   ;;  %v339_v11 = vld [vmem:[%s443_s1 + $0x30] sm:$0xff]   ;;  %v23_v13 = vld [vmem:[%s445_s0] sm:$0x3] }
   0x5   :  { %v340_v12 = vld [vmem:[%s443_s1 + $0x38] sm:$0xff]   ;;  %v24_v14 = vpack.c.bf16 %v23_v13, %v23_v13  ;;  %v345_v15 = vld [vmem:[%s444_s3 + $0x20] sm:$0xff]   ;;  %v346_v16 = vld [vmem:[%s444_s3 + $0x28] sm:$0xff]  }
   0x6   :  { %v347_v17 = vld [vmem:[%s444_s3 + $0x30] sm:$0xff]   ;;  %v348_v18 = vld [vmem:[%s444_s3 + $0x38] sm:$0xff]   ;;  %v255_v20 = vld [vmem:[%s447_s2] ss:$0 sm:$0xff] }
   0x7   :  { %294 = vmatpush3.bf16.msra.mxu0 %v334_v2  ;;  %314 = vmatpush3.bf16.msra.mxu1 %v342_v6 }
   0x8   :  { %295 = vmatprep.subr.bf16.mxu0 %v351_v0  ;;  %315 = vmatprep.subr.bf16.mxu1 %v351_v0 }
   0x9   :  { %v264_v28 = vld [vmem:[#allocation2] ss:$0 sm:$0xff] }
   0xb   :  { %296 = vmatpush3.bf16.msra.mxu0 %v335_v3  ;;  %316 = vmatpush3.bf16.msra.mxu1 %v343_v8 }
   0xc   :  { %297 = vmatprep.subr.bf16.mxu0 %v351_v0  ;;  %317 = vmatprep.subr.bf16.mxu1 %v351_v0 }
   0xf   :  { %298 = vmatpush3.bf16.msra.mxu0 %v336_v5  ;;  %318 = vmatpush3.bf16.msra.mxu1 %v344_v10 }
  0x10   :  { %299 = vmatprep.subr.bf16.mxu0 %v351_v0  ;;  %319 = vmatprep.subr.bf16.mxu1 %v351_v0 }
  0x13   :  { %300 = vmatpush3.bf16.msra.mxu0 %v337_v7  ;;  %320 = vmatpush3.bf16.msra.mxu1 %v345_v15 }
  0x14   :  { %301 = vmatprep.subr.bf16.mxu0 %v351_v0  ;;  %321 = vmatprep.subr.bf16.mxu1 %v351_v0 }
  0x17   :  { %302 = vmatpush3.bf16.msra.mxu0 %v338_v9  ;;  %322 = vmatpush3.bf16.msra.mxu1 %v346_v16 }
  0x18   :  { %303 = vmatprep.subr.bf16.mxu0 %v351_v0  ;;  %323 = vmatprep.subr.bf16.mxu1 %v351_v0 }
  0x1b   :  { %304 = vmatpush3.bf16.msra.mxu0 %v339_v11  ;;  %324 = vmatpush3.bf16.msra.mxu1 %v347_v17 }
  0x1c   :  { %305 = vmatprep.subr.bf16.mxu0 %v351_v0  ;;  %325 = vmatprep.subr.bf16.mxu1 %v351_v0 }
  0x1f   :  { %306 = vmatpush3.bf16.msra.mxu0 %v340_v12  ;;  %326 = vmatpush3.bf16.msra.mxu1 %v348_v18 }
  0x22   :  { %308 = vmatmul.mubr.bf16.vlgmr.msra.gmra.mrb[0].mxu0 %v24_v14 }
  0xf5   :  { %v130_v21 = vpop.f32.mrb[0].mxu0 }
  0xf6   :  { %v131_v22 = vadd.f32 %v255_v20, %v130_v21  ;;  %v309_v23 = vpop.f32.mrb[1].mxu0 }
  0xf7   :  { %v133_v24 = vpop.f32.mrb[2].mxu0 }
  0xf8   :  { %349 = vtanh.f32 %v131_v22  ;;  %v310_v25 = vpop.f32.mrb[3].mxu0 }
 0x102   :  { %v350_v26 = vpop.eup %349 }
 0x103   :  { %v137_v27 = vpack.c.bf16 %v350_v26, %v350_v26 }
 0x105   :  { %328 = vmatmul.mubr.bf16.vlgmr.msra.gmra.mrb[0].mxu1 %v137_v27 }
 0x1d8   :  { %v243_v29 = vpop.f32.mrb[0].mxu1 }
 0x1d9   :  { %v244_v30 = vadd.f32 %v264_v28, %v243_v29  ;;  %v329_v31 = vpop.f32.mrb[1].mxu1 }
 0x1da   :  { %v246_v32 = vpop.f32.mrb[2].mxu1 }
 0x1db   :  { %250 = vst.msk [vmem:[%s448_s5] sm:$0x3] %vm249_vm1, %v244_v30  ;;  %v330_v33 = vpop.f32.mrb[3].mxu1 }

// kernel: model_forward.5
= control target key start
LH: loop header
LB: loop body
LE: loop exit
PB: predicated region body
PF: predicated region fallthrough
CT: control target
= control target key end

     0   :  { %v15895_v1 = vmov 0   ;;  %vm701_vm0 = vcmask 261120   ;;  %s10781_s15 = smov 32   ;;  %vm4920_vm1 = vcmask 523264   ;;  %vm4953_vm2 = vcmask 785408   ;;  %s15878_s2 = inlined_call_operand.vmem [shape: bf16[128,384], index: 2, kind: input, shape index: {}]   ;;  %s15879_s0 = inlined_call_operand.vmem [shape: f32[256,128], index: 0, kind: input, shape index: {}]   ;;  %s15880_s3 = inlined_call_operand.vmem [shape: f32[1,384], index: 3, kind: input, shape index: {}]   ;;  %s15881_s1 = inlined_call_operand.vmem [shape: f32[2,128], index: 1, kind: input, shape index: {}]   ;;  %s15882_s4 = inlined_call_operand.vmem [shape: bf16[128,128], index: 4, kind: input, shape index: {}]   ;;  %s15883_s5 = inlined_call_operand.vmem [shape: f32[1,128], index: 5, kind: input, shape index: {}]   ;;  %s15884_s8 = inlined_call_operand.vmem [shape: bf16[128,512], index: 8, kind: input, shape index: {}]   ;;  %s15885_s6 = inlined_call_operand.vmem [shape: f32[1,128], index: 6, kind: input, shape index: {}]   ;;  %s15886_s7 = inlined_call_operand.vmem [shape: f32[1,128], index: 7, kind: input, shape index: {}]   ;;  %s15887_s10 = inlined_call_operand.vmem [shape: bf16[512,128], index: 10, kind: input, shape index: {}]   ;;  %s15888_s9 = inlined_call_operand.vmem [shape: f32[1,512], index: 9, kind: input, shape index: {}]   ;;  %s15889_s11 = inlined_call_operand.vmem [shape: f32[1,128], index: 11, kind: input, shape index: {}]   ;;  %s15890_s12 = inlined_call_operand.vmem [shape: f32[1,128], index: 12, kind: input, shape index: {}]   ;;  %s15891_s13 = inlined_call_operand.vmem [shape: f32[1,128], index: 13, kind: input, shape index: {}]   ;;  %s15892_s14 = inlined_call_operand.vmem [shape: f32[256,128], index: 14, kind: output, shape index: {}]  }
   0x1   :  { %v9727_v0 = vld [vmem:[%s15878_s2 + $0x4] ss:$12 sps:$4 sm:$0xff]   ;;  %305 = vmatprep.mubr.bf16.mxu0 %v15895_v1  ;;  %425 = vmatprep.mubr.bf16.mxu1 %v15895_v1  ;;  %v9729_v2 = vld [vmem:[%s15878_s2] ss:$12 sps:$4 sm:$0xff]   ;;  %v9730_v3 = vld [vmem:[%s15878_s2 + $0x1c] ss:$12 sps:$4 sm:$0xff]  }
   0x2   :  { %273 = vmatprep.subr.bf16.mxu0 %v9727_v0  ;;  %9402 = vmatprep.subr.bf16.mxu1 %v9727_v0  ;;  %v9732_v4 = vld [vmem:[%s15878_s2 + $0x18] ss:$12 sps:$4 sm:$0xff]   ;;  %v9733_v5 = vld [vmem:[%s15878_s2 + $0x34] ss:$12 sps:$4 sm:$0xff]   ;;  %v9735_v6 = vld [vmem:[%s15878_s2 + $0x30] ss:$12 sps:$4 sm:$0xff]  }
   0x3   :  { %274 = vmatpush1.bf16.msra.mxu0 %v9729_v2  ;;  %9410 = vmatpush1.bf16.msra.mxu1 %v9729_v2  ;;  %v9736_v7 = vld [vmem:[%s15878_s2 + $0x4c] ss:$12 sps:$4 sm:$0xff]   ;;  %v9738_v8 = vld [vmem:[%s15878_s2 + $0x48] ss:$12 sps:$4 sm:$0xff]   ;;  %v9739_v9 = vld [vmem:[%s15878_s2 + $0x64] ss:$12 sps:$4 sm:$0xff]  }
   0x4   :  { %275 = vmatprep.subr.bf16.mxu0 %v9730_v3  ;;  %9403 = vmatprep.subr.bf16.mxu1 %v9730_v3  ;;  %v9741_v10 = vld [vmem:[%s15878_s2 + $0x60] ss:$12 sps:$4 sm:$0xff]   ;;  %v9742_v11 = vld [vmem:[%s15878_s2 + $0x7c] ss:$12 sps:$4 sm:$0xff]   ;;  %v9744_v12 = vld [vmem:[%s15878_s2 + $0x78] ss:$12 sps:$4 sm:$0xff]  }
   0x5   :  { %v9745_v13 = vld [vmem:[%s15878_s2 + $0x94] ss:$12 sps:$4 sm:$0xff]   ;;  %v9747_v14 = vld [vmem:[%s15878_s2 + $0x90] ss:$12 sps:$4 sm:$0xff]   ;;  %v9748_v15 = vld [vmem:[%s15878_s2 + $0xac] ss:$12 sps:$4 sm:$0xff]  }
   0x6   :  { %v9750_v16 = vld [vmem:[%s15878_s2 + $0xa8] ss:$12 sps:$4 sm:$0xff]   ;;  %v48_v17 = vld [vmem:[%s15879_s0] sm:$0xff]  ;;  %v51_v26 = vld [vmem:[%s15879_s0 + $0x18] sm:$0xff] }
   0x7   :  { %276 = vmatpush1.bf16.msra.mxu0 %v9732_v4  ;;  %9411 = vmatpush1.bf16.msra.mxu1 %v9732_v4  ;;  %v49_v18 = vld [vmem:[%s15879_s0 + $0x8] sm:$0xff]  ;;  %v72_v19 = vld [vmem:[%s15879_s0 + $0xc0] sm:$0xff]  ;;  %v50_v25 = vld [vmem:[%s15879_s0 + $0x10] sm:$0xff] }
   0x8   :  { %277 = vmatprep.subr.bf16.mxu0 %v9733_v5  ;;  %9404 = vmatprep.subr.bf16.mxu1 %v9733_v5  ;;  %v73_v20 = vld [vmem:[%s15879_s0 + $0xc8] sm:$0xff]  ;;  %v80_v22 = vpack.c.bf16 %v49_v18, %v48_v17  ;;  %v74_v27 = vld [vmem:[%s15879_s0 + $0xd0] sm:$0xff]  ;;  %v75_v28 = vld [vmem:[%s15879_s0 + $0xd8] sm:$0xff]  ;;  %v81_v30 = vpack.c.bf16 %v51_v26, %v50_v25 }
   0x9   :  { %v9751_v21 = vld [vmem:[%s15878_s2 + $0x8] ss:$12 sps:$4 sm:$0xff]   ;;  %v10922_v23 = vpack.c.bf16 %v73_v20, %v72_v19  ;;  %v9752_v24 = vld [vmem:[%s15878_s2 + $0x20] ss:$12 sps:$4 sm:$0xff]   ;;  %v9753_v29 = vld [vmem:[%s15878_s2 + $0x38] ss:$12 sps:$4 sm:$0xff]   ;;  %v10945_v31 = vpack.c.bf16 %v75_v28, %v74_v27 }
   0xa   :  { %v9754_v32 = vld [vmem:[%s15878_s2 + $0x50] ss:$12 sps:$4 sm:$0xff]   ;;  %v52_v33 = vld [vmem:[%s15879_s0 + $0x20] sm:$0xff]  ;;  %v53_v34 = vld [vmem:[%s15879_s0 + $0x28] sm:$0xff] }
   0xb   :  { %278 = vmatpush1.bf16.msra.mxu0 %v9735_v6  ;;  %9412 = vmatpush1.bf16.msra.mxu1 %v9735_v6  ;;  %v76_v35 = vld [vmem:[%s15879_s0 + $0xe0] sm:$0xff]  ;;  %v77_v36 = vld [vmem:[%s15879_s0 + $0xe8] sm:$0xff]  ;;  %v82_v38 = vpack.c.bf16 %v53_v34, %v52_v33  ;;  %v54_v41 = vld [vmem:[%s15879_s0 + $0x30] sm:$0xff] }
   0xc   :  { %279 = vmatprep.subr.bf16.mxu0 %v9736_v7  ;;  %9405 = vmatprep.subr.bf16.mxu1 %v9736_v7  ;;  %v9755_v37 = vld [vmem:[%s15878_s2 + $0x68] ss:$12 sps:$4 sm:$0xff]   ;;  %v10968_v39 = vpack.c.bf16 %v77_v36, %v76_v35  ;;  %v9756_v40 = vld [vmem:[%s15878_s2 + $0x80] ss:$12 sps:$4 sm:$0xff]   ;;  %v55_v42 = vld [vmem:[%s15879_s0 + $0x38] sm:$0xff] }
   0xd   :  { %v78_v43 = vld [vmem:[%s15879_s0 + $0xf0] sm:$0xff]  ;;  %v79_v44 = vld [vmem:[%s15879_s0 + $0xf8] sm:$0xff]  ;;  %v83_v46 = vpack.c.bf16 %v55_v42, %v54_v41  ;;  %v56_v49 = vld [vmem:[%s15879_s0 + $0x40] sm:$0xff] }
   0xe   :  { %v9757_v45 = vld [vmem:[%s15878_s2 + $0x98] ss:$12 sps:$4 sm:$0xff]   ;;  %v10991_v47 = vpack.c.bf16 %v79_v44, %v78_v43  ;;  %v9758_v48 = vld [vmem:[%s15878_s2 + $0xb0] ss:$12 sps:$4 sm:$0xff]   ;;  %v57_v50 = vld [vmem:[%s15879_s0 + $0x48] sm:$0xff] }
   0xf   :  { %280 = vmatpush1.bf16.msra.mxu0 %v9738_v8  ;;  %9413 = vmatpush1.bf16.msra.mxu1 %v9738_v8  ;;  %v84_v51 = vpack.c.bf16 %v57_v50, %v56_v49  ;;  %v58_v52 = vld [vmem:[%s15879_s0 + $0x50] sm:$0xff]  ;;  %v59_v53 = vld [vmem:[%s15879_s0 + $0x58] sm:$0xff]  ;;  %v60_v55 = vld [vmem:[%s15879_s0 + $0x60] sm:$0xff] }
  0x10   :  { %281 = vmatprep.subr.bf16.mxu0 %v9739_v9  ;;  %9406 = vmatprep.subr.bf16.mxu1 %v9739_v9  ;;  %v85_v54 = vpack.c.bf16 %v59_v53, %v58_v52  ;;  %v61_v56 = vld [vmem:[%s15879_s0 + $0x68] sm:$0xff]  ;;  %v62_v58 = vld [vmem:[%s15879_s0 + $0x70] sm:$0xff]  ;;  %v63_v59 = vld [vmem:[%s15879_s0 + $0x78] sm:$0xff] }
  0x11   :  { %v86_v57 = vpack.c.bf16 %v61_v56, %v60_v55  ;;  %v87_v60 = vpack.c.bf16 %v63_v59, %v62_v58  ;;  %v64_v61 = vld [vmem:[%s15879_s0 + $0x80] sm:$0xff]  ;;  %v65_v62 = vld [vmem:[%s15879_s0 + $0x88] sm:$0xff]  ;;  %v66_v0 = vld [vmem:[%s15879_s0 + $0x90] sm:$0xff] }
  0x12   :  { %v88_v63 = vpack.c.bf16 %v65_v62, %v64_v61  ;;  %v67_v2 = vld [vmem:[%s15879_s0 + $0x98] sm:$0xff]  ;;  %v68_v3 = vld [vmem:[%s15879_s0 + $0xa0] sm:$0xff]  ;;  %v69_v4 = vld [vmem:[%s15879_s0 + $0xa8] sm:$0xff] }
  0x13   :  { %282 = vmatpush1.bf16.msra.mxu0 %v9741_v10  ;;  %9414 = vmatpush1.bf16.msra.mxu1 %v9741_v10  ;;  %v89_v5 = vpack.c.bf16 %v67_v2, %v66_v0  ;;  %v90_v6 = vpack.c.bf16 %v69_v4, %v68_v3  ;;  %v70_v7 = vld [vmem:[%s15879_s0 + $0xb0] sm:$0xff]  ;;  %v71_v8 = vld [vmem:[%s15879_s0 + $0xb8] sm:$0xff]  ;;  %v130_v10 = vlaneseq }
  0x14   :  { %283 = vmatprep.subr.bf16.mxu0 %v9742_v11  ;;  %9407 = vmatprep.subr.bf16.mxu1 %v9742_v11  ;;  %v91_v9 = vpack.c.bf16 %v71_v8, %v70_v7 }
  0x15   :  { %v11057_v11 = vshrl.u32 %v130_v10, 7 }
  0x17   :  { %284 = vmatpush1.bf16.msra.mxu0 %v9744_v12  ;;  %9415 = vmatpush1.bf16.msra.mxu1 %v9744_v12  ;;  %16092 = vst [vmem:[#allocation2_spill] sm:$0xff] %v11057_v11  ;;  %v11060_v12 = vsub.s32 0, %v11057_v11 }
  0x18   :  { %285 = vmatprep.subr.bf16.mxu0 %v9745_v13  ;;  %9408 = vmatprep.subr.bf16.mxu1 %v9745_v13  ;;  %v11065_v13 = vld [vmem:[%s15880_s3] sm:$0x7]  ;;  %s10778_s3 = smov 96  }
  0x19   :  { %16093 = vst [vmem:[#allocation3_spill] sm:$0xff] %v11060_v12 }
  0x1b   :  { %286 = vmatpush1.bf16.msra.mxu0 %v9747_v14  ;;  %9416 = vmatpush1.bf16.msra.mxu1 %v9747_v14  ;;  %v15893_v14 = vsub.s32 1, %v11057_v11 }
  0x1c   :  { %287 = vmatprep.subr.bf16.mxu0 %v9748_v15  ;;  %9409 = vmatprep.subr.bf16.mxu1 %v9748_v15  ;;  %v11070_v15 = vrot.slane %v11065_v13, %v11060_v12 }
  0x1d   :  { %v11075_v17 = vrot.slane %v11065_v13, %v15893_v14 }
  0x1f   :  { %288 = vmatpush1.bf16.msra.mxu0 %v9750_v16  ;;  %9417 = vmatpush1.bf16.msra.mxu1 %v9750_v16 }
  0x20   :  { %8794 = vmatprep.subr.bf16.mxu1 %v9751_v21 }
  0x22   :  { %306 = vmatmul.mubr.bf16.vlgmr.msra.gmra.mrb[0].mxu0 %v80_v22  ;;  %426 = vmatmul.mubr.bf16.vlgmr.msra.gmra.mrb[0].mxu1 %v10922_v23 }
  0x23   :  { %315 = vmatprep.mubr.bf16.mxu0 %v15895_v1  ;;  %435 = vmatprep.mubr.bf16.mxu1 %v15895_v1 }
  0x24   :  { %8795 = vmatpush3.bf16.msra.mxu1 %v9751_v21 }
  0x25   :  { %8796 = vmatprep.subr.bf16.mxu1 %v9752_v24 }
  0x28   :  { %8797 = vmatpush3.bf16.msra.mxu1 %v9752_v24 }
  0x29   :  { %8798 = vmatprep.subr.bf16.mxu1 %v9753_v29 }
  0x2a   :  { %316 = vmatmul.mubr.bf16.gmra.mrb[4].mxu0 %v81_v30  ;;  %436 = vmatmul.mubr.bf16.gmra.mrb[4].mxu1 %v10945_v31 }
  0x2b   :  { %325 = vmatprep.mubr.bf16.mxu0 %v15895_v1  ;;  %445 = vmatprep.mubr.bf16.mxu1 %v15895_v1 }
  0x2c   :  { %8799 = vmatpush3.bf16.msra.mxu1 %v9753_v29 }
  0x2d   :  { %8800 = vmatprep.subr.bf16.mxu1 %v9754_v32 }
  0x30   :  { %8801 = vmatpush3.bf16.msra.mxu1 %v9754_v32 }
  0x31   :  { %8802 = vmatprep.subr.bf16.mxu1 %v9755_v37 }
  0x32   :  { %326 = vmatmul.mubr.bf16.gmra.mrb[8].mxu0 %v82_v38  ;;  %446 = vmatmul.mubr.bf16.gmra.mrb[8].mxu1 %v10968_v39 }
  0x33   :  { %335 = vmatprep.mubr.bf16.mxu0 %v15895_v1  ;;  %455 = vmatprep.mubr.bf16.mxu1 %v15895_v1 }
  0x34   :  { %8803 = vmatpush3.bf16.msra.mxu1 %v9755_v37 }
  0x35   :  { %8804 = vmatprep.subr.bf16.mxu1 %v9756_v40 }
  0x38   :  { %8805 = vmatpush3.bf16.msra.mxu1 %v9756_v40 }
  0x39   :  { %8806 = vmatprep.subr.bf16.mxu1 %v9757_v45 }
  0x3a   :  { %336 = vmatmul.mubr.bf16.gmra.mrb[12].mxu0 %v83_v46  ;;  %456 = vmatmul.mubr.bf16.gmra.mrb[12].mxu1 %v10991_v47 }
  0x3b   :  { %345 = vmatprep.mubr.bf16.mxu0 %v15895_v1  ;;  %8810 = vmatprep.mubr.bf16.mxu1 %v80_v22 }
  0x3c   :  { %8807 = vmatpush3.bf16.msra.mxu1 %v9757_v45 }
  0x3d   :  { %8808 = vmatprep.subr.bf16.mxu1 %v9758_v48 }
  0x40   :  { %8809 = vmatpush3.bf16.msra.mxu1 %v9758_v48 }
  0x42   :  { %346 = vmatmul.mubr.bf16.gmra.mrb[16].mxu0 %v84_v51 }
  0x43   :  { %355 = vmatprep.mubr.bf16.mxu0 %v15895_v1  ;;  %8811 = vmatmul.mubr.bf16.vlgmr.msra.gmra.mrb[16].mxu1 %v81_v30 }
  0x44   :  { %8814 = vmatprep.mubr.bf16.mxu1 %v82_v38 }
  0x4a   :  { %356 = vmatmul.mubr.bf16.gmra.mrb[20].mxu0 %v85_v54 }
  0x4b   :  { %365 = vmatprep.mubr.bf16.mxu0 %v15895_v1  ;;  %8815 = vmatmul.mubr.bf16.gmra.mrb[20].mxu1 %v83_v46 }
  0x4c   :  { %8818 = vmatprep.mubr.bf16.mxu1 %v84_v51 }
  0x52   :  { %366 = vmatmul.mubr.bf16.gmra.mrb[24].mxu0 %v86_v57 }
  0x53   :  { %375 = vmatprep.mubr.bf16.mxu0 %v15895_v1  ;;  %8819 = vmatmul.mubr.bf16.gmra.mrb[24].mxu1 %v85_v54 }
  0x54   :  { %8822 = vmatprep.mubr.bf16.mxu1 %v86_v57 }
  0x5a   :  { %376 = vmatmul.mubr.bf16.gmra.mrb[28].mxu0 %v87_v60 }
  0x5b   :  { %385 = vmatprep.mubr.bf16.mxu0 %v15895_v1  ;;  %8823 = vmatmul.mubr.bf16.gmra.mrb[28].mxu1 %v87_v60 }
  0x5c   :  { %8826 = vmatprep.mubr.bf16.mxu1 %v88_v63 }
  0x62   :  { %386 = vmatmul.mubr.bf16.gmra.mrb[32].mxu0 %v88_v63 }
  0x63   :  { %395 = vmatprep.mubr.bf16.mxu0 %v15895_v1  ;;  %8827 = vmatmul.mubr.bf16.gmra.mrb[32].mxu1 %v89_v5 }
  0x64   :  { %8830 = vmatprep.mubr.bf16.mxu1 %v90_v6 }
  0x6a   :  { %396 = vmatmul.mubr.bf16.gmra.mrb[36].mxu0 %v89_v5 }
  0x6b   :  { %405 = vmatprep.mubr.bf16.mxu0 %v15895_v1  ;;  %8831 = vmatmul.mubr.bf16.gmra.mrb[36].mxu1 %v91_v9 }
  0x6c   :  { %8834 = vmatprep.mubr.bf16.mxu1 %v10922_v23 }
  0x72   :  { %406 = vmatmul.mubr.bf16.gmra.mrb[40].mxu0 %v90_v6 }
  0x73   :  { %415 = vmatprep.mubr.bf16.mxu0 %v15895_v1  ;;  %8835 = vmatmul.mubr.bf16.gmra.mrb[40].mxu1 %v10945_v31 }
  0x74   :  { %8838 = vmatprep.mubr.bf16.mxu1 %v10968_v39 }
  0x7a   :  { %416 = vmatmul.mubr.bf16.gmra.mrb[44].mxu0 %v91_v9 }
  0x7b   :  { %8839 = vmatmul.mubr.bf16.gmra.mrb[44].mxu1 %v10991_v47 }
  0xf5   :  { %v307_v16 = vpop.f32.mrb[0].mxu0  ;;  %v427_v18 = vpop.f32.mrb[0].mxu1 }
  0xf6   :  { %v309_v19 = vpop.f32.mrb[1].mxu0  ;;  %v428_v20 = vadd.f32 %v427_v18, %v11070_v15  ;;  %v429_v21 = vpop.f32.mrb[1].mxu1  ;;  %v308_v25 = vadd.f32 %v307_v16, %v11070_v15 }
  0xf7   :  { %v311_v22 = vpop.f32.mrb[2].mxu0  ;;  %v430_v23 = vadd.f32 %v429_v21, %v11075_v17  ;;  %v431_v24 = vpop.f32.mrb[2].mxu1  ;;  %v310_v30 = vadd.f32 %v309_v19, %v11075_v17 }
  0xf8   :  { %v312_v26 = vadd.f32 %v311_v22, %v11070_v15  ;;  %v313_v27 = vpop.f32.mrb[3].mxu0  ;;  %v432_v28 = vadd.f32 %v431_v24, %v11070_v15  ;;  %v433_v29 = vpop.f32.mrb[3].mxu1 }
  0xf9   :  { %v314_v31 = vadd.f32 %v313_v27, %v11075_v17  ;;  %v434_v32 = vadd.f32 %v433_v29, %v11075_v17 }
  0xfa   :  { %v11085_v33 = vpack.c.bf16 %v312_v26, %v308_v25  ;;  %v11087_v34 = vpack.c.bf16 %v432_v28, %v428_v20 }
  0xfb   :  { %v11089_v35 = vpack.c.bf16 %v314_v31, %v310_v30  ;;  %v11091_v36 = vpack.c.bf16 %v434_v32, %v430_v23 }
  0xfc   :  { %16094 = vst [vmem:[#allocation4_spill] sm:$0xff] %v11085_v33  ;;  %16095 = vst [vmem:[#allocation5_spill] sm:$0xff] %v11087_v34  ;;  %1572 = vrot.lane.b32.xlu0 %v11085_v33, %s10778_s3  ;;  %8858 = vmatprep.mubr.msk.bf16.mxu1 %vm701_vm0, %v11085_v33 }
  0xfd   :  { %16096 = vst [vmem:[#allocation6_spill] sm:$0xff] %v11089_v35  ;;  %16097 = vst [vmem:[#allocation7_spill] sm:$0xff] %v11091_v36  ;;  %v317_v37 = vpop.f32.mrb[4].mxu0  ;;  %9418 = vmatprep.subr.msk.bf16.mxu1 %vm701_vm0, %v11089_v35  ;;  %v727_v38 = vsel %vm701_vm0, %v11089_v35, 0  ;;  %v437_v39 = vpop.f32.mrb[4].mxu1 }
  0xfe   :  { %v319_v40 = vpop.f32.mrb[5].mxu0  ;;  %8843 = vmatpush3.bf16.xpose.msra.mxu1 %v727_v38  ;;  %v438_v41 = vadd.f32 %v437_v39, %v11070_v15  ;;  %v439_v42 = vpop.f32.mrb[5].mxu1  ;;  %v318_v46 = vadd.f32 %v317_v37, %v11070_v15 }
  0xff   :  { %v321_v43 = vpop.f32.mrb[6].mxu0  ;;  %v440_v44 = vadd.f32 %v439_v42, %v11075_v17  ;;  %v441_v45 = vpop.f32.mrb[6].mxu1  ;;  %v320_v51 = vadd.f32 %v319_v40, %v11075_v17 }
 0x100   :  { %v322_v47 = vadd.f32 %v321_v43, %v11070_v15  ;;  %v323_v48 = vpop.f32.mrb[7].mxu0  ;;  %1596 = vrot.lane.b32.xlu0 %v11089_v35, %s10778_s3  ;;  %v442_v49 = vadd.f32 %v441_v45, %v11070_v15  ;;  %v443_v50 = vpop.f32.mrb[7].mxu1 }
 0x101   :  { %v324_v52 = vadd.f32 %v323_v48, %v11075_v17  ;;  %v444_v53 = vadd.f32 %v443_v50, %v11075_v17 }
 0x102   :  { %v11111_v54 = vpack.c.bf16 %v322_v47, %v318_v46  ;;  %v11113_v55 = vpack.c.bf16 %v442_v49, %v438_v41 }
 0x103   :  { %v11115_v56 = vpack.c.bf16 %v324_v52, %v320_v51  ;;  %v11117_v57 = vpack.c.bf16 %v444_v53, %v440_v44 }
 0x104   :  { %16098 = vst [vmem:[#allocation8_spill] sm:$0xff] %v11111_v54  ;;  %16099 = vst [vmem:[#allocation9_spill] sm:$0xff] %v11113_v55  ;;  %1797 = vrot.lane.b32.xlu0 %v11091_v36, %s10778_s3 }
 0x105   :  { %16100 = vst [vmem:[#allocation10_spill] sm:$0xff] %v11115_v56  ;;  %16101 = vst [vmem:[#allocation11_spill] sm:$0xff] %v11117_v57  ;;  %v327_v58 = vpop.f32.mrb[8].mxu0  ;;  %1598 = vrot.lane.b32.xlu1 %v11115_v56, %s10778_s3  ;;  %9419 = vmatprep.subr.msk.bf16.mxu1 %vm701_vm0, %v11115_v56  ;;  %v730_v59 = vsel %vm701_vm0, %v11115_v56, 0  ;;  %v447_v60 = vpop.f32.mrb[8].mxu1 }
 0x106   :  { %v329_v61 = vpop.f32.mrb[9].mxu0  ;;  %8845 = vmatpush3.bf16.xpose.msra.mxu1 %v730_v59  ;;  %v448_v62 = vadd.f32 %v447_v60, %v11070_v15  ;;  %v449_v63 = vpop.f32.mrb[9].mxu1  ;;  %v328_v4 = vadd.f32 %v327_v58, %v11070_v15 }
 0x107   :  { %v331_v0 = vpop.f32.mrb[10].mxu0  ;;  %v450_v2 = vadd.f32 %v449_v63, %v11075_v17  ;;  %v451_v3 = vpop.f32.mrb[10].mxu1  ;;  %v330_v9 = vadd.f32 %v329_v61, %v11075_v17 }
 0x108   :  { %v332_v5 = vadd.f32 %v331_v0, %v11070_v15  ;;  %v333_v6 = vpop.f32.mrb[11].mxu0  ;;  %1574 = vrot.lane.b32.xlu0 %v11111_v54, %s10778_s3  ;;  %v452_v7 = vadd.f32 %v451_v3, %v11070_v15  ;;  %v453_v8 = vpop.f32.mrb[11].mxu1 }
 0x109   :  { %v334_v10 = vadd.f32 %v333_v6, %v11075_v17  ;;  %1799 = vrot.lane.b32.xlu1 %v11117_v57, %s10778_s3  ;;  %v454_v16 = vadd.f32 %v453_v8, %v11075_v17 }
 0x10a   :  { %v11139_v18 = vpack.c.bf16 %v332_v5, %v328_v4  ;;  %v11141_v19 = vpack.c.bf16 %v452_v7, %v448_v62 }
 0x10b   :  { %v11143_v20 = vpack.c.bf16 %v334_v10, %v330_v9  ;;  %v11145_v21 = vpack.c.bf16 %v454_v16, %v450_v2 }
 0x10c   :  { %16102 = vst [vmem:[#allocation12_spill] sm:$0xff] %v11139_v18  ;;  %16103 = vst [vmem:[#allocation13_spill] sm:$0xff] %v11141_v19 }
 0x10d   :  { %16104 = vst [vmem:[#allocation14_spill] sm:$0xff] %v11143_v20  ;;  %16105 = vst [vmem:[#allocation15_spill] sm:$0xff] %v11145_v21  ;;  %v337_v22 = vpop.f32.mrb[12].mxu0  ;;  %1576 = vrot.lane.b32.xlu1 %v11139_v18, %s10778_s3  ;;  %9420 = vmatprep.subr.msk.bf16.mxu1 %vm701_vm0, %v11143_v20  ;;  %v733_v23 = vsel %vm701_vm0, %v11143_v20, 0  ;;  %v457_v24 = vpop.f32.mrb[12].mxu1 }
 0x10e   :  { %1600 = vrot.lane.b32.xlu0 %v11143_v20, %s10778_s3  ;;  %v339_v25 = vpop.f32.mrb[13].mxu0  ;;  %8847 = vmatpush3.bf16.xpose.msra.mxu1 %v733_v23  ;;  %v458_v26 = vadd.f32 %v457_v24, %v11070_v15  ;;  %v459_v27 = vpop.f32.mrb[13].mxu1  ;;  %v338_v31 = vadd.f32 %v337_v22, %v11070_v15 }
 0x10f   :  { %v341_v28 = vpop.f32.mrb[14].mxu0  ;;  %v460_v29 = vadd.f32 %v459_v27, %v11075_v17  ;;  %v461_v30 = vpop.f32.mrb[14].mxu1  ;;  %v340_v40 = vadd.f32 %v339_v25, %v11075_v17 }
 0x110   :  { %v342_v32 = vadd.f32 %v341_v28, %v11070_v15  ;;  %v343_v37 = vpop.f32.mrb[15].mxu0  ;;  %v462_v38 = vadd.f32 %v461_v30, %v11070_v15  ;;  %v463_v39 = vpop.f32.mrb[15].mxu1 }
 0x111   :  { %v344_v41 = vadd.f32 %v343_v37, %v11075_v17  ;;  %v464_v42 = vadd.f32 %v463_v39, %v11075_v17 }
 0x112   :  { %v11163_v43 = vpack.c.bf16 %v342_v32, %v338_v31  ;;  %v11165_v44 = vpack.c.bf16 %v462_v38, %v458_v26 }
 0x113   :  { %v11167_v45 = vpack.c.bf16 %v344_v41, %v340_v40  ;;  %v11169_v46 = vpack.c.bf16 %v464_v42, %v460_v29 }
 0x114   :  { %16106 = vst [vmem:[#allocation16_spill] sm:$0xff] %v11163_v43  ;;  %16107 = vst [vmem:[#allocation17_spill] sm:$0xff] %v11165_v44  ;;  %1578 = vrot.lane.b32.xlu0 %v11163_v43, %s10778_s3 }
 0x115   :  { %16108 = vst [vmem:[#allocation18_spill] sm:$0xff] %v11167_v45  ;;  %v347_v47 = vpop.f32.mrb[16].mxu0  ;;  %9421 = vmatprep.subr.msk.bf16.mxu1 %vm701_vm0, %v11167_v45  ;;  %v736_v48 = vsel %vm701_vm0, %v11167_v45, 0 }
 0x116   :  { %v349_v49 = vpop.f32.mrb[17].mxu0  ;;  %8849 = vmatpush3.bf16.xpose.msra.mxu1 %v736_v48  ;;  %v348_v51 = vadd.f32 %v347_v47, %v11070_v15 }
 0x117   :  { %v351_v50 = vpop.f32.mrb[18].mxu0  ;;  %v350_v58 = vadd.f32 %v349_v49, %v11075_v17 }
 0x118   :  { %v352_v52 = vadd.f32 %v351_v50, %v11070_v15  ;;  %v353_v53 = vpop.f32.mrb[19].mxu0  ;;  %1602 = vrot.lane.b32.xlu0 %v11167_v45, %s10778_s3 }
 0x119   :  { %v354_v59 = vadd.f32 %v353_v53, %v11075_v17 }
 0x11a   :  { %v11183_v60 = vpack.c.bf16 %v352_v52, %v348_v51 }
 0x11b   :  { %v11185_v61 = vpack.c.bf16 %v354_v59, %v350_v58 }
 0x11c   :  { %16109 = vst [vmem:[#allocation19_spill] sm:$0xff] %v11183_v60 }
 0x11d   :  { %16110 = vst [vmem:[#allocation20_spill] sm:$0xff] %v11185_v61  ;;  %v357_v62 = vpop.f32.mrb[20].mxu0  ;;  %1604 = vrot.lane.b32.xlu1 %v11185_v61, %s10778_s3  ;;  %9422 = vmatprep.subr.msk.bf16.mxu1 %vm701_vm0, %v11185_v61  ;;  %v739_v63 = vsel %vm701_vm0, %v11185_v61, 0 }
 0x11e   :  { %v359_v0 = vpop.f32.mrb[21].mxu0  ;;  %8851 = vmatpush3.bf16.xpose.msra.mxu1 %v739_v63  ;;  %v358_v3 = vadd.f32 %v357_v62, %v11070_v15 }
 0x11f   :  { %v361_v2 = vpop.f32.mrb[22].mxu0  ;;  %v360_v6 = vadd.f32 %v359_v0, %v11075_v17 }
 0x120   :  { %v362_v4 = vadd.f32 %v361_v2, %v11070_v15  ;;  %v363_v5 = vpop.f32.mrb[23].mxu0 }
 0x121   :  { %v364_v7 = vadd.f32 %v363_v5, %v11075_v17 }
 0x122   :  { %v11197_v8 = vpack.c.bf16 %v362_v4, %v358_v3 }
 0x123   :  { %v11199_v9 = vpack.c.bf16 %v364_v7, %v360_v6 }
 0x124   :  { %16111 = vst [vmem:[#allocation21_spill] sm:$0xff] %v11197_v8 }
 0x125   :  { %16112 = vst [vmem:[#allocation22_spill] sm:$0xff] %v11199_v9  ;;  %v367_v10 = vpop.f32.mrb[24].mxu0  ;;  %9423 = vmatprep.subr.msk.bf16.mxu1 %vm701_vm0, %v11199_v9  ;;  %1606 = vrot.lane.b32.xlu0 %v11199_v9, %s10778_s3  ;;  %v742_v16 = vsel %vm701_vm0, %v11199_v9, 0 }
 0x126   :  { %v369_v22 = vpop.f32.mrb[25].mxu0  ;;  %8853 = vmatpush3.bf16.xpose.msra.mxu1 %v742_v16  ;;  %v368_v24 = vadd.f32 %v367_v10, %v11070_v15 }
 0x127   :  { %v371_v23 = vpop.f32.mrb[26].mxu0  ;;  %v370_v27 = vadd.f32 %v369_v22, %v11075_v17 }
 0x128   :  { %v372_v25 = vadd.f32 %v371_v23, %v11070_v15  ;;  %v373_v26 = vpop.f32.mrb[27].mxu0 }
 0x129   :  { %v374_v28 = vadd.f32 %v373_v26, %v11075_v17 }
 0x12a   :  { %v11211_v29 = vpack.c.bf16 %v372_v25, %v368_v24 }
 0x12b   :  { %v11213_v30 = vpack.c.bf16 %v374_v28, %v370_v27 }
 0x12c   :  { %16113 = vst [vmem:[#allocation23_spill] sm:$0xff] %v11211_v29 }
 0x12d   :  { %16114 = vst [vmem:[#allocation24_spill] sm:$0xff] %v11213_v30  ;;  %v377_v31 = vpop.f32.mrb[28].mxu0  ;;  %1608 = vrot.lane.b32.xlu1 %v11213_v30, %s10778_s3  ;;  %9424 = vmatprep.subr.msk.bf16.mxu1 %vm701_vm0, %v11213_v30  ;;  %v745_v32 = vsel %vm701_vm0, %v11213_v30, 0 }
 0x12e   :  { %v379_v37 = vpop.f32.mrb[29].mxu0  ;;  %8855 = vmatpush3.bf16.xpose.msra.mxu1 %v745_v32  ;;  %v378_v39 = vadd.f32 %v377_v31, %v11070_v15 }
 0x12f   :  { %v381_v38 = vpop.f32.mrb[30].mxu0  ;;  %v380_v42 = vadd.f32 %v379_v37, %v11075_v17  ;;  %v15894_v37 = vsub.s32 2, %v11057_v11 }
 0x130   :  { %v382_v40 = vadd.f32 %v381_v38, %v11070_v15  ;;  %v383_v41 = vpop.f32.mrb[31].mxu0  ;;  %v8812_v38 = vpop.f32.mrb[16].mxu1 }
 0x131   :  { %v384_v47 = vadd.f32 %v383_v41, %v11075_v17 }
 0x132   :  { %v11225_v48 = vpack.c.bf16 %v382_v40, %v378_v39 }
 0x133   :  { %v11227_v49 = vpack.c.bf16 %v384_v47, %v380_v42  ;;  %v500_v42 = vpop.f32.mrb[17].mxu1 }
 0x134   :  { %16115 = vst [vmem:[#allocation25_spill] sm:$0xff] %v11225_v48 }
 0x135   :  { %16116 = vst [vmem:[#allocation26_spill] sm:$0xff] %v11227_v49  ;;  %v387_v50 = vpop.f32.mrb[32].mxu0  ;;  %9425 = vmatprep.subr.msk.bf16.mxu1 %vm701_vm0, %v11227_v49  ;;  %1610 = vrot.lane.b32.xlu0 %v11227_v49, %s10778_s3  ;;  %v748_v51 = vsel %vm701_vm0, %v11227_v49, 0 }
 0x136   :  { %v389_v52 = vpop.f32.mrb[33].mxu0  ;;  %8857 = vmatpush3.bf16.xpose.msra.mxu1 %v748_v51  ;;  %v388_v58 = vadd.f32 %v387_v50, %v11070_v15  ;;  %v11281_v51 = vrot.slane %v11065_v13, %v15894_v37 }
 0x137   :  { %v391_v53 = vpop.f32.mrb[34].mxu0  ;;  %v390_v63 = vadd.f32 %v389_v52, %v11075_v17  ;;  %v8813_v52 = vpop.f32.mrb[18].mxu1 }
 0x138   :  { %v392_v59 = vadd.f32 %v391_v53, %v11070_v15  ;;  %v393_v62 = vpop.f32.mrb[35].mxu0 }
 0x139   :  { %v394_v0 = vadd.f32 %v393_v62, %v11075_v17  ;;  %v509_v62 = vadd.f32 %v8812_v38, %v11281_v51 }
 0x13a   :  { %v11239_v2 = vpack.c.bf16 %v392_v59, %v388_v58  ;;  %v503_v58 = vpop.f32.mrb[19].mxu1 }
 0x13b   :  { %v11241_v3 = vpack.c.bf16 %v394_v0, %v390_v63  ;;  %v501_v63 = vadd.f32 %v500_v42, %v11281_v51  ;;  %v512_v0 = vadd.f32 %v8813_v52, %v11281_v51 }
 0x13c   :  { %16117 = vst [vmem:[#allocation27_spill] sm:$0xff] %v11239_v2  ;;  %8890 = vmatprep.mubr.msk.bf16.mxu0 %vm701_vm0, %v11239_v2 }
 0x13d   :  { %16118 = vst [vmem:[#allocation28_spill] sm:$0xff] %v11241_v3  ;;  %v397_v4 = vpop.f32.mrb[36].mxu0  ;;  %9426 = vmatprep.subr.msk.bf16.mxu0 %vm701_vm0, %v11241_v3  ;;  %1789 = vrot.lane.b32.xlu0 %v11241_v3, %s10778_s3  ;;  %v872_v5 = vsel %vm701_vm0, %v11241_v3, 0 }
 0x13e   :  { %8859 = vmatmul.mubr.msk.bf16.vlgmr.msra.gmra.mrb[48].mxu1 %vm701_vm0, %v11111_v54  ;;  %v399_v6 = vpop.f32.mrb[37].mxu0  ;;  %8875 = vmatpush3.bf16.xpose.msra.mxu0 %v872_v5  ;;  %v398_v10 = vadd.f32 %v397_v4, %v11070_v15  ;;  %v8816_v4 = vpop.f32.mrb[20].mxu1  ;;  %v504_v5 = vadd.f32 %v503_v58, %v11281_v51 }
 0x13f   :  { %8862 = vmatprep.mubr.msk.bf16.mxu1 %vm701_vm0, %v11139_v18  ;;  %v401_v7 = vpop.f32.mrb[38].mxu0  ;;  %v400_v23 = vadd.f32 %v399_v6, %v11075_v17  ;;  %v525_v6 = vadd.f32 %v8816_v4, %v11281_v51 }
 0x140   :  { %v402_v16 = vadd.f32 %v401_v7, %v11070_v15  ;;  %v403_v22 = vpop.f32.mrb[39].mxu0  ;;  %v516_v7 = vpop.f32.mrb[21].mxu1 }
 0x141   :  { %v404_v24 = vadd.f32 %v403_v22, %v11075_v17  ;;  %v517_v22 = vadd.f32 %v516_v7, %v11281_v51 }
 0x142   :  { %v11259_v25 = vpack.c.bf16 %v402_v16, %v398_v10  ;;  %v11298_v16 = vpack.c.bf16 %v512_v0, %v509_v62 }
 0x143   :  { %v11261_v26 = vpack.c.bf16 %v404_v24, %v400_v23  ;;  %v8817_v23 = vpop.f32.mrb[22].mxu1 }
 0x144   :  { %16119 = vst [vmem:[#allocation29_spill] sm:$0xff] %v11259_v25  ;;  %16123 = vst [vmem:[#allocation33_spill] sm:$0xff] %v11298_v16 }
 0x145   :  { %16120 = vst [vmem:[#allocation30_spill] sm:$0xff] %v11261_v26  ;;  %v407_v27 = vpop.f32.mrb[40].mxu0  ;;  %9427 = vmatprep.subr.msk.bf16.mxu0 %vm701_vm0, %v11261_v26  ;;  %v875_v28 = vsel %vm701_vm0, %v11261_v26, 0  ;;  %1791 = vrot.lane.b32.xlu1 %v11261_v26, %s10778_s3 }
 0x146   :  { %8863 = vmatmul.mubr.msk.bf16.gmra.mrb[52].mxu1 %vm701_vm0, %v11163_v43  ;;  %v409_v31 = vpop.f32.mrb[41].mxu0  ;;  %8877 = vmatpush3.bf16.xpose.msra.mxu0 %v875_v28  ;;  %v408_v39 = vadd.f32 %v407_v27, %v11070_v15  ;;  %v11303_v27 = vpack.c.bf16 %v504_v5, %v501_v63  ;;  %v528_v28 = vadd.f32 %v8817_v23, %v11281_v51 }
 0x147   :  { %8866 = vmatprep.mubr.msk.bf16.mxu1 %vm701_vm0, %v11183_v60  ;;  %v411_v32 = vpop.f32.mrb[42].mxu0  ;;  %v410_v47 = vadd.f32 %v409_v31, %v11075_v17  ;;  %v519_v31 = vpop.f32.mrb[23].mxu1 }
 0x148   :  { %v412_v40 = vadd.f32 %v411_v32, %v11070_v15  ;;  %v413_v41 = vpop.f32.mrb[43].mxu0  ;;  %16124 = vst [vmem:[#allocation34_spill] sm:$0xff] %v11303_v27  ;;  %v520_v38 = vadd.f32 %v519_v31, %v11281_v51  ;;  %8906 = vmatprep.subr.bf16.mxu1 %v11303_v27 }
 0x149   :  { %v414_v50 = vadd.f32 %v413_v41, %v11075_v17  ;;  %8907 = vmatpush3.bf16.msra.mxu1 %v11303_v27 }
 0x14a   :  { %v11283_v53 = vpack.c.bf16 %v412_v40, %v408_v39  ;;  %v8820_v39 = vpop.f32.mrb[24].mxu1  ;;  %v11317_v63 = vpack.c.bf16 %v520_v38, %v517_v22  ;;  %8908 = vmatprep.subr.bf16.mxu1 %v11298_v16 }
 0x14b   :  { %v11285_v59 = vpack.c.bf16 %v414_v50, %v410_v47  ;;  %v11311_v47 = vpack.c.bf16 %v528_v28, %v525_v6  ;;  %v541_v50 = vadd.f32 %v8820_v39, %v11281_v51  ;;  %v532_v52 = vpop.f32.mrb[25].mxu1 }
 0x14c   :  { %16121 = vst [vmem:[#allocation31_spill] sm:$0xff] %v11283_v53  ;;  %16126 = vst [vmem:[#allocation36_spill] sm:$0xff] %v11317_v63  ;;  %v533_v0 = vadd.f32 %v532_v52, %v11281_v51  ;;  %v8821_v4 = vpop.f32.mrb[26].mxu1 }
 0x14d   :  { %16122 = vst [vmem:[#allocation32_spill] sm:$0xff] %v11285_v59  ;;  %v417_v13 = vpop.f32.mrb[44].mxu0  ;;  %9428 = vmatprep.subr.msk.bf16.mxu0 %vm701_vm0, %v11285_v59  ;;  %v878_v10 = vsel %vm701_vm0, %v11285_v59, 0  ;;  %1793 = vrot.lane.b32.xlu0 %v11285_v59, %s10778_s3  ;;  %16125 = vst [vmem:[#allocation35_spill] sm:$0xff] %v11311_v47  ;;  %v544_v5 = vadd.f32 %v8821_v4, %v11281_v51  ;;  %v535_v6 = vpop.f32.mrb[27].mxu1 }
 0x14e   :  { %8867 = vmatmul.mubr.msk.bf16.gmra.mrb[56].mxu1 %vm701_vm0, %v11197_v8  ;;  %v419_v24 = vpop.f32.mrb[45].mxu0  ;;  %8879 = vmatpush3.bf16.xpose.msra.mxu0 %v878_v10  ;;  %v418_v40 = vadd.f32 %v417_v13, %v11070_v15  ;;  %v536_v13 = vadd.f32 %v535_v6, %v11281_v51  ;;  %v8824_v10 = vpop.f32.mrb[28].mxu1 }
 0x14f   :  { %8870 = vmatprep.mubr.msk.bf16.mxu1 %vm701_vm0, %v11211_v29  ;;  %v421_v32 = vpop.f32.mrb[46].mxu0  ;;  %v420_v58 = vadd.f32 %v419_v24, %v11075_v17  ;;  %v557_v22 = vadd.f32 %v8824_v10, %v11281_v51  ;;  %v548_v23 = vpop.f32.mrb[29].mxu1  ;;  %8909 = vmatpush3.bf16.msra.mxu1 %v11298_v16 }
 0x150   :  { %v422_v41 = vadd.f32 %v421_v32, %v11070_v15  ;;  %v423_v42 = vpop.f32.mrb[47].mxu0  ;;  %v11337_v28 = vpack.c.bf16 %v536_v13, %v533_v0  ;;  %v549_v31 = vadd.f32 %v548_v23, %v11281_v51  ;;  %v8825_v32 = vpop.f32.mrb[30].mxu1  ;;  %8910 = vmatprep.subr.bf16.mxu1 %v11317_v63 }
 0x151   :  { %v424_v62 = vadd.f32 %v423_v42, %v11075_v17  ;;  %v11328_v17 = vpack.c.bf16 %v544_v5, %v541_v50  ;;  %v560_v38 = vadd.f32 %v8825_v32, %v11281_v51  ;;  %v551_v39 = vpop.f32.mrb[31].mxu1 }
 0x152   :  { %v11321_v15 = vpack.c.bf16 %v422_v41, %v418_v40  ;;  %16130 = vst [vmem:[#allocation40_spill] sm:$0xff] %v11337_v28  ;;  %v552_v40 = vadd.f32 %v551_v39, %v11281_v51  ;;  %v8828_v41 = vpop.f32.mrb[32].mxu1 }
 0x153   :  { %v11325_v7 = vpack.c.bf16 %v424_v62, %v420_v58  ;;  %16129 = vst [vmem:[#allocation39_spill] sm:$0xff] %v11328_v17  ;;  %v11347_v42 = vpack.c.bf16 %v560_v38, %v557_v22  ;;  %v573_v50 = vadd.f32 %v8828_v41, %v11281_v51  ;;  %v564_v52 = vpop.f32.mrb[33].mxu1  ;;  %8911 = vmatpush3.bf16.msra.mxu1 %v11317_v63 }
 0x154   :  { %16127 = vst [vmem:[#allocation37_spill] sm:$0xff] %v11321_v15  ;;  %v11351_v58 = vpack.c.bf16 %v552_v40, %v549_v31  ;;  %v565_v62 = vadd.f32 %v564_v52, %v11281_v51  ;;  %v8829_v0 = vpop.f32.mrb[34].mxu1  ;;  %8912 = vmatprep.subr.bf16.mxu1 %v11311_v47 }
 0x155   :  { %16128 = vst [vmem:[#allocation38_spill] sm:$0xff] %v11325_v7  ;;  %9429 = vmatprep.subr.msk.bf16.mxu0 %vm701_vm0, %v11325_v7  ;;  %v881_v24 = vsel %vm701_vm0, %v11325_v7, 0  ;;  %1795 = vrot.lane.b32.xlu1 %v11325_v7, %s10778_s3  ;;  %16131 = vst [vmem:[#allocation41_spill] sm:$0xff] %v11347_v42  ;;  %v576_v4 = vadd.f32 %v8829_v0, %v11281_v51  ;;  %v567_v5 = vpop.f32.mrb[35].mxu1 }
 0x156   :  { %8871 = vmatmul.mubr.msk.bf16.gmra.mrb[60].mxu1 %vm701_vm0, %v11225_v48  ;;  %8881 = vmatpush3.bf16.xpose.msra.mxu0 %v881_v24  ;;  %16132 = vst [vmem:[#allocation42_spill] sm:$0xff] %v11351_v58  ;;  %v568_v6 = vadd.f32 %v567_v5, %v11281_v51  ;;  %v8832_v13 = vpop.f32.mrb[36].mxu1  ;;  %v884_v24 = vsel %vm701_vm0, %v11091_v36, 0 }
 0x157   :  { %9430 = vmatprep.subr.msk.bf16.mxu0 %vm701_vm0, %v11091_v36  ;;  %v11357_v10 = vpack.c.bf16 %v576_v4, %v573_v50  ;;  %v589_v22 = vadd.f32 %v8832_v13, %v11281_v51  ;;  %v580_v23 = vpop.f32.mrb[37].mxu1  ;;  %8913 = vmatpush3.bf16.msra.mxu1 %v11311_v47 }
 0x158   :  { %v11363_v31 = vpack.c.bf16 %v568_v6, %v565_v62  ;;  %v581_v32 = vadd.f32 %v580_v23, %v11281_v51  ;;  %v8833_v38 = vpop.f32.mrb[38].mxu1  ;;  %8914 = vmatprep.subr.bf16.mxu1 %v11337_v28 }
 0x159   :  { %16133 = vst [vmem:[#allocation43_spill] sm:$0xff] %v11357_v10  ;;  %v592_v39 = vadd.f32 %v8833_v38, %v11281_v51  ;;  %v583_v40 = vpop.f32.mrb[39].mxu1 }
 0x15a   :  { %16134 = vst [vmem:[#allocation44_spill] sm:$0xff] %v11363_v31  ;;  %v584_v41 = vadd.f32 %v583_v40, %v11281_v51  ;;  %v8836_v50 = vpop.f32.mrb[40].mxu1 }
 0x15b   :  { %v11371_v52 = vpack.c.bf16 %v592_v39, %v589_v22  ;;  %v605_v62 = vadd.f32 %v8836_v50, %v11281_v51  ;;  %v596_v0 = vpop.f32.mrb[41].mxu1  ;;  %8915 = vmatpush3.bf16.msra.mxu1 %v11337_v28 }
 0x15c   :  { %v11375_v4 = vpack.c.bf16 %v584_v41, %v581_v32  ;;  %v597_v5 = vadd.f32 %v596_v0, %v11281_v51  ;;  %v8837_v6 = vpop.f32.mrb[42].mxu1  ;;  %8916 = vmatprep.subr.bf16.mxu1 %v11328_v17  ;;  %v887_v32 = vsel %vm701_vm0, %v11117_v57, 0 }
 0x15d   :  { %16135 = vst [vmem:[#allocation45_spill] sm:$0xff] %v11371_v52  ;;  %v608_v13 = vadd.f32 %v8837_v6, %v11281_v51  ;;  %v599_v23 = vpop.f32.mrb[43].mxu1 }
 0x15e   :  { %8883 = vmatpush3.bf16.xpose.msra.mxu0 %v884_v24  ;;  %16136 = vst [vmem:[#allocation46_spill] sm:$0xff] %v11375_v4  ;;  %v600_v24 = vadd.f32 %v599_v23, %v11281_v51  ;;  %v8840_v38 = vpop.f32.mrb[44].mxu1 }
 0x15f   :  { %9431 = vmatprep.subr.msk.bf16.mxu0 %vm701_vm0, %v11117_v57  ;;  %v11381_v22 = vpack.c.bf16 %v608_v13, %v605_v62  ;;  %v621_v39 = vadd.f32 %v8840_v38, %v11281_v51  ;;  %v612_v40 = vpop.f32.mrb[45].mxu1  ;;  %8917 = vmatpush3.bf16.msra.mxu1 %v11328_v17 }
 0x160   :  { %v11387_v41 = vpack.c.bf16 %v600_v24, %v597_v5  ;;  %v613_v50 = vadd.f32 %v612_v40, %v11281_v51  ;;  %v8841_v0 = vpop.f32.mrb[46].mxu1  ;;  %8918 = vmatprep.subr.bf16.mxu1 %v11351_v58  ;;  %v890_v24 = vsel %vm701_vm0, %v11145_v21, 0 }
 0x161   :  { %16137 = vst [vmem:[#allocation47_spill] sm:$0xff] %v11381_v22  ;;  %v624_v6 = vadd.f32 %v8841_v0, %v11281_v51  ;;  %v615_v23 = vpop.f32.mrb[47].mxu1 }
 0x162   :  { %16138 = vst [vmem:[#allocation48_spill] sm:$0xff] %v11387_v41  ;;  %v616_v62 = vadd.f32 %v615_v23, %v11281_v51 }
 0x163   :  { %v11395_v13 = vpack.c.bf16 %v624_v6, %v621_v39  ;;  %8919 = vmatpush3.bf16.msra.mxu1 %v11351_v58  ;;  %v893_v39 = vsel %vm701_vm0, %v11169_v46, 0 }
 0x164   :  { %v11398_v5 = vpack.c.bf16 %v616_v62, %v613_v50  ;;  %8920 = vmatprep.subr.bf16.mxu1 %v11347_v42 }
 0x165   :  { %16139 = vst [vmem:[#allocation49_spill] sm:$0xff] %v11395_v13 }
 0x166   :  { %8885 = vmatpush3.bf16.xpose.msra.mxu0 %v887_v32  ;;  %16140 = vst [vmem:[#allocation50_spill] sm:$0xff] %v11398_v5 }
 0x167   :  { %9432 = vmatprep.subr.msk.bf16.mxu0 %vm701_vm0, %v11145_v21  ;;  %8921 = vmatpush3.bf16.msra.mxu1 %v11347_v42 }
 0x168   :  { %8938 = vmatprep.subr.bf16.mxu1 %v11363_v31 }
 0x16e   :  { %8887 = vmatpush3.bf16.xpose.msra.mxu0 %v890_v24  ;;  %v1573_v38 = vpop.permute.xlu0 %1572 }
 0x16f   :  { %9433 = vmatprep.subr.msk.bf16.mxu0 %vm701_vm0, %v11169_v46 }
 0x172   :  { %v1597_v51 = vpop.permute.xlu0 %1596 }
 0x173   :  { %v1637_v32 = vsel %vm701_vm0, %v1597_v51, 0 }
 0x176   :  { %8889 = vmatpush3.bf16.xpose.msra.mxu0 %v893_v39  ;;  %v11411_v40 = vpop.permute.xlu0 %1797 }
 0x177   :  { %9434 = vmatprep.subr.msk.bf16.mxu0 %vm701_vm0, %v1597_v51  ;;  %16141 = vst [vmem:[#allocation51_spill] sm:$0xff] %v11411_v40  ;;  %v1599_v50 = vpop.permute.xlu1 %1598 }
 0x178   :  { %v1640_v23 = vsel %vm701_vm0, %v1599_v50, 0 }
 0x17a   :  { %v1575_v0 = vpop.permute.xlu0 %1574 }
 0x17b   :  { %v11425_v24 = vpop.permute.xlu1 %1799 }
 0x17c   :  { %16142 = vst [vmem:[#allocation52_spill] sm:$0xff] %v11425_v24 }
 0x17d   :  { %8891 = vmatmul.mubr.msk.bf16.vlgmr.msra.gmra.mrb[48].mxu0 %vm701_vm0, %v11259_v25 }
 0x17e   :  { %8894 = vmatprep.mubr.msk.bf16.mxu0 %vm701_vm0, %v11283_v53  ;;  %8971 = vmatpush3.bf16.xpose.msra.mxu0 %v1637_v32 }
 0x17f   :  { %9435 = vmatprep.subr.msk.bf16.mxu0 %vm701_vm0, %v1599_v50  ;;  %v1577_v32 = vpop.permute.xlu1 %1576 }
 0x180   :  { %v1601_v6 = vpop.permute.xlu0 %1600 }
 0x181   :  { %v1643_v51 = vsel %vm701_vm0, %v1601_v6, 0 }
 0x185   :  { %8895 = vmatmul.mubr.msk.bf16.gmra.mrb[52].mxu0 %vm701_vm0, %v11321_v15 }
 0x186   :  { %8898 = vmatprep.mubr.msk.bf16.mxu0 %vm701_vm0, %v11087_v34  ;;  %8973 = vmatpush3.bf16.xpose.msra.mxu0 %v1640_v23  ;;  %v1579_v62 = vpop.permute.xlu0 %1578 }
 0x187   :  { %9436 = vmatprep.subr.msk.bf16.mxu0 %vm701_vm0, %v1601_v6 }
 0x18a   :  { %v1603_v39 = vpop.permute.xlu0 %1602 }
 0x18b   :  { %v1646_v50 = vsel %vm701_vm0, %v1603_v39, 0 }
 0x18d   :  { %8899 = vmatmul.mubr.msk.bf16.gmra.mrb[56].mxu0 %vm701_vm0, %v11113_v55 }
 0x18e   :  { %8902 = vmatprep.mubr.msk.bf16.mxu0 %vm701_vm0, %v11141_v19  ;;  %8975 = vmatpush3.bf16.xpose.msra.mxu0 %v1643_v51 }
 0x18f   :  { %9437 = vmatprep.subr.msk.bf16.mxu0 %vm701_vm0, %v1603_v39  ;;  %v1605_v23 = vpop.permute.xlu1 %1604 }
 0x190   :  { %v1649_v6 = vsel %vm701_vm0, %v1605_v23, 0 }
 0x195   :  { %8903 = vmatmul.mubr.msk.bf16.gmra.mrb[60].mxu0 %vm701_vm0, %v11165_v44 }
 0x196   :  { %8977 = vmatpush3.bf16.xpose.msra.mxu0 %v1646_v50  ;;  %8986 = vmatprep.mubr.msk.bf16.mxu0 %vm701_vm0, %v1573_v38 }
 0x197   :  { %9438 = vmatprep.subr.msk.bf16.mxu0 %vm701_vm0, %v1605_v23  ;;  %v1607_v14 = vpop.permute.xlu0 %1606  ;;  %v627_v23 = vld [vmem:[%s15881_s1] sm:$0x3]  ;;  %s10780_s1 = smov 64  }
 0x198   :  { %v1652_v51 = vsel %vm701_vm0, %v1607_v14, 0 }
 0x19e   :  { %8979 = vmatpush3.bf16.xpose.msra.mxu0 %v1649_v6 }
 0x19f   :  { %9439 = vmatprep.subr.msk.bf16.mxu0 %vm701_vm0, %v1607_v14  ;;  %v1609_v37 = vpop.permute.xlu1 %1608  ;;  %v10779_v14 = vmov 1966171168  }
 0x1a0   :  { %v1655_v39 = vsel %vm701_vm0, %v1609_v37, 0  ;;  %v632_v50 = vunpack.c.l.s4 %v10779_v14 }
 0x1a2   :  { %v633_v6 = vunpack.c.0.s8 %v632_v50 }
 0x1a6   :  { %8981 = vmatpush3.bf16.xpose.msra.mxu0 %v1652_v51 }
 0x1a7   :  { %9440 = vmatprep.subr.msk.bf16.mxu0 %vm701_vm0, %v1609_v37  ;;  %v1611_v1 = vpop.permute.xlu0 %1610  ;;  %v628_v37 = vsub.f32 1.0, %v627_v23 }
 0x1a8   :  { %v1658_v38 = vsel %vm701_vm0, %v1611_v1, 0 }
 0x1a9   :  { %v629_v51 = vmul.f32 -10000.0, %v628_v37 }
 0x1ae   :  { %8983 = vmatpush3.bf16.xpose.msra.mxu0 %v1655_v39  ;;  %v11452_v39 = vsub.s32 %v633_v6, %v11057_v11 }
 0x1af   :  { %9441 = vmatprep.subr.msk.bf16.mxu0 %vm701_vm0, %v1611_v1 }
 0x1b0   :  { %v11455_v1 = vrot.slane %v629_v51, %v11452_v39 }
 0x1b6   :  { %8985 = vmatpush3.bf16.xpose.msra.mxu0 %v1658_v38 }
 0x1bd   :  { %8987 = vmatmul.mubr.msk.bf16.vlgmr.msra.gmra.mrb[64].mxu0 %vm701_vm0, %v1575_v0  ;;  %v645_v0 = vrot.slane %v11455_v1, %v11452_v39 }
 0x1be   :  { %8990 = vmatprep.mubr.msk.bf16.mxu0 %vm701_vm0, %v1577_v32 }
 0x1c5   :  { %8991 = vmatmul.mubr.msk.bf16.gmra.mrb[68].mxu0 %vm701_vm0, %v1579_v62  ;;  %v11460_v62 = vrot.slane %v645_v0, %v11060_v12 }
 0x1c7   :  { %16143 = vst [vmem:[#allocation53_spill] sm:$0xff] %v11460_v62 }
 0x211   :  { %v8860_v32 = vpop.f32.mrb[48].mxu1 }
 0x212   :  { %v784_v38 = vpop.f32.mrb[49].mxu1  ;;  %v994_v14 = vmul.f32 0.17677669, %v8860_v32 }
 0x213   :  { %v8861_v43 = vpop.f32.mrb[50].mxu1  ;;  %v992_v36 = vmul.f32 0.17677669, %v784_v38 }
 0x214   :  { %v787_v23 = vpop.f32.mrb[51].mxu1  ;;  %v11463_v50 = vadd.f32 %v11460_v62, %v994_v14  ;;  %v995_v37 = vmul.f32 0.17677669, %v8861_v43 }
 0x215   :  { %v11466_v6 = vadd.f32 %v11460_v62, %v992_v36  ;;  %v993_v51 = vmul.f32 0.17677669, %v787_v23 }
 0x216   :  { %1070 = vmax.xlane.f32.xlu1 %v11463_v50  ;;  %v11471_v0 = vadd.f32 %v11460_v62, %v995_v37 }
 0x217   :  { %1066 = vmax.xlane.f32.xlu0 %v11466_v6  ;;  %v11474_v32 = vadd.f32 %v11460_v62, %v993_v51 }
 0x219   :  { %v8864_v11 = vpop.f32.mrb[52].mxu1 }
 0x21a   :  { %1072 = vmax.xlane.f32.xlu1 %v11471_v0  ;;  %v800_v38 = vpop.f32.mrb[53].mxu1  ;;  %v998_v14 = vmul.f32 0.17677669, %v8864_v11 }
 0x21b   :  { %1068 = vmax.xlane.f32.xlu0 %v11474_v32  ;;  %v8865_v36 = vpop.f32.mrb[54].mxu1  ;;  %v996_v3 = vmul.f32 0.17677669, %v800_v38 }
 0x21c   :  { %v803_v43 = vpop.f32.mrb[55].mxu1  ;;  %v11479_v23 = vadd.f32 %v11460_v62, %v998_v14  ;;  %v999_v59 = vmul.f32 0.17677669, %v8865_v36 }
 0x21d   :  { %v997_v33 = vmul.f32 0.17677669, %v803_v43  ;;  %v11487_v11 = vadd.f32 %v11460_v62, %v996_v3 }
 0x21e   :  { %v11482_v37 = vadd.f32 %v11460_v62, %v999_v59 }
 0x21f   :  { %1078 = vmax.xlane.f32.xlu0 %v11479_v23  ;;  %v11490_v57 = vadd.f32 %v11460_v62, %v997_v33 }
 0x220   :  { %1080 = vmax.xlane.f32.xlu1 %v11482_v37 }
 0x221   :  { %v8868_v51 = vpop.f32.mrb[56].mxu1 }
 0x222   :  { %v816_v49 = vpop.f32.mrb[57].mxu1  ;;  %v1002_v14 = vmul.f32 0.17677669, %v8868_v51 }
 0x223   :  { %1074 = vmax.xlane.f32.xlu0 %v11487_v11  ;;  %v8869_v38 = vpop.f32.mrb[58].mxu1  ;;  %v1000_v18 = vmul.f32 0.17677669, %v816_v49 }
 0x224   :  { %1076 = vmax.xlane.f32.xlu1 %v11490_v57  ;;  %v819_v59 = vpop.f32.mrb[59].mxu1  ;;  %v11495_v36 = vadd.f32 %v11460_v62, %v1002_v14  ;;  %v1003_v43 = vmul.f32 0.17677669, %v8869_v38 }
 0x225   :  { %v1001_v3 = vmul.f32 0.17677669, %v819_v59  ;;  %v11503_v51 = vadd.f32 %v11460_v62, %v1000_v18 }
 0x226   :  { %v11498_v7 = vadd.f32 %v11460_v62, %v1003_v43 }
 0x227   :  { %1086 = vmax.xlane.f32.xlu0 %v11495_v36  ;;  %v11506_v9 = vadd.f32 %v11460_v62, %v1001_v3 }
 0x228   :  { %1088 = vmax.xlane.f32.xlu1 %v11498_v7 }
 0x229   :  { %v8872_v33 = vpop.f32.mrb[60].mxu1 }
 0x22a   :  { %v832_v26 = vpop.f32.mrb[61].mxu1  ;;  %v1006_v14 = vmul.f32 0.17677669, %v8872_v33 }
 0x22b   :  { %1082 = vmax.xlane.f32.xlu0 %v11503_v51  ;;  %v8873_v49 = vpop.f32.mrb[62].mxu1  ;;  %v1004_v54 = vmul.f32 0.17677669, %v832_v26  ;;  %v638_v26 = vcombine.high %v11455_v1, %v11455_v1 }
 0x22c   :  { %1084 = vmax.xlane.f32.xlu1 %v11506_v9  ;;  %v835_v38 = vpop.f32.mrb[63].mxu1  ;;  %v11511_v59 = vadd.f32 %v11460_v62, %v1006_v14  ;;  %v1007_v43 = vmul.f32 0.17677669, %v8873_v49 }
 0x22d   :  { %v1005_v18 = vmul.f32 0.17677669, %v835_v38  ;;  %v11519_v3 = vadd.f32 %v11460_v62, %v1004_v54  ;;  %v652_v14 = vrot.slane %v638_v26, %v11452_v39 }
 0x22e   :  { %v11514_v30 = vadd.f32 %v11460_v62, %v1007_v43 }
 0x22f   :  { %1094 = vmax.xlane.f32.xlu0 %v11511_v59  ;;  %v11522_v33 = vadd.f32 %v11460_v62, %v1005_v18  ;;  %v11532_v49 = vrot.slane %v652_v14, %v11060_v12 }
 0x230   :  { %1096 = vmax.xlane.f32.xlu1 %v11514_v30 }
 0x231   :  { %16144 = vst [vmem:[#allocation54_spill] sm:$0xff] %v11532_v49 }
 0x233   :  { %1090 = vmax.xlane.f32.xlu0 %v11519_v3 }
 0x234   :  { %1092 = vmax.xlane.f32.xlu1 %v11522_v33 }
 0x245   :  { %1582 = vrot.lane.b32.xlu1 %v11197_v8, %s10778_s3 }
 0x250   :  { %v8892_v54 = vpop.f32.mrb[48].mxu0 }
 0x251   :  { %v929_v38 = vpop.f32.mrb[49].mxu0  ;;  %v1010_v43 = vmul.f32 0.17677669, %v8892_v54 }
 0x252   :  { %v8893_v18 = vpop.f32.mrb[50].mxu0  ;;  %v1008_v56 = vmul.f32 0.17677669, %v929_v38 }
 0x253   :  { %v932_v61 = vpop.f32.mrb[51].mxu0  ;;  %v11535_v45 = vadd.f32 %v11532_v49, %v1010_v43  ;;  %v1011_v58 = vmul.f32 0.17677669, %v8893_v18 }
 0x254   :  { %v11539_v8 = vadd.f32 %v11532_v49, %v1008_v56  ;;  %v1009_v38 = vmul.f32 0.17677669, %v932_v61 }
 0x255   :  { %1102 = vmax.xlane.f32.xlu0 %v11535_v45  ;;  %v11543_v43 = vadd.f32 %v11532_v49, %v1011_v58 }
 0x256   :  { %v11547_v63 = vadd.f32 %v11532_v49, %v1009_v38 }
 0x258   :  { %v8896_v1 = vpop.f32.mrb[52].mxu0 }
 0x259   :  { %v945_v35 = vpop.f32.mrb[53].mxu0  ;;  %1098 = vmax.xlane.f32.xlu0 %v11539_v8  ;;  %v1014_v16 = vmul.f32 0.17677669, %v8896_v1 }
 0x25a   :  { %v8897_v39 = vpop.f32.mrb[54].mxu0 }
 0x25b   :  { %v948_v26 = vpop.f32.mrb[55].mxu0  ;;  %v1015_v47 = vmul.f32 0.17677669, %v8897_v39 }
 0x25c   :  { %v1013_v58 = vmul.f32 0.17677669, %v948_v26 }
 0x25d   :  { %v11553_v18 = vadd.f32 %v11532_v49, %v1015_v47 }
 0x25e   :  { %v11557_v61 = vadd.f32 %v11532_v49, %v1013_v58 }
 0x260   :  { %v8900_v14 = vpop.f32.mrb[56].mxu0 }
 0x261   :  { %v961_v12 = vpop.f32.mrb[57].mxu0 }
 0x262   :  { %v8901_v54 = vpop.f32.mrb[58].mxu0 }
 0x263   :  { %v964_v20 = vpop.f32.mrb[59].mxu0  ;;  %v1019_v27 = vmul.f32 0.17677669, %v8901_v54 }
 0x264   :  { %v1017_v39 = vmul.f32 0.17677669, %v964_v20 }
 0x265   :  { %v11561_v38 = vadd.f32 %v11532_v49, %v1019_v27 }
 0x268   :  { %v8904_v42 = vpop.f32.mrb[60].mxu0 }
 0x269   :  { %1104 = vmax.xlane.f32.xlu1 %v11543_v43  ;;  %v977_v56 = vpop.f32.mrb[61].mxu0  ;;  %v1022_v47 = vmul.f32 0.17677669, %v8904_v42 }
 0x26a   :  { %v8905_v28 = vpop.f32.mrb[62].mxu0  ;;  %v1020_v58 = vmul.f32 0.17677669, %v977_v56  ;;  %v11584_v56 = vadd.f32 %v11532_v49, %v1014_v16  ;;  %v1016_v16 = vmul.f32 0.17677669, %v961_v12 }
 0x26b   :  { %v980_v17 = vpop.f32.mrb[63].mxu0  ;;  %v11569_v26 = vadd.f32 %v11532_v49, %v1022_v47  ;;  %v1023_v27 = vmul.f32 0.17677669, %v8905_v28  ;;  %v1012_v47 = vmul.f32 0.17677669, %v945_v35 }
 0x26c   :  { %v11573_v54 = vadd.f32 %v11532_v49, %v1020_v58 }
 0x26d   :  { %1100 = vmax.xlane.f32.xlu1 %v11547_v63  ;;  %v11577_v20 = vadd.f32 %v11532_v49, %v1023_v27  ;;  %v11591_v58 = vadd.f32 %v11532_v49, %v1012_v47  ;;  %v11607_v47 = vadd.f32 %v11532_v49, %v1016_v16 }
 0x26f   :  { %1580 = vrot.lane.b32.xlu0 %v11183_v60, %s10778_s3  ;;  %v11565_v60 = vadd.f32 %v11532_v49, %v1017_v39  ;;  %v1021_v39 = vmul.f32 0.17677669, %v980_v17  ;;  %v1018_v17 = vmul.f32 0.17677669, %v8900_v14 }
 0x271   :  { %1112 = vmax.xlane.f32.xlu1 %v11553_v18  ;;  %v11581_v42 = vadd.f32 %v11532_v49, %v1021_v39  ;;  %v11601_v35 = vadd.f32 %v11532_v49, %v1018_v17  ;;  %v11618_v17 = vpop.permute.xlu0 %1789 }
 0x275   :  { %1108 = vmax.xlane.f32.xlu1 %v11557_v61 }
 0x279   :  { %1120 = vmax.xlane.f32.xlu1 %v11561_v38 }
 0x27d   :  { %1116 = vmax.xlane.f32.xlu1 %v11565_v60 }
 0x281   :  { %1126 = vmax.xlane.f32.xlu1 %v11569_v26 }
 0x285   :  { %1122 = vmax.xlane.f32.xlu1 %v11573_v54 }
 0x289   :  { %1128 = vmax.xlane.f32.xlu1 %v11577_v20 }
 0x28d   :  { %1124 = vmax.xlane.f32.xlu1 %v11581_v42 }
 0x28e   :  { %1110 = vmax.xlane.f32.xlu0 %v11584_v56 }
 0x290   :  { %v11588_v28 = vpop.f32.mrb[64].mxu0 }
 0x291   :  { %16145 = vst [vmem:[#allocation55_spill] sm:$0xff] %v11588_v28  ;;  %v11593_v1 = vpop.f32.mrb[65].mxu0 }
 0x292   :  { %16146 = vst [vmem:[#allocation56_spill] sm:$0xff] %v11593_v1  ;;  %v11595_v27 = vpop.f32.mrb[66].mxu0  ;;  %1106 = vmax.xlane.f32.xlu0 %v11591_v58  ;;  %v11622_v1 = vpop.permute.xlu0 %1793 }
 0x293   :  { %16147 = vst [vmem:[#allocation57_spill] sm:$0xff] %v11595_v27  ;;  %v11598_v39 = vpop.f32.mrb[67].mxu0  ;;  %v11614_v27 = vpop.permute.xlu1 %1791  ;;  %16154 = vst [vmem:[#allocation64_spill] sm:$0xff] %v11622_v1 }
 0x294   :  { %16151 = vst [vmem:[#allocation61_spill] sm:$0xff] %v11614_v27 }
 0x296   :  { %1118 = vmax.xlane.f32.xlu0 %v11601_v35 }
 0x297   :  { %v11620_v12 = vpop.permute.xlu1 %1795 }
 0x298   :  { %v11604_v24 = vpop.f32.mrb[68].mxu0  ;;  %16153 = vst [vmem:[#allocation63_spill] sm:$0xff] %v11620_v12 }
 0x299   :  { %16148 = vst [vmem:[#allocation58_spill] sm:$0xff] %v11604_v24  ;;  %v11609_v14 = vpop.f32.mrb[69].mxu0 }
 0x29a   :  { %16149 = vst [vmem:[#allocation59_spill] sm:$0xff] %v11609_v14  ;;  %v11611_v40 = vpop.f32.mrb[70].mxu0  ;;  %1114 = vmax.xlane.f32.xlu0 %v11607_v47 }
 0x29b   :  { %16150 = vst [vmem:[#allocation60_spill] sm:$0xff] %v11611_v40  ;;  %v11616_v28 = vpop.f32.mrb[71].mxu0 }
 0x29c   :  { %16152 = vst [vmem:[#allocation62_spill] sm:$0xff] %v11616_v28 }
 0x2a3   :  { %v1071_v24 = vpop.xlane.xlu1 %1070 }
 0x2a4   :  { %v1132_v16 = vsub.f32 %v11463_v50, %v1071_v24  ;;  %v1067_v49 = vpop.xlane.xlu0 %1066 }
 0x2a5   :  { %v1130_v14 = vsub.f32 %v11466_v6, %v1067_v49 }
 0x2a6   :  { %v1166_v19 = vmul.f32 1.442695, %v1132_v16 }
 0x2a7   :  { %v1162_v34 = vmul.f32 1.442695, %v1130_v14  ;;  %v1073_v53 = vpop.xlane.xlu1 %1072 }
 0x2a8   :  { %9847 = vpow2.f32 %v1166_v19  ;;  %v1133_v27 = vsub.f32 %v11471_v0, %v1073_v53  ;;  %v1069_v2 = vpop.xlane.xlu0 %1068 }
 0x2a9   :  { %v1131_v40 = vsub.f32 %v11474_v32, %v1069_v2  ;;  %9849 = vpow2.f32 %v1162_v34 }
 0x2aa   :  { %v1168_v48 = vmul.f32 1.442695, %v1133_v27 }
 0x2ab   :  { %v1164_v12 = vmul.f32 1.442695, %v1131_v40 }
 0x2ac   :  { %9851 = vpow2.f32 %v1168_v48  ;;  %v1079_v1 = vpop.xlane.xlu0 %1078 }
 0x2ad   :  { %v1136_v28 = vsub.f32 %v11479_v23, %v1079_v1  ;;  %v1081_v24 = vpop.xlane.xlu1 %1080  ;;  %9853 = vpow2.f32 %v1164_v12 }
 0x2ae   :  { %v1137_v6 = vsub.f32 %v11482_v37, %v1081_v24 }
 0x2af   :  { %v1174_v50 = vmul.f32 1.442695, %v1136_v28 }
 0x2b0   :  { %v1075_v49 = vpop.xlane.xlu0 %1074  ;;  %v1176_v48 = vmul.f32 1.442695, %v1137_v6 }
 0x2b1   :  { %9855 = vpow2.f32 %v1174_v50  ;;  %v1134_v19 = vsub.f32 %v11487_v11, %v1075_v49  ;;  %v1077_v53 = vpop.xlane.xlu1 %1076 }
 0x2b2   :  { %v11631_v0 = vpop.eup %9847  ;;  %v1135_v2 = vsub.f32 %v11490_v57, %v1077_v53 }
 0x2b3   :  { %v1170_v34 = vmul.f32 1.442695, %v1134_v19  ;;  %1230 = vadd.xlane.f32.xlu0 %v11631_v0  ;;  %v11635_v23 = vpop.eup %9849 }
 0x2b4   :  { %v1172_v40 = vmul.f32 1.442695, %v1135_v2  ;;  %v1087_v32 = vpop.xlane.xlu0 %1086 }
 0x2b5   :  { %9857 = vpow2.f32 %v1170_v34  ;;  %v1140_v37 = vsub.f32 %v11495_v36, %v1087_v32  ;;  %v1089_v28 = vpop.xlane.xlu1 %1088 }
 0x2b6   :  { %v11638_v1 = vpop.eup %9851  ;;  %9859 = vpow2.f32 %v1172_v40  ;;  %v1141_v16 = vsub.f32 %v11498_v7, %v1089_v28 }
 0x2b7   :  { %v1182_v11 = vmul.f32 1.442695, %v1140_v37  ;;  %1226 = vadd.xlane.f32.xlu0 %v11635_v23  ;;  %1232 = vadd.xlane.f32.xlu1 %v11638_v1  ;;  %9861 = vpow2.f32 %v1176_v48  ;;  %v11643_v12 = vpop.eup %9853 }
 0x2b8   :  { %v1083_v57 = vpop.xlane.xlu0 %1082  ;;  %v1184_v19 = vmul.f32 1.442695, %v1141_v16 }
 0x2b9   :  { %9863 = vpow2.f32 %v1182_v11  ;;  %v1138_v27 = vsub.f32 %v11503_v51, %v1083_v57  ;;  %v1085_v14 = vpop.xlane.xlu1 %1084 }
 0x2ba   :  { %v1139_v50 = vsub.f32 %v11506_v9, %v1085_v14 }
 0x2bb   :  { %v11646_v36 = vpop.eup %9855  ;;  %v1178_v24 = vmul.f32 1.442695, %v1138_v27  ;;  %1228 = vadd.xlane.f32.xlu1 %v11643_v12 }
 0x2bc   :  { %1238 = vadd.xlane.f32.xlu0 %v11646_v36  ;;  %v1095_v6 = vpop.xlane.xlu0 %1094  ;;  %v1180_v7 = vmul.f32 1.442695, %v1139_v50 }
 0x2bd   :  { %9865 = vpow2.f32 %v1178_v24  ;;  %v1097_v49 = vpop.xlane.xlu1 %1096  ;;  %v1144_v48 = vsub.f32 %v11511_v59, %v1095_v6 }
 0x2be   :  { %9867 = vpow2.f32 %v1184_v19  ;;  %v1145_v59 = vsub.f32 %v11514_v30, %v1097_v49 }
 0x2bf   :  { %v11651_v53 = vpop.eup %9857  ;;  %9869 = vpow2.f32 %v1180_v7  ;;  %v1190_v28 = vmul.f32 1.442695, %v1144_v48 }
 0x2c0   :  { %v11653_v51 = vpop.eup %9859  ;;  %1234 = vadd.xlane.f32.xlu0 %v11651_v53  ;;  %v1091_v32 = vpop.xlane.xlu0 %1090  ;;  %v1192_v14 = vmul.f32 1.442695, %v1145_v59 }
 0x2c1   :  { %1236 = vadd.xlane.f32.xlu1 %v11653_v51  ;;  %v1093_v2 = vpop.xlane.xlu1 %1092  ;;  %v11657_v34 = vpop.eup %9861  ;;  %v1142_v11 = vsub.f32 %v11519_v3, %v1091_v32 }
 0x2c2   :  { %v1143_v9 = vsub.f32 %v11522_v33, %v1093_v2 }
 0x2c3   :  { %v11661_v40 = vpop.eup %9863  ;;  %v1186_v33 = vmul.f32 1.442695, %v1142_v11 }
 0x2c4   :  { %v1188_v37 = vmul.f32 1.442695, %v1143_v9  ;;  %1240 = vadd.xlane.f32.xlu0 %v11657_v34 }
 0x2c5   :  { %1246 = vadd.xlane.f32.xlu1 %v11661_v40  ;;  %v1583_v32 = vpop.permute.xlu1 %1582 }
 0x2c6   :  { %9871 = vpow2.f32 %v1188_v37 }
 0x2c7   :  { %v11666_v57 = vpop.eup %9865  ;;  %9873 = vpow2.f32 %v1190_v28 }
 0x2c8   :  { %v11670_v27 = vpop.eup %9867  ;;  %9875 = vpow2.f32 %v1186_v33 }
 0x2c9   :  { %1242 = vadd.xlane.f32.xlu1 %v11666_v57  ;;  %v11673_v16 = vpop.eup %9869  ;;  %9877 = vpow2.f32 %v1192_v14 }
 0x2cd   :  { %1248 = vadd.xlane.f32.xlu1 %v11670_v27 }
 0x2d0   :  { %v11675_v24 = vpop.eup %9871 }
 0x2d1   :  { %1244 = vadd.xlane.f32.xlu1 %v11673_v16  ;;  %1252 = vadd.xlane.f32.xlu0 %v11675_v24  ;;  %v11679_v3 = vpop.eup %9873 }
 0x2d2   :  { %v11682_v30 = vpop.eup %9875 }
 0x2d3   :  { %v11685_v50 = vpop.eup %9877 }
 0x2d5   :  { %1254 = vadd.xlane.f32.xlu1 %v11679_v3 }
 0x2d9   :  { %1250 = vadd.xlane.f32.xlu1 %v11682_v30 }
 0x2dd   :  { %1256 = vadd.xlane.f32.xlu1 %v11685_v50 }
 0x2e2   :  { %v1103_v6 = vpop.xlane.xlu0 %1102 }
 0x2e3   :  { %v1148_v49 = vsub.f32 %v11535_v45, %v1103_v6 }
 0x2e5   :  { %v1198_v19 = vmul.f32 1.442695, %v1148_v49 }
 0x2e6   :  { %v1099_v7 = vpop.xlane.xlu0 %1098 }
 0x2e7   :  { %9879 = vpow2.f32 %v1198_v19  ;;  %v1146_v2 = vsub.f32 %v11539_v8, %v1099_v7 }
 0x2e9   :  { %v1194_v48 = vmul.f32 1.442695, %v1146_v2 }
 0x2ea   :  { %v1581_v9 = vpop.permute.xlu0 %1580 }
 0x2eb   :  { %9881 = vpow2.f32 %v1194_v48  ;;  %8994 = vmatprep.mubr.msk.bf16.mxu0 %vm701_vm0, %v1581_v9 }
 0x2ec   :  { %8995 = vmatmul.mubr.msk.bf16.gmra.mrb[72].mxu0 %vm701_vm0, %v1583_v32 }
 0x2f1   :  { %v11692_v37 = vpop.eup %9879 }
 0x2f2   :  { %16155 = vst [vmem:[#allocation65_spill] sm:$0xff] %v11692_v37  ;;  %1262 = vadd.xlane.f32.xlu0 %v11692_v37 }
 0x2f5   :  { %v11695_v28 = vpop.eup %9881 }
 0x2f6   :  { %v1105_v45 = vpop.xlane.xlu1 %1104  ;;  %1258 = vadd.xlane.f32.xlu1 %v11695_v28 }
 0x2f7   :  { %v1149_v11 = vsub.f32 %v11543_v43, %v1105_v45 }
 0x2f9   :  { %v1200_v8 = vmul.f32 1.442695, %v1149_v11 }
 0x2fa   :  { %v1101_v59 = vpop.xlane.xlu1 %1100 }
 0x2fb   :  { %9883 = vpow2.f32 %v1200_v8  ;;  %v1147_v33 = vsub.f32 %v11547_v63, %v1101_v59 }
 0x2fd   :  { %v1196_v14 = vmul.f32 1.442695, %v1147_v33 }
 0x2fe   :  { %v1113_v6 = vpop.xlane.xlu1 %1112 }
 0x2ff   :  { %9885 = vpow2.f32 %v1196_v14  ;;  %v1153_v8 = vsub.f32 %v11553_v18, %v1113_v6 }
 0x301   :  { %v1208_v37 = vmul.f32 1.442695, %v1153_v8 }
 0x302   :  { %v1109_v7 = vpop.xlane.xlu1 %1108 }
 0x303   :  { %v1151_v48 = vsub.f32 %v11557_v61, %v1109_v7 }
 0x305   :  { %v11700_v49 = vpop.eup %9883  ;;  %v1204_v63 = vmul.f32 1.442695, %v1151_v48 }
 0x306   :  { %1264 = vadd.xlane.f32.xlu0 %v11700_v49  ;;  %v1121_v43 = vpop.xlane.xlu1 %1120 }
 0x307   :  { %1584 = vrot.lane.b32.xlu1 %v11211_v29, %s10778_s3  ;;  %9887 = vpow2.f32 %v1204_v63  ;;  %v1157_v18 = vsub.f32 %v11561_v38, %v1121_v43 }
 0x309   :  { %v11705_v19 = vpop.eup %9885 }
 0x30a   :  { %16156 = vst [vmem:[#allocation66_spill] sm:$0xff] %v11705_v19  ;;  %1260 = vadd.xlane.f32.xlu0 %v11705_v19  ;;  %v1117_v2 = vpop.xlane.xlu1 %1116 }
 0x30e   :  { %v11709_v9 = vpop.xlane.xlu1 %1126 }
 0x311   :  { %v11721_v63 = vpop.eup %9887 }
 0x312   :  { %v11714_v14 = vpop.xlane.xlu1 %1122 }
 0x316   :  { %v11717_v48 = vpop.xlane.xlu1 %1128 }
 0x31b   :  { %v1111_v32 = vpop.xlane.xlu0 %1110 }
 0x31c   :  { %v1152_v45 = vsub.f32 %v11584_v56, %v1111_v32 }
 0x31e   :  { %v1206_v11 = vmul.f32 1.442695, %v1152_v45 }
 0x31f   :  { %v1107_v59 = vpop.xlane.xlu0 %1106 }
 0x320   :  { %9889 = vpow2.f32 %v1206_v11  ;;  %v1150_v33 = vsub.f32 %v11591_v58, %v1107_v59 }
 0x322   :  { %v1202_v29 = vmul.f32 1.442695, %v1150_v33 }
 0x323   :  { %v1119_v19 = vpop.xlane.xlu0 %1118 }
 0x324   :  { %9891 = vpow2.f32 %v1202_v29  ;;  %v1156_v61 = vsub.f32 %v11601_v35, %v1119_v19  ;;  %v1216_v29 = vmul.f32 1.442695, %v1157_v18  ;;  %v1155_v35 = vsub.f32 %v11565_v60, %v1117_v2 }
 0x325   :  { %9893 = vpow2.f32 %v1208_v37  ;;  %v1125_v37 = vpop.xlane.xlu1 %1124 }
 0x326   :  { %v1214_v7 = vmul.f32 1.442695, %v1156_v61  ;;  %v1212_v38 = vmul.f32 1.442695, %v1155_v35 }
 0x327   :  { %v1115_v56 = vpop.xlane.xlu0 %1114 }
 0x328   :  { %9895 = vpow2.f32 %v1214_v7  ;;  %v1154_v6 = vsub.f32 %v11607_v47, %v1115_v56  ;;  %v1159_v47 = vsub.f32 %v11581_v42, %v1125_v37 }
 0x32a   :  { %v11723_v58 = vpop.eup %9889  ;;  %v1210_v32 = vmul.f32 1.442695, %v1154_v6  ;;  %v1220_v60 = vmul.f32 1.442695, %v1159_v47 }
 0x32b   :  { %1270 = vadd.xlane.f32.xlu0 %v11723_v58  ;;  %1268 = vadd.xlane.f32.xlu1 %v11721_v63 }
 0x32c   :  { %9897 = vpow2.f32 %v1210_v32 }
 0x32d   :  { %9899 = vpow2.f32 %v1216_v29 }
 0x32e   :  { %v11728_v19 = vpop.eup %9891  ;;  %9901 = vpow2.f32 %v1212_v38 }
 0x32f   :  { %1266 = vadd.xlane.f32.xlu0 %v11728_v19  ;;  %v11732_v43 = vpop.eup %9893  ;;  %9903 = vpow2.f32 %v1220_v60 }
 0x332   :  { %v11734_v45 = vpop.eup %9895 }
 0x333   :  { %1272 = vadd.xlane.f32.xlu0 %v11732_v43  ;;  %1278 = vadd.xlane.f32.xlu1 %v11734_v45 }
 0x336   :  { %v11738_v2 = vpop.eup %9897 }
 0x337   :  { %1274 = vadd.xlane.f32.xlu1 %v11738_v2  ;;  %v11741_v11 = vpop.eup %9899 }
 0x338   :  { %v11744_v42 = vpop.eup %9901 }
 0x339   :  { %v11747_v59 = vpop.eup %9903 }
 0x33b   :  { %1280 = vadd.xlane.f32.xlu1 %v11741_v11 }
 0x33f   :  { %1276 = vadd.xlane.f32.xlu1 %v11744_v42 }
 0x340   :  { %v1231_v8 = vpop.xlane.xlu0 %1230 }
 0x343   :  { %1284 = vadd.xlane.f32.xlu1 %v11747_v59 }
 0x344   :  { %v1227_v33 = vpop.xlane.xlu0 %1226  ;;  %v1233_v61 = vpop.xlane.xlu1 %1232 }
 0x345   :  { %9905 = vrcp.f32 %v1233_v61 }
 0x346   :  { %9907 = vrcp.f32 %v1227_v33 }
 0x347   :  { %9909 = vrcp.f32 %v1231_v8  ;;  %v1160_v8 = vsub.f32 %v11569_v26, %v11709_v9  ;;  %v1158_v26 = vsub.f32 %v11573_v54, %v11714_v14 }
 0x348   :  { %v1229_v7 = vpop.xlane.xlu1 %1228 }
 0x349   :  { %9911 = vrcp.f32 %v1229_v7  ;;  %v1239_v56 = vpop.xlane.xlu0 %1238  ;;  %1801 = vrot.lane.b32.xlu0 %v11145_v21, %s10778_s3  ;;  %v1222_v21 = vmul.f32 1.442695, %v1160_v8  ;;  %v1218_v14 = vmul.f32 1.442695, %v1158_v26 }
 0x34d   :  { %v1235_v18 = vpop.xlane.xlu0 %1234 }
 0x34e   :  { %9913 = vrcp.f32 %v1235_v18  ;;  %v1237_v6 = vpop.xlane.xlu1 %1236 }
 0x34f   :  { %9915 = vrcp.f32 %v1237_v6  ;;  %v9906_v32 = vpop.eup %9905 }
 0x350   :  { %9917 = vrcp.f32 %v1239_v56  ;;  %v9908_v29 = vpop.eup %9907  ;;  %v1325_v60 = vmul.f32 %v9906_v32, %v11638_v1 }
 0x351   :  { %v1241_v35 = vpop.xlane.xlu0 %1240  ;;  %v9910_v37 = vpop.eup %9909  ;;  %v1322_v33 = vmul.f32 %v9908_v29, %v11635_v23  ;;  %v1161_v29 = vsub.f32 %v11577_v20, %v11717_v48 }
 0x352   :  { %9919 = vrcp.f32 %v1241_v35  ;;  %v1247_v38 = vpop.xlane.xlu1 %1246  ;;  %v1324_v7 = vmul.f32 %v9910_v37, %v11631_v0 }
 0x353   :  { %v9912_v47 = vpop.eup %9911  ;;  %9921 = vpow2.f32 %v1222_v21  ;;  %v1224_v20 = vmul.f32 1.442695, %v1161_v29 }
 0x354   :  { %1803 = vrot.lane.b32.xlu1 %v11169_v46, %s10778_s3  ;;  %v1323_v61 = vmul.f32 %v9912_v47, %v11643_v12  ;;  %v1355_v6 = vpack.c.bf16 %v1325_v60, %v1324_v7 }
 0x356   :  { %v1243_v56 = vpop.xlane.xlu1 %1242  ;;  %v1354_v18 = vpack.c.bf16 %v1323_v61, %v1322_v33 }
 0x358   :  { %v9914_v35 = vpop.eup %9913  ;;  %8922 = vmatprep.mubr.bf16.mxu1 %v1354_v18  ;;  %1767 = vrot.lane.b32.xlu1 %v11259_v25, %s10778_s3 }
 0x359   :  { %v9916_v1 = vpop.eup %9915  ;;  %8923 = vmatmul.mubr.bf16.vlgmr.msra.gmra.mrb[64].mxu1 %v1355_v6  ;;  %v1326_v23 = vmul.f32 %v9914_v35, %v11651_v53 }
 0x35a   :  { %v9918_v9 = vpop.eup %9917  ;;  %8939 = vmatpush3.bf16.msra.mxu1 %v11363_v31  ;;  %v1249_v0 = vpop.xlane.xlu1 %1248  ;;  %v1327_v12 = vmul.f32 %v9916_v1, %v11653_v51 }
 0x35b   :  { %8940 = vmatprep.subr.bf16.mxu1 %v11357_v10  ;;  %9923 = vrcp.f32 %v1249_v0  ;;  %v1328_v53 = vmul.f32 %v9918_v9, %v11646_v36 }
 0x35c   :  { %v9920_v32 = vpop.eup %9919  ;;  %1771 = vrot.lane.b32.xlu1 %v11321_v15, %s10778_s3  ;;  %v1356_v54 = vpack.c.bf16 %v1327_v12, %v1326_v23  ;;  %9925 = vrcp.f32 %v1243_v56 }
 0x35d   :  { %v1329_v37 = vmul.f32 %v9920_v32, %v11657_v34  ;;  %9927 = vrcp.f32 %v1247_v38  ;;  %v11782_v34 = vpop.eup %9921 }
 0x35e   :  { %8941 = vmatpush3.bf16.msra.mxu1 %v11357_v10  ;;  %8926 = vmatprep.mubr.bf16.mxu1 %v1356_v54  ;;  %v1245_v51 = vpop.xlane.xlu1 %1244  ;;  %v1253_v48 = vpop.xlane.xlu0 %1252 }
 0x35f   :  { %8942 = vmatprep.subr.bf16.mxu1 %v11375_v4  ;;  %v1357_v21 = vpack.c.bf16 %v1329_v37, %v1328_v53  ;;  %9929 = vrcp.f32 %v1245_v51  ;;  %v16157_v53 = vld [vmem:[#allocation62_spill] sm:$0xff]  ;;  %v16158_v51 = vld [vmem:[#allocation25_spill] sm:$0xff] }
 0x360   :  { %1775 = vrot.lane.b32.xlu1 %v11113_v55, %s10778_s3  ;;  %9931 = vpow2.f32 %v1218_v14  ;;  %v1955_v37 = vmul.f32 0.17677669, %v16157_v53 }
 0x361   :  { %8927 = vmatmul.mubr.bf16.gmra.mrb[68].mxu1 %v1357_v21  ;;  %9933 = vpow2.f32 %v1224_v20 }
 0x362   :  { %8943 = vmatpush3.bf16.msra.mxu1 %v11375_v4  ;;  %v1255_v36 = vpop.xlane.xlu1 %1254  ;;  %9935 = vrcp.f32 %v1253_v48  ;;  %v11821_v20 = vadd.f32 %v1955_v37, %v11460_v62 }
 0x363   :  { %8944 = vmatprep.subr.bf16.mxu1 %v11371_v52 }
 0x364   :  { %1779 = vrot.lane.b32.xlu1 %v11165_v44, %s10778_s3 }
 0x365   :  { %v9924_v47 = vpop.eup %9923 }
 0x366   :  { %8945 = vmatpush3.bf16.msra.mxu1 %v11371_v52  ;;  %v1251_v38 = vpop.xlane.xlu1 %1250  ;;  %v9926_v60 = vpop.eup %9925  ;;  %v1333_v7 = vmul.f32 %v9924_v47, %v11670_v27  ;;  %v16162_v47 = vld [vmem:[#allocation5_spill] sm:$0xff] }
 0x367   :  { %8946 = vmatprep.subr.bf16.mxu1 %v11387_v41  ;;  %9937 = vrcp.f32 %v1251_v38  ;;  %v9928_v8 = vpop.eup %9927  ;;  %v1330_v18 = vmul.f32 %v9926_v60, %v11666_v57 }
 0x368   :  { %1286 = vadd.xlane.f32.xlu0 %v11782_v34  ;;  %9939 = vrcp.f32 %v1255_v36  ;;  %v1332_v35 = vmul.f32 %v9928_v8, %v11661_v40  ;;  %v16161_v36 = vld [vmem:[#allocation31_spill] sm:$0xff]  ;;  %v16163_v8 = vld [vmem:[#allocation13_spill] sm:$0xff] }
 0x369   :  { %v9930_v33 = vpop.eup %9929 }
 0x36a   :  { %8947 = vmatpush3.bf16.msra.mxu1 %v11387_v41  ;;  %v1257_v61 = vpop.xlane.xlu1 %1256  ;;  %v11789_v56 = vpop.eup %9931  ;;  %v1331_v6 = vmul.f32 %v9930_v33, %v11673_v16  ;;  %v1359_v23 = vpack.c.bf16 %v1333_v7, %v1332_v35 }
 0x36b   :  { %8948 = vmatprep.subr.bf16.mxu1 %v11381_v22  ;;  %9941 = vrcp.f32 %v1257_v61  ;;  %v11796_v26 = vpop.eup %9933 }
 0x36c   :  { %1282 = vadd.xlane.f32.xlu0 %v11789_v56  ;;  %v1358_v1 = vpack.c.bf16 %v1331_v6, %v1330_v18  ;;  %v9936_v27 = vpop.eup %9935 }
 0x36d   :  { %v1335_v40 = vmul.f32 %v9936_v27, %v11675_v24 }
 0x36e   :  { %8949 = vmatpush3.bf16.msra.mxu1 %v11381_v22  ;;  %8930 = vmatprep.mubr.bf16.mxu1 %v1358_v1 }
 0x36f   :  { %8950 = vmatprep.subr.bf16.mxu1 %v11398_v5  ;;  %8931 = vmatmul.mubr.bf16.gmra.mrb[72].mxu1 %v1359_v23  ;;  %v16164_v23 = vld [vmem:[#allocation66_spill] sm:$0xff] }
 0x370   :  { %1288 = vadd.xlane.f32.xlu0 %v11796_v26 }
 0x371   :  { %v9938_v57 = vpop.eup %9937 }
 0x372   :  { %8951 = vmatpush3.bf16.msra.mxu1 %v11398_v5  ;;  %v1334_v16 = vmul.f32 %v9938_v57, %v11682_v30  ;;  %v9940_v9 = vpop.eup %9939  ;;  %v1951_v30 = vmul.f32 0.17677669, %v11598_v39  ;;  %v16160_v39 = vld [vmem:[#allocation27_spill] sm:$0xff]  ;;  %v16165_v57 = vld [vmem:[#allocation65_spill] sm:$0xff] }
 0x373   :  { %8952 = vmatprep.subr.bf16.mxu1 %v11395_v13  ;;  %v1336_v32 = vmul.f32 %v9940_v9, %v11679_v3  ;;  %v16159_v3 = vld [vmem:[#allocation60_spill] sm:$0xff] }
 0x374   :  { %v1360_v0 = vpack.c.bf16 %v1335_v40, %v1334_v16  ;;  %v11812_v14 = vadd.f32 %v1951_v30, %v11460_v62 }
 0x375   :  { %v9942_v12 = vpop.eup %9941 }
 0x376   :  { %8953 = vmatpush3.bf16.msra.mxu1 %v11395_v13  ;;  %8934 = vmatprep.mubr.bf16.mxu1 %v1360_v0  ;;  %v1337_v29 = vmul.f32 %v9942_v12, %v11685_v50  ;;  %v1957_v50 = vmul.f32 0.17677669, %v16159_v3  ;;  %v1830_v0 = vsel %vm701_vm0, %v11618_v17, 0  ;;  %v16166_v12 = vld [vmem:[#allocation61_spill] sm:$0xff] }
 0x377   :  { %9442 = vmatprep.subr.msk.bf16.mxu1 %vm701_vm0, %v11618_v17  ;;  %v16170_v17 = vld [vmem:[#allocation57_spill] sm:$0xff] }
 0x378   :  { %v1361_v54 = vpack.c.bf16 %v1337_v29, %v1336_v32  ;;  %v11827_v48 = vadd.f32 %v1957_v50, %v11460_v62  ;;  %v16167_v32 = vld [vmem:[#allocation56_spill] sm:$0xff]  ;;  %v1953_v53 = vmul.f32 0.17677669, %v16170_v17 }
 0x379   :  { %v1950_v29 = vmul.f32 0.17677669, %v16167_v32 }
 0x37a   :  { %8935 = vmatmul.mubr.bf16.gmra.mrb[76].mxu1 %v1361_v54  ;;  %v16169_v54 = vld [vmem:[#allocation55_spill] sm:$0xff] }
 0x37b   :  { %v1952_v30 = vmul.f32 0.17677669, %v16169_v54 }
 0x37d   :  { %v11856_v37 = vadd.f32 %v1952_v30, %v11460_v62 }
 0x37f   :  { %v1263_v38 = vpop.xlane.xlu0 %1262 }
 0x383   :  { %v1259_v24 = vpop.xlane.xlu1 %1258 }
 0x386   :  { %1586 = vrot.lane.b32.xlu0 %v16158_v51, %s10778_s3 }
 0x387   :  { %v1585_v21 = vpop.permute.xlu1 %1584 }
 0x388   :  { %2016 = vmax.xlane.f32.xlu1 %v11812_v14  ;;  %8998 = vmatprep.mubr.msk.bf16.mxu0 %vm701_vm0, %v1585_v21 }
 0x38a   :  { %1765 = vrot.lane.b32.xlu0 %v16160_v39, %s10778_s3 }
 0x38c   :  { %2024 = vmax.xlane.f32.xlu1 %v11821_v20 }
 0x38e   :  { %1769 = vrot.lane.b32.xlu0 %v16161_v36, %s10778_s3 }
 0x390   :  { %2028 = vmax.xlane.f32.xlu1 %v11827_v48 }
 0x392   :  { %1773 = vrot.lane.b32.xlu0 %v16162_v47, %s10778_s3 }
 0x393   :  { %v1265_v60 = vpop.xlane.xlu0 %1264 }
 0x394   :  { %9943 = vrcp.f32 %v1265_v60  ;;  %v11864_v60 = vadd.f32 %v1953_v53, %v11460_v62 }
 0x395   :  { %9945 = vrcp.f32 %v1259_v24  ;;  %v11851_v24 = vadd.f32 %v1950_v29, %v11460_v62 }
 0x396   :  { %1777 = vrot.lane.b32.xlu0 %v16163_v8, %s10778_s3  ;;  %9947 = vrcp.f32 %v1263_v38  ;;  %v16171_v38 = vld [vmem:[#allocation63_spill] sm:$0xff] }
 0x397   :  { %v1261_v33 = vpop.xlane.xlu0 %1260 }
 0x398   :  { %9949 = vrcp.f32 %v1261_v33  ;;  %v16172_v33 = vld [vmem:[#allocation59_spill] sm:$0xff] }
 0x39e   :  { %v9944_v61 = vpop.eup %9943 }
 0x39f   :  { %v9946_v7 = vpop.eup %9945  ;;  %v1341_v35 = vmul.f32 %v9944_v61, %v11700_v49  ;;  %v16168_v49 = vld [vmem:[#allocation64_spill] sm:$0xff]  ;;  %v1954_v61 = vmul.f32 0.17677669, %v16172_v33 }
 0x3a0   :  { %v9948_v18 = vpop.eup %9947  ;;  %v1338_v1 = vmul.f32 %v9946_v7, %v11695_v28  ;;  %v1833_v28 = vsel %vm701_vm0, %v16166_v12, 0  ;;  %v1836_v21 = vsel %vm701_vm0, %v16168_v49, 0 }
 0x3a1   :  { %v1340_v16 = vmul.f32 %v9948_v18, %v16165_v57  ;;  %v16173_v18 = vld [vmem:[#allocation58_spill] sm:$0xff] }
 0x3a2   :  { %v9950_v6 = vpop.eup %9949 }
 0x3a3   :  { %v1339_v27 = vmul.f32 %v9950_v6, %v16164_v23  ;;  %v1363_v9 = vpack.c.bf16 %v1341_v35, %v1340_v16  ;;  %v1956_v6 = vmul.f32 0.17677669, %v16173_v18  ;;  %v11870_v35 = vadd.f32 %v1954_v61, %v11460_v62  ;;  %v16175_v18 = vld [vmem:[#allocation52_spill] sm:$0xff] }
 0x3a4   :  { %v1839_v23 = vsel %vm701_vm0, %v16171_v38, 0 }
 0x3a5   :  { %v1362_v40 = vpack.c.bf16 %v1339_v27, %v1338_v1 }
 0x3a7   :  { %8954 = vmatprep.mubr.bf16.mxu1 %v1362_v40 }
 0x3a8   :  { %8955 = vmatmul.mubr.bf16.vlgmr.msra.gmra.mrb[80].mxu1 %v1363_v9  ;;  %v16174_v9 = vld [vmem:[#allocation51_spill] sm:$0xff] }
 0x3a9   :  { %9003 = vmatpush3.bf16.xpose.msra.mxu1 %v1830_v0 }
 0x3aa   :  { %9443 = vmatprep.subr.msk.bf16.mxu1 %vm701_vm0, %v16166_v12  ;;  %v11878_v12 = vadd.f32 %v1956_v6, %v11460_v62 }
 0x3b1   :  { %9005 = vmatpush3.bf16.xpose.msra.mxu1 %v1833_v28 }
 0x3b2   :  { %9444 = vmatprep.subr.msk.bf16.mxu1 %vm701_vm0, %v16168_v49 }
 0x3b5   :  { %2014 = vmax.xlane.f32.xlu0 %v11851_v24 }
 0x3b8   :  { %v1271_v3 = vpop.xlane.xlu0 %1270  ;;  %v1269_v50 = vpop.xlane.xlu1 %1268 }
 0x3b9   :  { %9007 = vmatpush3.bf16.xpose.msra.mxu1 %v1836_v21  ;;  %2018 = vmax.xlane.f32.xlu0 %v11856_v37  ;;  %9951 = vrcp.f32 %v1269_v50 }
 0x3ba   :  { %9445 = vmatprep.subr.msk.bf16.mxu1 %vm701_vm0, %v16171_v38 }
 0x3bc   :  { %v1267_v7 = vpop.xlane.xlu0 %1266 }
 0x3bd   :  { %9953 = vrcp.f32 %v1267_v7  ;;  %2020 = vmax.xlane.f32.xlu0 %v11864_v60 }
 0x3be   :  { %9955 = vrcp.f32 %v1271_v3  ;;  %v1842_v3 = vsel %vm701_vm0, %v16174_v9, 0 }
 0x3bf   :  { %v8996_v1 = vpop.f32.mrb[72].mxu0 }
 0x3c0   :  { %v1726_v27 = vpop.f32.mrb[73].mxu0  ;;  %v1273_v57 = vpop.xlane.xlu0 %1272  ;;  %v1960_v53 = vmul.f32 0.17677669, %v8996_v1 }
 0x3c1   :  { %9009 = vmatpush3.bf16.xpose.msra.mxu1 %v1839_v23  ;;  %9957 = vrcp.f32 %v1273_v57  ;;  %v1279_v16 = vpop.xlane.xlu1 %1278  ;;  %v8997_v40 = vpop.f32.mrb[74].mxu0  ;;  %2022 = vmax.xlane.f32.xlu0 %v11870_v35  ;;  %v1958_v32 = vmul.f32 0.17677669, %v1726_v27 }
 0x3c2   :  { %9446 = vmatprep.subr.msk.bf16.mxu1 %vm701_vm0, %v16174_v9  ;;  %v1729_v0 = vpop.f32.mrb[75].mxu0  ;;  %v1961_v49 = vmul.f32 0.17677669, %v8997_v40  ;;  %v11899_v23 = vadd.f32 %v1960_v53, %v11460_v62  ;;  %v1845_v40 = vsel %vm701_vm0, %v16175_v18, 0 }
 0x3c3   :  { %v1959_v29 = vmul.f32 0.17677669, %v1729_v0  ;;  %v9952_v28 = vpop.eup %9951  ;;  %v11885_v21 = vadd.f32 %v1958_v32, %v11460_v62 }
 0x3c4   :  { %v1343_v38 = vmul.f32 %v9952_v28, %v11721_v63  ;;  %v11893_v61 = vadd.f32 %v1961_v49, %v11460_v62  ;;  %v1802_v9 = vpop.permute.xlu0 %1801 }
 0x3c5   :  { %v11881_v54 = vadd.f32 %v1959_v29, %v11460_v62  ;;  %v1275_v30 = vpop.xlane.xlu1 %1274  ;;  %2026 = vmax.xlane.f32.xlu0 %v11878_v12 }
 0x3c7   :  { %v9954_v17 = vpop.eup %9953  ;;  %2032 = vmax.xlane.f32.xlu1 %v11881_v54 }
 0x3c8   :  { %v1342_v50 = vmul.f32 %v9954_v17, %v11728_v19  ;;  %v9956_v33 = vpop.eup %9955 }
 0x3c9   :  { %9011 = vmatpush3.bf16.xpose.msra.mxu1 %v1842_v3  ;;  %v1281_v7 = vpop.xlane.xlu1 %1280  ;;  %2030 = vmax.xlane.f32.xlu0 %v11885_v21  ;;  %v1344_v63 = vmul.f32 %v9956_v33, %v11723_v58 }
 0x3ca   :  { %9447 = vmatprep.subr.msk.bf16.mxu1 %vm701_vm0, %v16175_v18  ;;  %v1364_v6 = vpack.c.bf16 %v1343_v38, %v1342_v50  ;;  %9959 = vrcp.f32 %v1281_v7 }
 0x3cb   :  { %v9958_v1 = vpop.eup %9957  ;;  %2036 = vmax.xlane.f32.xlu1 %v11893_v61  ;;  %9961 = vrcp.f32 %v1275_v30 }
 0x3cc   :  { %8958 = vmatprep.mubr.bf16.mxu1 %v1364_v6  ;;  %v1345_v19 = vmul.f32 %v9958_v1, %v11732_v43  ;;  %9963 = vrcp.f32 %v1279_v16  ;;  %v1848_v43 = vsel %vm701_vm0, %v1802_v9, 0 }
 0x3cd   :  { %v1277_v27 = vpop.xlane.xlu1 %1276  ;;  %2034 = vmax.xlane.f32.xlu0 %v11899_v23 }
 0x3ce   :  { %9965 = vrcp.f32 %v1277_v27  ;;  %v1365_v57 = vpack.c.bf16 %v1345_v19, %v1344_v63 }
 0x3d0   :  { %8959 = vmatmul.mubr.bf16.gmra.mrb[84].mxu1 %v1365_v57 }
 0x3d1   :  { %9013 = vmatpush3.bf16.xpose.msra.mxu1 %v1845_v40  ;;  %v1285_v0 = vpop.xlane.xlu1 %1284 }
 0x3d2   :  { %9448 = vmatprep.subr.msk.bf16.mxu1 %vm701_vm0, %v1802_v9  ;;  %9967 = vrcp.f32 %v1285_v0 }
 0x3d4   :  { %v9960_v32 = vpop.eup %9959 }
 0x3d5   :  { %v9962_v29 = vpop.eup %9961  ;;  %v1349_v16 = vmul.f32 %v9960_v32, %v11741_v11  ;;  %v1804_v49 = vpop.permute.xlu1 %1803 }
 0x3d6   :  { %v9964_v58 = vpop.eup %9963  ;;  %v1346_v30 = vmul.f32 %v9962_v29, %v11738_v2  ;;  %v1851_v38 = vsel %vm701_vm0, %v1804_v49, 0 }
 0x3d7   :  { %v1348_v53 = vmul.f32 %v9964_v58, %v11734_v45 }
 0x3d8   :  { %v9966_v28 = vpop.eup %9965 }
 0x3d9   :  { %9015 = vmatpush3.bf16.xpose.msra.mxu1 %v1848_v43  ;;  %v1347_v17 = vmul.f32 %v9966_v28, %v11744_v42  ;;  %v1367_v50 = vpack.c.bf16 %v1349_v16, %v1348_v53  ;;  %v1768_v0 = vpop.permute.xlu1 %1767 }
 0x3da   :  { %9449 = vmatprep.subr.msk.bf16.mxu1 %vm701_vm0, %v1804_v49 }
 0x3db   :  { %v1366_v3 = vpack.c.bf16 %v1347_v17, %v1346_v30 }
 0x3dc   :  { %v9968_v42 = vpop.eup %9967 }
 0x3dd   :  { %8962 = vmatprep.mubr.bf16.mxu1 %v1366_v3  ;;  %v1351_v6 = vmul.f32 %v9968_v42, %v11747_v59  ;;  %v1772_v59 = vpop.permute.xlu1 %1771 }
 0x3de   :  { %8963 = vmatmul.mubr.bf16.gmra.mrb[88].mxu1 %v1367_v50 }
 0x3e1   :  { %9017 = vmatpush3.bf16.xpose.msra.mxu1 %v1851_v38 }
 0x3f5   :  { %v1287_v33 = vpop.xlane.xlu0 %1286 }
 0x3f9   :  { %v1283_v11 = vpop.xlane.xlu0 %1282 }
 0x3fa   :  { %9969 = vrcp.f32 %v1283_v11 }
 0x3fb   :  { %9971 = vrcp.f32 %v1287_v33 }
 0x3fd   :  { %v1289_v7 = vpop.xlane.xlu0 %1288 }
 0x3fe   :  { %9973 = vrcp.f32 %v1289_v7 }
 0x401   :  { %v1587_v2 = vpop.permute.xlu0 %1586 }
 0x402   :  { %8999 = vmatmul.mubr.msk.bf16.gmra.mrb[76].mxu0 %vm701_vm0, %v1587_v2 }
 0x404   :  { %v9970_v18 = vpop.eup %9969 }
 0x405   :  { %v1350_v45 = vmul.f32 %v9970_v18, %v11789_v56  ;;  %v9972_v1 = vpop.eup %9971  ;;  %v1766_v9 = vpop.permute.xlu0 %1765 }
 0x406   :  { %v1352_v27 = vmul.f32 %v9972_v1, %v11782_v34  ;;  %v1776_v34 = vpop.permute.xlu1 %1775 }
 0x407   :  { %v1368_v63 = vpack.c.bf16 %v1351_v6, %v1350_v45 }
 0x408   :  { %v9974_v19 = vpop.eup %9973 }
 0x409   :  { %8966 = vmatprep.mubr.bf16.mxu1 %v1368_v63  ;;  %v1353_v57 = vmul.f32 %v9974_v19, %v11796_v26  ;;  %v1770_v32 = vpop.permute.xlu0 %1769 }
 0x40a   :  { %v1780_v26 = vpop.permute.xlu1 %1779 }
 0x40b   :  { %v1369_v40 = vpack.c.bf16 %v1353_v57, %v1352_v27 }
 0x40d   :  { %8967 = vmatmul.mubr.bf16.gmra.mrb[92].mxu1 %v1369_v40  ;;  %v1774_v56 = vpop.permute.xlu0 %1773 }
 0x40e   :  { %9018 = vmatprep.mubr.msk.bf16.mxu1 %vm701_vm0, %v1766_v9 }
 0x411   :  { %v1778_v29 = vpop.permute.xlu0 %1777 }
 0x415   :  { %9019 = vmatmul.mubr.msk.bf16.vlgmr.msra.gmra.mrb[96].mxu1 %vm701_vm0, %v1768_v0 }
 0x416   :  { %9022 = vmatprep.mubr.msk.bf16.mxu1 %vm701_vm0, %v1770_v32 }
 0x41d   :  { %9023 = vmatmul.mubr.msk.bf16.gmra.mrb[100].mxu1 %vm701_vm0, %v1772_v59 }
 0x41e   :  { %9026 = vmatprep.mubr.msk.bf16.mxu1 %vm701_vm0, %v1774_v56 }
 0x425   :  { %9027 = vmatmul.mubr.msk.bf16.gmra.mrb[104].mxu1 %vm701_vm0, %v1776_v34 }
 0x426   :  { %9030 = vmatprep.mubr.msk.bf16.mxu1 %vm701_vm0, %v1778_v29 }
 0x42c   :  { %v11927_v58 = vpop.f32.mrb[64].mxu1 }
 0x42d   :  { %16176 = vst [vmem:[#allocation62_spill] sm:$0xff] %v11927_v58  ;;  %v11929_v28 = vpop.f32.mrb[65].mxu1  ;;  %9031 = vmatmul.mubr.msk.bf16.gmra.mrb[108].mxu1 %vm701_vm0, %v1780_v26  ;;  %v16217_v58 = vld [vmem:[#allocation6_spill] sm:$0xff] }
 0x42e   :  { %16177 = vst [vmem:[#allocation25_spill] sm:$0xff] %v11929_v28  ;;  %v11932_v43 = vpop.f32.mrb[66].mxu1  ;;  %v16219_v28 = vld [vmem:[#allocation18_spill] sm:$0xff] }
 0x42f   :  { %16178 = vst [vmem:[#allocation60_spill] sm:$0xff] %v11932_v43  ;;  %v11934_v16 = vpop.f32.mrb[67].mxu1  ;;  %v16218_v43 = vld [vmem:[#allocation10_spill] sm:$0xff] }
 0x430   :  { %16179 = vst [vmem:[#allocation66_spill] sm:$0xff] %v11934_v16  ;;  %v16220_v16 = vld [vmem:[#allocation20_spill] sm:$0xff] }
 0x434   :  { %v11936_v49 = vpop.f32.mrb[68].mxu1 }
 0x435   :  { %16180 = vst [vmem:[#allocation65_spill] sm:$0xff] %v11936_v49  ;;  %v11938_v30 = vpop.f32.mrb[69].mxu1 }
 0x436   :  { %16181 = vst [vmem:[#allocation61_spill] sm:$0xff] %v11938_v30  ;;  %v11940_v17 = vpop.f32.mrb[70].mxu1 }
 0x437   :  { %16182 = vst [vmem:[#allocation56_spill] sm:$0xff] %v11940_v17  ;;  %v11942_v53 = vpop.f32.mrb[71].mxu1  ;;  %v16216_v17 = vld [vmem:[#allocation14_spill] sm:$0xff] }
 0x438   :  { %16183 = vst [vmem:[#allocation64_spill] sm:$0xff] %v11942_v53 }
 0x442   :  { %v11944_v3 = vpop.f32.mrb[72].mxu1 }
 0x443   :  { %16184 = vst [vmem:[#allocation55_spill] sm:$0xff] %v11944_v3  ;;  %v11946_v50 = vpop.f32.mrb[73].mxu1  ;;  %v16213_v3 = vld [vmem:[#allocation40_spill] sm:$0xff] }
 0x444   :  { %16185 = vst [vmem:[#allocation57_spill] sm:$0xff] %v11946_v50  ;;  %v11948_v38 = vpop.f32.mrb[74].mxu1 }
 0x445   :  { %16186 = vst [vmem:[#allocation63_spill] sm:$0xff] %v11948_v38  ;;  %v11950_v33 = vpop.f32.mrb[75].mxu1  ;;  %v16214_v38 = vld [vmem:[#allocation41_spill] sm:$0xff] }
 0x446   :  { %16187 = vst [vmem:[#allocation59_spill] sm:$0xff] %v11950_v33  ;;  %v16215_v33 = vld [vmem:[#allocation42_spill] sm:$0xff] }
 0x44d   :  { %v11952_v11 = vpop.f32.mrb[76].mxu1 }
 0x44e   :  { %16188 = vst [vmem:[#allocation58_spill] sm:$0xff] %v11952_v11  ;;  %v11954_v7 = vpop.f32.mrb[77].mxu1 }
 0x44f   :  { %16189 = vst [vmem:[#allocation51_spill] sm:$0xff] %v11954_v7  ;;  %v11956_v2 = vpop.f32.mrb[78].mxu1 }
 0x450   :  { %16190 = vst [vmem:[#allocation52_spill] sm:$0xff] %v11956_v2  ;;  %v11958_v42 = vpop.f32.mrb[79].mxu1 }
 0x451   :  { %16191 = vst [vmem:[#allocation67_spill] sm:$0xff] %v11958_v42  ;;  %v16212_v42 = vld [vmem:[#allocation39_spill] sm:$0xff] }
 0x47b   :  { %v11960_v18 = vpop.f32.mrb[80].mxu1 }
 0x47c   :  { %16192 = vst [vmem:[#allocation68_spill] sm:$0xff] %v11960_v18  ;;  %v11962_v45 = vpop.f32.mrb[81].mxu1 }
 0x47d   :  { %16193 = vst [vmem:[#allocation69_spill] sm:$0xff] %v11962_v45  ;;  %v11964_v6 = vpop.f32.mrb[82].mxu1 }
 0x47e   :  { %16194 = vst [vmem:[#allocation70_spill] sm:$0xff] %v11964_v6  ;;  %v11966_v1 = vpop.f32.mrb[83].mxu1  ;;  %v16211_v6 = vld [vmem:[#allocation36_spill] sm:$0xff] }
 0x47f   :  { %16195 = vst [vmem:[#allocation71_spill] sm:$0xff] %v11966_v1  ;;  %v16210_v1 = vld [vmem:[#allocation35_spill] sm:$0xff] }
 0x4a3   :  { %v11968_v63 = vpop.f32.mrb[84].mxu1 }
 0x4a4   :  { %16196 = vst [vmem:[#allocation72_spill] sm:$0xff] %v11968_v63  ;;  %v11970_v19 = vpop.f32.mrb[85].mxu1 }
 0x4a5   :  { %16197 = vst [vmem:[#allocation73_spill] sm:$0xff] %v11970_v19  ;;  %v11972_v27 = vpop.f32.mrb[86].mxu1 }
 0x4a6   :  { %16198 = vst [vmem:[#allocation74_spill] sm:$0xff] %v11972_v27  ;;  %v11974_v57 = vpop.f32.mrb[87].mxu1 }
 0x4a7   :  { %16199 = vst [vmem:[#allocation75_spill] sm:$0xff] %v11974_v57 }
 0x4b1   :  { %v11976_v40 = vpop.f32.mrb[88].mxu1 }
 0x4b2   :  { %16200 = vst [vmem:[#allocation76_spill] sm:$0xff] %v11976_v40  ;;  %v11978_v9 = vpop.f32.mrb[89].mxu1 }
 0x4b3   :  { %16201 = vst [vmem:[#allocation77_spill] sm:$0xff] %v11978_v9  ;;  %v11980_v0 = vpop.f32.mrb[90].mxu1 }
 0x4b4   :  { %16202 = vst [vmem:[#allocation78_spill] sm:$0xff] %v11980_v0  ;;  %v11982_v32 = vpop.f32.mrb[91].mxu1 }
 0x4b5   :  { %16203 = vst [vmem:[#allocation79_spill] sm:$0xff] %v11982_v32 }
 0x4d5   :  { %v9000_v59 = vpop.f32.mrb[76].mxu0 }
 0x4d6   :  { %v1742_v56 = vpop.f32.mrb[77].mxu0  ;;  %v1964_v63 = vmul.f32 0.17677669, %v9000_v59 }
 0x4d7   :  { %v1962_v34 = vmul.f32 0.17677669, %v1742_v56  ;;  %v9001_v29 = vpop.f32.mrb[78].mxu0 }
 0x4d8   :  { %v1745_v26 = vpop.f32.mrb[79].mxu0  ;;  %v1965_v45 = vmul.f32 0.17677669, %v9001_v29  ;;  %v11992_v9 = vadd.f32 %v1964_v63, %v11460_v62 }
 0x4d9   :  { %v11985_v19 = vadd.f32 %v1962_v34, %v11460_v62  ;;  %v1963_v27 = vmul.f32 0.17677669, %v1745_v26 }
 0x4da   :  { %v11996_v56 = vadd.f32 %v1965_v45, %v11460_v62 }
 0x4db   :  { %v11988_v57 = vadd.f32 %v1963_v27, %v11460_v62  ;;  %2038 = vmax.xlane.f32.xlu0 %v11985_v19 }
 0x4dd   :  { %2040 = vmax.xlane.f32.xlu1 %v11988_v57 }
 0x4df   :  { %2042 = vmax.xlane.f32.xlu0 %v11992_v9 }
 0x4e0   :  { %v11999_v59 = vpop.f32.mrb[92].mxu1 }
 0x4e1   :  { %16204 = vst [vmem:[#allocation80_spill] sm:$0xff] %v11999_v59  ;;  %2044 = vmax.xlane.f32.xlu1 %v11996_v56  ;;  %v12002_v34 = vpop.f32.mrb[93].mxu1  ;;  %v16208_v59 = vld [vmem:[#allocation33_spill] sm:$0xff] }
 0x4e2   :  { %16205 = vst [vmem:[#allocation81_spill] sm:$0xff] %v12002_v34  ;;  %v12004_v27 = vpop.f32.mrb[94].mxu1 }
 0x4e3   :  { %16206 = vst [vmem:[#allocation82_spill] sm:$0xff] %v12004_v27  ;;  %v12006_v29 = vpop.f32.mrb[95].mxu1 }
 0x4e4   :  { %16207 = vst [vmem:[#allocation83_spill] sm:$0xff] %v12006_v29  ;;  %v16209_v29 = vld [vmem:[#allocation34_spill] sm:$0xff] }
 0x4e8   :  { %v12008_v26 = vpop.f32.mrb[96].mxu1 }
 0x4e9   :  { %v12010_v63 = vpop.f32.mrb[97].mxu1 }
 0x4ea   :  { %v12012_v32 = vpop.f32.mrb[98].mxu1 }
 0x4eb   :  { %v12014_v45 = vpop.f32.mrb[99].mxu1 }
 0x4f0   :  { %v12016_v40 = vpop.f32.mrb[100].mxu1 }
 0x4f1   :  { %v12018_v0 = vpop.f32.mrb[101].mxu1 }
 0x4f2   :  { %2328 = vrot.lane.b32.xlu1 %v16208_v59, %s10778_s3  ;;  %v12022_v34 = vpop.f32.mrb[102].mxu1 }
 0x4f3   :  { %v12024_v27 = vpop.f32.mrb[103].mxu1 }
 0x4f5   :  { %2326 = vrot.lane.b32.xlu0 %v16209_v29, %s10778_s3 }
 0x4f6   :  { %2332 = vrot.lane.b32.xlu1 %v16210_v1, %s10778_s3 }
 0x4f8   :  { %v12030_v18 = vpop.f32.mrb[104].mxu1 }
 0x4f9   :  { %2330 = vrot.lane.b32.xlu0 %v16211_v6, %s10778_s3  ;;  %v12034_v7 = vpop.f32.mrb[105].mxu1 }
 0x4fa   :  { %2336 = vrot.lane.b32.xlu1 %v16212_v42, %s10778_s3  ;;  %v12038_v11 = vpop.f32.mrb[106].mxu1 }
 0x4fb   :  { %v12040_v2 = vpop.f32.mrb[107].mxu1 }
 0x4fd   :  { %2334 = vrot.lane.b32.xlu0 %v16213_v3, %s10778_s3  ;;  %v1975_v3 = vmul.f32 0.17677669, %v12040_v2 }
 0x4fe   :  { %2340 = vrot.lane.b32.xlu1 %v16214_v38, %s10778_s3 }
 0x500   :  { %v12046_v50 = vpop.f32.mrb[108].mxu1 }
 0x501   :  { %2338 = vrot.lane.b32.xlu0 %v16215_v33, %s10778_s3  ;;  %v12050_v49 = vpop.f32.mrb[109].mxu1 }
 0x502   :  { %2596 = vrot.lane.b32.xlu1 %v16216_v17, %s10780_s1  ;;  %v12054_v30 = vpop.f32.mrb[110].mxu1  ;;  %v1978_v29 = vmul.f32 0.17677669, %v12050_v49 }
 0x503   :  { %v12056_v53 = vpop.f32.mrb[111].mxu1  ;;  %v1981_v59 = vmul.f32 0.17677669, %v12054_v30 }
 0x504   :  { %v1979_v62 = vmul.f32 0.17677669, %v12056_v53 }
 0x505   :  { %2592 = vrot.lane.b32.xlu0 %v16217_v58, %s10780_s1  ;;  %v16221_v58 = vld [vmem:[#allocation24_spill] sm:$0xff] }
 0x506   :  { %2455 = vrot.lane.b32.xlu1 %v11363_v31, %s10778_s3  ;;  %v2017_v31 = vpop.xlane.xlu1 %2016 }
 0x509   :  { %2594 = vrot.lane.b32.xlu0 %v16218_v43, %s10780_s1  ;;  %v16222_v43 = vld [vmem:[#allocation8_spill] sm:$0xff] }
 0x50a   :  { %2457 = vrot.lane.b32.xlu1 %v11357_v10, %s10778_s3  ;;  %v16223_v10 = vld [vmem:[#allocation22_spill] sm:$0xff] }
 0x50d   :  { %2598 = vrot.lane.b32.xlu0 %v16219_v28, %s10780_s1  ;;  %v16224_v28 = vld [vmem:[#allocation30_spill] sm:$0xff] }
 0x50e   :  { %2459 = vrot.lane.b32.xlu1 %v11375_v4, %s10778_s3 }
 0x511   :  { %2600 = vrot.lane.b32.xlu0 %v16220_v16, %s10780_s1  ;;  %v16225_v16 = vld [vmem:[#allocation38_spill] sm:$0xff] }
 0x512   :  { %2604 = vrot.lane.b32.xlu1 %v16221_v58, %s10780_s1  ;;  %v16231_v58 = vld [vmem:[#allocation32_spill] sm:$0xff] }
 0x515   :  { %2461 = vrot.lane.b32.xlu0 %v11371_v52, %s10778_s3  ;;  %v16226_v52 = vld [vmem:[#allocation12_spill] sm:$0xff] }
 0x516   :  { %2578 = vrot.lane.b32.xlu1 %v16222_v43, %s10780_s1  ;;  %v2015_v43 = vpop.xlane.xlu0 %2014 }
 0x517   :  { %v2078_v4 = vsub.f32 %v11851_v24, %v2015_v43 }
 0x519   :  { %2602 = vrot.lane.b32.xlu0 %v16223_v10, %s10780_s1  ;;  %v16227_v10 = vld [vmem:[#allocation11_spill] sm:$0xff]  ;;  %v2110_v17 = vmul.f32 1.442695, %v2078_v4 }
 0x51a   :  { %2771 = vrot.lane.b32.xlu1 %v16224_v28, %s10780_s1  ;;  %v16228_v28 = vld [vmem:[#allocation26_spill] sm:$0xff] }
 0x51d   :  { %2463 = vrot.lane.b32.xlu0 %v11387_v41, %s10778_s3  ;;  %v16229_v41 = vld [vmem:[#allocation4_spill] sm:$0xff] }
 0x51e   :  { %2775 = vrot.lane.b32.xlu1 %v16225_v16, %s10780_s1  ;;  %v2019_v16 = vpop.xlane.xlu0 %2018 }
 0x521   :  { %2465 = vrot.lane.b32.xlu0 %v11381_v22, %s10778_s3 }
 0x522   :  { %2580 = vrot.lane.b32.xlu1 %v16226_v52, %s10780_s1  ;;  %v2021_v22 = vpop.xlane.xlu0 %2020  ;;  %v16230_v52 = vld [vmem:[#allocation28_spill] sm:$0xff] }
 0x525   :  { %2467 = vrot.lane.b32.xlu0 %v11398_v5, %s10778_s3  ;;  %v2080_v5 = vsub.f32 %v11856_v37, %v2019_v16  ;;  %v2025_v37 = vpop.xlane.xlu1 %2024 }
 0x526   :  { %2779 = vrot.lane.b32.xlu1 %v16227_v10, %s10780_s1  ;;  %v2023_v10 = vpop.xlane.xlu0 %2022 }
 0x529   :  { %2469 = vrot.lane.b32.xlu0 %v11395_v13, %s10778_s3  ;;  %v2114_v13 = vmul.f32 1.442695, %v2080_v5  ;;  %v2082_v5 = vsub.f32 %v11870_v35, %v2023_v10  ;;  %v2029_v43 = vpop.xlane.xlu1 %2028 }
 0x52a   :  { %v2027_v33 = vpop.xlane.xlu0 %2026  ;;  %v2085_v4 = vsub.f32 %v11827_v48, %v2029_v43 }
 0x52b   :  { %9975 = vpow2.f32 %v2114_v13 }
 0x52c   :  { %9977 = vpow2.f32 %v2110_v17 }
 0x52d   :  { %2606 = vrot.lane.b32.xlu0 %v16228_v28, %s10780_s1  ;;  %v16232_v28 = vld [vmem:[#allocation7_spill] sm:$0xff]  ;;  %v2033_v35 = vpop.xlane.xlu1 %2032 }
 0x52e   :  { %v2031_v13 = vpop.xlane.xlu0 %2030 }
 0x52f   :  { %v2086_v10 = vsub.f32 %v11885_v21, %v2031_v13 }
 0x531   :  { %2576 = vrot.lane.b32.xlu0 %v16229_v41, %s10780_s1  ;;  %v2081_v41 = vsub.f32 %v11864_v60, %v2021_v22  ;;  %v2118_v22 = vmul.f32 1.442695, %v2082_v5 }
 0x532   :  { %v2035_v48 = vpop.xlane.xlu0 %2034 }
 0x533   :  { %v2116_v16 = vmul.f32 1.442695, %v2081_v41  ;;  %v2079_v41 = vsub.f32 %v11812_v14, %v2017_v31  ;;  %v2088_v14 = vsub.f32 %v11899_v23, %v2035_v48 }
 0x535   :  { %2769 = vrot.lane.b32.xlu0 %v16230_v52, %s10780_s1  ;;  %v16233_v52 = vld [vmem:[#allocation16_spill] sm:$0xff]  ;;  %9979 = vpow2.f32 %v2116_v16  ;;  %v12113_v38 = vpop.eup %9975  ;;  %v2112_v17 = vmul.f32 1.442695, %v2079_v41  ;;  %v2126_v16 = vmul.f32 1.442695, %v2086_v10 }
 0x536   :  { %v12117_v60 = vpop.eup %9977 }
 0x539   :  { %2773 = vrot.lane.b32.xlu0 %v16231_v58, %s10780_s1  ;;  %v2084_v58 = vsub.f32 %v11878_v12, %v2027_v33  ;;  %v2124_v12 = vmul.f32 1.442695, %v2085_v4  ;;  %v2083_v33 = vsub.f32 %v11821_v20, %v2025_v37  ;;  %v2130_v37 = vmul.f32 1.442695, %v2088_v14 }
 0x53a   :  { %v2087_v4 = vsub.f32 %v11881_v54, %v2033_v35 }
 0x53b   :  { %v2122_v24 = vmul.f32 1.442695, %v2084_v58  ;;  %v2120_v31 = vmul.f32 1.442695, %v2083_v33 }
 0x53c   :  { %v2128_v41 = vmul.f32 1.442695, %v2087_v4 }
 0x53d   :  { %2777 = vrot.lane.b32.xlu0 %v16232_v28, %s10780_s1  ;;  %9981 = vpow2.f32 %v2122_v24  ;;  %v2037_v24 = vpop.xlane.xlu1 %2036 }
 0x53e   :  { %9983 = vpow2.f32 %v2118_v22  ;;  %v2089_v20 = vsub.f32 %v11893_v61, %v2037_v24 }
 0x53f   :  { %v12122_v58 = vpop.eup %9979  ;;  %9985 = vpow2.f32 %v2124_v12 }
 0x540   :  { %9987 = vpow2.f32 %v2112_v17  ;;  %v2132_v22 = vmul.f32 1.442695, %v2089_v20 }
 0x541   :  { %2582 = vrot.lane.b32.xlu0 %v16233_v52, %s10780_s1  ;;  %9989 = vpow2.f32 %v2126_v16 }
 0x542   :  { %9991 = vpow2.f32 %v2120_v31 }
 0x543   :  { %9993 = vpow2.f32 %v2130_v37 }
 0x544   :  { %9995 = vpow2.f32 %v2132_v22 }
 0x545   :  { %9997 = vpow2.f32 %v2128_v41 }
 0x547   :  { %v12126_v5 = vpop.eup %9981 }
 0x548   :  { %v12130_v21 = vpop.eup %9983 }
 0x549   :  { %v12134_v43 = vpop.eup %9985 }
 0x54a   :  { %2178 = vadd.xlane.f32.xlu1 %v12113_v38  ;;  %v12138_v23 = vpop.eup %9987 }
 0x54b   :  { %v12141_v13 = vpop.eup %9989 }
 0x54c   :  { %v12144_v61 = vpop.eup %9991 }
 0x54d   :  { %v12147_v54 = vpop.eup %9993 }
 0x54e   :  { %2174 = vadd.xlane.f32.xlu1 %v12117_v60  ;;  %v12150_v35 = vpop.eup %9995 }
 0x54f   :  { %v12156_v24 = vpop.eup %9997 }
 0x552   :  { %2180 = vadd.xlane.f32.xlu1 %v12122_v58 }
 0x556   :  { %2186 = vadd.xlane.f32.xlu1 %v12126_v5 }
 0x55a   :  { %2182 = vadd.xlane.f32.xlu1 %v12130_v21 }
 0x55e   :  { %2188 = vadd.xlane.f32.xlu1 %v12134_v43 }
 0x560   :  { %2176 = vadd.xlane.f32.xlu0 %v12138_v23 }
 0x562   :  { %2190 = vadd.xlane.f32.xlu1 %v12141_v13 }
 0x564   :  { %2184 = vadd.xlane.f32.xlu0 %v12144_v61 }
 0x568   :  { %v2039_v12 = vpop.xlane.xlu0 %2038  ;;  %2194 = vadd.xlane.f32.xlu0 %v12147_v54 }
 0x569   :  { %v2090_v48 = vsub.f32 %v11985_v19, %v2039_v12  ;;  %v1968_v12 = vmul.f32 0.17677669, %v12008_v26 }
 0x56a   :  { %v2041_v10 = vpop.xlane.xlu1 %2040 }
 0x56b   :  { %v2091_v17 = vsub.f32 %v11988_v57, %v2041_v10  ;;  %v2134_v4 = vmul.f32 1.442695, %v2090_v48  ;;  %v16234_v48 = vld [vmem:[#allocation54_spill] sm:$0xff] }
 0x56c   :  { %v2043_v33 = vpop.xlane.xlu0 %2042  ;;  %2196 = vadd.xlane.f32.xlu0 %v12150_v35  ;;  %v12275_v2 = vadd.f32 %v1978_v29, %v16234_v48  ;;  %v12287_v49 = vadd.f32 %v1979_v62, %v16234_v48 }
 0x56d   :  { %v2136_v16 = vmul.f32 1.442695, %v2091_v17  ;;  %v2092_v31 = vsub.f32 %v11992_v9, %v2043_v33 }
 0x56e   :  { %v2045_v14 = vpop.xlane.xlu1 %2044 }
 0x56f   :  { %9999 = vpow2.f32 %v2136_v16  ;;  %v2138_v20 = vmul.f32 1.442695, %v2092_v31  ;;  %v2093_v57 = vsub.f32 %v11996_v56, %v2045_v14  ;;  %v12167_v16 = vadd.f32 %v1968_v12, %v16234_v48 }
 0x570   :  { %v2327_v37 = vpop.permute.xlu0 %2326  ;;  %2192 = vadd.xlane.f32.xlu0 %v12156_v24  ;;  %v1966_v31 = vmul.f32 0.17677669, %v12010_v63  ;;  %v1969_v63 = vmul.f32 0.17677669, %v12012_v32  ;;  %v1967_v32 = vmul.f32 0.17677669, %v12014_v45 }
 0x571   :  { %10001 = vpow2.f32 %v2138_v20  ;;  %9034 = vmatprep.subr.bf16.mxu0 %v2327_v37  ;;  %v2140_v41 = vmul.f32 1.442695, %v2093_v57  ;;  %v1972_v45 = vmul.f32 0.17677669, %v12016_v40  ;;  %v1973_v40 = vmul.f32 0.17677669, %v12022_v34 }
 0x572   :  { %9035 = vmatpush3.bf16.msra.mxu0 %v2327_v37  ;;  %v2329_v22 = vpop.permute.xlu1 %2328  ;;  %10003 = vpow2.f32 %v2134_v4  ;;  %v12175_v37 = vadd.f32 %v1966_v31, %v16234_v48  ;;  %v1970_v4 = vmul.f32 0.17677669, %v12018_v0  ;;  %v12195_v12 = vadd.f32 %v1969_v63, %v16234_v48 }
 0x573   :  { %9036 = vmatprep.subr.bf16.mxu0 %v2329_v22  ;;  %10005 = vpow2.f32 %v2140_v41  ;;  %v12207_v63 = vadd.f32 %v1967_v32, %v16234_v48  ;;  %v12219_v32 = vadd.f32 %v1972_v45, %v16234_v48  ;;  %v1971_v34 = vmul.f32 0.17677669, %v12024_v27 }
 0x574   :  { %v2331_v19 = vpop.permute.xlu0 %2330  ;;  %v12188_v41 = vadd.f32 %v1970_v4, %v16234_v48 }
 0x575   :  { %v12238_v45 = vadd.f32 %v1971_v34, %v16234_v48  ;;  %v16236_v34 = vld [vmem:[#allocation21_spill] sm:$0xff] }
 0x576   :  { %9037 = vmatpush3.bf16.msra.mxu0 %v2329_v22  ;;  %v2333_v9 = vpop.permute.xlu1 %2332 }
 0x577   :  { %9038 = vmatprep.subr.bf16.mxu0 %v2331_v19 }
 0x578   :  { %v2335_v10 = vpop.permute.xlu0 %2334 }
 0x579   :  { %v12161_v17 = vpop.eup %9999 }
 0x57a   :  { %2200 = vadd.xlane.f32.xlu0 %v12161_v17  ;;  %9039 = vmatpush3.bf16.msra.mxu0 %v2331_v19  ;;  %v2337_v56 = vpop.permute.xlu1 %2336 }
 0x57b   :  { %v12164_v33 = vpop.eup %10001  ;;  %9040 = vmatprep.subr.bf16.mxu0 %v2333_v9 }
 0x57c   :  { %v2339_v14 = vpop.permute.xlu0 %2338  ;;  %2202 = vadd.xlane.f32.xlu1 %v12164_v33  ;;  %v12172_v20 = vpop.eup %10003 }
 0x57d   :  { %v12185_v19 = vpop.eup %10005 }
 0x57e   :  { %2050 = vmax.xlane.f32.xlu0 %v12167_v16  ;;  %9041 = vmatpush3.bf16.msra.mxu0 %v2333_v9  ;;  %v2341_v26 = vpop.permute.xlu1 %2340  ;;  %v1976_v9 = vmul.f32 0.17677669, %v12030_v18  ;;  %v1974_v18 = vmul.f32 0.17677669, %v12034_v7  ;;  %v1977_v7 = vmul.f32 0.17677669, %v12038_v11 }
 0x57f   :  { %9042 = vmatprep.subr.bf16.mxu0 %v2335_v10 }
 0x580   :  { %v12178_v57 = vpop.permute.xlu0 %2592  ;;  %2198 = vadd.xlane.f32.xlu1 %v12172_v20  ;;  %v12200_v31 = vadd.f32 %v1976_v9, %v16234_v48  ;;  %v12212_v9 = vadd.f32 %v1974_v18, %v16234_v48  ;;  %v12226_v11 = vadd.f32 %v1977_v7, %v16234_v48  ;;  %v12230_v18 = vadd.f32 %v1973_v40, %v16234_v48 }
 0x582   :  { %2046 = vmax.xlane.f32.xlu0 %v12175_v37  ;;  %9043 = vmatpush3.bf16.msra.mxu0 %v2335_v10  ;;  %v12183_v22 = vpop.permute.xlu1 %2596 }
 0x583   :  { %9044 = vmatprep.subr.bf16.mxu0 %v2337_v56 }
 0x584   :  { %v12191_v0 = vpop.permute.xlu0 %2594  ;;  %2204 = vadd.xlane.f32.xlu1 %v12185_v19 }
 0x586   :  { %2054 = vmax.xlane.f32.xlu0 %v12188_v41  ;;  %9045 = vmatpush3.bf16.msra.mxu0 %v2337_v56  ;;  %v2456_v10 = vpop.permute.xlu1 %2455 }
 0x587   :  { %9046 = vmatprep.subr.bf16.mxu0 %v2339_v14  ;;  %9066 = vmatprep.subr.bf16.mxu1 %v2456_v10 }
 0x588   :  { %v12203_v4 = vpop.permute.xlu0 %2598  ;;  %2052 = vmax.xlane.f32.xlu1 %v12195_v12  ;;  %9067 = vmatpush3.bf16.msra.mxu1 %v2456_v10 }
 0x58a   :  { %2066 = vmax.xlane.f32.xlu0 %v12200_v31  ;;  %9047 = vmatpush3.bf16.msra.mxu0 %v2339_v14  ;;  %v2458_v56 = vpop.permute.xlu1 %2457 }
 0x58b   :  { %9048 = vmatprep.subr.bf16.mxu0 %v2341_v26  ;;  %9068 = vmatprep.subr.bf16.mxu1 %v2458_v56 }
 0x58c   :  { %v12215_v28 = vpop.permute.xlu0 %2600  ;;  %2048 = vmax.xlane.f32.xlu1 %v12207_v63  ;;  %9069 = vmatpush3.bf16.msra.mxu1 %v2458_v56 }
 0x58e   :  { %2062 = vmax.xlane.f32.xlu0 %v12212_v9  ;;  %9049 = vmatpush3.bf16.msra.mxu0 %v2341_v26  ;;  %v2460_v14 = vpop.permute.xlu1 %2459 }
 0x58f   :  { %9070 = vmatprep.subr.bf16.mxu1 %v2460_v14  ;;  %9450 = vmatprep.subr.msk.bf16.mxu0 %vm701_vm0, %v12178_v57 }
 0x590   :  { %v2462_v10 = vpop.permute.xlu0 %2461  ;;  %2058 = vmax.xlane.f32.xlu1 %v12219_v32  ;;  %9071 = vmatpush3.bf16.msra.mxu1 %v2460_v14 }
 0x591   :  { %9072 = vmatprep.subr.bf16.mxu1 %v2462_v10 }
 0x592   :  { %2068 = vmax.xlane.f32.xlu0 %v12226_v11 }
 0x594   :  { %v12234_v26 = vpop.permute.xlu0 %2602  ;;  %2060 = vmax.xlane.f32.xlu1 %v12230_v18  ;;  %9073 = vmatpush3.bf16.msra.mxu1 %v2462_v10  ;;  %v16235_v10 = vld [vmem:[#allocation19_spill] sm:$0xff] }
 0x598   :  { %v2464_v56 = vpop.permute.xlu0 %2463  ;;  %2056 = vmax.xlane.f32.xlu1 %v12238_v45 }
 0x599   :  { %9074 = vmatprep.subr.bf16.mxu1 %v2464_v56 }
 0x59a   :  { %9075 = vmatpush3.bf16.msra.mxu1 %v2464_v56 }
 0x59c   :  { %v2466_v7 = vpop.permute.xlu0 %2465 }
 0x59d   :  { %9076 = vmatprep.subr.bf16.mxu1 %v2466_v7 }
 0x59e   :  { %9077 = vmatpush3.bf16.msra.mxu1 %v2466_v7  ;;  %v12253_v7 = vpop.permute.xlu1 %2604 }
 0x5a0   :  { %v2468_v40 = vpop.permute.xlu0 %2467 }
 0x5a1   :  { %9078 = vmatprep.subr.bf16.mxu1 %v2468_v40 }
 0x5a2   :  { %9079 = vmatpush3.bf16.msra.mxu1 %v2468_v40  ;;  %v12255_v40 = vpop.permute.xlu1 %2578 }
 0x5a4   :  { %v2470_v27 = vpop.permute.xlu0 %2469 }
 0x5a5   :  { %9080 = vmatprep.subr.bf16.mxu1 %v2470_v27 }
 0x5a6   :  { %9081 = vmatpush3.bf16.msra.mxu1 %v2470_v27  ;;  %v12257_v27 = vpop.permute.xlu1 %2771 }
 0x5a7   :  { %16238 = vst [vmem:[#allocation85_spill] sm:$0xff] %v12257_v27 }
 0x5a8   :  { %v12241_v14 = vpop.permute.xlu0 %2606  ;;  %2584 = vrot.lane.b32.xlu0 %v16235_v10, %s10780_s1  ;;  %v12263_v10 = vadd.f32 %v1975_v3, %v16234_v48 }
 0x5a9   :  { %2586 = vrot.lane.b32.xlu1 %v16236_v34, %s10780_s1  ;;  %v1980_v34 = vmul.f32 0.17677669, %v12046_v50  ;;  %v12282_v50 = vadd.f32 %v1981_v59, %v16234_v48 }
 0x5aa   :  { %v12260_v42 = vpop.permute.xlu1 %2775 }
 0x5ab   :  { %16239 = vst [vmem:[#allocation86_spill] sm:$0xff] %v12260_v42  ;;  %v12270_v1 = vadd.f32 %v1980_v34, %v16234_v48 }
 0x5ac   :  { %v12247_v52 = vpop.permute.xlu0 %2576 }
 0x5ae   :  { %v12266_v6 = vpop.permute.xlu1 %2580 }
 0x5b0   :  { %v12249_v56 = vpop.permute.xlu0 %2769 }
 0x5b1   :  { %16237 = vst [vmem:[#allocation84_spill] sm:$0xff] %v12249_v56  ;;  %9458 = vmatprep.subr.msk.bf16.mxu1 %vm701_vm0, %v12249_v56 }
 0x5b2   :  { %v12278_v3 = vpop.permute.xlu1 %2779 }
 0x5b3   :  { %16240 = vst [vmem:[#allocation87_spill] sm:$0xff] %v12278_v3 }
 0x5b4   :  { %v12289_v29 = vpop.permute.xlu0 %2773 }
 0x5b5   :  { %16241 = vst [vmem:[#allocation88_spill] sm:$0xff] %v12289_v29 }
 0x5b8   :  { %v12292_v3 = vpop.permute.xlu0 %2777 }
 0x5b9   :  { %16242 = vst [vmem:[#allocation89_spill] sm:$0xff] %v12292_v3 }
 0x5bc   :  { %v12294_v56 = vpop.permute.xlu0 %2582 }
 0x5cd   :  { %2064 = vmax.xlane.f32.xlu1 %v12263_v10 }
 0x5d1   :  { %2074 = vmax.xlane.f32.xlu1 %v12270_v1 }
 0x5d5   :  { %2070 = vmax.xlane.f32.xlu1 %v12275_v2 }
 0x5d7   :  { %v2179_v34 = vpop.xlane.xlu1 %2178 }
 0x5d9   :  { %2076 = vmax.xlane.f32.xlu1 %v12282_v50 }
 0x5db   :  { %v2175_v42 = vpop.xlane.xlu1 %2174 }
 0x5dd   :  { %2072 = vmax.xlane.f32.xlu1 %v12287_v49 }
 0x5df   :  { %v2181_v30 = vpop.xlane.xlu1 %2180 }
 0x5e0   :  { %10007 = vrcp.f32 %v2181_v30 }
 0x5e1   :  { %10009 = vrcp.f32 %v2175_v42 }
 0x5e2   :  { %10011 = vrcp.f32 %v2179_v34 }
 0x5e3   :  { %v2187_v27 = vpop.xlane.xlu1 %2186 }
 0x5e7   :  { %v2183_v59 = vpop.xlane.xlu1 %2182 }
 0x5ea   :  { %v10008_v29 = vpop.eup %10007 }
 0x5eb   :  { %v2189_v62 = vpop.xlane.xlu1 %2188  ;;  %v10010_v44 = vpop.eup %10009  ;;  %v2273_v55 = vmul.f32 %v10008_v29, %v12122_v58 }
 0x5ec   :  { %v10012_v47 = vpop.eup %10011  ;;  %v2270_v42 = vmul.f32 %v10010_v44, %v12117_v60  ;;  %v2633_v44 = vsel %vm701_vm0, %v12178_v57, 0 }
 0x5ed   :  { %v2177_v53 = vpop.xlane.xlu0 %2176 }
 0x5ee   :  { %10013 = vrcp.f32 %v2177_v53 }
 0x5ef   :  { %10015 = vrcp.f32 %v2183_v59  ;;  %v2191_v36 = vpop.xlane.xlu1 %2190  ;;  %v2272_v59 = vmul.f32 %v10012_v47, %v12113_v38 }
 0x5f1   :  { %v2185_v48 = vpop.xlane.xlu0 %2184 }
 0x5f2   :  { %10017 = vrcp.f32 %v2185_v48 }
 0x5f3   :  { %10019 = vrcp.f32 %v2189_v62 }
 0x5f4   :  { %10021 = vrcp.f32 %v2187_v27  ;;  %v2303_v27 = vpack.c.bf16 %v2273_v55, %v2272_v59 }
 0x5f5   :  { %v2195_v8 = vpop.xlane.xlu0 %2194 }
 0x5f8   :  { %v10014_v3 = vpop.eup %10013 }
 0x5f9   :  { %v2197_v15 = vpop.xlane.xlu0 %2196  ;;  %v2271_v34 = vmul.f32 %v10014_v3, %v12138_v23  ;;  %v10016_v30 = vpop.eup %10015 }
 0x5fa   :  { %10023 = vrcp.f32 %v2197_v15  ;;  %v2274_v58 = vmul.f32 %v10016_v30, %v12130_v21 }
 0x5fb   :  { %v2302_v48 = vpack.c.bf16 %v2271_v34, %v2270_v42  ;;  %10025 = vrcp.f32 %v2191_v36 }
 0x5fc   :  { %v10018_v53 = vpop.eup %10017  ;;  %10027 = vrcp.f32 %v2195_v8 }
 0x5fd   :  { %v10020_v62 = vpop.eup %10019  ;;  %v2193_v39 = vpop.xlane.xlu0 %2192  ;;  %9050 = vmatprep.mubr.bf16.mxu0 %v2302_v48  ;;  %v2275_v29 = vmul.f32 %v10018_v53, %v12144_v61 }
 0x5fe   :  { %10029 = vrcp.f32 %v2193_v39  ;;  %9051 = vmatmul.mubr.bf16.vlgmr.msra.gmra.mrb[80].mxu0 %v2303_v27  ;;  %v10022_v60 = vpop.eup %10021  ;;  %v2277_v55 = vmul.f32 %v10020_v62, %v12134_v43  ;;  %v2636_v39 = vsel %vm701_vm0, %v12191_v0, 0 }
 0x5ff   :  { %9099 = vmatpush3.bf16.xpose.msra.mxu0 %v2633_v44  ;;  %v2304_v15 = vpack.c.bf16 %v2275_v29, %v2274_v58  ;;  %v2276_v36 = vmul.f32 %v10022_v60, %v12126_v5 }
 0x600   :  { %9451 = vmatprep.subr.msk.bf16.mxu0 %vm701_vm0, %v12191_v0 }
 0x601   :  { %9054 = vmatprep.mubr.bf16.mxu0 %v2304_v15  ;;  %v2305_v47 = vpack.c.bf16 %v2277_v55, %v2276_v36 }
 0x604   :  { %v10024_v8 = vpop.eup %10023 }
 0x605   :  { %v10026_v38 = vpop.eup %10025  ;;  %v2281_v57 = vmul.f32 %v10024_v8, %v12150_v35  ;;  %v2639_v35 = vsel %vm701_vm0, %v12183_v22, 0 }
 0x606   :  { %9055 = vmatmul.mubr.bf16.gmra.mrb[84].mxu0 %v2305_v47  ;;  %v10028_v21 = vpop.eup %10027  ;;  %v2278_v3 = vmul.f32 %v10026_v38, %v12141_v13 }
 0x607   :  { %9101 = vmatpush3.bf16.xpose.msra.mxu0 %v2636_v39  ;;  %v2201_v23 = vpop.xlane.xlu0 %2200  ;;  %v2280_v42 = vmul.f32 %v10028_v21, %v12147_v54 }
 0x608   :  { %v10030_v61 = vpop.eup %10029  ;;  %9452 = vmatprep.subr.msk.bf16.mxu0 %vm701_vm0, %v12183_v22  ;;  %10031 = vrcp.f32 %v2201_v23  ;;  %v2642_v22 = vsel %vm701_vm0, %v12203_v4, 0 }
 0x609   :  { %v2203_v43 = vpop.xlane.xlu1 %2202  ;;  %v2279_v5 = vmul.f32 %v10030_v61, %v12156_v24  ;;  %v2307_v59 = vpack.c.bf16 %v2281_v57, %v2280_v42 }
 0x60b   :  { %v2051_v34 = vpop.xlane.xlu0 %2050  ;;  %v2306_v30 = vpack.c.bf16 %v2279_v5, %v2278_v3  ;;  %v2648_v3 = vsel %vm701_vm0, %v12234_v26, 0 }
 0x60c   :  { %v2096_v0 = vsub.f32 %v12167_v16, %v2051_v34 }
 0x60d   :  { %9058 = vmatprep.mubr.bf16.mxu0 %v2306_v30  ;;  %v2199_v48 = vpop.xlane.xlu1 %2198  ;;  %v2654_v30 = vsel %vm701_vm0, %v12241_v14, 0 }
 0x60e   :  { %v2146_v53 = vmul.f32 1.442695, %v2096_v0  ;;  %10033 = vrcp.f32 %v2199_v48  ;;  %9059 = vmatmul.mubr.bf16.gmra.mrb[88].mxu0 %v2307_v59  ;;  %v16243_v0 = vld [vmem:[#allocation23_spill] sm:$0xff] }
 0x60f   :  { %10035 = vrcp.f32 %v2203_v43  ;;  %9103 = vmatpush3.bf16.xpose.msra.mxu0 %v2639_v35  ;;  %v2047_v13 = vpop.xlane.xlu0 %2046 }
 0x610   :  { %10037 = vpow2.f32 %v2146_v53  ;;  %v2094_v54 = vsub.f32 %v12175_v37, %v2047_v13  ;;  %9453 = vmatprep.subr.msk.bf16.mxu0 %vm701_vm0, %v12203_v4 }
 0x611   :  { %v2205_v24 = vpop.xlane.xlu1 %2204 }
 0x612   :  { %v2142_v16 = vmul.f32 1.442695, %v2094_v54  ;;  %10039 = vrcp.f32 %v2205_v24  ;;  %v10032_v62 = vpop.eup %10031  ;;  %v16244_v54 = vld [vmem:[#allocation15_spill] sm:$0xff] }
 0x613   :  { %v2283_v55 = vmul.f32 %v10032_v62, %v12161_v17  ;;  %v2055_v47 = vpop.xlane.xlu0 %2054 }
 0x614   :  { %10041 = vpow2.f32 %v2142_v16  ;;  %v2098_v17 = vsub.f32 %v12188_v41, %v2055_v47 }
 0x615   :  { %v2053_v27 = vpop.xlane.xlu1 %2052 }
 0x616   :  { %v2097_v58 = vsub.f32 %v12195_v12, %v2053_v27 }
 0x617   :  { %9105 = vmatpush3.bf16.xpose.msra.mxu0 %v2642_v22  ;;  %v2067_v34 = vpop.xlane.xlu0 %2066 }
 0x618   :  { %v10034_v29 = vpop.eup %10033  ;;  %v2148_v44 = vmul.f32 1.442695, %v2097_v58  ;;  %9454 = vmatprep.subr.msk.bf16.mxu0 %vm701_vm0, %v12215_v28 }
 0x619   :  { %v10036_v37 = vpop.eup %10035  ;;  %v2049_v60 = vpop.xlane.xlu1 %2048  ;;  %v2282_v15 = vmul.f32 %v10034_v29, %v12172_v20 }
 0x61a   :  { %v12329_v36 = vpop.eup %10037  ;;  %10043 = vpow2.f32 %v2148_v44  ;;  %v2095_v12 = vsub.f32 %v12207_v63, %v2049_v60  ;;  %v2284_v21 = vmul.f32 %v10036_v37, %v12164_v33  ;;  %v2645_v63 = vsel %vm701_vm0, %v12215_v28, 0 }
 0x61b   :  { %2210 = vadd.xlane.f32.xlu0 %v12329_v36  ;;  %v2308_v4 = vpack.c.bf16 %v2283_v55, %v2282_v15 }
 0x61c   :  { %v10040_v8 = vpop.eup %10039  ;;  %v2144_v38 = vmul.f32 1.442695, %v2095_v12 }
 0x61d   :  { %9062 = vmatprep.mubr.bf16.mxu0 %v2308_v4  ;;  %v2059_v39 = vpop.xlane.xlu1 %2058  ;;  %v2285_v23 = vmul.f32 %v10040_v8, %v12185_v19  ;;  %v2150_v19 = vmul.f32 1.442695, %v2098_v17  ;;  %v16247_v17 = vld [vmem:[#allocation31_spill] sm:$0xff] }
 0x61e   :  { %v12335_v20 = vpop.eup %10041  ;;  %10045 = vpow2.f32 %v2144_v38  ;;  %v2100_v61 = vsub.f32 %v12219_v32, %v2059_v39 }
 0x61f   :  { %9107 = vmatpush3.bf16.xpose.msra.mxu0 %v2645_v63  ;;  %2206 = vadd.xlane.f32.xlu1 %v12335_v20  ;;  %v2309_v57 = vpack.c.bf16 %v2285_v23, %v2284_v21  ;;  %v16246_v23 = vld [vmem:[#allocation37_spill] sm:$0xff] }
 0x620   :  { %v2154_v43 = vmul.f32 1.442695, %v2100_v61  ;;  %9455 = vmatprep.subr.msk.bf16.mxu0 %vm701_vm0, %v12234_v26  ;;  %v16248_v61 = vld [vmem:[#allocation9_spill] sm:$0xff] }
 0x621   :  { %9063 = vmatmul.mubr.bf16.gmra.mrb[92].mxu0 %v2309_v57  ;;  %v2061_v33 = vpop.xlane.xlu1 %2060  ;;  %v16249_v63 = vld [vmem:[#allocation5_spill] sm:$0xff] }
 0x622   :  { %10047 = vpow2.f32 %v2154_v43  ;;  %v2101_v41 = vsub.f32 %v12230_v18, %v2061_v33  ;;  %9114 = vmatprep.mubr.msk.bf16.mxu0 %vm701_vm0, %v12247_v52  ;;  %v2651_v52 = vsel %vm701_vm0, %v12253_v7, 0  ;;  %v16250_v57 = vld [vmem:[#allocation17_spill] sm:$0xff] }
 0x623   :  { %10049 = vpow2.f32 %v2150_v19  ;;  %v16251_v43 = vld [vmem:[#allocation13_spill] sm:$0xff] }
 0x624   :  { %v12347_v32 = vpop.eup %10043  ;;  %v2156_v28 = vmul.f32 1.442695, %v2101_v41 }
 0x625   :  { %2212 = vadd.xlane.f32.xlu1 %v12347_v32  ;;  %v2057_v48 = vpop.xlane.xlu1 %2056 }
 0x626   :  { %10051 = vpow2.f32 %v2156_v28  ;;  %v2099_v35 = vsub.f32 %v12238_v45, %v2057_v48 }
 0x627   :  { %9109 = vmatpush3.bf16.xpose.msra.mxu0 %v2648_v3 }
 0x628   :  { %v12352_v5 = vpop.eup %10045  ;;  %9456 = vmatprep.subr.msk.bf16.mxu0 %vm701_vm0, %v12253_v7  ;;  %v2063_v7 = vpop.xlane.xlu0 %2062  ;;  %v2152_v13 = vmul.f32 1.442695, %v2099_v35 }
 0x629   :  { %2208 = vadd.xlane.f32.xlu0 %v12352_v5  ;;  %v2102_v24 = vsub.f32 %v12212_v9, %v2063_v7 }
 0x62a   :  { %10053 = vpow2.f32 %v2152_v13 }
 0x62b   :  { %v2158_v16 = vmul.f32 1.442695, %v2102_v24  ;;  %v16253_v24 = vld [vmem:[#allocation85_spill] sm:$0xff] }
 0x62c   :  { %v12357_v18 = vpop.eup %10047  ;;  %v2069_v59 = vpop.xlane.xlu0 %2068 }
 0x62d   :  { %2218 = vadd.xlane.f32.xlu0 %v12357_v18  ;;  %v12362_v42 = vpop.eup %10049 }
 0x62f   :  { %9111 = vmatpush3.bf16.xpose.msra.mxu0 %v2651_v52 }
 0x630   :  { %9457 = vmatprep.subr.msk.bf16.mxu0 %vm701_vm0, %v12241_v14  ;;  %v12367_v26 = vpop.eup %10051  ;;  %v2585_v53 = vpop.permute.xlu0 %2584  ;;  %v2104_v14 = vsub.f32 %v12200_v31, %v2067_v34 }
 0x631   :  { %2214 = vadd.xlane.f32.xlu0 %v12362_v42 }
 0x634   :  { %v12388_v27 = vpop.eup %10053 }
 0x635   :  { %2220 = vadd.xlane.f32.xlu0 %v12367_v26 }
 0x636   :  { %2588 = vrot.lane.b32.xlu1 %v16243_v0, %s10780_s1 }
 0x637   :  { %9113 = vmatpush3.bf16.xpose.msra.mxu0 %v2654_v30 }
 0x63e   :  { %9115 = vmatmul.mubr.msk.bf16.vlgmr.msra.gmra.mrb[96].mxu0 %vm701_vm0, %v12255_v40  ;;  %v2587_v40 = vpop.permute.xlu1 %2586 }
 0x63f   :  { %9118 = vmatprep.mubr.msk.bf16.mxu0 %vm701_vm0, %v12266_v6  ;;  %v2162_v6 = vmul.f32 1.442695, %v2104_v14 }
 0x641   :  { %10055 = vpow2.f32 %v2162_v6 }
 0x642   :  { %10057 = vpow2.f32 %v2158_v16 }
 0x646   :  { %9119 = vmatmul.mubr.msk.bf16.gmra.mrb[100].mxu0 %vm701_vm0, %v12294_v56  ;;  %v2105_v56 = vsub.f32 %v12226_v11, %v2069_v59 }
 0x647   :  { %9122 = vmatprep.mubr.msk.bf16.mxu0 %vm701_vm0, %v2585_v53 }
 0x648   :  { %v2164_v45 = vmul.f32 1.442695, %v2105_v56 }
 0x64a   :  { %10059 = vpow2.f32 %v2164_v45 }
 0x64b   :  { %2781 = vrot.lane.b32.xlu0 %v16244_v54, %s10780_s1  ;;  %v12392_v58 = vpop.eup %10055 }
 0x64c   :  { %v12396_v11 = vpop.eup %10057 }
 0x64e   :  { %9123 = vmatmul.mubr.msk.bf16.gmra.mrb[104].mxu0 %vm701_vm0, %v2587_v40  ;;  %v16252_v40 = vld [vmem:[#allocation84_spill] sm:$0xff] }
 0x64f   :  { %v2810_v6 = vsel %vm701_vm0, %v16252_v40, 0 }
 0x654   :  { %v12400_v15 = vpop.eup %10059 }
 0x65a   :  { %2216 = vadd.xlane.f32.xlu1 %v12388_v27  ;;  %v2065_v31 = vpop.xlane.xlu1 %2064 }
 0x65b   :  { %v2103_v62 = vsub.f32 %v12263_v10, %v2065_v31 }
 0x65d   :  { %v2160_v22 = vmul.f32 1.442695, %v2103_v62 }
 0x65e   :  { %2226 = vadd.xlane.f32.xlu1 %v12392_v58  ;;  %v2075_v9 = vpop.xlane.xlu1 %2074 }
 0x65f   :  { %10061 = vpow2.f32 %v2160_v22  ;;  %v2108_v29 = vsub.f32 %v12270_v1, %v2075_v9  ;;  %v16259_v9 = vld [vmem:[#allocation86_spill] sm:$0xff] }
 0x661   :  { %v2170_v44 = vmul.f32 1.442695, %v2108_v29 }
 0x662   :  { %2222 = vadd.xlane.f32.xlu1 %v12396_v11  ;;  %v2071_v37 = vpop.xlane.xlu1 %2070 }
 0x663   :  { %10063 = vpow2.f32 %v2170_v44  ;;  %v2106_v60 = vsub.f32 %v12275_v2, %v2071_v37 }
 0x665   :  { %v2166_v10 = vmul.f32 1.442695, %v2106_v60 }
 0x666   :  { %2228 = vadd.xlane.f32.xlu1 %v12400_v15  ;;  %v2077_v55 = vpop.xlane.xlu1 %2076 }
 0x667   :  { %10065 = vpow2.f32 %v2166_v10  ;;  %v2109_v12 = vsub.f32 %v12282_v50, %v2077_v55 }
 0x669   :  { %v12404_v47 = vpop.eup %10061  ;;  %v2172_v1 = vmul.f32 1.442695, %v2109_v12 }
 0x66a   :  { %2224 = vadd.xlane.f32.xlu1 %v12404_v47  ;;  %v2073_v4 = vpop.xlane.xlu1 %2072 }
 0x66b   :  { %10067 = vpow2.f32 %v2172_v1  ;;  %v2107_v8 = vsub.f32 %v12287_v49, %v2073_v4  ;;  %v16245_v49 = vld [vmem:[#allocation27_spill] sm:$0xff]  ;;  %v2819_v1 = vsel %vm701_vm0, %v16259_v9, 0  ;;  %v16264_v4 = vld [vmem:[#allocation89_spill] sm:$0xff] }
 0x66d   :  { %v12408_v38 = vpop.eup %10063  ;;  %v2168_v2 = vmul.f32 1.442695, %v2107_v8 }
 0x66e   :  { %2234 = vadd.xlane.f32.xlu0 %v12408_v38 }
 0x66f   :  { %10069 = vpow2.f32 %v2168_v2 }
 0x671   :  { %v12411_v39 = vpop.eup %10065 }
 0x672   :  { %2230 = vadd.xlane.f32.xlu0 %v12411_v39 }
 0x675   :  { %v12414_v50 = vpop.eup %10067 }
 0x676   :  { %2236 = vadd.xlane.f32.xlu0 %v12414_v50 }
 0x679   :  { %v12417_v21 = vpop.eup %10069 }
 0x67a   :  { %2232 = vadd.xlane.f32.xlu1 %v12417_v21 }
 0x68b   :  { %2783 = vrot.lane.b32.xlu1 %v11169_v46, %s10780_s1 }
 0x68c   :  { %2590 = vrot.lane.b32.xlu0 %v16158_v51, %s10780_s1 }
 0x68f   :  { %2755 = vrot.lane.b32.xlu1 %v11259_v25, %s10780_s1 }
 0x690   :  { %2753 = vrot.lane.b32.xlu0 %v16245_v49, %s10780_s1 }
 0x693   :  { %2759 = vrot.lane.b32.xlu1 %v16246_v23, %s10780_s1 }
 0x694   :  { %2757 = vrot.lane.b32.xlu0 %v16247_v17, %s10780_s1  ;;  %v16323_v17 = vld [vmem:[#allocation38_spill] sm:$0xff] }
 0x697   :  { %2763 = vrot.lane.b32.xlu1 %v16248_v61, %s10780_s1 }
 0x698   :  { %2761 = vrot.lane.b32.xlu0 %v16249_v63, %s10780_s1 }
 0x69b   :  { %2767 = vrot.lane.b32.xlu1 %v16250_v57, %s10780_s1 }
 0x69c   :  { %2765 = vrot.lane.b32.xlu0 %v16251_v43, %s10780_s1 }
 0x6a8   :  { %v2211_v19 = vpop.xlane.xlu0 %2210 }
 0x6ac   :  { %v2207_v33 = vpop.xlane.xlu1 %2206 }
 0x6b2   :  { %v2213_v41 = vpop.xlane.xlu1 %2212 }
 0x6b3   :  { %10071 = vrcp.f32 %v2213_v41 }
 0x6b4   :  { %10073 = vrcp.f32 %v2207_v33 }
 0x6b5   :  { %10075 = vrcp.f32 %v2211_v19 }
 0x6b6   :  { %v2209_v28 = vpop.xlane.xlu0 %2208  ;;  %v2589_v3 = vpop.permute.xlu1 %2588 }
 0x6b7   :  { %10077 = vrcp.f32 %v2209_v28  ;;  %9126 = vmatprep.mubr.msk.bf16.mxu0 %vm701_vm0, %v2589_v3 }
 0x6ba   :  { %v2219_v62 = vpop.xlane.xlu0 %2218 }
 0x6bd   :  { %v10072_v52 = vpop.eup %10071 }
 0x6be   :  { %v10074_v34 = vpop.eup %10073  ;;  %v2289_v59 = vmul.f32 %v10072_v52, %v12347_v32  ;;  %v2813_v32 = vsel %vm701_vm0, %v16253_v24, 0  ;;  %v2215_v55 = vpop.xlane.xlu0 %2214  ;;  %v2822_v52 = vsel %vm701_vm0, %v16264_v4, 0 }
 0x6bf   :  { %v10076_v30 = vpop.eup %10075  ;;  %v2286_v48 = vmul.f32 %v10074_v34, %v12335_v20  ;;  %v16254_v20 = vld [vmem:[#allocation88_spill] sm:$0xff]  ;;  %10079 = vrcp.f32 %v2215_v55 }
 0x6c0   :  { %v2288_v35 = vmul.f32 %v10076_v30, %v12329_v36  ;;  %v2816_v22 = vsel %vm701_vm0, %v16254_v20, 0  ;;  %v16269_v30 = vld [vmem:[#allocation87_spill] sm:$0xff] }
 0x6c1   :  { %v10078_v7 = vpop.eup %10077 }
 0x6c2   :  { %v2287_v53 = vmul.f32 %v10078_v7, %v12352_v5  ;;  %v2311_v13 = vpack.c.bf16 %v2289_v59, %v2288_v35  ;;  %v2221_v33 = vpop.xlane.xlu0 %2220 }
 0x6c3   :  { %10081 = vrcp.f32 %v2221_v33 }
 0x6c4   :  { %v2310_v14 = vpack.c.bf16 %v2287_v53, %v2286_v48  ;;  %10083 = vrcp.f32 %v2219_v62  ;;  %v2825_v48 = vsel %vm701_vm0, %v16269_v30, 0 }
 0x6c6   :  { %9082 = vmatprep.mubr.bf16.mxu1 %v2310_v14  ;;  %v2782_v14 = vpop.permute.xlu0 %2781 }
 0x6c7   :  { %9083 = vmatmul.mubr.bf16.vlgmr.msra.gmra.mrb[112].mxu1 %v2311_v13 }
 0x6c8   :  { %9131 = vmatpush3.bf16.xpose.msra.mxu1 %v2810_v6 }
 0x6c9   :  { %9459 = vmatprep.subr.msk.bf16.mxu1 %vm701_vm0, %v16253_v24  ;;  %v10080_v59 = vpop.eup %10079 }
 0x6ca   :  { %v2290_v24 = vmul.f32 %v10080_v59, %v12362_v42 }
 0x6cd   :  { %v10082_v35 = vpop.eup %10081 }
 0x6ce   :  { %v10084_v13 = vpop.eup %10083 }
 0x6cf   :  { %v2292_v55 = vmul.f32 %v10084_v13, %v12357_v18 }
 0x6d0   :  { %9133 = vmatpush3.bf16.xpose.msra.mxu1 %v2813_v32 }
 0x6d1   :  { %9460 = vmatprep.subr.msk.bf16.mxu1 %vm701_vm0, %v16254_v20  ;;  %v12453_v5 = vpop.f32.mrb[80].mxu0  ;;  %v2293_v20 = vmul.f32 %v10082_v35, %v12367_v26  ;;  %v2828_v26 = vsel %vm701_vm0, %v2782_v14, 0 }
 0x6d2   :  { %16255 = vst [vmem:[#allocation23_spill] sm:$0xff] %v12453_v5  ;;  %v12455_v36 = vpop.f32.mrb[81].mxu0  ;;  %v16308_v5 = vld [vmem:[#allocation45_spill] sm:$0xff] }
 0x6d3   :  { %16256 = vst [vmem:[#allocation15_spill] sm:$0xff] %v12455_v36  ;;  %v12457_v16 = vpop.f32.mrb[82].mxu0  ;;  %v2313_v33 = vpack.c.bf16 %v2293_v20, %v2292_v55  ;;  %v16310_v36 = vld [vmem:[#allocation22_spill] sm:$0xff] }
 0x6d4   :  { %16257 = vst [vmem:[#allocation84_spill] sm:$0xff] %v12457_v16  ;;  %v12461_v45 = vpop.f32.mrb[83].mxu0 }
 0x6d5   :  { %16258 = vst [vmem:[#allocation85_spill] sm:$0xff] %v12461_v45 }
 0x6d8   :  { %9135 = vmatpush3.bf16.xpose.msra.mxu1 %v2816_v22 }
 0x6d9   :  { %9461 = vmatprep.subr.msk.bf16.mxu1 %vm701_vm0, %v16259_v9  ;;  %v12469_v29 = vpop.f32.mrb[84].mxu0 }
 0x6da   :  { %16260 = vst [vmem:[#allocation88_spill] sm:$0xff] %v12469_v29  ;;  %v12471_v44 = vpop.f32.mrb[85].mxu0  ;;  %v16306_v29 = vld [vmem:[#allocation20_spill] sm:$0xff] }
 0x6db   :  { %16261 = vst [vmem:[#allocation86_spill] sm:$0xff] %v12471_v44  ;;  %v12473_v37 = vpop.f32.mrb[86].mxu0  ;;  %v16302_v44 = vld [vmem:[#allocation10_spill] sm:$0xff] }
 0x6dc   :  { %16262 = vst [vmem:[#allocation90_spill] sm:$0xff] %v12473_v37  ;;  %v12477_v10 = vpop.f32.mrb[87].mxu0  ;;  %v16307_v37 = vld [vmem:[#allocation24_spill] sm:$0xff] }
 0x6dd   :  { %16263 = vst [vmem:[#allocation91_spill] sm:$0xff] %v12477_v10  ;;  %v16303_v10 = vld [vmem:[#allocation43_spill] sm:$0xff] }
 0x6e0   :  { %9137 = vmatpush3.bf16.xpose.msra.mxu1 %v2819_v1 }
 0x6e1   :  { %9462 = vmatprep.subr.msk.bf16.mxu1 %vm701_vm0, %v16264_v4  ;;  %v12485_v8 = vpop.f32.mrb[88].mxu0 }
 0x6e2   :  { %16265 = vst [vmem:[#allocation89_spill] sm:$0xff] %v12485_v8  ;;  %v12487_v2 = vpop.f32.mrb[89].mxu0 }
 0x6e3   :  { %16266 = vst [vmem:[#allocation92_spill] sm:$0xff] %v12487_v2  ;;  %v12489_v19 = vpop.f32.mrb[90].mxu0  ;;  %v16301_v2 = vld [vmem:[#allocation44_spill] sm:$0xff] }
 0x6e4   :  { %16267 = vst [vmem:[#allocation93_spill] sm:$0xff] %v12489_v19  ;;  %v12493_v28 = vpop.f32.mrb[91].mxu0 }
 0x6e5   :  { %16268 = vst [vmem:[#allocation94_spill] sm:$0xff] %v12493_v28 }
 0x6e7   :  { %v2217_v34 = vpop.xlane.xlu1 %2216 }
 0x6e8   :  { %9139 = vmatpush3.bf16.xpose.msra.mxu1 %v2822_v52  ;;  %10085 = vrcp.f32 %v2217_v34 }
 0x6e9   :  { %9463 = vmatprep.subr.msk.bf16.mxu1 %vm701_vm0, %v16269_v30 }
 0x6eb   :  { %v2227_v7 = vpop.xlane.xlu1 %2226 }
 0x6ef   :  { %v2223_v53 = vpop.xlane.xlu1 %2222 }
 0x6f0   :  { %9141 = vmatpush3.bf16.xpose.msra.mxu1 %v2825_v48 }
 0x6f1   :  { %9464 = vmatprep.subr.msk.bf16.mxu1 %vm701_vm0, %v2782_v14 }
 0x6f2   :  { %v10086_v40 = vpop.eup %10085 }
 0x6f3   :  { %v2229_v6 = vpop.xlane.xlu1 %2228  ;;  %v2291_v32 = vmul.f32 %v10086_v40, %v12388_v27 }
 0x6f4   :  { %v12507_v62 = vpop.f32.mrb[92].mxu0  ;;  %10087 = vrcp.f32 %v2229_v6 }
 0x6f5   :  { %16270 = vst [vmem:[#allocation87_spill] sm:$0xff] %v12507_v62  ;;  %v12509_v22 = vpop.f32.mrb[93].mxu0  ;;  %v2312_v9 = vpack.c.bf16 %v2291_v32, %v2290_v24  ;;  %10089 = vrcp.f32 %v2223_v53  ;;  %v16300_v62 = vld [vmem:[#allocation6_spill] sm:$0xff] }
 0x6f6   :  { %16271 = vst [vmem:[#allocation95_spill] sm:$0xff] %v12509_v22  ;;  %v12512_v1 = vpop.f32.mrb[94].mxu0  ;;  %10091 = vrcp.f32 %v2227_v7  ;;  %v16298_v22 = vld [vmem:[#allocation42_spill] sm:$0xff] }
 0x6f7   :  { %16272 = vst [vmem:[#allocation96_spill] sm:$0xff] %v12512_v1  ;;  %v12516_v42 = vpop.f32.mrb[95].mxu0  ;;  %9086 = vmatprep.mubr.bf16.mxu1 %v2312_v9  ;;  %v2225_v27 = vpop.xlane.xlu1 %2224 }
 0x6f8   :  { %16273 = vst [vmem:[#allocation97_spill] sm:$0xff] %v12516_v42  ;;  %9143 = vmatpush3.bf16.xpose.msra.mxu1 %v2828_v26  ;;  %10093 = vrcp.f32 %v2225_v27  ;;  %v16299_v42 = vld [vmem:[#allocation14_spill] sm:$0xff] }
 0x6f9   :  { %9087 = vmatmul.mubr.bf16.gmra.mrb[116].mxu1 %v2313_v33 }
 0x6fb   :  { %v2235_v18 = vpop.xlane.xlu0 %2234 }
 0x6fe   :  { %v10088_v34 = vpop.eup %10087 }
 0x6ff   :  { %v2231_v30 = vpop.xlane.xlu0 %2230  ;;  %v10090_v7 = vpop.eup %10089  ;;  %v2297_v53 = vmul.f32 %v10088_v34, %v12400_v15 }
 0x700   :  { %v10092_v59 = vpop.eup %10091  ;;  %v2294_v13 = vmul.f32 %v10090_v7, %v12396_v11 }
 0x701   :  { %v2296_v40 = vmul.f32 %v10092_v59, %v12392_v58 }
 0x702   :  { %v10094_v48 = vpop.eup %10093 }
 0x703   :  { %v2237_v35 = vpop.xlane.xlu0 %2236  ;;  %v2295_v14 = vmul.f32 %v10094_v48, %v12404_v47  ;;  %v2315_v24 = vpack.c.bf16 %v2297_v53, %v2296_v40 }
 0x704   :  { %10095 = vrcp.f32 %v2237_v35  ;;  %v16274_v35 = vld [vmem:[#allocation53_spill] sm:$0xff] }
 0x705   :  { %v2314_v6 = vpack.c.bf16 %v2295_v14, %v2294_v13  ;;  %10097 = vrcp.f32 %v2231_v30 }
 0x706   :  { %10099 = vrcp.f32 %v2235_v18 }
 0x707   :  { %v2591_v32 = vpop.permute.xlu0 %2590  ;;  %9090 = vmatprep.mubr.bf16.mxu1 %v2314_v6  ;;  %v2233_v20 = vpop.xlane.xlu1 %2232 }
 0x708   :  { %10101 = vrcp.f32 %v2233_v20  ;;  %9091 = vmatmul.mubr.bf16.gmra.mrb[120].mxu1 %v2315_v24  ;;  %9127 = vmatmul.mubr.msk.bf16.gmra.mrb[108].mxu0 %vm701_vm0, %v2591_v32 }
 0x70b   :  { %v2784_v15 = vpop.permute.xlu1 %2783 }
 0x70c   :  { %9465 = vmatprep.subr.msk.bf16.mxu1 %vm701_vm0, %v2784_v15  ;;  %v2831_v11 = vsel %vm701_vm0, %v2784_v15, 0 }
 0x70d   :  { %9145 = vmatpush3.bf16.xpose.msra.mxu1 %v2831_v11 }
 0x70e   :  { %v10096_v47 = vpop.eup %10095 }
 0x70f   :  { %v10098_v58 = vpop.eup %10097  ;;  %v2301_v33 = vmul.f32 %v10096_v47, %v12414_v50  ;;  %v2754_v50 = vpop.permute.xlu0 %2753 }
 0x710   :  { %v10100_v9 = vpop.eup %10099  ;;  %v2298_v30 = vmul.f32 %v10098_v58, %v12411_v39 }
 0x711   :  { %v9116_v55 = vpop.f32.mrb[96].mxu0  ;;  %v2300_v48 = vmul.f32 %v10100_v9, %v12408_v38  ;;  %v2756_v9 = vpop.permute.xlu1 %2755 }
 0x712   :  { %v10102_v26 = vpop.eup %10101  ;;  %v2690_v27 = vpop.f32.mrb[97].mxu0  ;;  %v2932_v53 = vmul.f32 0.17677669, %v9116_v55 }
 0x713   :  { %v2930_v18 = vmul.f32 0.17677669, %v2690_v27  ;;  %v9117_v34 = vpop.f32.mrb[98].mxu0  ;;  %v2299_v7 = vmul.f32 %v10102_v26, %v12417_v21  ;;  %v2317_v6 = vpack.c.bf16 %v2301_v33, %v2300_v48  ;;  %v2758_v27 = vpop.permute.xlu0 %2757 }
 0x714   :  { %v2693_v59 = vpop.f32.mrb[99].mxu0  ;;  %v12540_v39 = vadd.f32 %v2932_v53, %v16274_v35  ;;  %v2933_v21 = vmul.f32 0.17677669, %v9117_v34 }
 0x715   :  { %v12533_v13 = vadd.f32 %v2930_v18, %v16274_v35  ;;  %v2931_v14 = vmul.f32 0.17677669, %v2693_v59  ;;  %v2316_v40 = vpack.c.bf16 %v2299_v7, %v2298_v30 }
 0x716   :  { %v12546_v11 = vadd.f32 %v2933_v21, %v16274_v35 }
 0x717   :  { %v12536_v24 = vadd.f32 %v2931_v14, %v16274_v35  ;;  %2994 = vmax.xlane.f32.xlu0 %v12533_v13  ;;  %9094 = vmatprep.mubr.bf16.mxu1 %v2316_v40 }
 0x718   :  { %9095 = vmatmul.mubr.bf16.gmra.mrb[124].mxu1 %v2317_v6  ;;  %v2760_v6 = vpop.permute.xlu1 %2759 }
 0x719   :  { %v9120_v38 = vpop.f32.mrb[100].mxu0  ;;  %2996 = vmax.xlane.f32.xlu1 %v12536_v24  ;;  %9146 = vmatprep.mubr.msk.bf16.mxu1 %vm701_vm0, %v2754_v50 }
 0x71a   :  { %v2706_v32 = vpop.f32.mrb[101].mxu0  ;;  %v2936_v33 = vmul.f32 0.17677669, %v9120_v38  ;;  %v2762_v38 = vpop.permute.xlu0 %2761 }
 0x71b   :  { %v9121_v20 = vpop.f32.mrb[102].mxu0  ;;  %2998 = vmax.xlane.f32.xlu0 %v12540_v39  ;;  %v2934_v47 = vmul.f32 0.17677669, %v2706_v32 }
 0x71c   :  { %v2709_v15 = vpop.f32.mrb[103].mxu0  ;;  %v2937_v55 = vmul.f32 0.17677669, %v9121_v20  ;;  %v12563_v53 = vadd.f32 %v2936_v33, %v16274_v35 }
 0x71d   :  { %v2935_v58 = vmul.f32 0.17677669, %v2709_v15  ;;  %v12554_v18 = vadd.f32 %v2934_v47, %v16274_v35 }
 0x71e   :  { %v12559_v7 = vadd.f32 %v2937_v55, %v16274_v35 }
 0x71f   :  { %v12549_v26 = vadd.f32 %v2935_v58, %v16274_v35  ;;  %3000 = vmax.xlane.f32.xlu0 %v12546_v11  ;;  %v2764_v58 = vpop.permute.xlu1 %2763 }
 0x720   :  { %9147 = vmatmul.mubr.msk.bf16.vlgmr.msra.gmra.mrb[128].mxu1 %vm701_vm0, %v2756_v9  ;;  %v2766_v9 = vpop.permute.xlu0 %2765 }
 0x721   :  { %v9124_v34 = vpop.f32.mrb[104].mxu0  ;;  %3004 = vmax.xlane.f32.xlu1 %v12549_v26  ;;  %9150 = vmatprep.mubr.msk.bf16.mxu1 %vm701_vm0, %v2758_v27 }
 0x722   :  { %v2722_v30 = vpop.f32.mrb[105].mxu0  ;;  %v2940_v32 = vmul.f32 0.17677669, %v9124_v34 }
 0x723   :  { %v9125_v59 = vpop.f32.mrb[106].mxu0  ;;  %3002 = vmax.xlane.f32.xlu0 %v12554_v18  ;;  %v2938_v14 = vmul.f32 0.17677669, %v2722_v30  ;;  %v2768_v55 = vpop.permute.xlu1 %2767 }
 0x724   :  { %v2725_v48 = vpop.f32.mrb[107].mxu0  ;;  %v2941_v50 = vmul.f32 0.17677669, %v9125_v59  ;;  %v12581_v47 = vadd.f32 %v2940_v32, %v16274_v35 }
 0x725   :  { %v2939_v40 = vmul.f32 0.17677669, %v2725_v48  ;;  %3008 = vmax.xlane.f32.xlu1 %v12559_v7  ;;  %v12572_v20 = vadd.f32 %v2938_v14, %v16274_v35 }
 0x726   :  { %v12577_v15 = vadd.f32 %v2941_v50, %v16274_v35 }
 0x727   :  { %v12567_v21 = vadd.f32 %v2939_v40, %v16274_v35  ;;  %3006 = vmax.xlane.f32.xlu0 %v12563_v53 }
 0x728   :  { %9151 = vmatmul.mubr.msk.bf16.gmra.mrb[132].mxu1 %vm701_vm0, %v2760_v6 }
 0x729   :  { %3012 = vmax.xlane.f32.xlu1 %v12567_v21  ;;  %9154 = vmatprep.mubr.msk.bf16.mxu1 %vm701_vm0, %v2762_v38 }
 0x72b   :  { %3010 = vmax.xlane.f32.xlu0 %v12572_v20 }
 0x72d   :  { %3016 = vmax.xlane.f32.xlu1 %v12577_v15 }
 0x72f   :  { %3014 = vmax.xlane.f32.xlu0 %v12581_v47 }
 0x730   :  { %9155 = vmatmul.mubr.msk.bf16.gmra.mrb[136].mxu1 %vm701_vm0, %v2764_v58 }
 0x731   :  { %9158 = vmatprep.mubr.msk.bf16.mxu1 %vm701_vm0, %v2766_v9 }
 0x738   :  { %9159 = vmatmul.mubr.msk.bf16.gmra.mrb[140].mxu1 %vm701_vm0, %v2768_v55 }
 0x79a   :  { %v12588_v27 = vpop.f32.mrb[112].mxu1 }
 0x79b   :  { %16275 = vst [vmem:[#allocation98_spill] sm:$0xff] %v12588_v27  ;;  %v12590_v33 = vpop.f32.mrb[113].mxu1 }
 0x79c   :  { %16276 = vst [vmem:[#allocation99_spill] sm:$0xff] %v12590_v33  ;;  %v12592_v34 = vpop.f32.mrb[114].mxu1  ;;  %v16297_v33 = vld [vmem:[#allocation41_spill] sm:$0xff] }
 0x79d   :  { %16277 = vst [vmem:[#allocation100_spill] sm:$0xff] %v12592_v34  ;;  %v12596_v59 = vpop.f32.mrb[115].mxu1 }
 0x79e   :  { %16278 = vst [vmem:[#allocation101_spill] sm:$0xff] %v12596_v59 }
 0x7a4   :  { %v2995_v16 = vpop.xlane.xlu0 %2994 }
 0x7a8   :  { %v2999_v45 = vpop.xlane.xlu0 %2998 }
 0x7cc   :  { %v12600_v14 = vpop.f32.mrb[116].mxu1 }
 0x7cd   :  { %16279 = vst [vmem:[#allocation102_spill] sm:$0xff] %v12600_v14  ;;  %v12602_v40 = vpop.f32.mrb[117].mxu1  ;;  %v16296_v14 = vld [vmem:[#allocation40_spill] sm:$0xff] }
 0x7ce   :  { %16280 = vst [vmem:[#allocation103_spill] sm:$0xff] %v12602_v40  ;;  %v12604_v6 = vpop.f32.mrb[118].mxu1 }
 0x7cf   :  { %16281 = vst [vmem:[#allocation104_spill] sm:$0xff] %v12604_v6  ;;  %v12608_v38 = vpop.f32.mrb[119].mxu1 }
 0x7d0   :  { %16282 = vst [vmem:[#allocation105_spill] sm:$0xff] %v12608_v38  ;;  %v16295_v38 = vld [vmem:[#allocation39_spill] sm:$0xff] }
 0x7db   :  { %v12612_v58 = vpop.f32.mrb[120].mxu1  ;;  %v9128_v9 = vpop.f32.mrb[108].mxu0 }
 0x7dc   :  { %16283 = vst [vmem:[#allocation106_spill] sm:$0xff] %v12612_v58  ;;  %v12614_v55 = vpop.f32.mrb[121].mxu1  ;;  %v2738_v48 = vpop.f32.mrb[109].mxu0  ;;  %v2944_v12 = vmul.f32 0.17677669, %v9128_v9  ;;  %v16291_v58 = vld [vmem:[#allocation33_spill] sm:$0xff] }
 0x7dd   :  { %16284 = vst [vmem:[#allocation107_spill] sm:$0xff] %v12614_v55  ;;  %v2942_v30 = vmul.f32 0.17677669, %v2738_v48  ;;  %v12616_v52 = vpop.f32.mrb[122].mxu1  ;;  %v9129_v4 = vpop.f32.mrb[110].mxu0 }
 0x7de   :  { %16285 = vst [vmem:[#allocation108_spill] sm:$0xff] %v12616_v52  ;;  %v12620_v41 = vpop.f32.mrb[123].mxu1  ;;  %v2741_v50 = vpop.f32.mrb[111].mxu0  ;;  %v2945_v31 = vmul.f32 0.17677669, %v9129_v4  ;;  %v12632_v40 = vadd.f32 %v2944_v12, %v16274_v35  ;;  %v16292_v52 = vld [vmem:[#allocation34_spill] sm:$0xff] }
 0x7df   :  { %16286 = vst [vmem:[#allocation109_spill] sm:$0xff] %v12620_v41  ;;  %v12623_v60 = vadd.f32 %v2942_v30, %v16274_v35  ;;  %v2943_v56 = vmul.f32 0.17677669, %v2741_v50 }
 0x7e0   :  { %v12636_v9 = vadd.f32 %v2945_v31, %v16274_v35 }
 0x7e1   :  { %v12628_v48 = vadd.f32 %v2943_v56, %v16274_v35  ;;  %3018 = vmax.xlane.f32.xlu0 %v12623_v60  ;;  %v16322_v35 = vld [vmem:[#allocation32_spill] sm:$0xff] }
 0x7e3   :  { %3020 = vmax.xlane.f32.xlu1 %v12628_v48 }
 0x7e5   :  { %3022 = vmax.xlane.f32.xlu0 %v12632_v40 }
 0x7e7   :  { %3024 = vmax.xlane.f32.xlu1 %v12636_v9 }
 0x7eb   :  { %v12640_v30 = vpop.f32.mrb[124].mxu1 }
 0x7ec   :  { %16287 = vst [vmem:[#allocation110_spill] sm:$0xff] %v12640_v30  ;;  %v12642_v4 = vpop.f32.mrb[125].mxu1  ;;  %v16293_v30 = vld [vmem:[#allocation35_spill] sm:$0xff] }
 0x7ed   :  { %16288 = vst [vmem:[#allocation111_spill] sm:$0xff] %v12642_v4  ;;  %v12644_v56 = vpop.f32.mrb[126].mxu1 }
 0x7ee   :  { %16289 = vst [vmem:[#allocation112_spill] sm:$0xff] %v12644_v56  ;;  %v12648_v12 = vpop.f32.mrb[127].mxu1  ;;  %v16294_v56 = vld [vmem:[#allocation36_spill] sm:$0xff] }
 0x7ef   :  { %16290 = vst [vmem:[#allocation113_spill] sm:$0xff] %v12648_v12 }
 0x7f3   :  { %v12652_v31 = vpop.f32.mrb[128].mxu1 }
 0x7f4   :  { %v12654_v3 = vpop.f32.mrb[129].mxu1 }
 0x7f5   :  { %v12656_v55 = vpop.f32.mrb[130].mxu1 }
 0x7f6   :  { %v12658_v41 = vpop.f32.mrb[131].mxu1 }
 0x7f8   :  { %3300 = vrot.lane.b32.xlu1 %v16291_v58, %s10780_s1  ;;  %v16321_v58 = vld [vmem:[#allocation16_spill] sm:$0xff] }
 0x7fb   :  { %3298 = vrot.lane.b32.xlu0 %v16292_v52, %s10780_s1  ;;  %v12664_v50 = vpop.f32.mrb[132].mxu1 }
 0x7fc   :  { %3304 = vrot.lane.b32.xlu1 %v16293_v30, %s10780_s1  ;;  %v12668_v32 = vpop.f32.mrb[133].mxu1 }
 0x7fd   :  { %v12670_v4 = vpop.f32.mrb[134].mxu1 }
 0x7fe   :  { %v12672_v12 = vpop.f32.mrb[135].mxu1 }
 0x7ff   :  { %3302 = vrot.lane.b32.xlu0 %v16294_v56, %s10780_s1 }
 0x800   :  { %3308 = vrot.lane.b32.xlu1 %v16295_v38, %s10780_s1  ;;  %v2949_v38 = vmul.f32 0.17677669, %v12656_v55  ;;  %v2952_v55 = vmul.f32 0.17677669, %v12664_v50 }
 0x803   :  { %3306 = vrot.lane.b32.xlu0 %v16296_v14, %s10780_s1  ;;  %v12680_v6 = vpop.f32.mrb[136].mxu1 }
 0x804   :  { %3312 = vrot.lane.b32.xlu1 %v16297_v33, %s10780_s1  ;;  %v12684_v59 = vpop.f32.mrb[137].mxu1 }
 0x805   :  { %v12686_v27 = vpop.f32.mrb[138].mxu1 }
 0x806   :  { %v12688_v34 = vpop.f32.mrb[139].mxu1 }
 0x807   :  { %3310 = vrot.lane.b32.xlu0 %v16298_v22, %s10780_s1  ;;  %v16315_v22 = vld [vmem:[#allocation26_spill] sm:$0xff] }
 0x808   :  { %3560 = vrot.lane.b32.xlu1 %v16299_v42, %s10781_s15  ;;  %v16304_v42 = vld [vmem:[#allocation18_spill] sm:$0xff] }
 0x80b   :  { %3556 = vrot.lane.b32.xlu0 %v16300_v62, %s10781_s15  ;;  %v12696_v1 = vpop.f32.mrb[140].mxu1  ;;  %v16305_v62 = vld [vmem:[#allocation46_spill] sm:$0xff] }
 0x80c   :  { %3419 = vrot.lane.b32.xlu1 %v16301_v2, %s10780_s1  ;;  %v12700_v28 = vpop.f32.mrb[141].mxu1  ;;  %v16314_v2 = vld [vmem:[#allocation49_spill] sm:$0xff] }
 0x80d   :  { %v12702_v8 = vpop.f32.mrb[142].mxu1 }
 0x80e   :  { %v12704_v19 = vpop.f32.mrb[143].mxu1 }
 0x80f   :  { %3558 = vrot.lane.b32.xlu0 %v16302_v44, %s10781_s15  ;;  %v16309_v44 = vld [vmem:[#allocation8_spill] sm:$0xff] }
 0x810   :  { %3421 = vrot.lane.b32.xlu1 %v16303_v10, %s10780_s1  ;;  %v3058_v10 = vsub.f32 %v12533_v13, %v2995_v16 }
 0x812   :  { %v3090_v33 = vmul.f32 1.442695, %v3058_v10 }
 0x813   :  { %3562 = vrot.lane.b32.xlu0 %v16304_v42, %s10781_s15  ;;  %v16311_v42 = vld [vmem:[#allocation48_spill] sm:$0xff] }
 0x814   :  { %3423 = vrot.lane.b32.xlu1 %v16305_v62, %s10780_s1  ;;  %v16312_v62 = vld [vmem:[#allocation47_spill] sm:$0xff] }
 0x817   :  { %3564 = vrot.lane.b32.xlu0 %v16306_v29, %s10781_s15  ;;  %v3001_v29 = vpop.xlane.xlu0 %3000 }
 0x818   :  { %3568 = vrot.lane.b32.xlu1 %v16307_v37, %s10781_s15  ;;  %v16313_v37 = vld [vmem:[#allocation50_spill] sm:$0xff] }
 0x81b   :  { %3425 = vrot.lane.b32.xlu0 %v16308_v5, %s10780_s1  ;;  %v3060_v5 = vsub.f32 %v12540_v39, %v2999_v45 }
 0x81c   :  { %3542 = vrot.lane.b32.xlu1 %v16309_v44, %s10781_s15  ;;  %v3003_v44 = vpop.xlane.xlu0 %3002 }
 0x81f   :  { %3566 = vrot.lane.b32.xlu0 %v16310_v36, %s10781_s15  ;;  %v3094_v36 = vmul.f32 1.442695, %v3060_v5  ;;  %v3062_v5 = vsub.f32 %v12554_v18, %v3003_v44 }
 0x820   :  { %v3007_v30 = vpop.xlane.xlu0 %3006 }
 0x821   :  { %10103 = vpow2.f32 %v3094_v36  ;;  %v3098_v10 = vmul.f32 1.442695, %v3062_v5 }
 0x822   :  { %10105 = vpow2.f32 %v3090_v33 }
 0x823   :  { %3427 = vrot.lane.b32.xlu0 %v16311_v42, %s10780_s1  ;;  %v2997_v42 = vpop.xlane.xlu1 %2996 }
 0x824   :  { %v3059_v33 = vsub.f32 %v12536_v24, %v2997_v42 }
 0x827   :  { %3429 = vrot.lane.b32.xlu0 %v16312_v62, %s10780_s1  ;;  %v3061_v62 = vsub.f32 %v12546_v11, %v3001_v29  ;;  %v3005_v45 = vpop.xlane.xlu1 %3004  ;;  %v3011_v29 = vpop.xlane.xlu0 %3010 }
 0x828   :  { %v3063_v44 = vsub.f32 %v12549_v26, %v3005_v45 }
 0x829   :  { %v3096_v39 = vmul.f32 1.442695, %v3061_v62  ;;  %v3092_v62 = vmul.f32 1.442695, %v3059_v33 }
 0x82a   :  { %v3100_v24 = vmul.f32 1.442695, %v3063_v44 }
 0x82b   :  { %3431 = vrot.lane.b32.xlu0 %v16313_v37, %s10780_s1  ;;  %v16316_v37 = vld [vmem:[#allocation4_spill] sm:$0xff]  ;;  %10107 = vpow2.f32 %v3096_v39  ;;  %v3009_v13 = vpop.xlane.xlu1 %3008  ;;  %v3015_v36 = vpop.xlane.xlu0 %3014 }
 0x82c   :  { %v3065_v11 = vsub.f32 %v12559_v7, %v3009_v13  ;;  %v3068_v42 = vsub.f32 %v12581_v47, %v3015_v36 }
 0x82e   :  { %v3110_v45 = vmul.f32 1.442695, %v3068_v42 }
 0x82f   :  { %3433 = vrot.lane.b32.xlu0 %v16314_v2, %s10780_s1  ;;  %v3064_v2 = vsub.f32 %v12563_v53, %v3007_v30  ;;  %v3104_v53 = vmul.f32 1.442695, %v3065_v11  ;;  %v3013_v18 = vpop.xlane.xlu1 %3012 }
 0x830   :  { %v3067_v13 = vsub.f32 %v12567_v21, %v3013_v18 }
 0x831   :  { %v3102_v16 = vmul.f32 1.442695, %v3064_v2  ;;  %v3066_v2 = vsub.f32 %v12572_v20, %v3011_v29 }
 0x832   :  { %v3108_v29 = vmul.f32 1.442695, %v3067_v13 }
 0x833   :  { %3570 = vrot.lane.b32.xlu0 %v16315_v22, %s10781_s15  ;;  %v12741_v22 = vpop.eup %10103  ;;  %10109 = vpow2.f32 %v3102_v16  ;;  %v3106_v7 = vmul.f32 1.442695, %v3066_v2  ;;  %v3017_v5 = vpop.xlane.xlu1 %3016 }
 0x834   :  { %10111 = vpow2.f32 %v3098_v10  ;;  %v3069_v26 = vsub.f32 %v12577_v15, %v3017_v5 }
 0x835   :  { %10113 = vpow2.f32 %v3104_v53 }
 0x836   :  { %10115 = vpow2.f32 %v3092_v62  ;;  %v3112_v10 = vmul.f32 1.442695, %v3069_v26 }
 0x837   :  { %3540 = vrot.lane.b32.xlu0 %v16316_v37, %s10781_s15  ;;  %v12745_v37 = vpop.eup %10105  ;;  %10117 = vpow2.f32 %v3106_v7 }
 0x838   :  { %v12750_v30 = vpop.eup %10107  ;;  %10119 = vpow2.f32 %v3100_v24 }
 0x839   :  { %10121 = vpow2.f32 %v3110_v45 }
 0x83a   :  { %10123 = vpow2.f32 %v3112_v10 }
 0x83b   :  { %10125 = vpow2.f32 %v3108_v29 }
 0x83d   :  { %v12754_v39 = vpop.eup %10109 }
 0x83e   :  { %v12758_v20 = vpop.eup %10111 }
 0x83f   :  { %v12762_v16 = vpop.eup %10113 }
 0x840   :  { %3158 = vadd.xlane.f32.xlu1 %v12741_v22  ;;  %v12766_v47 = vpop.eup %10115 }
 0x841   :  { %v12769_v11 = vpop.eup %10117 }
 0x842   :  { %v12772_v15 = vpop.eup %10119 }
 0x843   :  { %v12775_v21 = vpop.eup %10121 }
 0x844   :  { %3154 = vadd.xlane.f32.xlu1 %v12745_v37  ;;  %v12778_v33 = vpop.eup %10123 }
 0x845   :  { %v12781_v53 = vpop.eup %10125 }
 0x848   :  { %3160 = vadd.xlane.f32.xlu1 %v12750_v30 }
 0x84c   :  { %3166 = vadd.xlane.f32.xlu1 %v12754_v39 }
 0x850   :  { %3162 = vadd.xlane.f32.xlu1 %v12758_v20 }
 0x854   :  { %3168 = vadd.xlane.f32.xlu1 %v12762_v16 }
 0x856   :  { %3156 = vadd.xlane.f32.xlu0 %v12766_v47 }
 0x858   :  { %3170 = vadd.xlane.f32.xlu1 %v12769_v11 }
 0x85a   :  { %3164 = vadd.xlane.f32.xlu0 %v12772_v15 }
 0x85e   :  { %3174 = vadd.xlane.f32.xlu0 %v12775_v21 }
 0x862   :  { %3176 = vadd.xlane.f32.xlu0 %v12778_v33 }
 0x866   :  { %3172 = vadd.xlane.f32.xlu0 %v12781_v53 }
 0x86e   :  { %v3019_v2 = vpop.xlane.xlu0 %3018 }
 0x86f   :  { %v3070_v36 = vsub.f32 %v12623_v60, %v3019_v2 }
 0x870   :  { %v3021_v18 = vpop.xlane.xlu1 %3020 }
 0x871   :  { %v3071_v62 = vsub.f32 %v12628_v48, %v3021_v18  ;;  %v3114_v45 = vmul.f32 1.442695, %v3070_v36 }
 0x872   :  { %v3023_v44 = vpop.xlane.xlu0 %3022 }
 0x873   :  { %v3116_v7 = vmul.f32 1.442695, %v3071_v62  ;;  %v3072_v24 = vsub.f32 %v12632_v40, %v3023_v44  ;;  %v2948_v40 = vmul.f32 0.17677669, %v12652_v31  ;;  %v16317_v44 = vld [vmem:[#allocation54_spill] sm:$0xff] }
 0x874   :  { %v3025_v42 = vpop.xlane.xlu1 %3024 }
 0x875   :  { %10127 = vpow2.f32 %v3116_v7  ;;  %v3118_v5 = vmul.f32 1.442695, %v3072_v24  ;;  %v3073_v13 = vsub.f32 %v12636_v9, %v3025_v42  ;;  %v12795_v36 = vadd.f32 %v2948_v40, %v16317_v44 }
 0x876   :  { %v3299_v26 = vpop.permute.xlu0 %3298  ;;  %v2946_v7 = vmul.f32 0.17677669, %v12654_v3 }
 0x877   :  { %10129 = vpow2.f32 %v3118_v5  ;;  %9162 = vmatprep.subr.bf16.mxu0 %v3299_v26  ;;  %v3120_v48 = vmul.f32 1.442695, %v3073_v13 }
 0x878   :  { %9163 = vmatpush3.bf16.msra.mxu0 %v3299_v26  ;;  %v3301_v10 = vpop.permute.xlu1 %3300  ;;  %10131 = vpow2.f32 %v3114_v45  ;;  %v12803_v5 = vadd.f32 %v2946_v7, %v16317_v44  ;;  %v16318_v7 = vld [vmem:[#allocation30_spill] sm:$0xff] }
 0x879   :  { %9164 = vmatprep.subr.bf16.mxu0 %v3301_v10  ;;  %10133 = vpow2.f32 %v3120_v48 }
 0x87a   :  { %v3303_v29 = vpop.permute.xlu0 %3302 }
 0x87c   :  { %9165 = vmatpush3.bf16.msra.mxu0 %v3301_v10  ;;  %v3305_v60 = vpop.permute.xlu1 %3304 }
 0x87d   :  { %9166 = vmatprep.subr.bf16.mxu0 %v3303_v29 }
 0x87e   :  { %v3307_v2 = vpop.permute.xlu0 %3306 }
 0x87f   :  { %v12789_v18 = vpop.eup %10127 }
 0x880   :  { %3180 = vadd.xlane.f32.xlu0 %v12789_v18  ;;  %9167 = vmatpush3.bf16.msra.mxu0 %v3303_v29  ;;  %v3309_v9 = vpop.permute.xlu1 %3308 }
 0x881   :  { %v12792_v62 = vpop.eup %10129  ;;  %9168 = vmatprep.subr.bf16.mxu0 %v3305_v60 }
 0x882   :  { %v3311_v24 = vpop.permute.xlu0 %3310  ;;  %3182 = vadd.xlane.f32.xlu1 %v12792_v62  ;;  %v12800_v42 = vpop.eup %10131 }
 0x883   :  { %v12811_v45 = vpop.eup %10133 }
 0x884   :  { %3030 = vmax.xlane.f32.xlu0 %v12795_v36  ;;  %9169 = vmatpush3.bf16.msra.mxu0 %v3305_v60  ;;  %v3313_v31 = vpop.permute.xlu1 %3312 }
 0x885   :  { %9170 = vmatprep.subr.bf16.mxu0 %v3307_v2 }
 0x886   :  { %v12805_v26 = vpop.permute.xlu0 %3556  ;;  %3178 = vadd.xlane.f32.xlu1 %v12800_v42 }
 0x888   :  { %3026 = vmax.xlane.f32.xlu0 %v12803_v5  ;;  %9171 = vmatpush3.bf16.msra.mxu0 %v3307_v2  ;;  %v12809_v3 = vpop.permute.xlu1 %3560 }
 0x889   :  { %9172 = vmatprep.subr.bf16.mxu0 %v3309_v9 }
 0x88a   :  { %v12813_v13 = vpop.permute.xlu0 %3558  ;;  %3184 = vadd.xlane.f32.xlu1 %v12811_v45 }
 0x88c   :  { %9173 = vmatpush3.bf16.msra.mxu0 %v3309_v9  ;;  %v3420_v10 = vpop.permute.xlu1 %3419 }
 0x88d   :  { %9174 = vmatprep.subr.bf16.mxu0 %v3311_v24  ;;  %9194 = vmatprep.subr.bf16.mxu1 %v3420_v10 }
 0x88e   :  { %v12816_v29 = vpop.permute.xlu0 %3562  ;;  %9195 = vmatpush3.bf16.msra.mxu1 %v3420_v10  ;;  %v16319_v10 = vld [vmem:[#allocation28_spill] sm:$0xff] }
 0x890   :  { %9175 = vmatpush3.bf16.msra.mxu0 %v3311_v24  ;;  %v3422_v48 = vpop.permute.xlu1 %3421 }
 0x891   :  { %9176 = vmatprep.subr.bf16.mxu0 %v3313_v31  ;;  %9196 = vmatprep.subr.bf16.mxu1 %v3422_v48 }
 0x892   :  { %v12818_v60 = vpop.permute.xlu0 %3564  ;;  %9197 = vmatpush3.bf16.msra.mxu1 %v3422_v48 }
 0x894   :  { %9177 = vmatpush3.bf16.msra.mxu0 %v3313_v31  ;;  %v3424_v40 = vpop.permute.xlu1 %3423 }
 0x895   :  { %9198 = vmatprep.subr.bf16.mxu1 %v3424_v40  ;;  %9466 = vmatprep.subr.msk.bf16.mxu0 %vm701_vm0, %v12805_v26 }
 0x896   :  { %v3426_v2 = vpop.permute.xlu0 %3425  ;;  %9199 = vmatpush3.bf16.msra.mxu1 %v3424_v40 }
 0x897   :  { %9200 = vmatprep.subr.bf16.mxu1 %v3426_v2 }
 0x89a   :  { %v12822_v9 = vpop.permute.xlu0 %3566  ;;  %9201 = vmatpush3.bf16.msra.mxu1 %v3426_v2  ;;  %v2950_v2 = vmul.f32 0.17677669, %v12668_v32 }
 0x89b   :  { %3735 = vrot.lane.b32.xlu1 %v16318_v7, %s10781_s15 }
 0x89c   :  { %v12831_v7 = vadd.f32 %v2950_v2, %v16317_v44  ;;  %v2953_v2 = vmul.f32 0.17677669, %v12670_v4 }
 0x89e   :  { %v3428_v24 = vpop.permute.xlu0 %3427  ;;  %3733 = vrot.lane.b32.xlu0 %v16319_v10, %s10781_s15  ;;  %v2956_v10 = vmul.f32 0.17677669, %v12680_v6 }
 0x89f   :  { %9202 = vmatprep.subr.bf16.mxu1 %v3428_v24 }
 0x8a0   :  { %9203 = vmatpush3.bf16.msra.mxu1 %v3428_v24  ;;  %v12835_v24 = vadd.f32 %v2949_v38, %v16317_v44  ;;  %v12853_v38 = vpop.permute.xlu1 %3568 }
 0x8a2   :  { %v3430_v31 = vpop.permute.xlu0 %3429 }
 0x8a3   :  { %9204 = vmatprep.subr.bf16.mxu1 %v3430_v31 }
 0x8a4   :  { %9205 = vmatpush3.bf16.msra.mxu1 %v3430_v31  ;;  %v2947_v31 = vmul.f32 0.17677669, %v12658_v41  ;;  %v2957_v41 = vmul.f32 0.17677669, %v12686_v27  ;;  %v2951_v27 = vmul.f32 0.17677669, %v12672_v12 }
 0x8a5   :  { %v16320_v12 = vld [vmem:[#allocation12_spill] sm:$0xff] }
 0x8a6   :  { %v3432_v48 = vpop.permute.xlu0 %3431  ;;  %v12845_v32 = vadd.f32 %v2947_v31, %v16317_v44  ;;  %v12862_v50 = vadd.f32 %v2957_v41, %v16317_v44  ;;  %v12869_v31 = vpop.permute.xlu1 %3542  ;;  %v12874_v4 = vadd.f32 %v2951_v27, %v16317_v44 }
 0x8a7   :  { %9206 = vmatprep.subr.bf16.mxu1 %v3432_v48 }
 0x8a8   :  { %9207 = vmatpush3.bf16.msra.mxu1 %v3432_v48  ;;  %v12840_v48 = vadd.f32 %v2956_v10, %v16317_v44  ;;  %v12866_v10 = vadd.f32 %v2953_v2, %v16317_v44 }
 0x8aa   :  { %v3434_v40 = vpop.permute.xlu0 %3433 }
 0x8ab   :  { %9208 = vmatprep.subr.bf16.mxu1 %v3434_v40 }
 0x8ac   :  { %9209 = vmatpush3.bf16.msra.mxu1 %v3434_v40  ;;  %v2954_v40 = vmul.f32 0.17677669, %v12684_v59  ;;  %v12857_v59 = vadd.f32 %v2952_v55, %v16317_v44 }
 0x8ae   :  { %v12850_v6 = vadd.f32 %v2954_v40, %v16317_v44  ;;  %v12877_v56 = vpop.permute.xlu0 %3570 }
 0x8b2   :  { %v12879_v14 = vpop.permute.xlu0 %3540 }
 0x8bd   :  { %3034 = vmax.xlane.f32.xlu0 %v12831_v7 }
 0x8bf   :  { %3032 = vmax.xlane.f32.xlu1 %v12835_v24 }
 0x8c1   :  { %3046 = vmax.xlane.f32.xlu0 %v12840_v48 }
 0x8c3   :  { %3028 = vmax.xlane.f32.xlu1 %v12845_v32 }
 0x8c5   :  { %3042 = vmax.xlane.f32.xlu0 %v12850_v6 }
 0x8c7   :  { %3038 = vmax.xlane.f32.xlu1 %v12857_v59 }
 0x8c9   :  { %3048 = vmax.xlane.f32.xlu0 %v12862_v50 }
 0x8cb   :  { %3040 = vmax.xlane.f32.xlu1 %v12866_v10 }
 0x8cd   :  { %v3159_v40 = vpop.xlane.xlu1 %3158 }
 0x8cf   :  { %3036 = vmax.xlane.f32.xlu1 %v12874_v4 }
 0x8d1   :  { %v3155_v55 = vpop.xlane.xlu1 %3154 }
 0x8d5   :  { %v3161_v41 = vpop.xlane.xlu1 %3160 }
 0x8d6   :  { %10135 = vrcp.f32 %v3161_v41 }
 0x8d7   :  { %10137 = vrcp.f32 %v3155_v55 }
 0x8d8   :  { %10139 = vrcp.f32 %v3159_v40 }
 0x8d9   :  { %v3167_v2 = vpop.xlane.xlu1 %3166 }
 0x8dd   :  { %v3163_v52 = vpop.xlane.xlu1 %3162 }
 0x8df   :  { %3544 = vrot.lane.b32.xlu0 %v16320_v12, %s10781_s15 }
 0x8e0   :  { %3546 = vrot.lane.b32.xlu1 %v16321_v58, %s10781_s15  ;;  %v10136_v12 = vpop.eup %10135 }
 0x8e1   :  { %v3169_v43 = vpop.xlane.xlu1 %3168  ;;  %v10138_v58 = vpop.eup %10137  ;;  %v3253_v40 = vmul.f32 %v10136_v12, %v12750_v30 }
 0x8e2   :  { %v10140_v41 = vpop.eup %10139 }
 0x8e3   :  { %v3157_v27 = vpop.xlane.xlu0 %3156 }
 0x8e4   :  { %10141 = vrcp.f32 %v3157_v27  ;;  %3737 = vrot.lane.b32.xlu1 %v16322_v35, %s10781_s15  ;;  %v3250_v35 = vmul.f32 %v10138_v58, %v12745_v37  ;;  %v3597_v37 = vsel %vm701_vm0, %v12805_v26, 0 }
 0x8e5   :  { %10143 = vrcp.f32 %v3163_v52  ;;  %v3171_v27 = vpop.xlane.xlu1 %3170 }
 0x8e7   :  { %v3165_v63 = vpop.xlane.xlu0 %3164 }
 0x8e8   :  { %10145 = vrcp.f32 %v3165_v63  ;;  %3739 = vrot.lane.b32.xlu1 %v16323_v17, %s10781_s15  ;;  %v3252_v63 = vmul.f32 %v10140_v41, %v12741_v22 }
 0x8e9   :  { %10147 = vrcp.f32 %v3169_v43 }
 0x8ea   :  { %10149 = vrcp.f32 %v3167_v2  ;;  %v3283_v2 = vpack.c.bf16 %v3253_v40, %v3252_v63  ;;  %v2961_v63 = vmul.f32 0.17677669, %v12702_v8 }
 0x8eb   :  { %v3175_v49 = vpop.xlane.xlu0 %3174 }
 0x8ee   :  { %v10142_v55 = vpop.eup %10141 }
 0x8ef   :  { %v3177_v57 = vpop.xlane.xlu0 %3176  ;;  %v3251_v52 = vmul.f32 %v10142_v55, %v12766_v47  ;;  %v10144_v61 = vpop.eup %10143 }
 0x8f0   :  { %10151 = vrcp.f32 %v3177_v57  ;;  %v3254_v30 = vmul.f32 %v10144_v61, %v12758_v20 }
 0x8f1   :  { %v3282_v17 = vpack.c.bf16 %v3251_v52, %v3250_v35  ;;  %10153 = vrcp.f32 %v3171_v27  ;;  %v2955_v27 = vmul.f32 0.17677669, %v12688_v34  ;;  %v2958_v34 = vmul.f32 0.17677669, %v12700_v28 }
 0x8f2   :  { %v10146_v43 = vpop.eup %10145  ;;  %10155 = vrcp.f32 %v3175_v49  ;;  %v3609_v28 = vsel %vm701_vm0, %v12818_v60, 0 }
 0x8f3   :  { %v10148_v23 = vpop.eup %10147  ;;  %v3173_v25 = vpop.xlane.xlu0 %3172  ;;  %9178 = vmatprep.mubr.bf16.mxu0 %v3282_v17  ;;  %v3255_v12 = vmul.f32 %v10146_v43, %v12772_v15 }
 0x8f4   :  { %10157 = vrcp.f32 %v3173_v25  ;;  %9179 = vmatmul.mubr.bf16.vlgmr.msra.gmra.mrb[112].mxu0 %v3283_v2  ;;  %v10150_v47 = vpop.eup %10149  ;;  %v3257_v22 = vmul.f32 %v10148_v23, %v12762_v16  ;;  %v3600_v25 = vsel %vm701_vm0, %v12813_v13, 0 }
 0x8f5   :  { %9227 = vmatpush3.bf16.xpose.msra.mxu0 %v3597_v37  ;;  %v3284_v57 = vpack.c.bf16 %v3255_v12, %v3254_v30  ;;  %v3256_v49 = vmul.f32 %v10150_v47, %v12754_v39  ;;  %v12937_v30 = vadd.f32 %v2961_v63, %v16317_v44  ;;  %v2959_v12 = vmul.f32 0.17677669, %v12704_v19 }
 0x8f6   :  { %9467 = vmatprep.subr.msk.bf16.mxu0 %vm701_vm0, %v12813_v13  ;;  %v3603_v13 = vsel %vm701_vm0, %v12809_v3, 0 }
 0x8f7   :  { %9182 = vmatprep.mubr.bf16.mxu0 %v3284_v57  ;;  %v3285_v58 = vpack.c.bf16 %v3257_v22, %v3256_v49  ;;  %v12947_v47 = vadd.f32 %v2959_v12, %v16317_v44 }
 0x8fa   :  { %v10152_v61 = vpop.eup %10151 }
 0x8fb   :  { %v10154_v20 = vpop.eup %10153  ;;  %v3261_v41 = vmul.f32 %v10152_v61, %v12778_v33  ;;  %v12915_v33 = vadd.f32 %v2955_v27, %v16317_v44 }
 0x8fc   :  { %9183 = vmatmul.mubr.bf16.gmra.mrb[116].mxu0 %v3285_v58  ;;  %v10156_v15 = vpop.eup %10155  ;;  %v3258_v23 = vmul.f32 %v10154_v20, %v12769_v11  ;;  %v2960_v11 = vmul.f32 0.17677669, %v12696_v1  ;;  %v12929_v1 = vadd.f32 %v2958_v34, %v16317_v44 }
 0x8fd   :  { %9229 = vmatpush3.bf16.xpose.msra.mxu0 %v3600_v25  ;;  %v3260_v39 = vmul.f32 %v10156_v15, %v12775_v21  ;;  %v3606_v21 = vsel %vm701_vm0, %v12816_v29, 0 }
 0x8fe   :  { %v10158_v26 = vpop.eup %10157  ;;  %9468 = vmatprep.subr.msk.bf16.mxu0 %vm701_vm0, %v12809_v3  ;;  %v12922_v3 = vadd.f32 %v2960_v11, %v16317_v44 }
 0x8ff   :  { %v3259_v16 = vmul.f32 %v10158_v26, %v12781_v53  ;;  %v3287_v40 = vpack.c.bf16 %v3261_v41, %v3260_v39  ;;  %v3615_v41 = vsel %vm701_vm0, %v12853_v38, 0 }
 0x901   :  { %v3286_v55 = vpack.c.bf16 %v3259_v16, %v3258_v23 }
 0x903   :  { %9186 = vmatprep.mubr.bf16.mxu0 %v3286_v55 }
 0x904   :  { %9187 = vmatmul.mubr.bf16.gmra.mrb[120].mxu0 %v3287_v40 }
 0x905   :  { %9231 = vmatpush3.bf16.xpose.msra.mxu0 %v3603_v13 }
 0x906   :  { %9469 = vmatprep.subr.msk.bf16.mxu0 %vm701_vm0, %v12816_v29 }
 0x90c   :  { %3044 = vmax.xlane.f32.xlu1 %v12915_v33 }
 0x90d   :  { %9233 = vmatpush3.bf16.xpose.msra.mxu0 %v3606_v21  ;;  %v3181_v53 = vpop.xlane.xlu0 %3180 }
 0x90e   :  { %9470 = vmatprep.subr.msk.bf16.mxu0 %vm701_vm0, %v12818_v60  ;;  %10159 = vrcp.f32 %v3181_v53 }
 0x90f   :  { %v3183_v35 = vpop.xlane.xlu1 %3182 }
 0x910   :  { %3054 = vmax.xlane.f32.xlu1 %v12922_v3 }
 0x911   :  { %v3031_v52 = vpop.xlane.xlu0 %3030 }
 0x912   :  { %v3076_v29 = vsub.f32 %v12795_v36, %v3031_v52 }
 0x913   :  { %v3179_v17 = vpop.xlane.xlu1 %3178 }
 0x914   :  { %v3126_v43 = vmul.f32 1.442695, %v3076_v29  ;;  %10161 = vrcp.f32 %v3179_v17  ;;  %3050 = vmax.xlane.f32.xlu1 %v12929_v1 }
 0x915   :  { %10163 = vrcp.f32 %v3183_v35  ;;  %9235 = vmatpush3.bf16.xpose.msra.mxu0 %v3609_v28  ;;  %v3027_v2 = vpop.xlane.xlu0 %3026 }
 0x916   :  { %10165 = vpow2.f32 %v3126_v43  ;;  %v3074_v8 = vsub.f32 %v12803_v5, %v3027_v2  ;;  %9471 = vmatprep.subr.msk.bf16.mxu0 %vm701_vm0, %v12822_v9  ;;  %v3612_v5 = vsel %vm701_vm0, %v12822_v9, 0 }
 0x917   :  { %v3185_v36 = vpop.xlane.xlu1 %3184 }
 0x918   :  { %v3122_v37 = vmul.f32 1.442695, %v3074_v8  ;;  %10167 = vrcp.f32 %v3185_v36  ;;  %3056 = vmax.xlane.f32.xlu1 %v12937_v30  ;;  %v10160_v19 = vpop.eup %10159 }
 0x919   :  { %v12944_v60 = vpop.permute.xlu0 %3733  ;;  %v3263_v58 = vmul.f32 %v10160_v19, %v12789_v18 }
 0x91a   :  { %10169 = vpow2.f32 %v3122_v37  ;;  %9474 = vmatprep.subr.msk.bf16.mxu1 %vm701_vm0, %v12944_v60 }
 0x91c   :  { %3052 = vmax.xlane.f32.xlu1 %v12947_v47 }
 0x91d   :  { %9237 = vmatpush3.bf16.xpose.msra.mxu0 %v3612_v5 }
 0x91e   :  { %v10162_v57 = vpop.eup %10161  ;;  %9472 = vmatprep.subr.msk.bf16.mxu0 %vm701_vm0, %v12853_v38 }
 0x91f   :  { %v10164_v22 = vpop.eup %10163  ;;  %v3262_v49 = vmul.f32 %v10162_v57, %v12800_v42  ;;  %v12976_v42 = vpop.permute.xlu1 %3735 }
 0x920   :  { %v12958_v61 = vpop.eup %10165  ;;  %v3264_v15 = vmul.f32 %v10164_v22, %v12792_v62  ;;  %v3618_v62 = vsel %vm701_vm0, %v12877_v56, 0 }
 0x921   :  { %3190 = vadd.xlane.f32.xlu0 %v12958_v61  ;;  %v3288_v20 = vpack.c.bf16 %v3263_v58, %v3262_v49 }
 0x922   :  { %v10168_v25 = vpop.eup %10167 }
 0x923   :  { %9190 = vmatprep.mubr.bf16.mxu0 %v3288_v20  ;;  %v3265_v9 = vmul.f32 %v10168_v25, %v12811_v45 }
 0x924   :  { %v12963_v26 = vpop.eup %10169 }
 0x925   :  { %9239 = vmatpush3.bf16.xpose.msra.mxu0 %v3615_v41  ;;  %3186 = vadd.xlane.f32.xlu1 %v12963_v26  ;;  %v3289_v18 = vpack.c.bf16 %v3265_v9, %v3264_v15 }
 0x926   :  { %9473 = vmatprep.subr.msk.bf16.mxu0 %vm701_vm0, %v12877_v56 }
 0x927   :  { %9191 = vmatmul.mubr.bf16.gmra.mrb[124].mxu0 %v3289_v18 }
 0x928   :  { %9242 = vmatprep.mubr.msk.bf16.mxu0 %vm701_vm0, %v12879_v14 }
 0x92d   :  { %9241 = vmatpush3.bf16.xpose.msra.mxu0 %v3618_v62 }
 0x934   :  { %9243 = vmatmul.mubr.msk.bf16.vlgmr.msra.gmra.mrb[128].mxu0 %vm701_vm0, %v12869_v31 }
 0x94a   :  { %v3035_v45 = vpop.xlane.xlu0 %3034 }
 0x94b   :  { %v3078_v56 = vsub.f32 %v12831_v7, %v3035_v45 }
 0x94c   :  { %v3033_v38 = vpop.xlane.xlu1 %3032 }
 0x94d   :  { %v3077_v23 = vsub.f32 %v12835_v24, %v3033_v38  ;;  %v3130_v34 = vmul.f32 1.442695, %v3078_v56 }
 0x94e   :  { %v3047_v16 = vpop.xlane.xlu0 %3046 }
 0x94f   :  { %v3128_v39 = vmul.f32 1.442695, %v3077_v23  ;;  %v3084_v7 = vsub.f32 %v12840_v48, %v3047_v16  ;;  %v16325_v23 = vld [vmem:[#allocation7_spill] sm:$0xff] }
 0x950   :  { %v3029_v55 = vpop.xlane.xlu1 %3028 }
 0x951   :  { %10171 = vpow2.f32 %v3128_v39  ;;  %v3075_v40 = vsub.f32 %v12845_v32, %v3029_v55  ;;  %v3142_v17 = vmul.f32 1.442695, %v3084_v7  ;;  %v16326_v55 = vld [vmem:[#allocation11_spill] sm:$0xff] }
 0x952   :  { %v3043_v14 = vpop.xlane.xlu0 %3042 }
 0x953   :  { %v3124_v13 = vmul.f32 1.442695, %v3075_v40  ;;  %v3082_v37 = vsub.f32 %v12850_v6, %v3043_v14 }
 0x954   :  { %v3039_v27 = vpop.xlane.xlu1 %3038 }
 0x955   :  { %10173 = vpow2.f32 %v3124_v13  ;;  %v3080_v31 = vsub.f32 %v12857_v59, %v3039_v27  ;;  %v3138_v5 = vmul.f32 1.442695, %v3082_v37  ;;  %v16328_v13 = vld [vmem:[#allocation37_spill] sm:$0xff] }
 0x956   :  { %v3049_v11 = vpop.xlane.xlu0 %3048 }
 0x957   :  { %v3134_v21 = vmul.f32 1.442695, %v3080_v31  ;;  %v16358_v31 = vld [vmem:[#allocation34_spill] sm:$0xff] }
 0x958   :  { %v3041_v53 = vpop.xlane.xlu1 %3040 }
 0x959   :  { %10175 = vpow2.f32 %v3134_v21  ;;  %v3081_v24 = vsub.f32 %v12866_v10, %v3041_v53  ;;  %v3085_v10 = vsub.f32 %v12862_v50, %v3049_v11  ;;  %v16324_v50 = vld [vmem:[#allocation19_spill] sm:$0xff]  ;;  %v16359_v21 = vld [vmem:[#allocation40_spill] sm:$0xff] }
 0x95a   :  { %v3545_v35 = vpop.permute.xlu0 %3544  ;;  %10177 = vpow2.f32 %v3130_v34  ;;  %v16331_v34 = vld [vmem:[#allocation21_spill] sm:$0xff] }
 0x95b   :  { %v12983_v52 = vpop.eup %10171  ;;  %9246 = vmatprep.mubr.msk.bf16.mxu0 %vm701_vm0, %v3545_v35  ;;  %v3136_v63 = vmul.f32 1.442695, %v3081_v24  ;;  %v3144_v28 = vmul.f32 1.442695, %v3085_v10  ;;  %v16333_v10 = vld [vmem:[#allocation31_spill] sm:$0xff] }
 0x95c   :  { %3192 = vadd.xlane.f32.xlu1 %v12983_v52  ;;  %v3037_v32 = vpop.xlane.xlu1 %3036 }
 0x95d   :  { %10179 = vpow2.f32 %v3136_v63  ;;  %v3079_v36 = vsub.f32 %v12874_v4, %v3037_v32 }
 0x95e   :  { %10181 = vpow2.f32 %v3142_v17 }
 0x95f   :  { %v12988_v59 = vpop.eup %10173  ;;  %10183 = vpow2.f32 %v3144_v28  ;;  %v3132_v19 = vmul.f32 1.442695, %v3079_v36 }
 0x960   :  { %3188 = vadd.xlane.f32.xlu0 %v12988_v59  ;;  %v3547_v29 = vpop.permute.xlu1 %3546 }
 0x961   :  { %9247 = vmatmul.mubr.msk.bf16.gmra.mrb[132].mxu0 %vm701_vm0, %v3547_v29  ;;  %10185 = vpow2.f32 %v3132_v19  ;;  %v16332_v29 = vld [vmem:[#allocation27_spill] sm:$0xff]  ;;  %v16357_v19 = vld [vmem:[#allocation33_spill] sm:$0xff] }
 0x962   :  { %10187 = vpow2.f32 %v3138_v5  ;;  %v16334_v5 = vld [vmem:[#allocation5_spill] sm:$0xff] }
 0x963   :  { %v12993_v43 = vpop.eup %10175 }
 0x964   :  { %3198 = vadd.xlane.f32.xlu0 %v12993_v43  ;;  %v12996_v2 = vpop.eup %10177  ;;  %v13012_v57 = vpop.permute.xlu1 %3737 }
 0x967   :  { %v12999_v48 = vpop.eup %10179 }
 0x968   :  { %3194 = vadd.xlane.f32.xlu0 %v12996_v2  ;;  %v13004_v12 = vpop.eup %10181  ;;  %v13019_v58 = vpop.permute.xlu1 %3739 }
 0x969   :  { %v13007_v8 = vpop.eup %10183 }
 0x96b   :  { %v13014_v22 = vpop.eup %10185 }
 0x96c   :  { %3200 = vadd.xlane.f32.xlu0 %v12999_v48  ;;  %v13017_v49 = vpop.eup %10187 }
 0x96d   :  { %3548 = vrot.lane.b32.xlu1 %v16324_v50, %s10781_s15 }
 0x970   :  { %3206 = vadd.xlane.f32.xlu0 %v13004_v12 }
 0x974   :  { %3208 = vadd.xlane.f32.xlu0 %v13007_v8 }
 0x991   :  { %3196 = vadd.xlane.f32.xlu1 %v13014_v22 }
 0x995   :  { %3202 = vadd.xlane.f32.xlu1 %v13017_v49 }
 0x999   :  { %v3045_v20 = vpop.xlane.xlu1 %3044 }
 0x99a   :  { %v3083_v4 = vsub.f32 %v12915_v33, %v3045_v20  ;;  %v16335_v20 = vld [vmem:[#allocation13_spill] sm:$0xff] }
 0x99c   :  { %v3140_v6 = vmul.f32 1.442695, %v3083_v4 }
 0x99d   :  { %v3055_v25 = vpop.xlane.xlu1 %3054 }
 0x99e   :  { %10189 = vpow2.f32 %v3140_v6  ;;  %v3088_v15 = vsub.f32 %v12922_v3, %v3055_v25 }
 0x9a0   :  { %v3150_v9 = vmul.f32 1.442695, %v3088_v15 }
 0x9a1   :  { %v3051_v41 = vpop.xlane.xlu1 %3050 }
 0x9a2   :  { %10191 = vpow2.f32 %v3150_v9  ;;  %v3086_v18 = vsub.f32 %v12929_v1, %v3051_v41 }
 0x9a4   :  { %v3146_v62 = vmul.f32 1.442695, %v3086_v18 }
 0x9a5   :  { %v3057_v45 = vpop.xlane.xlu1 %3056 }
 0x9a6   :  { %10193 = vpow2.f32 %v3146_v62  ;;  %v3089_v38 = vsub.f32 %v12937_v30, %v3057_v45  ;;  %3741 = vrot.lane.b32.xlu1 %v16325_v23, %s10781_s15 }
 0x9a8   :  { %v13028_v16 = vpop.eup %10189  ;;  %v3152_v33 = vmul.f32 1.442695, %v3089_v38 }
 0x9a9   :  { %3204 = vadd.xlane.f32.xlu0 %v13028_v16  ;;  %v3053_v39 = vpop.xlane.xlu1 %3052 }
 0x9aa   :  { %10195 = vpow2.f32 %v3152_v33  ;;  %v3087_v3 = vsub.f32 %v12947_v47, %v3053_v39  ;;  %3743 = vrot.lane.b32.xlu1 %v16326_v55, %s10781_s15 }
 0x9ac   :  { %v13034_v1 = vpop.eup %10191  ;;  %v3148_v40 = vmul.f32 1.442695, %v3087_v3 }
 0x9ad   :  { %3214 = vadd.xlane.f32.xlu0 %v13034_v1 }
 0x9ae   :  { %10197 = vpow2.f32 %v3148_v40  ;;  %3552 = vrot.lane.b32.xlu1 %v16243_v0, %s10781_s15  ;;  %v16327_v0 = vld [vmem:[#allocation29_spill] sm:$0xff]  ;;  %v3191_v6 = vpop.xlane.xlu0 %3190 }
 0x9b0   :  { %v13039_v30 = vpop.eup %10193 }
 0x9b1   :  { %3210 = vadd.xlane.f32.xlu0 %v13039_v30 }
 0x9b2   :  { %3554 = vrot.lane.b32.xlu1 %v16158_v51, %s10781_s15  ;;  %v16329_v51 = vld [vmem:[#allocation9_spill] sm:$0xff]  ;;  %v3187_v4 = vpop.xlane.xlu1 %3186 }
 0x9b4   :  { %v13044_v47 = vpop.eup %10195 }
 0x9b5   :  { %3216 = vadd.xlane.f32.xlu0 %v13044_v47 }
 0x9b6   :  { %3745 = vrot.lane.b32.xlu1 %v16244_v54, %s10781_s15 }
 0x9b8   :  { %v13049_v14 = vpop.eup %10197 }
 0x9b9   :  { %3212 = vadd.xlane.f32.xlu0 %v13049_v14 }
 0x9ba   :  { %3747 = vrot.lane.b32.xlu1 %v11169_v46, %s10781_s15  ;;  %v16330_v46 = vld [vmem:[#allocation17_spill] sm:$0xff] }
 0x9be   :  { %3719 = vrot.lane.b32.xlu1 %v16327_v0, %s10781_s15 }
 0x9c2   :  { %3723 = vrot.lane.b32.xlu1 %v16328_v13, %s10781_s15 }
 0x9c6   :  { %3727 = vrot.lane.b32.xlu1 %v16329_v51, %s10781_s15 }
 0x9c7   :  { %v13060_v27 = vpop.f32.mrb[112].mxu0 }
 0x9c8   :  { %v13062_v56 = vpop.f32.mrb[113].mxu0 }
 0x9c9   :  { %v13064_v54 = vpop.f32.mrb[114].mxu0 }
 0x9ca   :  { %v13068_v11 = vpop.f32.mrb[115].mxu0  ;;  %3731 = vrot.lane.b32.xlu1 %v16330_v46, %s10781_s15 }
 0x9cf   :  { %v13074_v53 = vpop.f32.mrb[116].mxu0  ;;  %3550 = vrot.lane.b32.xlu0 %v16331_v34, %s10781_s15 }
 0x9d0   :  { %v13078_v24 = vpop.f32.mrb[117].mxu0 }
 0x9d1   :  { %v13080_v35 = vpop.f32.mrb[118].mxu0 }
 0x9d2   :  { %v13084_v7 = vpop.f32.mrb[119].mxu0 }
 0x9d3   :  { %3717 = vrot.lane.b32.xlu0 %v16332_v29, %s10781_s15 }
 0x9d7   :  { %v13090_v17 = vpop.f32.mrb[120].mxu0  ;;  %3721 = vrot.lane.b32.xlu0 %v16333_v10, %s10781_s15 }
 0x9d8   :  { %v13094_v28 = vpop.f32.mrb[121].mxu0 }
 0x9d9   :  { %v13096_v50 = vpop.f32.mrb[122].mxu0 }
 0x9da   :  { %v13100_v37 = vpop.f32.mrb[123].mxu0 }
 0x9db   :  { %3725 = vrot.lane.b32.xlu0 %v16334_v5, %s10781_s15 }
 0x9df   :  { %3729 = vrot.lane.b32.xlu0 %v16335_v20, %s10781_s15 }
 0x9e9   :  { %v3193_v25 = vpop.xlane.xlu1 %3192 }
 0x9ea   :  { %10199 = vrcp.f32 %v3193_v25 }
 0x9eb   :  { %10201 = vrcp.f32 %v3187_v4  ;;  %v16340_v4 = vld [vmem:[#allocation53_spill] sm:$0xff] }
 0x9ec   :  { %10203 = vrcp.f32 %v3191_v6 }
 0x9ed   :  { %v3189_v15 = vpop.xlane.xlu0 %3188  ;;  %v3549_v9 = vpop.permute.xlu1 %3548 }
 0x9ee   :  { %10205 = vrcp.f32 %v3189_v15  ;;  %9250 = vmatprep.mubr.msk.bf16.mxu0 %vm701_vm0, %v3549_v9 }
 0x9f1   :  { %v3199_v25 = vpop.xlane.xlu0 %3198 }
 0x9f4   :  { %v10200_v41 = vpop.eup %10199 }
 0x9f5   :  { %v10202_v18 = vpop.eup %10201  ;;  %v3269_v38 = vmul.f32 %v10200_v41, %v12983_v52  ;;  %v3777_v52 = vsel %vm701_vm0, %v12976_v42, 0 }
 0x9f6   :  { %v10204_v62 = vpop.eup %10203  ;;  %v3266_v23 = vmul.f32 %v10202_v18, %v12963_v26  ;;  %v3195_v18 = vpop.xlane.xlu0 %3194 }
 0x9f7   :  { %v3268_v39 = vmul.f32 %v10204_v62, %v12958_v61  ;;  %v3774_v61 = vsel %vm701_vm0, %v12944_v60, 0 }
 0x9f8   :  { %v10206_v45 = vpop.eup %10205 }
 0x9f9   :  { %v3267_v33 = vmul.f32 %v10206_v45, %v12988_v59  ;;  %v3291_v13 = vpack.c.bf16 %v3269_v38, %v3268_v39 }
 0x9fa   :  { %v13113_v3 = vpop.f32.mrb[124].mxu0  ;;  %v3201_v45 = vpop.xlane.xlu0 %3200 }
 0x9fb   :  { %16336 = vst [vmem:[#allocation14_spill] sm:$0xff] %v13113_v3  ;;  %v13115_v55 = vpop.f32.mrb[125].mxu0  ;;  %v3290_v40 = vpack.c.bf16 %v3267_v33, %v3266_v23  ;;  %10207 = vrcp.f32 %v3201_v45 }
 0x9fc   :  { %16337 = vst [vmem:[#allocation6_spill] sm:$0xff] %v13115_v55  ;;  %v13117_v0 = vpop.f32.mrb[126].mxu0  ;;  %10209 = vrcp.f32 %v3195_v18 }
 0x9fd   :  { %16338 = vst [vmem:[#allocation10_spill] sm:$0xff] %v13117_v0  ;;  %v13121_v46 = vpop.f32.mrb[127].mxu0  ;;  %9210 = vmatprep.mubr.bf16.mxu1 %v3290_v40  ;;  %10211 = vrcp.f32 %v3199_v25 }
 0x9fe   :  { %16339 = vst [vmem:[#allocation18_spill] sm:$0xff] %v13121_v46  ;;  %9211 = vmatmul.mubr.bf16.vlgmr.msra.gmra.mrb[144].mxu1 %v3291_v13 }
 0x9ff   :  { %9259 = vmatpush3.bf16.xpose.msra.mxu1 %v3774_v61 }
 0xa00   :  { %9475 = vmatprep.subr.msk.bf16.mxu1 %vm701_vm0, %v12976_v42  ;;  %v3780_v42 = vsel %vm701_vm0, %v13012_v57, 0 }
 0xa05   :  { %v10208_v33 = vpop.eup %10207 }
 0xa06   :  { %v10210_v40 = vpop.eup %10209 }
 0xa07   :  { %v9244_v59 = vpop.f32.mrb[128].mxu0  ;;  %9261 = vmatpush3.bf16.xpose.msra.mxu1 %v3777_v52  ;;  %v10212_v61 = vpop.eup %10211 }
 0xa08   :  { %v3654_v34 = vpop.f32.mrb[129].mxu0  ;;  %9476 = vmatprep.subr.msk.bf16.mxu1 %vm701_vm0, %v13012_v57  ;;  %v3896_v20 = vmul.f32 0.17677669, %v9244_v59  ;;  %v3783_v57 = vsel %vm701_vm0, %v13019_v58, 0 }
 0xa09   :  { %v3894_v29 = vmul.f32 0.17677669, %v3654_v34  ;;  %v9245_v10 = vpop.f32.mrb[130].mxu0  ;;  %v3270_v34 = vmul.f32 %v10210_v40, %v12996_v2 }
 0xa0a   :  { %v3657_v5 = vpop.f32.mrb[131].mxu0  ;;  %v13143_v9 = vadd.f32 %v3896_v20, %v16340_v4  ;;  %v3897_v41 = vmul.f32 0.17677669, %v9245_v10  ;;  %v3207_v10 = vpop.xlane.xlu0 %3206 }
 0xa0b   :  { %v13134_v6 = vadd.f32 %v3894_v29, %v16340_v4  ;;  %v3895_v60 = vmul.f32 0.17677669, %v3657_v5  ;;  %v3272_v5 = vmul.f32 %v10212_v61, %v12993_v43 }
 0xa0c   :  { %v13150_v62 = vadd.f32 %v3897_v41, %v16340_v4 }
 0xa0d   :  { %v13137_v15 = vadd.f32 %v3895_v60, %v16340_v4  ;;  %3958 = vmax.xlane.f32.xlu0 %v13134_v6 }
 0xa0e   :  { %v3209_v41 = vpop.xlane.xlu0 %3208 }
 0xa0f   :  { %3960 = vmax.xlane.f32.xlu1 %v13137_v15  ;;  %9263 = vmatpush3.bf16.xpose.msra.mxu1 %v3780_v42 }
 0xa10   :  { %9477 = vmatprep.subr.msk.bf16.mxu1 %vm701_vm0, %v13019_v58  ;;  %v3273_v58 = vmul.f32 %v10208_v33, %v12999_v48 }
 0xa11   :  { %3962 = vmax.xlane.f32.xlu0 %v13143_v9 }
 0xa12   :  { %v3293_v60 = vpack.c.bf16 %v3273_v58, %v3272_v5 }
 0xa15   :  { %3964 = vmax.xlane.f32.xlu0 %v13150_v62 }
 0xa17   :  { %9265 = vmatpush3.bf16.xpose.msra.mxu1 %v3783_v57 }
 0xa1e   :  { %v3197_v38 = vpop.xlane.xlu1 %3196 }
 0xa1f   :  { %10213 = vrcp.f32 %v3197_v38 }
 0xa20   :  { %10215 = vrcp.f32 %v3209_v41 }
 0xa22   :  { %v3203_v23 = vpop.xlane.xlu1 %3202 }
 0xa23   :  { %10217 = vrcp.f32 %v3203_v23 }
 0xa24   :  { %10219 = vrcp.f32 %v3207_v10 }
 0xa26   :  { %v3742_v39 = vpop.permute.xlu1 %3741 }
 0xa27   :  { %9478 = vmatprep.subr.msk.bf16.mxu1 %vm701_vm0, %v3742_v39  ;;  %v3786_v13 = vsel %vm701_vm0, %v3742_v39, 0 }
 0xa28   :  { %9267 = vmatpush3.bf16.xpose.msra.mxu1 %v3786_v13 }
 0xa29   :  { %v10214_v52 = vpop.eup %10213 }
 0xa2a   :  { %v3744_v59 = vpop.permute.xlu1 %3743  ;;  %v3271_v29 = vmul.f32 %v10214_v52, %v13014_v22 }
 0xa2b   :  { %9479 = vmatprep.subr.msk.bf16.mxu1 %vm701_vm0, %v3744_v59  ;;  %v3789_v42 = vsel %vm701_vm0, %v3744_v59, 0 }
 0xa2c   :  { %v3292_v20 = vpack.c.bf16 %v3271_v29, %v3270_v34  ;;  %v10216_v34 = vpop.eup %10215 }
 0xa2d   :  { %v10218_v5 = vpop.eup %10217  ;;  %v3277_v41 = vmul.f32 %v10216_v34, %v13007_v8 }
 0xa2e   :  { %9214 = vmatprep.mubr.bf16.mxu1 %v3292_v20  ;;  %v3553_v25 = vpop.permute.xlu1 %3552  ;;  %v10220_v20 = vpop.eup %10219 }
 0xa2f   :  { %9215 = vmatmul.mubr.bf16.gmra.mrb[148].mxu1 %v3293_v60 }
 0xa30   :  { %9269 = vmatpush3.bf16.xpose.msra.mxu1 %v3789_v42 }
 0xa32   :  { %v3555_v48 = vpop.permute.xlu1 %3554 }
 0xa34   :  { %v9248_v18 = vpop.f32.mrb[132].mxu0 }
 0xa35   :  { %v3670_v2 = vpop.f32.mrb[133].mxu0  ;;  %v3900_v33 = vmul.f32 0.17677669, %v9248_v18 }
 0xa36   :  { %v3898_v22 = vmul.f32 0.17677669, %v3670_v2  ;;  %v9249_v57 = vpop.f32.mrb[134].mxu0  ;;  %v3205_v45 = vpop.xlane.xlu0 %3204  ;;  %v3274_v2 = vmul.f32 %v10218_v5, %v13017_v49 }
 0xa37   :  { %10221 = vrcp.f32 %v3205_v45  ;;  %v3746_v43 = vpop.permute.xlu1 %3745  ;;  %v3673_v38 = vpop.f32.mrb[135].mxu0  ;;  %v3901_v61 = vmul.f32 0.17677669, %v9249_v57  ;;  %v13173_v59 = vadd.f32 %v3900_v33, %v16340_v4  ;;  %v3276_v57 = vmul.f32 %v10220_v20, %v13004_v12 }
 0xa38   :  { %v13164_v39 = vadd.f32 %v3898_v22, %v16340_v4  ;;  %v3899_v40 = vmul.f32 0.17677669, %v3673_v38  ;;  %9480 = vmatprep.subr.msk.bf16.mxu1 %vm701_vm0, %v3746_v43  ;;  %v3792_v13 = vsel %vm701_vm0, %v3746_v43, 0 }
 0xa39   :  { %9271 = vmatpush3.bf16.xpose.msra.mxu1 %v3792_v13  ;;  %v13178_v29 = vadd.f32 %v3901_v61, %v16340_v4  ;;  %v3295_v43 = vpack.c.bf16 %v3277_v41, %v3276_v57 }
 0xa3a   :  { %v13169_v23 = vadd.f32 %v3899_v40, %v16340_v4  ;;  %v3215_v52 = vpop.xlane.xlu0 %3214  ;;  %3966 = vmax.xlane.f32.xlu0 %v13164_v39 }
 0xa3b   :  { %v3748_v58 = vpop.permute.xlu1 %3747 }
 0xa3c   :  { %9481 = vmatprep.subr.msk.bf16.mxu1 %vm701_vm0, %v3748_v58  ;;  %3968 = vmax.xlane.f32.xlu1 %v13169_v23  ;;  %v3795_v60 = vsel %vm701_vm0, %v3748_v58, 0 }
 0xa3e   :  { %v3211_v10 = vpop.xlane.xlu0 %3210  ;;  %3970 = vmax.xlane.f32.xlu0 %v13173_v59 }
 0xa40   :  { %3972 = vmax.xlane.f32.xlu1 %v13178_v29 }
 0xa41   :  { %v10222_v42 = vpop.eup %10221  ;;  %9273 = vmatpush3.bf16.xpose.msra.mxu1 %v3795_v60 }
 0xa42   :  { %v3217_v18 = vpop.xlane.xlu0 %3216  ;;  %v3275_v22 = vmul.f32 %v10222_v42, %v13028_v16 }
 0xa43   :  { %10223 = vrcp.f32 %v3217_v18 }
 0xa44   :  { %v3294_v45 = vpack.c.bf16 %v3275_v22, %v3274_v2  ;;  %10225 = vrcp.f32 %v3211_v10 }
 0xa45   :  { %10227 = vrcp.f32 %v3215_v52 }
 0xa46   :  { %v3213_v38 = vpop.xlane.xlu0 %3212  ;;  %9218 = vmatprep.mubr.bf16.mxu1 %v3294_v45 }
 0xa47   :  { %10229 = vrcp.f32 %v3213_v38  ;;  %9219 = vmatmul.mubr.bf16.gmra.mrb[152].mxu1 %v3295_v43 }
 0xa4a   :  { %v3551_v33 = vpop.permute.xlu0 %3550 }
 0xa4b   :  { %9251 = vmatmul.mubr.msk.bf16.gmra.mrb[136].mxu0 %vm701_vm0, %v3551_v33 }
 0xa4c   :  { %9254 = vmatprep.mubr.msk.bf16.mxu0 %vm701_vm0, %v3553_v25  ;;  %v3720_v25 = vpop.permute.xlu1 %3719 }
 0xa4d   :  { %v10224_v8 = vpop.eup %10223 }
 0xa4e   :  { %v10226_v49 = vpop.eup %10225  ;;  %v3281_v12 = vmul.f32 %v10224_v8, %v13044_v47  ;;  %v3718_v10 = vpop.permute.xlu0 %3717 }
 0xa4f   :  { %v10228_v40 = vpop.eup %10227  ;;  %v3278_v13 = vmul.f32 %v10226_v49, %v13039_v30 }
 0xa50   :  { %v3280_v52 = vmul.f32 %v10228_v40, %v13034_v1  ;;  %v3724_v30 = vpop.permute.xlu1 %3723 }
 0xa51   :  { %v10230_v16 = vpop.eup %10229 }
 0xa52   :  { %v3279_v61 = vmul.f32 %v10230_v16, %v13049_v14  ;;  %v3297_v34 = vpack.c.bf16 %v3281_v12, %v3280_v52  ;;  %v3722_v5 = vpop.permute.xlu0 %3721 }
 0xa53   :  { %9255 = vmatmul.mubr.msk.bf16.gmra.mrb[140].mxu0 %vm701_vm0, %v3555_v48 }
 0xa54   :  { %v3296_v58 = vpack.c.bf16 %v3279_v61, %v3278_v13  ;;  %v3728_v1 = vpop.permute.xlu1 %3727 }
 0xa56   :  { %9222 = vmatprep.mubr.bf16.mxu1 %v3296_v58  ;;  %v3726_v47 = vpop.permute.xlu0 %3725 }
 0xa57   :  { %9223 = vmatmul.mubr.bf16.gmra.mrb[156].mxu1 %v3297_v34 }
 0xa58   :  { %9274 = vmatprep.mubr.msk.bf16.mxu1 %vm701_vm0, %v3718_v10  ;;  %v3732_v48 = vpop.permute.xlu1 %3731 }
 0xa5a   :  { %v3730_v14 = vpop.permute.xlu0 %3729 }
 0xa5f   :  { %9275 = vmatmul.mubr.msk.bf16.vlgmr.msra.gmra.mrb[160].mxu1 %vm701_vm0, %v3720_v25 }
 0xa60   :  { %9278 = vmatprep.mubr.msk.bf16.mxu1 %vm701_vm0, %v3722_v5 }
 0xa67   :  { %9279 = vmatmul.mubr.msk.bf16.gmra.mrb[164].mxu1 %vm701_vm0, %v3724_v30 }
 0xa68   :  { %9282 = vmatprep.mubr.msk.bf16.mxu1 %vm701_vm0, %v3726_v47 }
 0xa6f   :  { %9283 = vmatmul.mubr.msk.bf16.gmra.mrb[168].mxu1 %vm701_vm0, %v3728_v1 }
 0xa70   :  { %9286 = vmatprep.mubr.msk.bf16.mxu1 %vm701_vm0, %v3730_v14 }
 0xa77   :  { %9287 = vmatmul.mubr.msk.bf16.gmra.mrb[172].mxu1 %vm701_vm0, %v3732_v48 }
 0xad1   :  { %v13202_v20 = vpop.f32.mrb[144].mxu1 }
 0xad2   :  { %16341 = vst [vmem:[#allocation20_spill] sm:$0xff] %v13202_v20  ;;  %v13204_v60 = vpop.f32.mrb[145].mxu1 }
 0xad3   :  { %16342 = vst [vmem:[#allocation24_spill] sm:$0xff] %v13204_v60  ;;  %v13206_v42 = vpop.f32.mrb[146].mxu1 }
 0xad4   :  { %16343 = vst [vmem:[#allocation8_spill] sm:$0xff] %v13206_v42  ;;  %v13210_v18 = vpop.f32.mrb[147].mxu1 }
 0xad5   :  { %16344 = vst [vmem:[#allocation22_spill] sm:$0xff] %v13210_v18 }
 0xb02   :  { %v13214_v22 = vpop.f32.mrb[148].mxu1 }
 0xb03   :  { %16345 = vst [vmem:[#allocation26_spill] sm:$0xff] %v13214_v22  ;;  %v13216_v57 = vpop.f32.mrb[149].mxu1  ;;  %v3961_v22 = vpop.xlane.xlu1 %3960 }
 0xb04   :  { %16346 = vst [vmem:[#allocation4_spill] sm:$0xff] %v13216_v57  ;;  %v13218_v45 = vpop.f32.mrb[150].mxu1  ;;  %v16366_v57 = vld [vmem:[#allocation44_spill] sm:$0xff] }
 0xb05   :  { %16347 = vst [vmem:[#allocation54_spill] sm:$0xff] %v13218_v45  ;;  %v13222_v38 = vpop.f32.mrb[151].mxu1 }
 0xb06   :  { %16348 = vst [vmem:[#allocation30_spill] sm:$0xff] %v13222_v38  ;;  %v16367_v38 = vld [vmem:[#allocation46_spill] sm:$0xff] }
 0xb1a   :  { %v13226_v8 = vpop.f32.mrb[152].mxu1 }
 0xb1b   :  { %16349 = vst [vmem:[#allocation28_spill] sm:$0xff] %v13226_v8  ;;  %v13228_v49 = vpop.f32.mrb[153].mxu1 }
 0xb1c   :  { %16350 = vst [vmem:[#allocation12_spill] sm:$0xff] %v13228_v49  ;;  %v13230_v40 = vpop.f32.mrb[154].mxu1 }
 0xb1d   :  { %16351 = vst [vmem:[#allocation16_spill] sm:$0xff] %v13230_v40  ;;  %v13234_v12 = vpop.f32.mrb[155].mxu1  ;;  %v16365_v40 = vld [vmem:[#allocation43_spill] sm:$0xff] }
 0xb1e   :  { %16352 = vst [vmem:[#allocation32_spill] sm:$0xff] %v13234_v12  ;;  %v9252_v61 = vpop.f32.mrb[136].mxu0 }
 0xb1f   :  { %v3686_v52 = vpop.f32.mrb[137].mxu0  ;;  %v3904_v25 = vmul.f32 0.17677669, %v9252_v61 }
 0xb20   :  { %v3902_v58 = vmul.f32 0.17677669, %v3686_v52  ;;  %v9253_v34 = vpop.f32.mrb[138].mxu0 }
 0xb21   :  { %v3689_v10 = vpop.f32.mrb[139].mxu0  ;;  %v3905_v47 = vmul.f32 0.17677669, %v9253_v34  ;;  %v13246_v14 = vadd.f32 %v3904_v25, %v16340_v4 }
 0xb22   :  { %v13239_v5 = vadd.f32 %v3902_v58, %v16340_v4  ;;  %v3903_v30 = vmul.f32 0.17677669, %v3689_v10 }
 0xb23   :  { %v13250_v13 = vadd.f32 %v3905_v47, %v16340_v4 }
 0xb24   :  { %v13242_v1 = vadd.f32 %v3903_v30, %v16340_v4  ;;  %3974 = vmax.xlane.f32.xlu0 %v13239_v5 }
 0xb26   :  { %3976 = vmax.xlane.f32.xlu1 %v13242_v1  ;;  %v9256_v48 = vpop.f32.mrb[140].mxu0 }
 0xb27   :  { %v3702_v52 = vpop.f32.mrb[141].mxu0  ;;  %v3908_v10 = vmul.f32 0.17677669, %v9256_v48 }
 0xb28   :  { %v3906_v61 = vmul.f32 0.17677669, %v3702_v52  ;;  %3978 = vmax.xlane.f32.xlu0 %v13246_v14  ;;  %v9257_v58 = vpop.f32.mrb[142].mxu0 }
 0xb29   :  { %v3705_v34 = vpop.f32.mrb[143].mxu0  ;;  %v3909_v43 = vmul.f32 0.17677669, %v9257_v58 }
 0xb2a   :  { %v13254_v30 = vadd.f32 %v3906_v61, %v16340_v4  ;;  %v3907_v16 = vmul.f32 0.17677669, %v3705_v34  ;;  %3980 = vmax.xlane.f32.xlu1 %v13250_v13  ;;  %v13257_v25 = vpop.f32.mrb[156].mxu1  ;;  %v13272_v34 = vadd.f32 %v3908_v10, %v16340_v4 }
 0xb2b   :  { %16353 = vst [vmem:[#allocation38_spill] sm:$0xff] %v13257_v25  ;;  %v13259_v33 = vpop.f32.mrb[157].mxu1 }
 0xb2c   :  { %16354 = vst [vmem:[#allocation19_spill] sm:$0xff] %v13259_v33  ;;  %v13262_v47 = vadd.f32 %v3907_v16, %v16340_v4  ;;  %v13264_v52 = vpop.f32.mrb[158].mxu1  ;;  %3982 = vmax.xlane.f32.xlu0 %v13254_v30  ;;  %v13278_v16 = vadd.f32 %v3909_v43, %v16340_v4  ;;  %v3959_v33 = vpop.xlane.xlu0 %3958 }
 0xb2d   :  { %16355 = vst [vmem:[#allocation7_spill] sm:$0xff] %v13264_v52  ;;  %v13269_v61 = vpop.f32.mrb[159].mxu1 }
 0xb2e   :  { %16356 = vst [vmem:[#allocation11_spill] sm:$0xff] %v13269_v61  ;;  %3984 = vmax.xlane.f32.xlu1 %v13262_v47  ;;  %v16360_v61 = vld [vmem:[#allocation36_spill] sm:$0xff] }
 0xb30   :  { %3986 = vmax.xlane.f32.xlu0 %v13272_v34  ;;  %v3963_v8 = vpop.xlane.xlu0 %3962 }
 0xb31   :  { %v4024_v42 = vsub.f32 %v13143_v9, %v3963_v8 }
 0xb32   :  { %3988 = vmax.xlane.f32.xlu1 %v13278_v16  ;;  %v13282_v58 = vpop.f32.mrb[160].mxu1 }
 0xb33   :  { %v13284_v48 = vpop.f32.mrb[161].mxu1  ;;  %v4058_v46 = vmul.f32 1.442695, %v4024_v42 }
 0xb34   :  { %v13286_v41 = vpop.f32.mrb[162].mxu1 }
 0xb35   :  { %v13288_v10 = vpop.f32.mrb[163].mxu1 }
 0xb3a   :  { %v13290_v26 = vpop.f32.mrb[164].mxu1 }
 0xb3b   :  { %v13292_v2 = vpop.f32.mrb[165].mxu1 }
 0xb3c   :  { %v13294_v51 = vpop.f32.mrb[166].mxu1 }
 0xb3d   :  { %v13296_v4 = vpop.f32.mrb[167].mxu1 }
 0xb42   :  { %v13298_v43 = vpop.f32.mrb[168].mxu1 }
 0xb43   :  { %4264 = vrot.lane.b32.xlu1 %v16357_v19, %s10781_s15  ;;  %v13302_v36 = vpop.f32.mrb[169].mxu1  ;;  %v16361_v19 = vld [vmem:[#allocation39_spill] sm:$0xff] }
 0xb44   :  { %v13304_v63 = vpop.f32.mrb[170].mxu1 }
 0xb45   :  { %v13306_v32 = vpop.f32.mrb[171].mxu1 }
 0xb46   :  { %4262 = vrot.lane.b32.xlu0 %v16358_v31, %s10781_s15  ;;  %v16362_v31 = vld [vmem:[#allocation35_spill] sm:$0xff] }
 0xb47   :  { %4270 = vrot.lane.b32.xlu1 %v16359_v21, %s10781_s15  ;;  %v16363_v21 = vld [vmem:[#allocation41_spill] sm:$0xff] }
 0xb4a   :  { %4266 = vrot.lane.b32.xlu0 %v16360_v61, %s10781_s15  ;;  %v13314_v25 = vpop.f32.mrb[172].mxu1  ;;  %v16364_v61 = vld [vmem:[#allocation42_spill] sm:$0xff] }
 0xb4b   :  { %4272 = vrot.lane.b32.xlu1 %v16361_v19, %s10781_s15  ;;  %v13318_v52 = vpop.f32.mrb[173].mxu1  ;;  %v3965_v19 = vpop.xlane.xlu0 %3964 }
 0xb4c   :  { %v13320_v49 = vpop.f32.mrb[174].mxu1  ;;  %v4025_v0 = vsub.f32 %v13150_v62, %v3965_v19 }
 0xb4d   :  { %v13322_v12 = vpop.f32.mrb[175].mxu1 }
 0xb4e   :  { %4268 = vrot.lane.b32.xlu0 %v16362_v31, %s10781_s15  ;;  %v3969_v31 = vpop.xlane.xlu1 %3968  ;;  %v4060_v9 = vmul.f32 1.442695, %v4025_v0 }
 0xb4f   :  { %4276 = vrot.lane.b32.xlu1 %v16363_v21, %s10781_s15  ;;  %v3967_v45 = vpop.xlane.xlu0 %3966 }
 0xb52   :  { %4274 = vrot.lane.b32.xlu0 %v16364_v61, %s10781_s15  ;;  %v3973_v21 = vpop.xlane.xlu1 %3972 }
 0xb53   :  { %4385 = vrot.lane.b32.xlu1 %v16365_v40, %s10781_s15  ;;  %v3971_v60 = vpop.xlane.xlu0 %3970  ;;  %v4029_v61 = vsub.f32 %v13178_v29, %v3973_v21  ;;  %v4027_v40 = vsub.f32 %v13169_v23, %v3969_v31  ;;  %v4023_v29 = vsub.f32 %v13137_v15, %v3961_v22 }
 0xb54   :  { %v4028_v18 = vsub.f32 %v13173_v59, %v3971_v60 }
 0xb55   :  { %v4068_v55 = vmul.f32 1.442695, %v4029_v61 }
 0xb56   :  { %4383 = vrot.lane.b32.xlu0 %v16366_v57, %s10781_s15  ;;  %v4066_v20 = vmul.f32 1.442695, %v4028_v18  ;;  %v4022_v57 = vsub.f32 %v13134_v6, %v3959_v33  ;;  %v4026_v6 = vsub.f32 %v13164_v39, %v3967_v45 }
 0xb57   :  { %4387 = vrot.lane.b32.xlu1 %v16367_v38, %s10781_s15  ;;  %v4064_v38 = vmul.f32 1.442695, %v4027_v40 }
 0xb58   :  { %10231 = vpow2.f32 %v4066_v20  ;;  %v4054_v3 = vmul.f32 1.442695, %v4022_v57  ;;  %v4056_v20 = vmul.f32 1.442695, %v4023_v29 }
 0xb59   :  { %10233 = vpow2.f32 %v4068_v55 }
 0xb5a   :  { %10235 = vpow2.f32 %v4058_v46 }
 0xb5b   :  { %10237 = vpow2.f32 %v4064_v38 }
 0xb5c   :  { %10239 = vpow2.f32 %v4054_v3  ;;  %v4062_v3 = vmul.f32 1.442695, %v4026_v6 }
 0xb5d   :  { %10241 = vpow2.f32 %v4060_v9 }
 0xb5e   :  { %10243 = vpow2.f32 %v4056_v20 }
 0xb5f   :  { %10245 = vpow2.f32 %v4062_v3 }
 0xb62   :  { %v13342_v59 = vpop.eup %10231 }
 0xb63   :  { %v13346_v23 = vpop.eup %10233 }
 0xb64   :  { %v13350_v55 = vpop.eup %10235 }
 0xb65   :  { %v13353_v46 = vpop.eup %10237 }
 0xb66   :  { %v13356_v0 = vpop.eup %10239 }
 0xb67   :  { %v13359_v15 = vpop.eup %10241 }
 0xb68   :  { %v13362_v62 = vpop.eup %10243 }
 0xb69   :  { %v13365_v39 = vpop.eup %10245 }
 0xb75   :  { %4130 = vadd.xlane.f32.xlu0 %v13342_v59 }
 0xb79   :  { %4132 = vadd.xlane.f32.xlu0 %v13346_v23 }
 0xb7b   :  { %4122 = vadd.xlane.f32.xlu1 %v13350_v55 }
 0xb7d   :  { %4128 = vadd.xlane.f32.xlu0 %v13353_v46 }
 0xb7f   :  { %4118 = vadd.xlane.f32.xlu1 %v13356_v0 }
 0xb83   :  { %4124 = vadd.xlane.f32.xlu1 %v13359_v15 }
 0xb87   :  { %4120 = vadd.xlane.f32.xlu1 %v13362_v62 }
 0xb8b   :  { %4126 = vadd.xlane.f32.xlu1 %v13365_v39 }
 0xbb1   :  { %v3975_v60 = vpop.xlane.xlu0 %3974 }
 0xbb2   :  { %v4030_v18 = vsub.f32 %v13239_v5, %v3975_v60 }
 0xbb3   :  { %v3977_v42 = vpop.xlane.xlu1 %3976 }
 0xbb4   :  { %v4070_v19 = vmul.f32 1.442695, %v4030_v18  ;;  %v4031_v29 = vsub.f32 %v13242_v1, %v3977_v42  ;;  %v3913_v18 = vmul.f32 0.17677669, %v13286_v41 }
 0xbb5   :  { %v3979_v22 = vpop.xlane.xlu0 %3978 }
 0xbb6   :  { %v4032_v45 = vsub.f32 %v13246_v14, %v3979_v22  ;;  %v4072_v14 = vmul.f32 1.442695, %v4031_v29 }
 0xbb7   :  { %v3981_v33 = vpop.xlane.xlu1 %3980 }
 0xbb8   :  { %v4074_v8 = vmul.f32 1.442695, %v4032_v45  ;;  %v4033_v21 = vsub.f32 %v13250_v13, %v3981_v33 }
 0xbb9   :  { %v3983_v31 = vpop.xlane.xlu0 %3982 }
 0xbba   :  { %10247 = vpow2.f32 %v4074_v8  ;;  %v4034_v61 = vsub.f32 %v13254_v30, %v3983_v31  ;;  %v4076_v9 = vmul.f32 1.442695, %v4033_v21 }
 0xbbb   :  { %v3985_v40 = vpop.xlane.xlu1 %3984  ;;  %10249 = vpow2.f32 %v4070_v19  ;;  %v3911_v19 = vmul.f32 0.17677669, %v13288_v10 }
 0xbbc   :  { %v4078_v57 = vmul.f32 1.442695, %v4034_v61  ;;  %v4035_v33 = vsub.f32 %v13262_v47, %v3985_v40  ;;  %v3917_v40 = vmul.f32 0.17677669, %v13294_v51 }
 0xbbd   :  { %v3987_v38 = vpop.xlane.xlu0 %3986  ;;  %v13395_v47 = vadd.f32 %v3911_v19, %v16317_v44  ;;  %v3920_v19 = vmul.f32 0.17677669, %v13298_v43 }
 0xbbe   :  { %10251 = vpow2.f32 %v4078_v57  ;;  %v4036_v6 = vsub.f32 %v13272_v34, %v3987_v38  ;;  %v4080_v61 = vmul.f32 1.442695, %v4035_v33  ;;  %v13403_v29 = vadd.f32 %v3917_v40, %v16317_v44 }
 0xbbf   :  { %v3989_v5 = vpop.xlane.xlu1 %3988  ;;  %10253 = vpow2.f32 %v4076_v9  ;;  %v3915_v9 = vmul.f32 0.17677669, %v13296_v4  ;;  %v3925_v40 = vmul.f32 0.17677669, %v13320_v49 }
 0xbc0   :  { %10255 = vpow2.f32 %v4072_v14  ;;  %v4082_v60 = vmul.f32 1.442695, %v4036_v6  ;;  %v4037_v1 = vsub.f32 %v13278_v16, %v3989_v5  ;;  %v13387_v16 = vadd.f32 %v3913_v18, %v16317_v44 }
 0xbc1   :  { %v4263_v20 = vpop.permute.xlu0 %4262  ;;  %v3919_v14 = vmul.f32 0.17677669, %v13306_v32  ;;  %v3910_v18 = vmul.f32 0.17677669, %v13284_v48 }
 0xbc2   :  { %9290 = vmatprep.subr.bf16.mxu0 %v4263_v20  ;;  %10257 = vpow2.f32 %v4082_v60  ;;  %v4084_v8 = vmul.f32 1.442695, %v4037_v1  ;;  %v3924_v60 = vmul.f32 0.17677669, %v13314_v25 }
 0xbc3   :  { %9291 = vmatpush3.bf16.msra.mxu0 %v4263_v20  ;;  %v4265_v3 = vpop.permute.xlu1 %4264  ;;  %v13411_v20 = vadd.f32 %v3915_v9, %v16317_v44  ;;  %v13438_v25 = vadd.f32 %v3910_v18, %v16317_v44 }
 0xbc4   :  { %v13374_v13 = vpop.eup %10247  ;;  %9292 = vmatprep.subr.bf16.mxu0 %v4265_v3  ;;  %10259 = vpow2.f32 %v4084_v8 }
 0xbc5   :  { %v4267_v30 = vpop.permute.xlu0 %4266  ;;  %4138 = vadd.xlane.f32.xlu0 %v13374_v13  ;;  %v13378_v42 = vpop.eup %10249  ;;  %10261 = vpow2.f32 %v4080_v61  ;;  %v16368_v61 = vld [vmem:[#allocation48_spill] sm:$0xff] }
 0xbc7   :  { %9293 = vmatpush3.bf16.msra.mxu0 %v4265_v3  ;;  %v4271_v22 = vpop.permute.xlu1 %4270  ;;  %v3912_v3 = vmul.f32 0.17677669, %v13282_v58  ;;  %v13432_v58 = vadd.f32 %v3924_v60, %v16317_v44 }
 0xbc8   :  { %v13381_v34 = vpop.eup %10251  ;;  %9294 = vmatprep.subr.bf16.mxu0 %v4267_v30 }
 0xbc9   :  { %v4269_v45 = vpop.permute.xlu0 %4268  ;;  %4142 = vadd.xlane.f32.xlu1 %v13381_v34  ;;  %4134 = vadd.xlane.f32.xlu0 %v13378_v42  ;;  %v13390_v31 = vpop.eup %10253  ;;  %v13428_v1 = vadd.f32 %v3912_v3, %v16317_v44 }
 0xbca   :  { %v13398_v10 = vpop.eup %10255 }
 0xbcb   :  { %9295 = vmatpush3.bf16.msra.mxu0 %v4267_v30  ;;  %v4273_v41 = vpop.permute.xlu1 %4272  ;;  %v13420_v30 = vadd.f32 %v3919_v14, %v16317_v44 }
 0xbcc   :  { %9296 = vmatprep.subr.bf16.mxu0 %v4269_v45  ;;  %v13406_v5 = vpop.eup %10257 }
 0xbcd   :  { %v4275_v21 = vpop.permute.xlu0 %4274  ;;  %3996 = vmax.xlane.f32.xlu1 %v13387_v16  ;;  %4140 = vadd.xlane.f32.xlu0 %v13390_v31 }
 0xbce   :  { %v13414_v4 = vpop.eup %10259 }
 0xbcf   :  { %9297 = vmatpush3.bf16.msra.mxu0 %v4269_v45  ;;  %v4277_v57 = vpop.permute.xlu1 %4276  ;;  %v13423_v32 = vpop.eup %10261  ;;  %v3916_v45 = vmul.f32 0.17677669, %v13290_v26  ;;  %v13457_v26 = vadd.f32 %v3920_v19, %v16317_v44 }
 0xbd0   :  { %9298 = vmatprep.subr.bf16.mxu0 %v4271_v22 }
 0xbd1   :  { %v4384_v38 = vpop.permute.xlu0 %4383  ;;  %3992 = vmax.xlane.f32.xlu1 %v13395_v47  ;;  %4136 = vadd.xlane.f32.xlu0 %v13398_v10  ;;  %v13447_v48 = vadd.f32 %v3916_v45, %v16317_v44 }
 0xbd2   :  { %9322 = vmatprep.subr.bf16.mxu1 %v4384_v38 }
 0xbd3   :  { %9299 = vmatpush3.bf16.msra.mxu0 %v4271_v22  ;;  %9323 = vmatpush3.bf16.msra.mxu1 %v4384_v38  ;;  %v4386_v51 = vpop.permute.xlu1 %4385  ;;  %v3922_v22 = vmul.f32 0.17677669, %v13318_v52  ;;  %v3914_v52 = vmul.f32 0.17677669, %v13292_v2  ;;  %v3921_v2 = vmul.f32 0.17677669, %v13304_v63 }
 0xbd4   :  { %9300 = vmatprep.subr.bf16.mxu0 %v4273_v41  ;;  %9324 = vmatprep.subr.bf16.mxu1 %v4386_v51  ;;  %v3923_v63 = vmul.f32 0.17677669, %v13322_v12  ;;  %v16370_v12 = vld [vmem:[#allocation45_spill] sm:$0xff] }
 0xbd5   :  { %4004 = vmax.xlane.f32.xlu1 %v13403_v29  ;;  %4146 = vadd.xlane.f32.xlu0 %v13406_v5  ;;  %v13442_v33 = vadd.f32 %v3922_v22, %v16317_v44  ;;  %v13452_v8 = vadd.f32 %v3914_v52, %v16317_v44  ;;  %v13469_v43 = vadd.f32 %v3921_v2, %v16317_v44 }
 0xbd6   :  { %v13481_v38 = vadd.f32 %v3923_v63, %v16317_v44 }
 0xbd7   :  { %9301 = vmatpush3.bf16.msra.mxu0 %v4273_v41  ;;  %9325 = vmatpush3.bf16.msra.mxu1 %v4386_v51  ;;  %v4388_v6 = vpop.permute.xlu1 %4387  ;;  %v3918_v41 = vmul.f32 0.17677669, %v13302_v36  ;;  %v16369_v36 = vld [vmem:[#allocation47_spill] sm:$0xff] }
 0xbd8   :  { %9302 = vmatprep.subr.bf16.mxu0 %v4275_v21  ;;  %9326 = vmatprep.subr.bf16.mxu1 %v4388_v6 }
 0xbd9   :  { %4000 = vmax.xlane.f32.xlu1 %v13411_v20  ;;  %4148 = vadd.xlane.f32.xlu0 %v13414_v4 }
 0xbdb   :  { %9303 = vmatpush3.bf16.msra.mxu0 %v4275_v21  ;;  %9327 = vmatpush3.bf16.msra.mxu1 %v4388_v6  ;;  %v13462_v21 = vadd.f32 %v3918_v41, %v16317_v44 }
 0xbdc   :  { %9304 = vmatprep.subr.bf16.mxu0 %v4277_v57 }
 0xbdd   :  { %4008 = vmax.xlane.f32.xlu1 %v13420_v30  ;;  %4144 = vadd.xlane.f32.xlu0 %v13423_v32 }
 0xbdf   :  { %9305 = vmatpush3.bf16.msra.mxu0 %v4277_v57  ;;  %v13476_v57 = vadd.f32 %v3925_v40, %v16317_v44 }
 0xbe1   :  { %4018 = vmax.xlane.f32.xlu1 %v13432_v58  ;;  %3994 = vmax.xlane.f32.xlu0 %v13428_v1 }
 0xbe5   :  { %4014 = vmax.xlane.f32.xlu1 %v13442_v33  ;;  %3990 = vmax.xlane.f32.xlu0 %v13438_v25 }
 0xbe9   :  { %4002 = vmax.xlane.f32.xlu0 %v13447_v48 }
 0xbed   :  { %3998 = vmax.xlane.f32.xlu0 %v13452_v8 }
 0xbf1   :  { %4010 = vmax.xlane.f32.xlu0 %v13457_v26 }
 0xbf5   :  { %4006 = vmax.xlane.f32.xlu0 %v13462_v21 }
 0xbf6   :  { %4391 = vrot.lane.b32.xlu1 %v16368_v61, %s10781_s15 }
 0xbf9   :  { %4012 = vmax.xlane.f32.xlu0 %v13469_v43 }
 0xbfa   :  { %4393 = vrot.lane.b32.xlu1 %v16369_v36, %s10781_s15 }
 0xbfd   :  { %4020 = vmax.xlane.f32.xlu0 %v13476_v57 }
 0xc01   :  { %4016 = vmax.xlane.f32.xlu0 %v13481_v38 }
 0xc02   :  { %v4131_v9 = vpop.xlane.xlu0 %4130 }
 0xc06   :  { %v4133_v14 = vpop.xlane.xlu0 %4132 }
 0xc08   :  { %v4123_v51 = vpop.xlane.xlu1 %4122 }
 0xc0a   :  { %v4129_v3 = vpop.xlane.xlu0 %4128 }
 0xc0c   :  { %v4119_v49 = vpop.xlane.xlu1 %4118 }
 0xc10   :  { %v4125_v6 = vpop.xlane.xlu1 %4124 }
 0xc11   :  { %10263 = vrcp.f32 %v4125_v6 }
 0xc12   :  { %10265 = vrcp.f32 %v4119_v49 }
 0xc13   :  { %10267 = vrcp.f32 %v4123_v51 }
 0xc14   :  { %v4121_v60 = vpop.xlane.xlu1 %4120 }
 0xc15   :  { %10269 = vrcp.f32 %v4121_v60 }
 0xc16   :  { %10271 = vrcp.f32 %v4129_v3 }
 0xc17   :  { %4389 = vrot.lane.b32.xlu0 %v16370_v12, %s10781_s15 }
 0xc18   :  { %v4127_v18 = vpop.xlane.xlu1 %4126 }
 0xc19   :  { %10273 = vrcp.f32 %v4127_v18 }
 0xc1a   :  { %10275 = vrcp.f32 %v4133_v14 }
 0xc1b   :  { %v10264_v44 = vpop.eup %10263  ;;  %10277 = vrcp.f32 %v4131_v9 }
 0xc1c   :  { %v10266_v22 = vpop.eup %10265  ;;  %v4217_v19 = vmul.f32 %v10264_v44, %v13359_v15 }
 0xc1d   :  { %v10268_v45 = vpop.eup %10267  ;;  %v4214_v41 = vmul.f32 %v10266_v22, %v13356_v0 }
 0xc1e   :  { %v4216_v40 = vmul.f32 %v10268_v45, %v13350_v55 }
 0xc1f   :  { %v10270_v52 = vpop.eup %10269 }
 0xc20   :  { %v4215_v2 = vmul.f32 %v10270_v52, %v13362_v62  ;;  %v10272_v61 = vpop.eup %10271  ;;  %v4247_v51 = vpack.c.bf16 %v4217_v19, %v4216_v40 }
 0xc21   :  { %v4219_v9 = vmul.f32 %v10272_v61, %v13353_v46 }
 0xc22   :  { %v4246_v36 = vpack.c.bf16 %v4215_v2, %v4214_v41 }
 0xc23   :  { %v10274_v63 = vpop.eup %10273 }
 0xc24   :  { %v10276_v49 = vpop.eup %10275  ;;  %9306 = vmatprep.mubr.bf16.mxu0 %v4246_v36  ;;  %v4218_v14 = vmul.f32 %v10274_v63, %v13365_v39 }
 0xc25   :  { %9307 = vmatmul.mubr.bf16.vlgmr.msra.gmra.mrb[144].mxu0 %v4247_v51  ;;  %v10278_v6 = vpop.eup %10277  ;;  %v4221_v15 = vmul.f32 %v10276_v49, %v13346_v23 }
 0xc26   :  { %v4248_v3 = vpack.c.bf16 %v4219_v9, %v4218_v14  ;;  %v4220_v0 = vmul.f32 %v10278_v6, %v13342_v59 }
 0xc28   :  { %9310 = vmatprep.mubr.bf16.mxu0 %v4248_v3  ;;  %v4249_v62 = vpack.c.bf16 %v4221_v15, %v4220_v0 }
 0xc2d   :  { %9311 = vmatmul.mubr.bf16.gmra.mrb[148].mxu0 %v4249_v62 }
 0xc52   :  { %v4139_v55 = vpop.xlane.xlu0 %4138 }
 0xc56   :  { %v4135_v60 = vpop.xlane.xlu0 %4134  ;;  %v4143_v12 = vpop.xlane.xlu1 %4142 }
 0xc5a   :  { %v4141_v18 = vpop.xlane.xlu0 %4140  ;;  %v3997_v44 = vpop.xlane.xlu1 %3996 }
 0xc5b   :  { %10279 = vrcp.f32 %v4141_v18 }
 0xc5c   :  { %10281 = vrcp.f32 %v4135_v60 }
 0xc5d   :  { %10283 = vrcp.f32 %v4139_v55 }
 0xc5e   :  { %v4137_v39 = vpop.xlane.xlu0 %4136  ;;  %v3993_v22 = vpop.xlane.xlu1 %3992 }
 0xc5f   :  { %v4039_v46 = vsub.f32 %v13395_v47, %v3993_v22  ;;  %10285 = vrcp.f32 %v4137_v39 }
 0xc61   :  { %v4088_v45 = vmul.f32 1.442695, %v4039_v46 }
 0xc62   :  { %v4147_v23 = vpop.xlane.xlu0 %4146  ;;  %v13495_v52 = vpop.xlane.xlu1 %4004 }
 0xc63   :  { %10287 = vpow2.f32 %v4088_v45 }
 0xc64   :  { %10289 = vrcp.f32 %v4143_v12 }
 0xc65   :  { %v10280_v41 = vpop.eup %10279 }
 0xc66   :  { %v4149_v59 = vpop.xlane.xlu0 %4148  ;;  %v4001_v19 = vpop.xlane.xlu1 %4000  ;;  %v4225_v47 = vmul.f32 %v10280_v41, %v13390_v31 }
 0xc67   :  { %v4043_v2 = vsub.f32 %v13411_v20, %v4001_v19  ;;  %v10282_v61 = vpop.eup %10281  ;;  %10291 = vrcp.f32 %v4149_v59 }
 0xc68   :  { %v10284_v40 = vpop.eup %10283  ;;  %10293 = vrcp.f32 %v4147_v23  ;;  %v4222_v49 = vmul.f32 %v10282_v61, %v13378_v42  ;;  %v4041_v42 = vsub.f32 %v13387_v16, %v3997_v44 }
 0xc69   :  { %v4096_v36 = vmul.f32 1.442695, %v4043_v2  ;;  %v10286_v63 = vpop.eup %10285  ;;  %v4224_v9 = vmul.f32 %v10284_v40, %v13374_v13 }
 0xc6a   :  { %v4145_v51 = vpop.xlane.xlu0 %4144  ;;  %v4223_v14 = vmul.f32 %v10286_v63, %v13398_v10  ;;  %v4092_v22 = vmul.f32 1.442695, %v4041_v42 }
 0xc6b   :  { %10295 = vpow2.f32 %v4096_v36  ;;  %v4251_v15 = vpack.c.bf16 %v4225_v47, %v4224_v9 }
 0xc6c   :  { %10297 = vrcp.f32 %v4145_v51  ;;  %v4250_v20 = vpack.c.bf16 %v4223_v14, %v4222_v49  ;;  %v16371_v49 = vld [vmem:[#allocation50_spill] sm:$0xff] }
 0xc6d   :  { %v13502_v6 = vpop.eup %10287 }
 0xc6e   :  { %v3995_v3 = vpop.xlane.xlu0 %3994  ;;  %4152 = vadd.xlane.f32.xlu0 %v13502_v6  ;;  %9314 = vmatprep.mubr.bf16.mxu0 %v4250_v20  ;;  %v10290_v62 = vpop.eup %10289 }
 0xc6f   :  { %v4040_v0 = vsub.f32 %v13428_v1, %v3995_v3  ;;  %9315 = vmatmul.mubr.bf16.gmra.mrb[152].mxu0 %v4251_v15  ;;  %v4226_v16 = vmul.f32 %v10290_v62, %v13381_v34  ;;  %v4045_v34 = vsub.f32 %v13403_v29, %v13495_v52 }
 0xc71   :  { %v4090_v31 = vmul.f32 1.442695, %v4040_v0  ;;  %v10292_v10 = vpop.eup %10291  ;;  %v4100_v36 = vmul.f32 1.442695, %v4045_v34  ;;  %v9761_v34 = vld [vmem:[%s15882_s4 + $0x10] sm:$0xff]  }
 0xc72   :  { %v3991_v55 = vpop.xlane.xlu0 %3990  ;;  %v10294_v60 = vpop.eup %10293  ;;  %v4229_v1 = vmul.f32 %v10292_v10, %v13414_v4 }
 0xc73   :  { %10299 = vpow2.f32 %v4090_v31  ;;  %v4038_v13 = vsub.f32 %v13438_v25, %v3991_v55  ;;  %v4228_v25 = vmul.f32 %v10294_v60, %v13406_v5  ;;  %v4009_v5 = vpop.xlane.xlu1 %4008 }
 0xc74   :  { %v4047_v0 = vsub.f32 %v13420_v30, %v4009_v5  ;;  %v16376_v5 = vld [vmem:[#allocation84_spill] sm:$0xff] }
 0xc75   :  { %v13508_v12 = vpop.eup %10295  ;;  %v4086_v18 = vmul.f32 1.442695, %v4038_v13  ;;  %v4253_v19 = vpack.c.bf16 %v4229_v1, %v4228_v25  ;;  %v16372_v13 = vld [vmem:[#allocation49_spill] sm:$0xff] }
 0xc76   :  { %v10298_v39 = vpop.eup %10297  ;;  %v4003_v46 = vpop.xlane.xlu0 %4002  ;;  %4160 = vadd.xlane.f32.xlu0 %v13508_v12  ;;  %v4104_v62 = vmul.f32 1.442695, %v4047_v0 }
 0xc77   :  { %10301 = vpow2.f32 %v4086_v18  ;;  %v4044_v45 = vsub.f32 %v13447_v48, %v4003_v46  ;;  %v4227_v44 = vmul.f32 %v10298_v39, %v13423_v32  ;;  %v4019_v63 = vpop.xlane.xlu1 %4018 }
 0xc78   :  { %10303 = vpow2.f32 %v4092_v22  ;;  %v4052_v60 = vsub.f32 %v13432_v58, %v4019_v63  ;;  %v9763_v63 = vld [vmem:[%s15882_s4 + $0x20] sm:$0xff]  }
 0xc79   :  { %v4252_v23 = vpack.c.bf16 %v4227_v44, %v4226_v16  ;;  %v4098_v41 = vmul.f32 1.442695, %v4044_v45 }
 0xc7a   :  { %v3999_v59 = vpop.xlane.xlu0 %3998  ;;  %v4114_v39 = vmul.f32 1.442695, %v4052_v60  ;;  %v16384_v60 = vld [vmem:[#allocation91_spill] sm:$0xff] }
 0xc7b   :  { %v4042_v2 = vsub.f32 %v13452_v8, %v3999_v59  ;;  %9318 = vmatprep.mubr.bf16.mxu0 %v4252_v23  ;;  %10305 = vpow2.f32 %v4098_v41  ;;  %v4015_v52 = vpop.xlane.xlu1 %4014 }
 0xc7c   :  { %9319 = vmatmul.mubr.bf16.gmra.mrb[156].mxu0 %v4253_v19  ;;  %v4050_v55 = vsub.f32 %v13442_v33, %v4015_v52  ;;  %v16374_v19 = vld [vmem:[#allocation15_spill] sm:$0xff]  ;;  %v16380_v52 = vpack.i.bf16 %v13064_v54, %v13060_v27 }
 0xc7d   :  { %v13517_v61 = vpop.eup %10299  ;;  %v4094_v32 = vmul.f32 1.442695, %v4042_v2  ;;  %v9759_v2 = vld [vmem:[%s15882_s4] sm:$0xff]  }
 0xc7e   :  { %4154 = vadd.xlane.f32.xlu1 %v13517_v61  ;;  %v4011_v4 = vpop.xlane.xlu0 %4010  ;;  %v4110_v18 = vmul.f32 1.442695, %v4050_v55  ;;  %9354 = vmatprep.subr.bf16.mxu0 %v9759_v2  ;;  %v16382_v55 = vld [vmem:[#allocation88_spill] sm:$0xff] }
 0xc7f   :  { %10307 = vpow2.f32 %v4094_v32  ;;  %v4392_v3 = vpop.permute.xlu1 %4391  ;;  %v4048_v42 = vsub.f32 %v13457_v26, %v4011_v4  ;;  %9355 = vmatpush3.bf16.msra.mxu0 %v9759_v2  ;;  %v9760_v4 = vld [vmem:[%s15882_s4 + $0x8] sm:$0xff]   ;;  %v9762_v32 = vld [vmem:[%s15882_s4 + $0x18] sm:$0xff]  }
 0xc80   :  { %10309 = vpow2.f32 %v4100_v36  ;;  %9356 = vmatprep.subr.bf16.mxu0 %v9760_v4 }
 0xc81   :  { %v13522_v48 = vpop.eup %10301  ;;  %10311 = vpow2.f32 %v4104_v62  ;;  %v4106_v10 = vmul.f32 1.442695, %v4048_v42  ;;  %v16381_v42 = vld [vmem:[#allocation90_spill] sm:$0xff] }
 0xc82   :  { %4150 = vadd.xlane.f32.xlu1 %v13522_v48  ;;  %v4007_v40 = vpop.xlane.xlu0 %4006  ;;  %v13525_v8 = vpop.eup %10303 }
 0xc83   :  { %v4394_v31 = vpop.permute.xlu1 %4393  ;;  %10313 = vpow2.f32 %v4106_v10  ;;  %v4046_v22 = vsub.f32 %v13462_v21, %v4007_v40  ;;  %9357 = vmatpush3.bf16.msra.mxu0 %v9760_v4  ;;  %v16377_v40 = vld [vmem:[#allocation23_spill] sm:$0xff]  ;;  %v16383_v10 = vpack.i.bf16 %v16381_v42, %v16382_v55  ;;  %v16396_v4 = vpack.i.bf16 %v13100_v37, %v13094_v28 }
 0xc84   :  { %10315 = vpow2.f32 %v4110_v18  ;;  %9358 = vmatprep.subr.bf16.mxu0 %v9761_v34  ;;  %v16378_v36 = vpack.i.bf16 %v16376_v5, %v16377_v40  ;;  %v16385_v18 = vld [vmem:[#allocation86_spill] sm:$0xff] }
 0xc85   :  { %v13528_v47 = vpop.eup %10305  ;;  %10317 = vpow2.f32 %v4114_v39  ;;  %v4102_v46 = vmul.f32 1.442695, %v4046_v22  ;;  %v16386_v39 = vpack.i.bf16 %v16384_v60, %v16385_v18 }
 0xc86   :  { %v4013_v51 = vpop.xlane.xlu0 %4012  ;;  %4156 = vadd.xlane.f32.xlu1 %v13525_v8 }
 0xc87   :  { %v4049_v1 = vsub.f32 %v13469_v43, %v4013_v51  ;;  %10319 = vpow2.f32 %v4102_v46  ;;  %v16373_v43 = vld [vmem:[#allocation85_spill] sm:$0xff]  ;;  %9359 = vmatpush3.bf16.msra.mxu0 %v9761_v34  ;;  %v16379_v51 = vpack.i.bf16 %v13068_v11, %v13062_v56 }
 0xc88   :  { %v16375_v41 = vpack.i.bf16 %v16373_v43, %v16374_v19  ;;  %9360 = vmatprep.subr.bf16.mxu0 %v9762_v32  ;;  %v9766_v56 = vld [vmem:[%s15882_s4 + $0x38] sm:$0xff]  }
 0xc89   :  { %v13533_v14 = vpop.eup %10307  ;;  %v4108_v45 = vmul.f32 1.442695, %v4049_v1  ;;  %v16389_v43 = vld [vmem:[#allocation93_spill] sm:$0xff] }
 0xc8a   :  { %v4021_v29 = vpop.xlane.xlu0 %4020  ;;  %4162 = vadd.xlane.f32.xlu1 %v13528_v47  ;;  %v13536_v20 = vpop.eup %10309  ;;  %v16390_v19 = vld [vmem:[#allocation89_spill] sm:$0xff] }
 0xc8b   :  { %v13545_v30 = vpop.eup %10311  ;;  %10321 = vpow2.f32 %v4108_v45  ;;  %v4053_v44 = vsub.f32 %v13476_v57, %v4021_v29  ;;  %9361 = vmatpush3.bf16.msra.mxu0 %v9762_v32  ;;  %v9764_v29 = vld [vmem:[%s15882_s4 + $0x28] sm:$0xff]  }
 0xc8c   :  { %4395 = vrot.lane.b32.xlu0 %v16371_v49, %s10781_s15  ;;  %9362 = vmatprep.subr.bf16.mxu0 %v9763_v63  ;;  %v9765_v49 = vld [vmem:[%s15882_s4 + $0x30] sm:$0xff]  }
 0xc8d   :  { %v13548_v26 = vpop.eup %10313  ;;  %v4116_v23 = vmul.f32 1.442695, %v4053_v44  ;;  %v16388_v44 = vpack.i.bf16 %v13084_v7, %v13078_v24  ;;  %v16395_v7 = vpack.i.bf16 %v13096_v50, %v13090_v17 }
 0xc8e   :  { %v4017_v9 = vpop.xlane.xlu0 %4016  ;;  %4158 = vadd.xlane.f32.xlu1 %v13533_v14  ;;  %v13551_v33 = vpop.eup %10315 }
 0xc8f   :  { %v13555_v58 = vpop.eup %10317  ;;  %v4051_v16 = vsub.f32 %v13481_v38, %v4017_v9  ;;  %9363 = vmatpush3.bf16.msra.mxu0 %v9763_v63 }
 0xc90   :  { %9364 = vmatprep.subr.bf16.mxu0 %v9764_v29 }
 0xc91   :  { %v4112_v25 = vmul.f32 1.442695, %v4051_v16  ;;  %v13561_v59 = vpop.eup %10319  ;;  %v16387_v16 = vpack.i.bf16 %v13080_v35, %v13074_v53  ;;  %v16392_v53 = vld [vmem:[#allocation94_spill] sm:$0xff]  ;;  %v16393_v35 = vld [vmem:[#allocation92_spill] sm:$0xff] }
 0xc92   :  { %v4390_v15 = vpop.permute.xlu0 %4389  ;;  %4164 = vadd.xlane.f32.xlu1 %v13536_v20  ;;  %v16394_v2 = vpack.i.bf16 %v16392_v53, %v16393_v35 }
 0xc93   :  { %9328 = vmatprep.subr.bf16.mxu1 %v4390_v15  ;;  %10323 = vpow2.f32 %v4112_v25  ;;  %9365 = vmatpush3.bf16.msra.mxu0 %v9764_v29 }
 0xc94   :  { %9329 = vmatpush3.bf16.msra.mxu1 %v4390_v15  ;;  %10325 = vpow2.f32 %v4116_v23  ;;  %9366 = vmatprep.subr.bf16.mxu0 %v9765_v49 }
 0xc95   :  { %9330 = vmatprep.subr.bf16.mxu1 %v4392_v3  ;;  %v13564_v21 = vpop.eup %10321 }
 0xc97   :  { %9367 = vmatpush3.bf16.msra.mxu0 %v9765_v49 }
 0xc98   :  { %9331 = vmatpush3.bf16.msra.mxu1 %v4392_v3  ;;  %9368 = vmatprep.subr.bf16.mxu0 %v9766_v56 }
 0xc99   :  { %9332 = vmatprep.subr.bf16.mxu1 %v4394_v31 }
 0xc9b   :  { %9369 = vmatpush3.bf16.msra.mxu0 %v9766_v56 }
 0xc9c   :  { %9333 = vmatpush3.bf16.msra.mxu1 %v4394_v31 }
 0xc9d   :  { %v13571_v38 = vpop.eup %10323 }
 0xc9e   :  { %v13574_v57 = vpop.eup %10325 }
 0xca3   :  { %4397 = vrot.lane.b32.xlu1 %v16372_v13, %s10781_s15 }
 0xcab   :  { %4168 = vadd.xlane.f32.xlu0 %v13545_v30 }
 0xcaf   :  { %4170 = vadd.xlane.f32.xlu0 %v13548_v26 }
 0xcb3   :  { %4174 = vadd.xlane.f32.xlu0 %v13551_v33 }
 0xcb7   :  { %4178 = vadd.xlane.f32.xlu0 %v13555_v58 }
 0xcc7   :  { %4166 = vadd.xlane.f32.xlu1 %v13561_v59 }
 0xccb   :  { %4172 = vadd.xlane.f32.xlu1 %v13564_v21 }
 0xccd   :  { %9488 = vrot.lane.b32.xlu0 %v16375_v41, %s10781_s15  ;;  %v16391_v41 = vpack.i.bf16 %v16389_v43, %v16390_v19 }
 0xccf   :  { %4176 = vadd.xlane.f32.xlu1 %v13571_v38 }
 0xcd3   :  { %4180 = vadd.xlane.f32.xlu1 %v13574_v57 }
 0xce4   :  { %9493 = vrot.lane.b32.xlu1 %v16378_v36, %s10781_s15 }
 0xce8   :  { %9498 = vrot.lane.b32.xlu1 %v16379_v51, %s10780_s1 }
 0xcec   :  { %9503 = vrot.lane.b32.xlu1 %v16380_v52, %s10780_s1 }
 0xcf8   :  { %v9308_v11 = vpop.f32.mrb[144].mxu0 }
 0xcf9   :  { %v4320_v9 = vpop.f32.mrb[145].mxu0 }
 0xcfa   :  { %v9309_v3 = vpop.f32.mrb[146].mxu0 }
 0xcfb   :  { %v9512_v15 = vpack.i.bf16 %v9309_v3, %v9308_v11  ;;  %v4323_v0 = vpop.f32.mrb[147].mxu0  ;;  %v4153_v54 = vpop.xlane.xlu0 %4152 }
 0xcfc   :  { %v9507_v27 = vpack.i.bf16 %v4323_v0, %v4320_v9  ;;  %10327 = vrcp.f32 %v4153_v54 }
 0xcfd   :  { %9513 = vrot.lane.b32.xlu1 %v9512_v15, %s10778_s3 }
 0xcfe   :  { %9508 = vrot.lane.b32.xlu0 %v9507_v27, %s10778_s3 }
 0xd00   :  { %v9312_v31 = vpop.f32.mrb[148].mxu0 }
 0xd01   :  { %v4336_v62 = vpop.f32.mrb[149].mxu0  ;;  %9523 = vrot.lane.b32.xlu1 %v16383_v10, %s10781_s15 }
 0xd02   :  { %v9313_v13 = vpop.f32.mrb[150].mxu0  ;;  %9518 = vrot.lane.b32.xlu0 %v16386_v39, %s10781_s15 }
 0xd03   :  { %v9542_v22 = vpack.i.bf16 %v9313_v13, %v9312_v31  ;;  %v4339_v46 = vpop.f32.mrb[151].mxu0  ;;  %v4161_v1 = vpop.xlane.xlu0 %4160  ;;  %v16398_v13 = vld [vmem:[#allocation87_spill] sm:$0xff] }
 0xd04   :  { %v9537_v45 = vpack.i.bf16 %v4339_v46, %v4336_v62 }
 0xd05   :  { %9533 = vrot.lane.b32.xlu1 %v16387_v16, %s10780_s1 }
 0xd06   :  { %9528 = vrot.lane.b32.xlu0 %v16388_v44, %s10780_s1  ;;  %v10328_v5 = vpop.eup %10327 }
 0xd07   :  { %v4396_v25 = vpop.permute.xlu0 %4395  ;;  %v4231_v51 = vmul.f32 %v10328_v5, %v13502_v6  ;;  %v16413_v5 = vld [vmem:[#allocation99_spill] sm:$0xff] }
 0xd08   :  { %9334 = vmatprep.subr.bf16.mxu1 %v4396_v25 }
 0xd09   :  { %9543 = vrot.lane.b32.xlu1 %v9542_v22, %s10778_s3  ;;  %9335 = vmatpush3.bf16.msra.mxu1 %v4396_v25  ;;  %v16406_v25 = vld [vmem:[#allocation18_spill] sm:$0xff] }
 0xd0a   :  { %9538 = vrot.lane.b32.xlu0 %v9537_v45, %s10778_s3  ;;  %v16404_v45 = vld [vmem:[#allocation14_spill] sm:$0xff] }
 0xd0b   :  { %v4155_v23 = vpop.xlane.xlu1 %4154 }
 0xd0d   :  { %9553 = vrot.lane.b32.xlu1 %v16391_v41, %s10781_s15 }
 0xd0e   :  { %9548 = vrot.lane.b32.xlu0 %v16394_v2, %s10781_s15 }
 0xd0f   :  { %v4151_v24 = vpop.xlane.xlu1 %4150 }
 0xd10   :  { %10329 = vrcp.f32 %v4151_v24  ;;  %v16409_v24 = vld [vmem:[#allocation100_spill] sm:$0xff] }
 0xd11   :  { %9563 = vrot.lane.b32.xlu1 %v16395_v7, %s10780_s1  ;;  %v16410_v7 = vld [vmem:[#allocation98_spill] sm:$0xff] }
 0xd12   :  { %9558 = vrot.lane.b32.xlu0 %v16396_v4, %s10780_s1  ;;  %v16411_v4 = vpack.i.bf16 %v16409_v24, %v16410_v7 }
 0xd13   :  { %v4157_v34 = vpop.xlane.xlu1 %4156 }
 0xd14   :  { %10331 = vrcp.f32 %v4157_v34 }
 0xd15   :  { %10333 = vrcp.f32 %v4155_v23  ;;  %v16407_v23 = vld [vmem:[#allocation6_spill] sm:$0xff] }
 0xd16   :  { %10335 = vrcp.f32 %v4161_v1  ;;  %v16403_v1 = vld [vmem:[#allocation10_spill] sm:$0xff]  ;;  %v16408_v43 = vpack.i.bf16 %v16406_v25, %v16407_v23 }
 0xd17   :  { %v4163_v32 = vpop.xlane.xlu1 %4162  ;;  %v16405_v16 = vpack.i.bf16 %v16403_v1, %v16404_v45  ;;  %v16422_v1 = vld [vmem:[#allocation25_spill] sm:$0xff]  ;;  %v16424_v25 = vld [vmem:[#allocation62_spill] sm:$0xff] }
 0xd1a   :  { %v10330_v40 = vpop.eup %10329 }
 0xd1b   :  { %v4159_v36 = vpop.xlane.xlu1 %4158  ;;  %v4230_v63 = vmul.f32 %v10330_v40, %v13522_v48 }
 0xd1c   :  { %10337 = vrcp.f32 %v4159_v36 }
 0xd1d   :  { %v4254_v17 = vpack.c.bf16 %v4231_v51, %v4230_v63  ;;  %10339 = vrcp.f32 %v4163_v32  ;;  %v16412_v32 = vld [vmem:[#allocation101_spill] sm:$0xff]  ;;  %v16415_v63 = vld [vmem:[#allocation8_spill] sm:$0xff] }
 0xd1e   :  { %v10332_v50 = vpop.eup %10331  ;;  %v16414_v40 = vpack.i.bf16 %v16412_v32, %v16413_v5  ;;  %v16416_v51 = vld [vmem:[#allocation20_spill] sm:$0xff] }
 0xd1f   :  { %9338 = vmatprep.mubr.bf16.mxu1 %v4254_v17  ;;  %v4165_v29 = vpop.xlane.xlu1 %4164  ;;  %v10334_v28 = vpop.eup %10333  ;;  %v4233_v37 = vmul.f32 %v10332_v50, %v13525_v8  ;;  %v16417_v17 = vpack.i.bf16 %v16415_v63, %v16416_v51 }
 0xd20   :  { %10341 = vrcp.f32 %v4165_v29  ;;  %v10336_v49 = vpop.eup %10335  ;;  %v4232_v56 = vmul.f32 %v10334_v28, %v13517_v61  ;;  %v16418_v28 = vld [vmem:[#allocation22_spill] sm:$0xff] }
 0xd21   :  { %v4235_v9 = vmul.f32 %v10336_v49, %v13508_v12 }
 0xd22   :  { %v4255_v48 = vpack.c.bf16 %v4233_v37, %v4232_v56  ;;  %v16419_v37 = vld [vmem:[#allocation24_spill] sm:$0xff] }
 0xd23   :  { %v4398_v52 = vpop.permute.xlu1 %4397 }
 0xd24   :  { %9336 = vmatprep.subr.bf16.mxu1 %v4398_v52 }
 0xd25   :  { %9337 = vmatpush3.bf16.msra.mxu1 %v4398_v52  ;;  %v16420_v52 = vpack.i.bf16 %v16418_v28, %v16419_v37 }
 0xd26   :  { %v10338_v11 = vpop.eup %10337 }
 0xd27   :  { %v4234_v6 = vmul.f32 %v10338_v11, %v13533_v14  ;;  %v10340_v3 = vpop.eup %10339  ;;  %v16397_v14 = vld [vmem:[#allocation96_spill] sm:$0xff] }
 0xd28   :  { %9339 = vmatmul.mubr.bf16.vlgmr.msra.gmra.mrb[176].mxu1 %v4255_v48  ;;  %v4236_v27 = vmul.f32 %v10340_v3, %v13528_v47  ;;  %v16399_v60 = vpack.i.bf16 %v16397_v14, %v16398_v13  ;;  %v16400_v47 = vld [vmem:[#allocation97_spill] sm:$0xff] }
 0xd29   :  { %v4256_v15 = vpack.c.bf16 %v4235_v9, %v4234_v6 }
 0xd2a   :  { %v10342_v0 = vpop.eup %10341 }
 0xd2b   :  { %9342 = vmatprep.mubr.bf16.mxu1 %v4256_v15  ;;  %v4237_v8 = vmul.f32 %v10342_v0, %v13536_v20  ;;  %v16401_v20 = vld [vmem:[#allocation95_spill] sm:$0xff] }
 0xd2c   :  { %v16402_v18 = vpack.i.bf16 %v16400_v47, %v16401_v20 }
 0xd2d   :  { %v4257_v54 = vpack.c.bf16 %v4237_v8, %v4236_v27 }
 0xd30   :  { %9343 = vmatmul.mubr.bf16.gmra.mrb[180].mxu1 %v4257_v54 }
 0xd38   :  { %v4169_v12 = vpop.xlane.xlu0 %4168 }
 0xd39   :  { %10343 = vrcp.f32 %v4169_v12 }
 0xd3c   :  { %v4171_v22 = vpop.xlane.xlu0 %4170 }
 0xd40   :  { %v4175_v2 = vpop.xlane.xlu0 %4174 }
 0xd42   :  { %v9316_v61 = vpop.f32.mrb[152].mxu0 }
 0xd43   :  { %v4352_v31 = vpop.f32.mrb[153].mxu0  ;;  %v10344_v29 = vpop.eup %10343 }
 0xd44   :  { %v9317_v62 = vpop.f32.mrb[154].mxu0  ;;  %v4179_v36 = vpop.xlane.xlu0 %4178  ;;  %v4239_v48 = vmul.f32 %v10344_v29, %v13545_v30 }
 0xd45   :  { %v9572_v42 = vpack.i.bf16 %v9317_v62, %v9316_v61  ;;  %v4355_v55 = vpop.f32.mrb[155].mxu0 }
 0xd46   :  { %v9567_v10 = vpack.i.bf16 %v4355_v55, %v4352_v31 }
 0xd47   :  { %9573 = vrot.lane.b32.xlu1 %v9572_v42, %s10778_s3 }
 0xd48   :  { %9568 = vrot.lane.b32.xlu0 %v9567_v10, %s10778_s3  ;;  %v9489_v31 = vpop.permute.xlu0 %9488 }
 0xd49   :  { %v9491_v12 = vunpack.i.h.bf16 %v9489_v31  ;;  %v9490_v14 = vunpack.i.l.bf16 %v9489_v31 }
 0xd4b   :  { %9583 = vrot.lane.b32.xlu1 %v16399_v60, %s10781_s15  ;;  %v4888_v45 = vsel %vm701_vm0, %v16422_v1, %v9490_v14 }
 0xd4c   :  { %9578 = vrot.lane.b32.xlu0 %v16402_v18, %s10781_s15 }
 0xd4f   :  { %v9320_v39 = vpop.f32.mrb[156].mxu0  ;;  %9593 = vrot.lane.b32.xlu1 %v16405_v16, %s10780_s1  ;;  %v16423_v16 = vld [vmem:[#allocation60_spill] sm:$0xff] }
 0xd50   :  { %v4368_v46 = vpop.f32.mrb[157].mxu0  ;;  %9588 = vrot.lane.b32.xlu0 %v16408_v43, %s10780_s1 }
 0xd51   :  { %v9321_v44 = vpop.f32.mrb[158].mxu0 }
 0xd52   :  { %v9602_v19 = vpack.i.bf16 %v9321_v44, %v9320_v39  ;;  %v4371_v41 = vpop.f32.mrb[159].mxu0 }
 0xd53   :  { %v9597_v53 = vpack.i.bf16 %v4371_v41, %v4368_v46 }
 0xd54   :  { %9603 = vrot.lane.b32.xlu1 %v9602_v19, %s10778_s3  ;;  %v4167_v35 = vpop.xlane.xlu1 %4166 }
 0xd55   :  { %9598 = vrot.lane.b32.xlu0 %v9597_v53, %s10778_s3  ;;  %10345 = vrcp.f32 %v4167_v35  ;;  %v16425_v35 = vmov 0  }
 0xd56   :  { %10347 = vrcp.f32 %v4171_v22 }
 0xd58   :  { %9613 = vrot.lane.b32.xlu1 %v16411_v4, %s10781_s15  ;;  %v4173_v34 = vpop.xlane.xlu1 %4172 }
 0xd59   :  { %9608 = vrot.lane.b32.xlu0 %v16414_v40, %s10781_s15  ;;  %10349 = vrcp.f32 %v4173_v34 }
 0xd5a   :  { %10351 = vrcp.f32 %v4175_v2 }
 0xd5c   :  { %9623 = vrot.lane.b32.xlu1 %v16417_v17, %s10780_s1  ;;  %v4177_v50 = vpop.xlane.xlu1 %4176 }
 0xd5d   :  { %9618 = vrot.lane.b32.xlu0 %v16420_v52, %s10780_s1  ;;  %10353 = vrcp.f32 %v4177_v50 }
 0xd5e   :  { %10355 = vrcp.f32 %v4179_v36 }
 0xd5f   :  { %v10346_v49 = vpop.eup %10345 }
 0xd60   :  { %v4181_v56 = vpop.xlane.xlu1 %4180  ;;  %v4238_v11 = vmul.f32 %v10346_v49, %v13561_v59  ;;  %v10348_v6 = vpop.eup %10347 }
 0xd61   :  { %10357 = vrcp.f32 %v4181_v56  ;;  %v4240_v0 = vmul.f32 %v10348_v6, %v13548_v26 }
 0xd62   :  { %v4258_v9 = vpack.c.bf16 %v4239_v48, %v4238_v11 }
 0xd63   :  { %v10350_v3 = vpop.eup %10349 }
 0xd64   :  { %9346 = vmatprep.mubr.bf16.mxu1 %v4258_v9  ;;  %v9494_v15 = vpop.permute.xlu1 %9493  ;;  %v4241_v27 = vmul.f32 %v10350_v3, %v13564_v21  ;;  %v10352_v8 = vpop.eup %10351  ;;  %v16426_v9 = vld [vmem:[#allocation64_spill] sm:$0xff] }
 0xd65   :  { %v4242_v59 = vmul.f32 %v10352_v8, %v13551_v33  ;;  %v9496_v13 = vunpack.i.h.bf16 %v9494_v15  ;;  %v9495_v60 = vunpack.i.l.bf16 %v9494_v15  ;;  %v16427_v15 = vld [vmem:[#allocation61_spill] sm:$0xff] }
 0xd66   :  { %v4259_v54 = vpack.c.bf16 %v4241_v27, %v4240_v0  ;;  %v16428_v27 = vld [vmem:[#allocation56_spill] sm:$0xff] }
 0xd67   :  { %v10354_v61 = vpop.eup %10353  ;;  %v4891_v44 = vsel %vm701_vm0, %v16423_v16, %v9496_v13 }
 0xd68   :  { %9347 = vmatmul.mubr.bf16.gmra.mrb[184].mxu1 %v4259_v54  ;;  %v9499_v62 = vpop.permute.xlu1 %9498  ;;  %v4243_v30 = vmul.f32 %v10354_v61, %v13571_v38  ;;  %v10356_v42 = vpop.eup %10355  ;;  %v16421_v38 = vld [vmem:[#allocation66_spill] sm:$0xff]  ;;  %v16429_v54 = vld [vmem:[#allocation65_spill] sm:$0xff] }
 0xd69   :  { %v4244_v21 = vmul.f32 %v10356_v42, %v13555_v58  ;;  %v9501_v20 = vunpack.i.h.bf16 %v9499_v62  ;;  %v9500_v18 = vunpack.i.l.bf16 %v9499_v62  ;;  %v4889_v46 = vsel %vm701_vm0, %v16421_v38, %v9491_v12 }
 0xd6a   :  { %v4260_v55 = vpack.c.bf16 %v4243_v30, %v4242_v59  ;;  %v4890_v58 = vsel %vm701_vm0, %v16424_v25, %v9495_v60 }
 0xd6b   :  { %v10358_v10 = vpop.eup %10357  ;;  %v4921_v7 = vsel %vm4920_vm1, %v4888_v45, %v9500_v18  ;;  %v4922_v4 = vsel %vm4920_vm1, %v4889_v46, %v9501_v20 }
 0xd6c   :  { %9350 = vmatprep.mubr.bf16.mxu1 %v4260_v55  ;;  %v9504_v26 = vpop.permute.xlu1 %9503  ;;  %v4245_v47 = vmul.f32 %v10358_v10, %v13574_v57 }
 0xd6d   :  { %v9506_v39 = vunpack.i.h.bf16 %v9504_v26  ;;  %v9505_v22 = vunpack.i.l.bf16 %v9504_v26 }
 0xd6e   :  { %v4261_v33 = vpack.c.bf16 %v4245_v47, %v4244_v21 }
 0xd6f   :  { %v4923_v2 = vsel %vm4920_vm1, %v4890_v58, %v9505_v22  ;;  %v4924_v24 = vsel %vm4920_vm1, %v4891_v44, %v9506_v39 }
 0xd70   :  { %v9509_v57 = vpop.permute.xlu0 %9508  ;;  %9351 = vmatmul.mubr.bf16.gmra.mrb[188].mxu1 %v4261_v33  ;;  %v9514_v23 = vpop.permute.xlu1 %9513 }
 0xd71   :  { %v9511_v43 = vunpack.i.h.bf16 %v9509_v57  ;;  %v9510_v19 = vunpack.i.l.bf16 %v9509_v57  ;;  %v9516_v41 = vunpack.i.h.bf16 %v9514_v23  ;;  %v9515_v53 = vunpack.i.l.bf16 %v9514_v23  ;;  %5959 = vmatprep.mubr.bf16.mxu1 %v16425_v35  ;;  %v16430_v23 = vld [vmem:[#allocation59_spill] sm:$0xff] }
 0xd73   :  { %v4956_v34 = vsel %vm4953_vm2, %v4923_v2, %v9515_v53  ;;  %v4957_v32 = vsel %vm4953_vm2, %v4924_v24, %v9516_v41  ;;  %v4954_v5 = vsel %vm4953_vm2, %v4921_v7, %v9510_v19  ;;  %v4955_v40 = vsel %vm4953_vm2, %v4922_v4, %v9511_v43  ;;  %v16431_v19 = vld [vmem:[#allocation57_spill] sm:$0xff]  ;;  %v16432_v2 = vld [vmem:[#allocation63_spill] sm:$0xff] }
 0xd74   :  { %v4987_v36 = vpack.c.bf16 %v4957_v32, %v4956_v34  ;;  %v9519_v63 = vpop.permute.xlu0 %9518  ;;  %v9524_v51 = vpop.permute.xlu1 %9523  ;;  %v4986_v17 = vpack.c.bf16 %v4955_v40, %v4954_v5  ;;  %v16433_v7 = vld [vmem:[#allocation55_spill] sm:$0xff] }
 0xd75   :  { %v9521_v50 = vunpack.i.h.bf16 %v9519_v63  ;;  %v9520_v29 = vunpack.i.l.bf16 %v9519_v63  ;;  %v9526_v28 = vunpack.i.h.bf16 %v9524_v51  ;;  %v9525_v37 = vunpack.i.l.bf16 %v9524_v51 }
 0xd76   :  { %9370 = vmatprep.mubr.bf16.mxu0 %v4986_v17 }
 0xd77   :  { %9371 = vmatmul.mubr.bf16.vlgmr.msra.gmra.mrb[160].mxu0 %v4987_v36  ;;  %v4893_v3 = vsel %vm701_vm0, %v16426_v9, %v9521_v50  ;;  %v4892_v0 = vsel %vm701_vm0, %v16427_v15, %v9520_v29  ;;  %v4895_v8 = vsel %vm701_vm0, %v16428_v27, %v9526_v28  ;;  %v4894_v61 = vsel %vm701_vm0, %v16429_v54, %v9525_v37 }
 0xd78   :  { %v9529_v52 = vpop.permute.xlu0 %9528  ;;  %v9534_v49 = vpop.permute.xlu1 %9533 }
 0xd79   :  { %v9531_v56 = vunpack.i.h.bf16 %v9529_v52  ;;  %v9530_v11 = vunpack.i.l.bf16 %v9529_v52  ;;  %v9536_v48 = vunpack.i.h.bf16 %v9534_v49  ;;  %v9535_v6 = vunpack.i.l.bf16 %v9534_v49 }
 0xd7b   :  { %v4925_v10 = vsel %vm4920_vm1, %v4892_v0, %v9530_v11  ;;  %v4926_v12 = vsel %vm4920_vm1, %v4893_v3, %v9531_v56  ;;  %v4927_v14 = vsel %vm4920_vm1, %v4894_v61, %v9535_v6  ;;  %v4928_v13 = vsel %vm4920_vm1, %v4895_v8, %v9536_v48 }
 0xd7c   :  { %v9539_v31 = vpop.permute.xlu0 %9538  ;;  %v9544_v62 = vpop.permute.xlu1 %9543 }
 0xd7d   :  { %v9541_v59 = vunpack.i.h.bf16 %v9539_v31  ;;  %v9540_v30 = vunpack.i.l.bf16 %v9539_v31  ;;  %v9546_v42 = vunpack.i.h.bf16 %v9544_v62  ;;  %v9545_v55 = vunpack.i.l.bf16 %v9544_v62  ;;  %v16434_v62 = vld [vmem:[#allocation52_spill] sm:$0xff] }
 0xd7f   :  { %v4958_v60 = vsel %vm4953_vm2, %v4925_v10, %v9540_v30  ;;  %v4959_v26 = vsel %vm4953_vm2, %v4926_v12, %v9541_v59  ;;  %v4960_v21 = vsel %vm4953_vm2, %v4927_v14, %v9545_v55  ;;  %v4961_v47 = vsel %vm4953_vm2, %v4928_v13, %v9546_v42  ;;  %v16435_v30 = vld [vmem:[#allocation58_spill] sm:$0xff]  ;;  %v16436_v10 = vld [vmem:[#allocation67_spill] sm:$0xff] }
 0xd80   :  { %v4988_v20 = vpack.c.bf16 %v4959_v26, %v4958_v60  ;;  %v4989_v18 = vpack.c.bf16 %v4961_v47, %v4960_v21  ;;  %v9554_v39 = vpop.permute.xlu1 %9553  ;;  %v9549_v22 = vpop.permute.xlu0 %9548  ;;  %v16437_v14 = vld [vmem:[#allocation51_spill] sm:$0xff] }
 0xd81   :  { %v9551_v38 = vunpack.i.h.bf16 %v9549_v22  ;;  %v9550_v46 = vunpack.i.l.bf16 %v9549_v22  ;;  %v9556_v45 = vunpack.i.h.bf16 %v9554_v39  ;;  %v9555_v16 = vunpack.i.l.bf16 %v9554_v39 }
 0xd82   :  { %9374 = vmatprep.mubr.bf16.mxu0 %v4988_v20 }
 0xd83   :  { %9375 = vmatmul.mubr.bf16.gmra.mrb[164].mxu0 %v4989_v18  ;;  %v4897_v43 = vsel %vm701_vm0, %v16430_v23, %v9551_v38  ;;  %v4896_v41 = vsel %vm701_vm0, %v16431_v19, %v9550_v46  ;;  %v4899_v24 = vsel %vm701_vm0, %v16432_v2, %v9556_v45  ;;  %v4898_v4 = vsel %vm701_vm0, %v16433_v7, %v9555_v16  ;;  %v16439_v2 = vld [vmem:[#allocation102_spill] sm:$0xff] }
 0xd84   :  { %v9564_v33 = vpop.permute.xlu1 %9563  ;;  %v9559_v1 = vpop.permute.xlu0 %9558 }
 0xd85   :  { %v9566_v44 = vunpack.i.h.bf16 %v9564_v33  ;;  %v9565_v25 = vunpack.i.l.bf16 %v9564_v33  ;;  %v9561_v58 = vunpack.i.h.bf16 %v9559_v1  ;;  %v9560_v57 = vunpack.i.l.bf16 %v9559_v1 }
 0xd87   :  { %v4931_v63 = vsel %vm4920_vm1, %v4898_v4, %v9565_v25  ;;  %v4932_v51 = vsel %vm4920_vm1, %v4899_v24, %v9566_v44  ;;  %v4929_v17 = vsel %vm4920_vm1, %v4896_v41, %v9560_v57  ;;  %v4930_v50 = vsel %vm4920_vm1, %v4897_v43, %v9561_v58  ;;  %v16441_v4 = vld [vmem:[#allocation105_spill] sm:$0xff] }
 0xdb9   :  { %v9574_v53 = vpop.permute.xlu1 %9573 }
 0xdba   :  { %v9576_v34 = vunpack.i.h.bf16 %v9574_v53  ;;  %v9575_v32 = vunpack.i.l.bf16 %v9574_v53  ;;  %v9569_v5 = vpop.permute.xlu0 %9568  ;;  %v16438_v53 = vld [vmem:[#allocation104_spill] sm:$0xff] }
 0xdbb   :  { %v9571_v40 = vunpack.i.h.bf16 %v9569_v5  ;;  %v9570_v36 = vunpack.i.l.bf16 %v9569_v5  ;;  %v16440_v24 = vpack.i.bf16 %v16438_v53, %v16439_v2 }
 0xdbc   :  { %v4964_v29 = vsel %vm4953_vm2, %v4931_v63, %v9575_v32  ;;  %v4965_v28 = vsel %vm4953_vm2, %v4932_v51, %v9576_v34  ;;  %v16442_v34 = vld [vmem:[#allocation103_spill] sm:$0xff]  ;;  %v16444_v51 = vld [vmem:[#allocation54_spill] sm:$0xff] }
 0xdbd   :  { %v9584_v37 = vpop.permute.xlu1 %9583  ;;  %v4962_v52 = vsel %vm4953_vm2, %v4929_v17, %v9570_v36  ;;  %v4963_v49 = vsel %vm4953_vm2, %v4930_v50, %v9571_v40  ;;  %v4991_v56 = vpack.c.bf16 %v4965_v28, %v4964_v29  ;;  %v16443_v32 = vpack.i.bf16 %v16441_v4, %v16442_v34  ;;  %v16445_v17 = vld [vmem:[#allocation26_spill] sm:$0xff]  ;;  %v16448_v28 = vld [vmem:[#allocation4_spill] sm:$0xff] }
 0xdbe   :  { %v9579_v11 = vpop.permute.xlu0 %9578  ;;  %v4990_v48 = vpack.c.bf16 %v4963_v49, %v4962_v52  ;;  %v9586_v6 = vunpack.i.h.bf16 %v9584_v37  ;;  %v9585_v9 = vunpack.i.l.bf16 %v9584_v37  ;;  %v16446_v50 = vpack.i.bf16 %v16444_v51, %v16445_v17  ;;  %v16447_v29 = vld [vmem:[#allocation30_spill] sm:$0xff]  ;;  %v16450_v52 = vld [vmem:[#allocation108_spill] sm:$0xff] }
 0xdbf   :  { %v9581_v15 = vunpack.i.h.bf16 %v9579_v11  ;;  %v9580_v0 = vunpack.i.l.bf16 %v9579_v11  ;;  %v16449_v37 = vpack.i.bf16 %v16447_v29, %v16448_v28  ;;  %v16451_v49 = vld [vmem:[#allocation106_spill] sm:$0xff]  ;;  %v16453_v11 = vld [vmem:[#allocation109_spill] sm:$0xff]  ;;  %v10744_v17 = vld [vmem:[%s15879_s0 + $0x10] sm:$0xff] }
 0xdc0   :  { %9378 = vmatprep.mubr.bf16.mxu0 %v4990_v48  ;;  %v4903_v59 = vsel %vm701_vm0, %v16434_v62, %v9586_v6  ;;  %v4902_v42 = vsel %vm701_vm0, %v16435_v30, %v9585_v9  ;;  %v16454_v48 = vld [vmem:[#allocation107_spill] sm:$0xff]  ;;  %v16456_v9 = vld [vmem:[#allocation16_spill] sm:$0xff] }
 0xdc1   :  { %v9594_v3 = vpop.permute.xlu1 %9593  ;;  %9379 = vmatmul.mubr.bf16.gmra.mrb[168].mxu0 %v4991_v56  ;;  %v4901_v12 = vsel %vm701_vm0, %v16436_v10, %v9581_v15  ;;  %v4900_v13 = vsel %vm701_vm0, %v16437_v14, %v9580_v0  ;;  %v16452_v56 = vpack.i.bf16 %v16450_v52, %v16451_v49  ;;  %v16455_v6 = vpack.i.bf16 %v16453_v11, %v16454_v48  ;;  %v16459_v0 = vld [vmem:[#allocation32_spill] sm:$0xff]  ;;  %v16463_v10 = vld [vmem:[#allocation110_spill] sm:$0xff]  ;;  %v10745_v28 = vld [vmem:[%s15879_s0 + $0x8] sm:$0xff] }
 0xdc2   :  { %v9589_v27 = vpop.permute.xlu0 %9588  ;;  %v9596_v8 = vunpack.i.h.bf16 %v9594_v3  ;;  %v9595_v54 = vunpack.i.l.bf16 %v9594_v3  ;;  %v16457_v3 = vld [vmem:[#allocation28_spill] sm:$0xff] }
 0xdc3   :  { %v9591_v61 = vunpack.i.h.bf16 %v9589_v27  ;;  %v9590_v31 = vunpack.i.l.bf16 %v9589_v27  ;;  %v16458_v15 = vpack.i.bf16 %v16456_v9, %v16457_v3  ;;  %v16460_v27 = vld [vmem:[#allocation12_spill] sm:$0xff] }
 0xdc4   :  { %v4935_v18 = vsel %vm4920_vm1, %v4902_v42, %v9595_v54  ;;  %v4936_v39 = vsel %vm4920_vm1, %v4903_v59, %v9596_v8  ;;  %v16461_v8 = vpack.i.bf16 %v16459_v0, %v16460_v27  ;;  %v16475_v3 = vld [vmem:[#allocation68_spill] sm:$0xff]  ;;  %v16476_v0 = vld [vmem:[#allocation71_spill] sm:$0xff] }
 0xdc5   :  { %v4933_v22 = vsel %vm4920_vm1, %v4900_v13, %v9590_v31  ;;  %v4934_v33 = vsel %vm4920_vm1, %v4901_v12, %v9591_v61  ;;  %v16465_v13 = vld [vmem:[#allocation113_spill] sm:$0xff] }
 0xdc6   :  { %v9604_v55 = vpop.permute.xlu1 %9603 }
 0xdc7   :  { %v9606_v60 = vunpack.i.h.bf16 %v9604_v55  ;;  %v9605_v26 = vunpack.i.l.bf16 %v9604_v55  ;;  %v9599_v21 = vpop.permute.xlu0 %9598  ;;  %v16462_v55 = vld [vmem:[#allocation112_spill] sm:$0xff] }
 0xdc8   :  { %v9601_v47 = vunpack.i.h.bf16 %v9599_v21  ;;  %v9600_v20 = vunpack.i.l.bf16 %v9599_v21  ;;  %v16464_v12 = vpack.i.bf16 %v16462_v55, %v16463_v10 }
 0xdc9   :  { %v4968_v38 = vsel %vm4953_vm2, %v4935_v18, %v9605_v26  ;;  %v4969_v46 = vsel %vm4953_vm2, %v4936_v39, %v9606_v60  ;;  %v16466_v60 = vld [vmem:[#allocation111_spill] sm:$0xff] }
 0xdca   :  { %v4966_v1 = vsel %vm4953_vm2, %v4933_v22, %v9600_v20  ;;  %v4967_v45 = vsel %vm4953_vm2, %v4934_v33, %v9601_v47  ;;  %v4993_v16 = vpack.c.bf16 %v4969_v46, %v4968_v38  ;;  %v16467_v26 = vpack.i.bf16 %v16465_v13, %v16466_v60  ;;  %v16468_v39 = vld [vmem:[#allocation7_spill] sm:$0xff]  ;;  %v16469_v22 = vld [vmem:[#allocation38_spill] sm:$0xff] }
 0xdcb   :  { %v4992_v44 = vpack.c.bf16 %v4967_v45, %v4966_v1  ;;  %v16470_v33 = vpack.i.bf16 %v16468_v39, %v16469_v22  ;;  %v16471_v38 = vld [vmem:[#allocation11_spill] sm:$0xff]  ;;  %v9609_v2 = vpop.permute.xlu0 %9608  ;;  %v10748_v39 = vld [vmem:[%s15879_s0 + $0x20] sm:$0xff] }
 0xdcc   :  { %v16472_v46 = vld [vmem:[#allocation19_spill] sm:$0xff] }
 0xdcd   :  { %9382 = vmatprep.mubr.bf16.mxu0 %v4992_v44  ;;  %v16473_v1 = vpack.i.bf16 %v16471_v38, %v16472_v46  ;;  %v10749_v46 = vld [vmem:[%s15879_s0 + $0x38] sm:$0xff] }
 0xdce   :  { %9383 = vmatmul.mubr.bf16.gmra.mrb[172].mxu0 %v4993_v16 }
 0xdcf   :  { %v9619_v51 = vpop.permute.xlu0 %9618 }
 0xdd0   :  { %v9621_v11 = vunpack.i.h.bf16 %v9619_v51  ;;  %v9620_v48 = vunpack.i.l.bf16 %v9619_v51 }
 0xdfb   :  { %v9340_v25 = vpop.f32.mrb[176].mxu1 }
 0xdfc   :  { %v4441_v58 = vpop.f32.mrb[177].mxu1 }
 0xdfd   :  { %v9341_v57 = vpop.f32.mrb[178].mxu1 }
 0xdfe   :  { %v9632_v23 = vpack.i.bf16 %v9341_v57, %v9340_v25  ;;  %v4444_v43 = vpop.f32.mrb[179].mxu1 }
 0xdff   :  { %v9627_v19 = vpack.i.bf16 %v4444_v43, %v4441_v58 }
 0xe00   :  { %9633 = vrot.lane.b32.xlu1 %v9632_v23, %s10778_s3 }
 0xe01   :  { %9628 = vrot.lane.b32.xlu0 %v9627_v19, %s10778_s3  ;;  %v13825_v19 = vld [vmem:[%s15883_s5] ss:$0 sm:$0xff] }
 0xe03   :  { %v9344_v41 = vpop.f32.mrb[180].mxu1 }
 0xe04   :  { %9643 = vrot.lane.b32.xlu1 %v16440_v24, %s10781_s15  ;;  %v4457_v7 = vpop.f32.mrb[181].mxu1 }
 0xe05   :  { %9638 = vrot.lane.b32.xlu0 %v16443_v32, %s10781_s15  ;;  %v9345_v5 = vpop.f32.mrb[182].mxu1 }
 0xe06   :  { %v9662_v40 = vpack.i.bf16 %v9345_v5, %v9344_v41  ;;  %v4460_v36 = vpop.f32.mrb[183].mxu1  ;;  %v9614_v41 = vpop.permute.xlu1 %9613 }
 0xe07   :  { %v9657_v63 = vpack.i.bf16 %v4460_v36, %v4457_v7  ;;  %v10743_v7 = vld [vmem:[%s15879_s0] sm:$0xff]  ;;  %v9616_v5 = vunpack.i.h.bf16 %v9614_v41  ;;  %v9611_v36 = vunpack.i.h.bf16 %v9609_v2 }
 0xe08   :  { %9653 = vrot.lane.b32.xlu1 %v16446_v50, %s10780_s1 }
 0xe09   :  { %9648 = vrot.lane.b32.xlu0 %v16449_v37, %s10780_s1  ;;  %v4905_v27 = vsel %vm701_vm0, %v16476_v0, %v9611_v36 }
 0xe0a   :  { %v9624_v32 = vpop.permute.xlu1 %9623 }
 0xe0b   :  { %v9626_v49 = vunpack.i.h.bf16 %v9624_v32 }
 0xe0c   :  { %9663 = vrot.lane.b32.xlu1 %v9662_v40, %s10778_s3  ;;  %v9615_v40 = vunpack.i.l.bf16 %v9614_v41 }
 0xe0d   :  { %9658 = vrot.lane.b32.xlu0 %v9657_v63, %s10778_s3  ;;  %v9610_v63 = vunpack.i.l.bf16 %v9609_v2 }
 0xe10   :  { %9673 = vrot.lane.b32.xlu1 %v16452_v56, %s10781_s15  ;;  %v9625_v56 = vunpack.i.l.bf16 %v9624_v32 }
 0xe11   :  { %9668 = vrot.lane.b32.xlu0 %v16455_v6, %s10781_s15  ;;  %v16474_v6 = vld [vmem:[#allocation70_spill] sm:$0xff] }
 0xe12   :  { %v4907_v9 = vsel %vm701_vm0, %v16474_v6, %v9616_v5 }
 0xe13   :  { %v4940_v60 = vsel %vm4920_vm1, %v4907_v9, %v9626_v49 }
 0xe14   :  { %9683 = vrot.lane.b32.xlu1 %v16458_v15, %s10780_s1  ;;  %v4906_v15 = vsel %vm701_vm0, %v16475_v3, %v9615_v40 }
 0xe15   :  { %9678 = vrot.lane.b32.xlu0 %v16461_v8, %s10780_s1  ;;  %v4939_v13 = vsel %vm4920_vm1, %v4906_v15, %v9625_v56  ;;  %v16481_v56 = vld [vmem:[#allocation73_spill] sm:$0xff] }
 0xe3b   :  { %v9348_v54 = vpop.f32.mrb[184].mxu1 }
 0xe3c   :  { %v4473_v61 = vpop.f32.mrb[185].mxu1 }
 0xe3d   :  { %v9349_v31 = vpop.f32.mrb[186].mxu1 }
 0xe3e   :  { %v9692_v62 = vpack.i.bf16 %v9349_v31, %v9348_v54  ;;  %v4476_v59 = vpop.f32.mrb[187].mxu1  ;;  %v16477_v54 = vld [vmem:[#allocation69_spill] sm:$0xff] }
 0xe3f   :  { %v9687_v30 = vpack.i.bf16 %v4476_v59, %v4473_v61  ;;  %v4904_v61 = vsel %vm701_vm0, %v16477_v54, %v9610_v63  ;;  %v10746_v31 = vld [vmem:[%s15879_s0 + $0x18] sm:$0xff]  ;;  %v16478_v63 = vld [vmem:[#allocation74_spill] sm:$0xff] }
 0xe40   :  { %9693 = vrot.lane.b32.xlu1 %v9692_v62, %s10778_s3 }
 0xe41   :  { %9688 = vrot.lane.b32.xlu0 %v9687_v30, %s10778_s3  ;;  %v10747_v30 = vld [vmem:[%s15879_s0 + $0x28] sm:$0xff] }
 0xe43   :  { %v9352_v42 = vpop.f32.mrb[188].mxu1 }
 0xe44   :  { %9703 = vrot.lane.b32.xlu1 %v16464_v12, %s10781_s15  ;;  %v4489_v14 = vpop.f32.mrb[189].mxu1 }
 0xe45   :  { %9698 = vrot.lane.b32.xlu0 %v16467_v26, %s10781_s15  ;;  %v9353_v21 = vpop.f32.mrb[190].mxu1 }
 0xe46   :  { %v9722_v47 = vpack.i.bf16 %v9353_v21, %v9352_v42  ;;  %v4492_v20 = vpop.f32.mrb[191].mxu1 }
 0xe47   :  { %v9717_v18 = vpack.i.bf16 %v4492_v20, %v4489_v14  ;;  %v4938_v20 = vsel %vm4920_vm1, %v4905_v27, %v9621_v11 }
 0xe48   :  { %9713 = vrot.lane.b32.xlu1 %v16470_v33, %s10780_s1 }
 0xe49   :  { %9708 = vrot.lane.b32.xlu0 %v16473_v1, %s10780_s1 }
 0xe4a   :  { %v9372_v45 = vpop.f32.mrb[160].mxu0 }
 0xe4b   :  { %v5107_v16 = vpop.f32.mrb[161].mxu0  ;;  %v5116_v24 = vadd.f32 %v9372_v45, %v13825_v19 }
 0xe4c   :  { %9723 = vrot.lane.b32.xlu1 %v9722_v47, %s10778_s3  ;;  %v9373_v44 = vpop.f32.mrb[162].mxu0  ;;  %v5108_v53 = vadd.f32 %v13825_v19, %v5107_v16  ;;  %v4937_v47 = vsel %vm4920_vm1, %v4904_v61, %v9620_v48 }
 0xe4d   :  { %9718 = vrot.lane.b32.xlu0 %v9717_v18, %s10778_s3  ;;  %v5110_v25 = vpop.f32.mrb[163].mxu0  ;;  %v13839_v50 = vadd.f32 %v10744_v17, %v5116_v24  ;;  %v5119_v29 = vadd.f32 %v9373_v44, %v13825_v19  ;;  %v16479_v17 = vld [vmem:[#allocation72_spill] sm:$0xff] }
 0xe4e   :  { %v13832_v4 = vadd.f32 %v10743_v7, %v5108_v53  ;;  %v5111_v34 = vadd.f32 %v13825_v19, %v5110_v25 }
 0xe4f   :  { %v13862_v62 = vadd.f32 %v10746_v31, %v5119_v29 }
 0xe50   :  { %v13845_v37 = vadd.f32 %v10745_v28, %v5111_v34 }
 0xe56   :  { %v9376_v58 = vpop.f32.mrb[164].mxu0 }
 0xe57   :  { %v5123_v57 = vpop.f32.mrb[165].mxu0  ;;  %v5132_v18 = vadd.f32 %v9376_v58, %v13825_v19 }
 0xe58   :  { %v9377_v23 = vpop.f32.mrb[166].mxu0  ;;  %v5124_v8 = vadd.f32 %v13825_v19, %v5123_v57 }
 0xe59   :  { %v5126_v43 = vpop.f32.mrb[167].mxu0  ;;  %v5135_v59 = vadd.f32 %v9377_v23, %v13825_v19  ;;  %v10750_v23 = vld [vmem:[%s15879_s0 + $0x30] sm:$0xff] }
 0xe5a   :  { %v5127_v52 = vadd.f32 %v13825_v19, %v5126_v43  ;;  %v13880_v22 = vadd.f32 %v10748_v39, %v5124_v8  ;;  %v13896_v43 = vadd.f32 %v10750_v23, %v5132_v18 }
 0xe5b   :  { %v13887_v1 = vadd.f32 %v10749_v46, %v5135_v59  ;;  %v10753_v46 = vld [vmem:[%s15879_s0 + $0x50] sm:$0xff] }
 0xe5c   :  { %v13868_v42 = vadd.f32 %v10747_v30, %v5127_v52  ;;  %v16480_v52 = vld [vmem:[#allocation75_spill] sm:$0xff] }
 0xe6c   :  { %5268 = vadd.xlane.f32.xlu0 %v13832_v4 }
 0xe70   :  { %5270 = vadd.xlane.f32.xlu1 %v13845_v37  ;;  %5272 = vadd.xlane.f32.xlu0 %v13839_v50 }
 0xe72   :  { %v9634_v55 = vpop.permute.xlu1 %9633 }
 0xe73   :  { %v9636_v10 = vunpack.i.h.bf16 %v9634_v55  ;;  %v9635_v12 = vunpack.i.l.bf16 %v9634_v55  ;;  %v9629_v14 = vpop.permute.xlu0 %9628 }
 0xe74   :  { %v9631_v26 = vunpack.i.h.bf16 %v9629_v14  ;;  %v9630_v21 = vunpack.i.l.bf16 %v9629_v14  ;;  %5278 = vadd.xlane.f32.xlu1 %v13868_v42  ;;  %5274 = vadd.xlane.f32.xlu0 %v13862_v62 }
 0xe75   :  { %v4972_v33 = vsel %vm4953_vm2, %v4939_v13, %v9635_v12  ;;  %v4973_v38 = vsel %vm4953_vm2, %v4940_v60, %v9636_v10 }
 0xe76   :  { %v9644_v45 = vpop.permute.xlu1 %9643  ;;  %v4970_v16 = vsel %vm4953_vm2, %v4937_v47, %v9630_v21  ;;  %v4971_v44 = vsel %vm4953_vm2, %v4938_v20, %v9631_v26  ;;  %v4995_v25 = vpack.c.bf16 %v4973_v38, %v4972_v33  ;;  %v10751_v47 = vld [vmem:[%s15879_s0 + $0x40] sm:$0xff]  ;;  %v10752_v33 = vld [vmem:[%s15879_s0 + $0x48] sm:$0xff] }
 0xe77   :  { %v9639_v58 = vpop.permute.xlu0 %9638  ;;  %v4994_v57 = vpack.c.bf16 %v4971_v44, %v4970_v16  ;;  %v9646_v41 = vunpack.i.h.bf16 %v9644_v45  ;;  %v9645_v53 = vunpack.i.l.bf16 %v9644_v45  ;;  %v10754_v16 = vld [vmem:[%s15879_s0 + $0x58] sm:$0xff] }
 0xe78   :  { %5282 = vadd.xlane.f32.xlu1 %v13887_v1  ;;  %5276 = vadd.xlane.f32.xlu0 %v13880_v22  ;;  %v9641_v24 = vunpack.i.h.bf16 %v9639_v58  ;;  %v9640_v7 = vunpack.i.l.bf16 %v9639_v58 }
 0xe79   :  { %9386 = vmatprep.mubr.bf16.mxu0 %v4994_v57  ;;  %v4911_v51 = vsel %vm701_vm0, %v16478_v63, %v9646_v41  ;;  %v4910_v29 = vsel %vm701_vm0, %v16479_v17, %v9645_v53  ;;  %v10757_v63 = vld [vmem:[%s15879_s0 + $0x70] sm:$0xff]  ;;  %v10758_v17 = vld [vmem:[%s15879_s0 + $0x78] sm:$0xff] }
 0xe7a   :  { %v9654_v2 = vpop.permute.xlu1 %9653  ;;  %9387 = vmatmul.mubr.bf16.gmra.mrb[176].mxu0 %v4995_v25  ;;  %v4909_v49 = vsel %vm701_vm0, %v16480_v52, %v9641_v24  ;;  %v4908_v11 = vsel %vm701_vm0, %v16481_v56, %v9640_v7 }
 0xe7b   :  { %v9649_v34 = vpop.permute.xlu0 %9648  ;;  %v9656_v32 = vunpack.i.h.bf16 %v9654_v2  ;;  %v9655_v5 = vunpack.i.l.bf16 %v9654_v2  ;;  %v10755_v2 = vld [vmem:[%s15879_s0 + $0x60] sm:$0xff] }
 0xe7c   :  { %5280 = vadd.xlane.f32.xlu0 %v13896_v43  ;;  %v9651_v40 = vunpack.i.h.bf16 %v9649_v34  ;;  %v9650_v36 = vunpack.i.l.bf16 %v9649_v34 }
 0xe7d   :  { %v4943_v0 = vsel %vm4920_vm1, %v4910_v29, %v9655_v5  ;;  %v4944_v27 = vsel %vm4920_vm1, %v4911_v51, %v9656_v32  ;;  %v10756_v5 = vld [vmem:[%s15879_s0 + $0x68] sm:$0xff] }
 0xe7e   :  { %v9664_v28 = vpop.permute.xlu1 %9663  ;;  %v4941_v8 = vsel %vm4920_vm1, %v4908_v11, %v9650_v36  ;;  %v4942_v54 = vsel %vm4920_vm1, %v4909_v49, %v9651_v40 }
 0xe7f   :  { %v9666_v48 = vunpack.i.h.bf16 %v9664_v28  ;;  %v9665_v6 = vunpack.i.l.bf16 %v9664_v28  ;;  %v9659_v9 = vpop.permute.xlu0 %9658 }
 0xe80   :  { %v9661_v3 = vunpack.i.h.bf16 %v9659_v9  ;;  %v9660_v15 = vunpack.i.l.bf16 %v9659_v9 }
 0xe81   :  { %v4976_v61 = vsel %vm4953_vm2, %v4943_v0, %v9665_v6  ;;  %v4977_v31 = vsel %vm4953_vm2, %v4944_v27, %v9666_v48  ;;  %v16482_v0 = vld [vmem:[#allocation78_spill] sm:$0xff] }
 0xe82   :  { %v4974_v59 = vsel %vm4953_vm2, %v4941_v8, %v9660_v15  ;;  %v4975_v30 = vsel %vm4953_vm2, %v4942_v54, %v9661_v3  ;;  %v4997_v55 = vpack.c.bf16 %v4977_v31, %v4976_v61  ;;  %v9674_v34 = vpop.permute.xlu1 %9673  ;;  %v16483_v8 = vld [vmem:[#allocation76_spill] sm:$0xff]  ;;  %v16484_v31 = vld [vmem:[#allocation79_spill] sm:$0xff] }
 0xe83   :  { %v4996_v10 = vpack.c.bf16 %v4975_v30, %v4974_v59  ;;  %v9669_v36 = vpop.permute.xlu0 %9668  ;;  %v9676_v52 = vunpack.i.h.bf16 %v9674_v34  ;;  %v9675_v49 = vunpack.i.l.bf16 %v9674_v34  ;;  %v16485_v30 = vld [vmem:[#allocation77_spill] sm:$0xff] }
 0xe84   :  { %v9671_v11 = vunpack.i.h.bf16 %v9669_v36  ;;  %v9670_v48 = vunpack.i.l.bf16 %v9669_v36 }
 0xe85   :  { %9390 = vmatprep.mubr.bf16.mxu0 %v4996_v10  ;;  %v4915_v27 = vsel %vm701_vm0, %v16482_v0, %v9676_v52  ;;  %v4914_v54 = vsel %vm701_vm0, %v16483_v8, %v9675_v49  ;;  %v16487_v49 = vld [vmem:[#allocation80_spill] sm:$0xff] }
 0xe86   :  { %9391 = vmatmul.mubr.bf16.gmra.mrb[180].mxu0 %v4997_v55  ;;  %v9684_v28 = vpop.permute.xlu1 %9683  ;;  %v4913_v59 = vsel %vm701_vm0, %v16484_v31, %v9671_v11  ;;  %v4912_v55 = vsel %vm701_vm0, %v16485_v30, %v9670_v48  ;;  %v16488_v48 = vld [vmem:[#allocation83_spill] sm:$0xff] }
 0xe87   :  { %v9679_v56 = vpop.permute.xlu0 %9678  ;;  %v9686_v6 = vunpack.i.h.bf16 %v9684_v28  ;;  %v9685_v9 = vunpack.i.l.bf16 %v9684_v28  ;;  %v16486_v28 = vld [vmem:[#allocation82_spill] sm:$0xff] }
 0xe88   :  { %v9681_v3 = vunpack.i.h.bf16 %v9679_v56  ;;  %v9680_v15 = vunpack.i.l.bf16 %v9679_v56 }
 0xe94   :  { %v9380_v12 = vpop.f32.mrb[168].mxu0 }
 0xe95   :  { %v5139_v14 = vpop.f32.mrb[169].mxu0  ;;  %v5148_v21 = vadd.f32 %v9380_v12, %v13825_v19 }
 0xe96   :  { %v5140_v13 = vadd.f32 %v13825_v19, %v5139_v14  ;;  %v9381_v60 = vpop.f32.mrb[170].mxu0 }
 0xe97   :  { %v5142_v26 = vpop.f32.mrb[171].mxu0  ;;  %v5151_v39 = vadd.f32 %v9381_v60, %v13825_v19  ;;  %v13933_v45 = vadd.f32 %v10753_v46, %v5148_v21  ;;  %v4948_v21 = vsel %vm4920_vm1, %v4915_v27, %v9686_v6 }
 0xe98   :  { %v13920_v20 = vadd.f32 %v10751_v47, %v5140_v13  ;;  %v5143_v18 = vadd.f32 %v13825_v19, %v5142_v26  ;;  %v4947_v26 = vsel %vm4920_vm1, %v4914_v54, %v9685_v9  ;;  %v4945_v47 = vsel %vm4920_vm1, %v4912_v55, %v9680_v15  ;;  %v16489_v9 = vld [vmem:[#allocation81_spill] sm:$0xff] }
 0xe99   :  { %v13939_v44 = vadd.f32 %v10754_v16, %v5151_v39 }
 0xe9a   :  { %v13927_v38 = vadd.f32 %v10752_v33, %v5143_v18  ;;  %5284 = vadd.xlane.f32.xlu0 %v13920_v20  ;;  %v4946_v18 = vsel %vm4920_vm1, %v4913_v59, %v9681_v3 }
 0xe9c   :  { %5286 = vadd.xlane.f32.xlu1 %v13927_v38 }
 0xe9e   :  { %5288 = vadd.xlane.f32.xlu0 %v13933_v45 }
 0xea0   :  { %5290 = vadd.xlane.f32.xlu1 %v13939_v44 }
 0xea1   :  { %v9384_v25 = vpop.f32.mrb[172].mxu0 }
 0xea2   :  { %v5155_v58 = vpop.f32.mrb[173].mxu0  ;;  %v5164_v53 = vadd.f32 %v9384_v25, %v13825_v19 }
 0xea3   :  { %v5156_v57 = vadd.f32 %v13825_v19, %v5155_v58  ;;  %v9385_v23 = vpop.f32.mrb[174].mxu0 }
 0xea4   :  { %v5158_v41 = vpop.f32.mrb[175].mxu0  ;;  %v5167_v32 = vadd.f32 %v9385_v23, %v13825_v19  ;;  %v13961_v51 = vadd.f32 %v10757_v63, %v5164_v53 }
 0xea5   :  { %v13948_v24 = vadd.f32 %v10755_v2, %v5156_v57  ;;  %v5159_v7 = vadd.f32 %v13825_v19, %v5158_v41 }
 0xea6   :  { %v13967_v29 = vadd.f32 %v10758_v17, %v5167_v32 }
 0xea7   :  { %v13955_v40 = vadd.f32 %v10756_v5, %v5159_v7  ;;  %5292 = vadd.xlane.f32.xlu0 %v13948_v24 }
 0xea9   :  { %5294 = vadd.xlane.f32.xlu1 %v13955_v40 }
 0xeab   :  { %5296 = vadd.xlane.f32.xlu0 %v13961_v51 }
 0xead   :  { %5298 = vadd.xlane.f32.xlu1 %v13967_v29 }
 0xeb2   :  { %v9694_v61 = vpop.permute.xlu1 %9693 }
 0xeb3   :  { %v9696_v10 = vunpack.i.h.bf16 %v9694_v61  ;;  %v9695_v12 = vunpack.i.l.bf16 %v9694_v61  ;;  %v9689_v14 = vpop.permute.xlu0 %9688 }
 0xeb4   :  { %v9691_v13 = vunpack.i.h.bf16 %v9689_v14  ;;  %v9690_v60 = vunpack.i.l.bf16 %v9689_v14 }
 0xeb5   :  { %v4980_v39 = vsel %vm4953_vm2, %v4947_v26, %v9695_v12  ;;  %v4981_v33 = vsel %vm4953_vm2, %v4948_v21, %v9696_v10 }
 0xeb6   :  { %v9704_v46 = vpop.permute.xlu1 %9703  ;;  %v4978_v16 = vsel %vm4953_vm2, %v4945_v47, %v9690_v60  ;;  %v4979_v25 = vsel %vm4953_vm2, %v4946_v18, %v9691_v13  ;;  %v4999_v58 = vpack.c.bf16 %v4981_v33, %v4980_v39 }
 0xeb7   :  { %v9699_v57 = vpop.permute.xlu0 %9698  ;;  %v4998_v23 = vpack.c.bf16 %v4979_v25, %v4978_v16  ;;  %v9706_v41 = vunpack.i.h.bf16 %v9704_v46  ;;  %v9705_v53 = vunpack.i.l.bf16 %v9704_v46 }
 0xeb8   :  { %v9701_v7 = vunpack.i.h.bf16 %v9699_v57  ;;  %v9700_v34 = vunpack.i.l.bf16 %v9699_v57 }
 0xeb9   :  { %9394 = vmatprep.mubr.bf16.mxu0 %v4998_v23  ;;  %v4919_v52 = vsel %vm701_vm0, %v16486_v28, %v9706_v41  ;;  %v4918_v56 = vsel %vm701_vm0, %v16487_v49, %v9705_v53 }
 0xeba   :  { %v9714_v2 = vpop.permute.xlu1 %9713  ;;  %9395 = vmatmul.mubr.bf16.gmra.mrb[184].mxu0 %v4999_v58  ;;  %v4917_v6 = vsel %vm701_vm0, %v16488_v48, %v9701_v7  ;;  %v4916_v3 = vsel %vm701_vm0, %v16489_v9, %v9700_v34  ;;  %v10759_v58 = vld [vmem:[%s15879_s0 + $0x80] sm:$0xff]  ;;  %v10760_v7 = vld [vmem:[%s15879_s0 + $0x88] sm:$0xff] }
 0xebb   :  { %v9709_v32 = vpop.permute.xlu0 %9708  ;;  %v9716_v5 = vunpack.i.h.bf16 %v9714_v2  ;;  %v9715_v36 = vunpack.i.l.bf16 %v9714_v2 }
 0xebc   :  { %v9711_v63 = vunpack.i.h.bf16 %v9709_v32  ;;  %v9710_v17 = vunpack.i.l.bf16 %v9709_v32 }
 0xebd   :  { %v4951_v61 = vsel %vm4920_vm1, %v4918_v56, %v9715_v36  ;;  %v4952_v31 = vsel %vm4920_vm1, %v4919_v52, %v9716_v5  ;;  %v10761_v5 = vld [vmem:[%s15879_s0 + $0x90] sm:$0xff] }
 0xebe   :  { %v9724_v11 = vpop.permute.xlu1 %9723  ;;  %v4949_v59 = vsel %vm4920_vm1, %v4916_v3, %v9710_v17  ;;  %v4950_v30 = vsel %vm4920_vm1, %v4917_v6, %v9711_v63  ;;  %v10762_v17 = vld [vmem:[%s15879_s0 + $0x98] sm:$0xff] }
 0xebf   :  { %v9726_v15 = vunpack.i.h.bf16 %v9724_v11  ;;  %v9725_v0 = vunpack.i.l.bf16 %v9724_v11  ;;  %v9719_v27 = vpop.permute.xlu0 %9718 }
 0xec0   :  { %v9721_v8 = vunpack.i.h.bf16 %v9719_v27  ;;  %v9720_v54 = vunpack.i.l.bf16 %v9719_v27 }
 0xec1   :  { %v4984_v55 = vsel %vm4953_vm2, %v4951_v61, %v9725_v0  ;;  %v4985_v10 = vsel %vm4953_vm2, %v4952_v31, %v9726_v15  ;;  %v10763_v0 = vld [vmem:[%s15879_s0 + $0xa0] sm:$0xff]  ;;  %v10764_v31 = vld [vmem:[%s15879_s0 + $0xa8] sm:$0xff] }
 0xec2   :  { %v4982_v12 = vsel %vm4953_vm2, %v4949_v59, %v9720_v54  ;;  %v4983_v14 = vsel %vm4953_vm2, %v4950_v30, %v9721_v8  ;;  %v5001_v13 = vpack.c.bf16 %v4985_v10, %v4984_v55 }
 0xec3   :  { %v5000_v60 = vpack.c.bf16 %v4983_v14, %v4982_v12 }
 0xec5   :  { %9398 = vmatprep.mubr.bf16.mxu0 %v5000_v60  ;;  %v9767_v60 = vld [vmem:[%s15884_s8] ss:$16 sps:$4 sm:$0xff]  }
 0xec6   :  { %9399 = vmatmul.mubr.bf16.gmra.mrb[188].mxu0 %v5001_v13 }
 0xec7   :  { %6152 = vmatprep.mubr.bf16.mxu0 %v16425_v35 }
 0xef9   :  { %v5269_v26 = vpop.xlane.xlu0 %5268 }
 0xefa   :  { %v5333_v16 = vmul.f32 0.0078125, %v5269_v26  ;;  %v9770_v26 = vld [vmem:[%s15884_s8 + $0x8] ss:$16 sps:$4 sm:$0xff]  }
 0xefc   :  { %v14020_v32 = vsub.f32 %v13832_v4, %v5333_v16  ;;  %v10766_v16 = vld [vmem:[%s15879_s0 + $0xb8] sm:$0xff] }
 0xefd   :  { %v5271_v33 = vpop.xlane.xlu1 %5270  ;;  %v5273_v41 = vpop.xlane.xlu0 %5272 }
 0xefe   :  { %v5334_v53 = vmul.f32 0.0078125, %v5271_v33  ;;  %v5335_v52 = vmul.f32 0.0078125, %v5273_v41  ;;  %v5397_v56 = vmul.f32 %v14020_v32, %v14020_v32  ;;  %v9775_v33 = vld [vmem:[%s15884_s8 + $0x24] ss:$16 sps:$4 sm:$0xff]  }
 0xeff   :  { %v9781_v41 = vld [vmem:[%s15884_s8 + $0x44] ss:$16 sps:$4 sm:$0xff]  }
 0xf00   :  { %v14029_v63 = vsub.f32 %v13845_v37, %v5334_v53  ;;  %v14044_v15 = vsub.f32 %v13839_v50, %v5335_v52  ;;  %v9784_v53 = vld [vmem:[%s15884_s8 + $0x4c] ss:$16 sps:$4 sm:$0xff]   ;;  %v9785_v52 = vld [vmem:[%s15884_s8 + $0x60] ss:$16 sps:$4 sm:$0xff]  }
 0xf01   :  { %v5275_v4 = vpop.xlane.xlu0 %5274  ;;  %v5279_v50 = vpop.xlane.xlu1 %5278 }
 0xf02   :  { %v5336_v48 = vmul.f32 0.0078125, %v5275_v4  ;;  %v5398_v9 = vmul.f32 %v14029_v63, %v14029_v63  ;;  %v5399_v10 = vmul.f32 %v14044_v15, %v14044_v15  ;;  %v5338_v12 = vmul.f32 0.0078125, %v5279_v50  ;;  %v9790_v4 = vld [vmem:[%s15884_s8 + $0x6c] ss:$16 sps:$4 sm:$0xff]   ;;  %v9806_v50 = vld [vmem:[%s15884_s8 + $0xc8] ss:$16 sps:$4 sm:$0xff]  }
 0xf04   :  { %v14053_v61 = vsub.f32 %v13862_v62, %v5336_v48  ;;  %v9769_v62 = vld [vmem:[%s15884_s8 + $0x4] ss:$16 sps:$4 sm:$0xff]   ;;  %v9791_v48 = vld [vmem:[%s15884_s8 + $0x80] ss:$16 sps:$4 sm:$0xff]  }
 0xf05   :  { %v5277_v54 = vpop.xlane.xlu0 %5276  ;;  %5927 = vmatprep.subr.bf16.mxu1 %v9769_v62  ;;  %v9812_v62 = vld [vmem:[%s15884_s8 + $0xe8] ss:$16 sps:$4 sm:$0xff]  }
 0xf06   :  { %v5337_v30 = vmul.f32 0.0078125, %v5277_v54  ;;  %v5400_v13 = vmul.f32 %v14053_v61, %v14053_v61  ;;  %5928 = vmatpush1.bf16.msra.mxu1 %v9767_v60  ;;  %v9808_v54 = vld [vmem:[%s15884_s8 + $0xcc] ss:$16 sps:$4 sm:$0xff]  }
 0xf07   :  { %5929 = vmatprep.subr.bf16.mxu1 %v9775_v33 }
 0xf4d   :  { %v9388_v21 = vpop.f32.mrb[176].mxu0 }
 0xf4e   :  { %v5171_v47 = vpop.f32.mrb[177].mxu0  ;;  %v5180_v25 = vadd.f32 %v9388_v21, %v13825_v19  ;;  %v9772_v21 = vld [vmem:[%s15884_s8 + $0xc] ss:$16 sps:$4 sm:$0xff]  }
 0xf4f   :  { %v5172_v18 = vadd.f32 %v13825_v19, %v5171_v47  ;;  %v9389_v39 = vpop.f32.mrb[178].mxu0  ;;  %v14081_v47 = vsub.f32 %v13880_v22, %v5337_v30  ;;  %6120 = vmatprep.subr.bf16.mxu0 %v9772_v21  ;;  %v14095_v22 = vsub.f32 %v13868_v42, %v5338_v12  ;;  %v9811_v30 = vld [vmem:[%s15884_s8 + $0xe4] ss:$16 sps:$4 sm:$0xff]   ;;  %v5281_v12 = vpop.xlane.xlu0 %5280 }
 0xf50   :  { %v5174_v46 = vpop.f32.mrb[179].mxu0  ;;  %v5183_v2 = vadd.f32 %v9389_v39, %v13825_v19  ;;  %v14025_v36 = vadd.f32 %v10761_v5, %v5180_v25  ;;  %6121 = vmatpush1.bf16.msra.mxu0 %v9770_v26  ;;  %v9782_v5 = vld [vmem:[%s15884_s8 + $0x48] ss:$16 sps:$4 sm:$0xff]  }
 0xf51   :  { %v14009_v57 = vadd.f32 %v10759_v58, %v5172_v18  ;;  %v5175_v23 = vadd.f32 %v13825_v19, %v5174_v46  ;;  %v10765_v18 = vld [vmem:[%s15879_s0 + $0xb0] sm:$0xff]  ;;  %v9778_v46 = vld [vmem:[%s15884_s8 + $0x2c] ss:$16 sps:$4 sm:$0xff]   ;;  %v5401_v42 = vmul.f32 %v14081_v47, %v14081_v47 }
 0xf52   :  { %v14034_v28 = vadd.f32 %v10762_v17, %v5183_v2  ;;  %v9773_v58 = vld [vmem:[%s15884_s8 + $0x20] ss:$16 sps:$4 sm:$0xff]   ;;  %6122 = vmatprep.subr.bf16.mxu0 %v9778_v46  ;;  %v5402_v2 = vmul.f32 %v14095_v22, %v14095_v22  ;;  %v9787_v17 = vld [vmem:[%s15884_s8 + $0x64] ss:$16 sps:$4 sm:$0xff]  }
 0xf53   :  { %v14016_v34 = vadd.f32 %v10760_v7, %v5175_v23  ;;  %5300 = vadd.xlane.f32.xlu0 %v14009_v57  ;;  %v9776_v23 = vld [vmem:[%s15884_s8 + $0x28] ss:$16 sps:$4 sm:$0xff]   ;;  %5930 = vmatpush1.bf16.msra.mxu1 %v9773_v58  ;;  %v9779_v7 = vld [vmem:[%s15884_s8 + $0x40] ss:$16 sps:$4 sm:$0xff]  }
 0xf54   :  { %6123 = vmatpush1.bf16.msra.mxu0 %v9776_v23  ;;  %5931 = vmatprep.subr.bf16.mxu1 %v9781_v41  ;;  %v10767_v58 = vld [vmem:[%s15879_s0 + $0xc0] sm:$0xff]  ;;  %v5285_v41 = vpop.xlane.xlu0 %5284 }
 0xf55   :  { %5302 = vadd.xlane.f32.xlu1 %v14016_v34  ;;  %6124 = vmatprep.subr.bf16.mxu0 %v9784_v53 }
 0xf57   :  { %5304 = vadd.xlane.f32.xlu0 %v14025_v36  ;;  %5932 = vmatpush1.bf16.msra.mxu1 %v9779_v7 }
 0xf58   :  { %6125 = vmatpush1.bf16.msra.mxu0 %v9782_v5  ;;  %5933 = vmatprep.subr.bf16.mxu1 %v9787_v17  ;;  %v5341_v5 = vmul.f32 0.0078125, %v5285_v41 }
 0xf59   :  { %v9392_v49 = vpop.f32.mrb[180].mxu0  ;;  %5306 = vadd.xlane.f32.xlu1 %v14034_v28  ;;  %6126 = vmatprep.subr.bf16.mxu0 %v9790_v4 }
 0xf5a   :  { %v5187_v11 = vpop.f32.mrb[181].mxu0  ;;  %v5196_v55 = vadd.f32 %v9392_v49, %v13825_v19  ;;  %v9788_v49 = vld [vmem:[%s15884_s8 + $0x68] ss:$16 sps:$4 sm:$0xff]  }
 0xf5b   :  { %v5188_v37 = vadd.f32 %v13825_v19, %v5187_v11  ;;  %v9393_v6 = vpop.f32.mrb[182].mxu0  ;;  %5429 = vadd.xlane.f32.xlu0 %v5397_v56  ;;  %5934 = vmatpush1.bf16.msra.mxu1 %v9785_v52  ;;  %v9793_v56 = vld [vmem:[%s15884_s8 + $0x84] ss:$16 sps:$4 sm:$0xff]   ;;  %v9796_v11 = vld [vmem:[%s15884_s8 + $0x8c] ss:$16 sps:$4 sm:$0xff]  }
 0xf5c   :  { %v5190_v3 = vpop.f32.mrb[183].mxu0  ;;  %v5199_v14 = vadd.f32 %v9393_v6, %v13825_v19  ;;  %v14086_v39 = vadd.f32 %v10765_v18, %v5196_v55  ;;  %6127 = vmatpush1.bf16.msra.mxu0 %v9788_v49  ;;  %5935 = vmatprep.subr.bf16.mxu1 %v9793_v56  ;;  %v9799_v6 = vld [vmem:[%s15884_s8 + $0xa4] ss:$16 sps:$4 sm:$0xff]   ;;  %v9814_v55 = vld [vmem:[%s15884_s8 + $0xec] ss:$16 sps:$4 sm:$0xff]   ;;  %v14213_v56 = vsub.f32 %v13920_v20, %v5341_v5 }
 0xf5d   :  { %v14049_v27 = vadd.f32 %v10763_v0, %v5188_v37  ;;  %v5191_v8 = vadd.f32 %v13825_v19, %v5190_v3  ;;  %5431 = vadd.xlane.f32.xlu1 %v5398_v9  ;;  %v9794_v37 = vld [vmem:[%s15884_s8 + $0x88] ss:$16 sps:$4 sm:$0xff]   ;;  %6128 = vmatprep.subr.bf16.mxu0 %v9796_v11  ;;  %v9802_v9 = vld [vmem:[%s15884_s8 + $0xac] ss:$16 sps:$4 sm:$0xff]   ;;  %v9797_v3 = vld [vmem:[%s15884_s8 + $0xa0] ss:$16 sps:$4 sm:$0xff]  }
 0xf5e   :  { %v14100_v25 = vadd.f32 %v10766_v16, %v5199_v14  ;;  %v9800_v0 = vld [vmem:[%s15884_s8 + $0xa8] ss:$16 sps:$4 sm:$0xff]   ;;  %v5283_v14 = vpop.xlane.xlu1 %5282  ;;  %v10769_v11 = vld [vmem:[%s15879_s0 + $0xd0] sm:$0xff] }
 0xf5f   :  { %v14058_v59 = vadd.f32 %v10764_v31, %v5191_v8  ;;  %5308 = vadd.xlane.f32.xlu0 %v14049_v27  ;;  %5936 = vmatpush1.bf16.msra.mxu1 %v9791_v48  ;;  %v9805_v8 = vld [vmem:[%s15884_s8 + $0xc4] ss:$16 sps:$4 sm:$0xff]   ;;  %v9803_v31 = vld [vmem:[%s15884_s8 + $0xc0] ss:$16 sps:$4 sm:$0xff]   ;;  %v5340_v21 = vmul.f32 0.0078125, %v5283_v14 }
 0xf60   :  { %6129 = vmatpush1.bf16.msra.mxu0 %v9794_v37  ;;  %5937 = vmatprep.subr.bf16.mxu1 %v9799_v6  ;;  %v5289_v6 = vpop.xlane.xlu0 %5288 }
 0xf61   :  { %5310 = vadd.xlane.f32.xlu1 %v14058_v59  ;;  %6130 = vmatprep.subr.bf16.mxu0 %v9802_v9  ;;  %v14197_v53 = vsub.f32 %v13887_v1, %v5340_v21 }
 0xf63   :  { %5433 = vadd.xlane.f32.xlu0 %v5399_v10  ;;  %5938 = vmatpush1.bf16.msra.mxu1 %v9797_v3  ;;  %v9809_v10 = vld [vmem:[%s15884_s8 + $0xe0] ss:$16 sps:$4 sm:$0xff]   ;;  %v5404_v49 = vmul.f32 %v14197_v53, %v14197_v53 }
 0xf64   :  { %6131 = vmatpush1.bf16.msra.mxu0 %v9800_v0  ;;  %5939 = vmatprep.subr.bf16.mxu1 %v9805_v8  ;;  %v10770_v0 = vld [vmem:[%s15879_s0 + $0xd8] sm:$0xff] }
 0xf65   :  { %5435 = vadd.xlane.f32.xlu1 %v5400_v13  ;;  %6132 = vmatprep.subr.bf16.mxu0 %v9808_v54  ;;  %v5339_v13 = vmul.f32 0.0078125, %v5281_v12  ;;  %v5293_v12 = vpop.xlane.xlu0 %5292 }
 0xf67   :  { %5312 = vadd.xlane.f32.xlu0 %v14086_v39  ;;  %5940 = vmatpush1.bf16.msra.mxu1 %v9803_v31  ;;  %v14188_v16 = vsub.f32 %v13896_v43, %v5339_v13  ;;  %v5287_v43 = vpop.xlane.xlu1 %5286  ;;  %v10771_v13 = vld [vmem:[%s15879_s0 + $0xe0] sm:$0xff] }
 0xf68   :  { %6133 = vmatpush1.bf16.msra.mxu0 %v9806_v50  ;;  %5941 = vmatprep.subr.bf16.mxu1 %v9811_v30  ;;  %v5342_v52 = vmul.f32 0.0078125, %v5287_v43  ;;  %v5343_v50 = vmul.f32 0.0078125, %v5289_v6 }
 0xf69   :  { %5314 = vadd.xlane.f32.xlu1 %v14100_v25  ;;  %6134 = vmatprep.subr.bf16.mxu0 %v9814_v55  ;;  %v5403_v4 = vmul.f32 %v14188_v16, %v14188_v16 }
 0xf6a   :  { %v14221_v3 = vsub.f32 %v13927_v38, %v5342_v52  ;;  %v5405_v38 = vmul.f32 %v14213_v56, %v14213_v56  ;;  %v14237_v14 = vsub.f32 %v13933_v45, %v5343_v50  ;;  %v5345_v45 = vmul.f32 0.0078125, %v5293_v12 }
 0xf6b   :  { %5437 = vadd.xlane.f32.xlu0 %v5401_v42  ;;  %5942 = vmatpush1.bf16.msra.mxu1 %v9809_v10  ;;  %v5291_v54 = vpop.xlane.xlu1 %5290 }
 0xf6c   :  { %6135 = vmatpush1.bf16.msra.mxu0 %v9812_v62  ;;  %v5344_v55 = vmul.f32 0.0078125, %v5291_v54  ;;  %v5406_v62 = vmul.f32 %v14221_v3, %v14221_v3  ;;  %v14261_v5 = vsub.f32 %v13948_v24, %v5345_v45 }
 0xf6d   :  { %5439 = vadd.xlane.f32.xlu1 %v5402_v2  ;;  %v10768_v2 = vld [vmem:[%s15879_s0 + $0xc8] sm:$0xff] }
 0xf6e   :  { %v14245_v21 = vsub.f32 %v13939_v44, %v5344_v55 }
 0xf8d   :  { %v9396_v60 = vpop.f32.mrb[184].mxu0 }
 0xf8e   :  { %v5203_v26 = vpop.f32.mrb[185].mxu0  ;;  %v5212_v17 = vadd.f32 %v9396_v60, %v13825_v19 }
 0xf8f   :  { %v5204_v18 = vadd.f32 %v13825_v19, %v5203_v26  ;;  %v9397_v33 = vpop.f32.mrb[186].mxu0  ;;  %v5295_v26 = vpop.xlane.xlu1 %5294 }
 0xf90   :  { %v5206_v46 = vpop.f32.mrb[187].mxu0  ;;  %v5215_v1 = vadd.f32 %v9397_v33, %v13825_v19  ;;  %v14218_v48 = vadd.f32 %v10769_v11, %v5212_v17  ;;  %v5346_v41 = vmul.f32 0.0078125, %v5295_v26 }
 0xf91   :  { %v14193_v23 = vadd.f32 %v10767_v58, %v5204_v18  ;;  %v5207_v42 = vadd.f32 %v13825_v19, %v5206_v46  ;;  %v10772_v18 = vld [vmem:[%s15879_s0 + $0xe8] sm:$0xff]  ;;  %v5407_v58 = vmul.f32 %v14237_v14, %v14237_v14 }
 0xf92   :  { %v14226_v8 = vadd.f32 %v10770_v0, %v5215_v1  ;;  %v14269_v1 = vsub.f32 %v13955_v40, %v5346_v41 }
 0xf93   :  { %v14202_v7 = vadd.f32 %v10768_v2, %v5207_v42  ;;  %5316 = vadd.xlane.f32.xlu0 %v14193_v23  ;;  %v5297_v42 = vpop.xlane.xlu0 %5296  ;;  %v5408_v2 = vmul.f32 %v14245_v21, %v14245_v21  ;;  %v5299_v43 = vpop.xlane.xlu1 %5298 }
 0xf94   :  { %v5347_v17 = vmul.f32 0.0078125, %v5297_v42  ;;  %v5410_v6 = vmul.f32 %v14269_v1, %v14269_v1 }
 0xf95   :  { %5318 = vadd.xlane.f32.xlu1 %v14202_v7 }
 0xf96   :  { %v14278_v24 = vsub.f32 %v13961_v51, %v5347_v17 }
 0xf97   :  { %5441 = vadd.xlane.f32.xlu0 %v5403_v4  ;;  %v10773_v4 = vld [vmem:[%s15879_s0 + $0xf0] sm:$0xff] }
 0xf99   :  { %v9400_v37 = vpop.f32.mrb[188].mxu0  ;;  %5443 = vadd.xlane.f32.xlu1 %v5404_v49  ;;  %v10774_v49 = vld [vmem:[%s15879_s0 + $0xf8] sm:$0xff] }
 0xf9a   :  { %v5219_v9 = vpop.f32.mrb[189].mxu0  ;;  %v5228_v46 = vadd.f32 %v9400_v37, %v13825_v19  ;;  %v5409_v37 = vmul.f32 %v14261_v5, %v14261_v5 }
 0xf9b   :  { %v9401_v20 = vpop.f32.mrb[190].mxu0  ;;  %5320 = vadd.xlane.f32.xlu0 %v14218_v48  ;;  %v5220_v30 = vadd.f32 %v13825_v19, %v5219_v9  ;;  %v5411_v9 = vmul.f32 %v14278_v24, %v14278_v24 }
 0xf9c   :  { %v5222_v31 = vpop.f32.mrb[191].mxu0  ;;  %v5231_v44 = vadd.f32 %v9401_v20, %v13825_v19  ;;  %v14266_v52 = vadd.f32 %v10773_v4, %v5228_v46 }
 0xf9d   :  { %5322 = vadd.xlane.f32.xlu1 %v14226_v8  ;;  %v5223_v10 = vadd.f32 %v13825_v19, %v5222_v31  ;;  %v14242_v60 = vadd.f32 %v10771_v13, %v5220_v30  ;;  %v5348_v19 = vmul.f32 0.0078125, %v5299_v43 }
 0xf9e   :  { %v14274_v11 = vadd.f32 %v10774_v49, %v5231_v44 }
 0xf9f   :  { %5445 = vadd.xlane.f32.xlu0 %v5405_v38  ;;  %v14250_v33 = vadd.f32 %v10772_v18, %v5223_v10  ;;  %v14284_v40 = vsub.f32 %v13967_v29, %v5348_v19 }
 0xfa1   :  { %5447 = vadd.xlane.f32.xlu1 %v5406_v62  ;;  %v5412_v51 = vmul.f32 %v14284_v40, %v14284_v40 }
 0xfa3   :  { %5324 = vadd.xlane.f32.xlu0 %v14242_v60 }
 0xfa5   :  { %5326 = vadd.xlane.f32.xlu1 %v14250_v33 }
 0xfa7   :  { %5449 = vadd.xlane.f32.xlu0 %v5407_v58 }
 0xfa9   :  { %5451 = vadd.xlane.f32.xlu1 %v5408_v2 }
 0xfab   :  { %5328 = vadd.xlane.f32.xlu0 %v14266_v52 }
 0xfad   :  { %5330 = vadd.xlane.f32.xlu1 %v14274_v11 }
 0xfaf   :  { %5453 = vadd.xlane.f32.xlu0 %v5409_v37 }
 0xfb1   :  { %5455 = vadd.xlane.f32.xlu1 %v5410_v6 }
 0xfb3   :  { %5457 = vadd.xlane.f32.xlu0 %v5411_v9 }
 0xfb5   :  { %5459 = vadd.xlane.f32.xlu1 %v5412_v51 }
 0xfe0   :  { %v5301_v0 = vpop.xlane.xlu0 %5300 }
 0xfe1   :  { %v5349_v20 = vmul.f32 0.0078125, %v5301_v0 }
 0xfe2   :  { %v5303_v54 = vpop.xlane.xlu1 %5302 }
 0xfe3   :  { %v14293_v31 = vsub.f32 %v14009_v57, %v5349_v20  ;;  %v5350_v29 = vmul.f32 0.0078125, %v5303_v54 }
 0xfe4   :  { %v5305_v50 = vpop.xlane.xlu0 %5304 }
 0xfe5   :  { %v14296_v30 = vsub.f32 %v14016_v34, %v5350_v29  ;;  %v5351_v38 = vmul.f32 0.0078125, %v5305_v50  ;;  %v5413_v55 = vmul.f32 %v14293_v31, %v14293_v31 }
 0xfe6   :  { %v5307_v10 = vpop.xlane.xlu1 %5306 }
 0xfe7   :  { %v14301_v62 = vsub.f32 %v14025_v36, %v5351_v38  ;;  %v5352_v12 = vmul.f32 0.0078125, %v5307_v10  ;;  %5461 = vadd.xlane.f32.xlu0 %v5413_v55  ;;  %v5414_v13 = vmul.f32 %v14296_v30, %v14296_v30 }
 0xfe8   :  { %v5430_v57 = vpop.xlane.xlu0 %5429 }
 0xfe9   :  { %v14306_v26 = vsub.f32 %v14034_v28, %v5352_v12  ;;  %v5493_v18 = vmul.f32 0.0078125, %v5430_v57  ;;  %5463 = vadd.xlane.f32.xlu1 %v5414_v13  ;;  %v5415_v34 = vmul.f32 %v14301_v62, %v14301_v62 }
 0xfea   :  { %v5432_v45 = vpop.xlane.xlu1 %5431 }
 0xfeb   :  { %v5525_v46 = vadd.f32 1e-12, %v5493_v18  ;;  %v5494_v58 = vmul.f32 0.0078125, %v5432_v45  ;;  %5465 = vadd.xlane.f32.xlu0 %v5415_v34  ;;  %v5416_v36 = vmul.f32 %v14306_v26, %v14306_v26 }
 0xfec   :  { %v5309_v42 = vpop.xlane.xlu0 %5308 }
 0xfed   :  { %10359 = vrsqrt.f32 %v5525_v46  ;;  %v5526_v41 = vadd.f32 1e-12, %v5494_v58  ;;  %v5353_v44 = vmul.f32 0.0078125, %v5309_v42  ;;  %5467 = vadd.xlane.f32.xlu1 %v5416_v36 }
 0xfee   :  { %v5311_v2 = vpop.xlane.xlu1 %5310 }
 0xfef   :  { %10361 = vrsqrt.f32 %v5526_v41  ;;  %v14313_v28 = vsub.f32 %v14049_v27, %v5353_v44  ;;  %v5354_v43 = vmul.f32 0.0078125, %v5311_v2 }
 0xff0   :  { %v5434_v17 = vpop.xlane.xlu0 %5433 }
 0xff1   :  { %v14316_v4 = vsub.f32 %v14058_v59, %v5354_v43  ;;  %v5495_v19 = vmul.f32 0.0078125, %v5434_v17  ;;  %v5417_v49 = vmul.f32 %v14313_v28, %v14313_v28  ;;  %v14325_v59 = vld [vmem:[%s15885_s6] ss:$0 sm:$0xff] }
 0xff2   :  { %v5436_v37 = vpop.xlane.xlu1 %5435 }
 0xff3   :  { %v5527_v6 = vadd.f32 1e-12, %v5495_v19  ;;  %v5496_v9 = vmul.f32 0.0078125, %v5436_v37  ;;  %5469 = vadd.xlane.f32.xlu0 %v5417_v49  ;;  %v5418_v51 = vmul.f32 %v14316_v4, %v14316_v4 }
 0xff4   :  { %v5313_v0 = vpop.xlane.xlu0 %5312 }
 0xff5   :  { %10363 = vrsqrt.f32 %v5527_v6  ;;  %v5528_v27 = vadd.f32 1e-12, %v5496_v9  ;;  %v5355_v20 = vmul.f32 0.0078125, %v5313_v0  ;;  %5471 = vadd.xlane.f32.xlu1 %v5418_v51 }
 0xff6   :  { %v5315_v54 = vpop.xlane.xlu1 %5314 }
 0xff7   :  { %v10360_v29 = vpop.eup %10359  ;;  %10365 = vrsqrt.f32 %v5528_v27  ;;  %v14328_v50 = vsub.f32 %v14086_v39, %v5355_v20  ;;  %v5356_v38 = vmul.f32 0.0078125, %v5315_v54 }
 0xff8   :  { %v5589_v55 = vmul.f32 %v10360_v29, %v14020_v32  ;;  %v5438_v10 = vpop.xlane.xlu0 %5437 }
 0xff9   :  { %v10362_v12 = vpop.eup %10361  ;;  %v14332_v13 = vsub.f32 %v14100_v25, %v5356_v38  ;;  %v5497_v57 = vmul.f32 0.0078125, %v5438_v10  ;;  %v5419_v18 = vmul.f32 %v14328_v50, %v14328_v50  ;;  %v14343_v25 = vld [vmem:[%s15886_s7] ss:$0 sm:$0xff] }
 0xffa   :  { %v5627_v34 = vmul.f32 %v14325_v59, %v5589_v55  ;;  %v5590_v45 = vmul.f32 %v10362_v12, %v14029_v63  ;;  %v5440_v46 = vpop.xlane.xlu1 %5439 }
 0xffb   :  { %v5529_v58 = vadd.f32 1e-12, %v5497_v57  ;;  %v5498_v39 = vmul.f32 0.0078125, %v5440_v46  ;;  %5473 = vadd.xlane.f32.xlu0 %v5419_v18  ;;  %v5420_v32 = vmul.f32 %v14332_v13, %v14332_v13 }
 0xffc   :  { %v5628_v36 = vmul.f32 %v14325_v59, %v5590_v45  ;;  %v14347_v41 = vadd.f32 %v14343_v25, %v5627_v34 }
 0xffd   :  { %10367 = vrsqrt.f32 %v5529_v58  ;;  %v5530_v42 = vadd.f32 1e-12, %v5498_v39  ;;  %5475 = vadd.xlane.f32.xlu1 %v5420_v32 }
 0xffe   :  { %v14350_v63 = vadd.f32 %v14343_v25, %v5628_v36 }
 0xfff   :  { %v10364_v44 = vpop.eup %10363  ;;  %10369 = vrsqrt.f32 %v5530_v42 }
0x1000   :  { %v5697_v2 = vpack.c.bf16 %v14350_v63, %v14347_v41  ;;  %v5591_v43 = vmul.f32 %v10364_v44, %v14044_v15 }
0x1001   :  { %v10366_v17 = vpop.eup %10365 }
0x1002   :  { %5960 = vmatmul.mubr.bf16.vlgmr.msra.gmra.mrb[192].mxu1 %v5697_v2  ;;  %6153 = vmatmul.mubr.bf16.vlgmr.msra.gmra.mrb[192].mxu0 %v5697_v2  ;;  %v5592_v19 = vmul.f32 %v10366_v17, %v14053_v61  ;;  %v5629_v49 = vmul.f32 %v14325_v59, %v5591_v43 }
0x1003   :  { %5969 = vmatprep.mubr.bf16.mxu1 %v16425_v35  ;;  %6162 = vmatprep.mubr.bf16.mxu0 %v16425_v35 }
0x1004   :  { %v5630_v37 = vmul.f32 %v14325_v59, %v5592_v19  ;;  %v14361_v6 = vadd.f32 %v14343_v25, %v5629_v49 }
0x1006   :  { %v14364_v9 = vadd.f32 %v14343_v25, %v5630_v37 }
0x1007   :  { %v10368_v15 = vpop.eup %10367 }
0x1008   :  { %v5698_v51 = vpack.c.bf16 %v14364_v9, %v14361_v6  ;;  %v5593_v61 = vmul.f32 %v10368_v15, %v14081_v47 }
0x1009   :  { %v10370_v0 = vpop.eup %10369 }
0x100a   :  { %5970 = vmatmul.mubr.bf16.gmra.mrb[196].mxu1 %v5698_v51  ;;  %6163 = vmatmul.mubr.bf16.gmra.mrb[196].mxu0 %v5698_v51  ;;  %v5594_v27 = vmul.f32 %v10370_v0, %v14095_v22  ;;  %v5631_v20 = vmul.f32 %v14325_v59, %v5593_v61 }
0x100b   :  { %5979 = vmatprep.mubr.bf16.mxu1 %v16425_v35  ;;  %6172 = vmatprep.mubr.bf16.mxu0 %v16425_v35 }
0x100c   :  { %v5632_v54 = vmul.f32 %v14325_v59, %v5594_v27  ;;  %v14375_v29 = vadd.f32 %v14343_v25, %v5631_v20 }
0x100e   :  { %16490 = vst [vmem:[#allocation29_spill] sm:$0xff] %v14375_v29  ;;  %v14378_v38 = vadd.f32 %v14343_v25, %v5632_v54 }
0x1010   :  { %16491 = vst [vmem:[#allocation37_spill] sm:$0xff] %v14378_v38  ;;  %v5699_v47 = vpack.c.bf16 %v14378_v38, %v14375_v29 }
0x1012   :  { %5980 = vmatmul.mubr.bf16.gmra.mrb[200].mxu1 %v5699_v47  ;;  %6173 = vmatmul.mubr.bf16.gmra.mrb[200].mxu0 %v5699_v47 }
0x1013   :  { %5989 = vmatprep.mubr.bf16.mxu1 %v16425_v35  ;;  %6182 = vmatprep.mubr.bf16.mxu0 %v16425_v35 }
0x1020   :  { %v5317_v22 = vpop.xlane.xlu0 %5316 }
0x1021   :  { %v5357_v55 = vmul.f32 0.0078125, %v5317_v22 }
0x1022   :  { %v5319_v10 = vpop.xlane.xlu1 %5318 }
0x1023   :  { %v14385_v12 = vsub.f32 %v14193_v23, %v5357_v55  ;;  %v5358_v57 = vmul.f32 0.0078125, %v5319_v10 }
0x1024   :  { %v5442_v18 = vpop.xlane.xlu0 %5441 }
0x1025   :  { %v14388_v34 = vsub.f32 %v14202_v7, %v5358_v57  ;;  %v5499_v45 = vmul.f32 0.0078125, %v5442_v18  ;;  %v5421_v46 = vmul.f32 %v14385_v12, %v14385_v12 }
0x1026   :  { %v5444_v58 = vpop.xlane.xlu1 %5443 }
0x1027   :  { %v5531_v39 = vadd.f32 1e-12, %v5499_v45  ;;  %v5500_v32 = vmul.f32 0.0078125, %v5444_v58  ;;  %5477 = vadd.xlane.f32.xlu0 %v5421_v46  ;;  %v5422_v36 = vmul.f32 %v14388_v34, %v14388_v34 }
0x1028   :  { %v5321_v42 = vpop.xlane.xlu0 %5320 }
0x1029   :  { %10371 = vrsqrt.f32 %v5531_v39  ;;  %v5532_v23 = vadd.f32 1e-12, %v5500_v32  ;;  %v5359_v44 = vmul.f32 0.0078125, %v5321_v42  ;;  %5479 = vadd.xlane.f32.xlu1 %v5422_v36 }
0x102a   :  { %v5323_v2 = vpop.xlane.xlu1 %5322 }
0x102b   :  { %10373 = vrsqrt.f32 %v5532_v23  ;;  %v14395_v7 = vsub.f32 %v14218_v48, %v5359_v44  ;;  %v5360_v43 = vmul.f32 0.0078125, %v5323_v2 }
0x102c   :  { %v5446_v17 = vpop.xlane.xlu0 %5445 }
0x102d   :  { %v14398_v19 = vsub.f32 %v14226_v8, %v5360_v43  ;;  %v5501_v49 = vmul.f32 0.0078125, %v5446_v17  ;;  %v5423_v37 = vmul.f32 %v14395_v7, %v14395_v7 }
0x102e   :  { %v5448_v15 = vpop.xlane.xlu1 %5447 }
0x102f   :  { %v5533_v51 = vadd.f32 1e-12, %v5501_v49  ;;  %v5502_v61 = vmul.f32 0.0078125, %v5448_v15  ;;  %5481 = vadd.xlane.f32.xlu0 %v5423_v37  ;;  %v5424_v0 = vmul.f32 %v14398_v19, %v14398_v19 }
0x1030   :  { %v5325_v27 = vpop.xlane.xlu0 %5324 }
0x1031   :  { %10375 = vrsqrt.f32 %v5533_v51  ;;  %v5534_v48 = vadd.f32 1e-12, %v5502_v61  ;;  %v5361_v20 = vmul.f32 0.0078125, %v5325_v27  ;;  %5483 = vadd.xlane.f32.xlu1 %v5424_v0 }
0x1032   :  { %v5327_v54 = vpop.xlane.xlu1 %5326 }
0x1033   :  { %v10372_v47 = vpop.eup %10371  ;;  %10377 = vrsqrt.f32 %v5534_v48  ;;  %v14405_v8 = vsub.f32 %v14242_v60, %v5361_v20  ;;  %v5362_v22 = vmul.f32 0.0078125, %v5327_v54 }
0x1034   :  { %v5450_v55 = vpop.xlane.xlu0 %5449  ;;  %v5595_v10 = vmul.f32 %v10372_v47, %v14188_v16 }
0x1035   :  { %v10374_v57 = vpop.eup %10373  ;;  %v14409_v18 = vsub.f32 %v14250_v33, %v5362_v22  ;;  %v5503_v45 = vmul.f32 0.0078125, %v5450_v55  ;;  %v5425_v46 = vmul.f32 %v14405_v8, %v14405_v8 }
0x1036   :  { %v5452_v58 = vpop.xlane.xlu1 %5451  ;;  %v5596_v39 = vmul.f32 %v10374_v57, %v14197_v53  ;;  %v5633_v32 = vmul.f32 %v14325_v59, %v5595_v10 }
0x1037   :  { %v5535_v36 = vadd.f32 1e-12, %v5503_v45  ;;  %v5504_v60 = vmul.f32 0.0078125, %v5452_v58  ;;  %5485 = vadd.xlane.f32.xlu0 %v5425_v46  ;;  %v5426_v42 = vmul.f32 %v14409_v18, %v14409_v18 }
0x1038   :  { %v5329_v16 = vpop.xlane.xlu0 %5328  ;;  %v5634_v23 = vmul.f32 %v14325_v59, %v5596_v39  ;;  %v14419_v43 = vadd.f32 %v14343_v25, %v5633_v32 }
0x1039   :  { %10379 = vrsqrt.f32 %v5535_v36  ;;  %v5536_v33 = vadd.f32 1e-12, %v5504_v60  ;;  %v5363_v44 = vmul.f32 0.0078125, %v5329_v16  ;;  %5487 = vadd.xlane.f32.xlu1 %v5426_v42 }
0x103a   :  { %v5331_v2 = vpop.xlane.xlu1 %5330  ;;  %16492 = vst [vmem:[#allocation9_spill] sm:$0xff] %v14419_v43  ;;  %v14422_v53 = vadd.f32 %v14343_v25, %v5634_v23 }
0x103b   :  { %v10376_v17 = vpop.eup %10375  ;;  %10381 = vrsqrt.f32 %v5536_v33  ;;  %v14425_v49 = vsub.f32 %v14266_v52, %v5363_v44  ;;  %v5364_v37 = vmul.f32 0.0078125, %v5331_v2 }
0x103c   :  { %16493 = vst [vmem:[#allocation17_spill] sm:$0xff] %v14422_v53  ;;  %v5454_v15 = vpop.xlane.xlu0 %5453  ;;  %v5700_v51 = vpack.c.bf16 %v14422_v53, %v14419_v43  ;;  %v5597_v61 = vmul.f32 %v10376_v17, %v14213_v56 }
0x103d   :  { %v10378_v0 = vpop.eup %10377  ;;  %v14431_v27 = vsub.f32 %v14274_v11, %v5364_v37  ;;  %v5505_v48 = vmul.f32 0.0078125, %v5454_v15  ;;  %v5427_v20 = vmul.f32 %v14425_v49, %v14425_v49 }
0x103e   :  { %v5456_v54 = vpop.xlane.xlu1 %5455  ;;  %5990 = vmatmul.mubr.bf16.gmra.mrb[204].mxu1 %v5700_v51  ;;  %6183 = vmatmul.mubr.bf16.gmra.mrb[204].mxu0 %v5700_v51  ;;  %v5598_v52 = vmul.f32 %v10378_v0, %v14221_v3  ;;  %v5635_v47 = vmul.f32 %v14325_v59, %v5597_v61 }
0x103f   :  { %v5537_v22 = vadd.f32 1e-12, %v5505_v48  ;;  %v5506_v55 = vmul.f32 0.0078125, %v5456_v54  ;;  %5489 = vadd.xlane.f32.xlu0 %v5427_v20  ;;  %v5428_v56 = vmul.f32 %v14431_v27, %v14431_v27  ;;  %5999 = vmatprep.mubr.bf16.mxu1 %v16425_v35  ;;  %v9815_v20 = vld [vmem:[%s15887_s10 + $0x40] sm:$0xff]  }
0x1040   :  { %v5458_v11 = vpop.xlane.xlu0 %5457  ;;  %6192 = vmatprep.mubr.bf16.mxu0 %v16425_v35  ;;  %v5636_v10 = vmul.f32 %v14325_v59, %v5598_v52  ;;  %v14443_v46 = vadd.f32 %v14343_v25, %v5635_v47  ;;  %8570 = vmatprep.subr.bf16.mxu1 %v9815_v20  ;;  %v9836_v20 = vld [vmem:[%s15887_s10 + $0xe8] sm:$0xff]  }
0x1041   :  { %10383 = vrsqrt.f32 %v5537_v22  ;;  %v5538_v57 = vadd.f32 1e-12, %v5506_v55  ;;  %v5507_v45 = vmul.f32 0.0078125, %v5458_v11  ;;  %5491 = vadd.xlane.f32.xlu1 %v5428_v56  ;;  %v9818_v11 = vld [vmem:[%s15887_s10 + $0x80] sm:$0xff]  }
0x1042   :  { %v5460_v3 = vpop.xlane.xlu1 %5459  ;;  %16494 = vst [vmem:[#allocation21_spill] sm:$0xff] %v14443_v46  ;;  %v14446_v58 = vadd.f32 %v14343_v25, %v5636_v10  ;;  %v9819_v10 = vld [vmem:[%s15887_s10 + $0x48] sm:$0xff]  }
0x1043   :  { %v10380_v39 = vpop.eup %10379  ;;  %10385 = vrsqrt.f32 %v5538_v57  ;;  %v5539_v32 = vadd.f32 1e-12, %v5507_v45  ;;  %v5508_v36 = vmul.f32 0.0078125, %v5460_v3 }
0x1044   :  { %16495 = vst [vmem:[#allocation27_spill] sm:$0xff] %v14446_v58  ;;  %v5701_v60 = vpack.c.bf16 %v14446_v58, %v14443_v46  ;;  %v5599_v42 = vmul.f32 %v10380_v39, %v14237_v14  ;;  %v9822_v39 = vld [vmem:[%s15887_s10 + $0x88] sm:$0xff]  }
0x1045   :  { %v10382_v16 = vpop.eup %10381  ;;  %10387 = vrsqrt.f32 %v5539_v32  ;;  %v5540_v23 = vadd.f32 1e-12, %v5508_v36  ;;  %v9823_v36 = vld [vmem:[%s15887_s10 + $0x50] sm:$0xff]  }
0x1046   :  { %6000 = vmatmul.mubr.bf16.gmra.mrb[208].mxu1 %v5701_v60  ;;  %6193 = vmatmul.mubr.bf16.gmra.mrb[208].mxu0 %v5701_v60  ;;  %v5600_v33 = vmul.f32 %v10382_v16, %v14245_v21  ;;  %v5637_v44 = vmul.f32 %v14325_v59, %v5599_v42  ;;  %v9824_v60 = vld [vmem:[%s15887_s10 + $0xd0] sm:$0xff]  }
0x1047   :  { %10389 = vrsqrt.f32 %v5540_v23  ;;  %6009 = vmatprep.mubr.bf16.mxu1 %v16425_v35  ;;  %6202 = vmatprep.mubr.bf16.mxu0 %v16425_v35  ;;  %v9825_v16 = vld [vmem:[%s15887_s10 + $0x10] sm:$0xff]  }
0x1048   :  { %v5638_v2 = vmul.f32 %v14325_v59, %v5600_v33  ;;  %v14457_v17 = vadd.f32 %v14343_v25, %v5637_v44  ;;  %v9826_v23 = vld [vmem:[%s15887_s10 + $0x90] sm:$0xff]   ;;  %v9827_v44 = vld [vmem:[%s15887_s10 + $0x58] sm:$0xff]  }
0x104a   :  { %16496 = vst [vmem:[#allocation31_spill] sm:$0xff] %v14457_v17  ;;  %v14460_v14 = vadd.f32 %v14343_v25, %v5638_v2  ;;  %v9828_v2 = vld [vmem:[%s15887_s10 + $0xd8] sm:$0xff]  }
0x104b   :  { %v10384_v37 = vpop.eup %10383 }
0x104c   :  { %16497 = vst [vmem:[#allocation5_spill] sm:$0xff] %v14460_v14  ;;  %v5702_v15 = vpack.c.bf16 %v14460_v14, %v14457_v17  ;;  %v5601_v21 = vmul.f32 %v10384_v37, %v14261_v5  ;;  %v9816_v5 = vld [vmem:[%s15887_s10 + $0xc0] sm:$0xff]   ;;  %v9829_v37 = vld [vmem:[%s15887_s10 + $0x18] sm:$0xff]  }
0x104d   :  { %v10386_v51 = vpop.eup %10385  ;;  %8682 = vmatprep.subr.bf16.mxu0 %v9816_v5  ;;  %v9838_v5 = vld [vmem:[%s15887_s10 + $0xa8] sm:$0xff]  }
0x104e   :  { %6010 = vmatmul.mubr.bf16.gmra.mrb[212].mxu1 %v5702_v15  ;;  %6203 = vmatmul.mubr.bf16.gmra.mrb[212].mxu0 %v5702_v15  ;;  %v5602_v61 = vmul.f32 %v10386_v51, %v14269_v1  ;;  %v5639_v0 = vmul.f32 %v14325_v59, %v5601_v21  ;;  %v9817_v1 = vld [vmem:[%s15887_s10] sm:$0xff]   ;;  %v9830_v15 = vld [vmem:[%s15887_s10 + $0x98] sm:$0xff]  }
0x104f   :  { %v10388_v48 = vpop.eup %10387  ;;  %6019 = vmatprep.mubr.bf16.mxu1 %v16425_v35  ;;  %6212 = vmatprep.mubr.bf16.mxu0 %v16425_v35  ;;  %v9831_v21 = vld [vmem:[%s15887_s10 + $0x60] sm:$0xff]  }
0x1050   :  { %v5640_v54 = vmul.f32 %v14325_v59, %v5602_v61  ;;  %v14480_v47 = vadd.f32 %v14343_v25, %v5639_v0  ;;  %v5603_v55 = vmul.f32 %v10388_v48, %v14278_v24  ;;  %8571 = vmatpush3.bf16.msra.mxu1 %v9817_v1  ;;  %8683 = vmatpush3.bf16.msra.mxu0 %v9818_v11  ;;  %v9820_v24 = vld [vmem:[%s15887_s10 + $0xc8] sm:$0xff]   ;;  %v9832_v51 = vld [vmem:[%s15887_s10 + $0xe0] sm:$0xff]  }
0x1051   :  { %v10390_v52 = vpop.eup %10389  ;;  %8572 = vmatprep.subr.bf16.mxu1 %v9819_v10  ;;  %8684 = vmatprep.subr.bf16.mxu0 %v9820_v24  ;;  %v9833_v61 = vld [vmem:[%s15887_s10 + $0x20] sm:$0xff]   ;;  %v9835_v48 = vld [vmem:[%s15887_s10 + $0x68] sm:$0xff]  }
0x1052   :  { %16498 = vst [vmem:[#allocation13_spill] sm:$0xff] %v14480_v47  ;;  %v14483_v22 = vadd.f32 %v14343_v25, %v5640_v54  ;;  %v5604_v56 = vmul.f32 %v10390_v52, %v14284_v40  ;;  %v9821_v40 = vld [vmem:[%s15887_s10 + $0x8] sm:$0xff]   ;;  %v5641_v3 = vmul.f32 %v14325_v59, %v5603_v55  ;;  %v9834_v0 = vld [vmem:[%s15887_s10 + $0xa0] sm:$0xff]  }
0x1053   :  { %v9837_v54 = vld [vmem:[%s15887_s10 + $0x28] sm:$0xff]  }
0x1054   :  { %16499 = vst [vmem:[#allocation53_spill] sm:$0xff] %v14483_v22  ;;  %v5703_v57 = vpack.c.bf16 %v14483_v22, %v14480_v47  ;;  %v5642_v45 = vmul.f32 %v14325_v59, %v5604_v56  ;;  %8573 = vmatpush3.bf16.msra.mxu1 %v9821_v40  ;;  %8685 = vmatpush3.bf16.msra.mxu0 %v9822_v39  ;;  %v9842_v39 = vld [vmem:[%s15887_s10 + $0xb0] sm:$0xff]  }
0x1055   :  { %v14518_v42 = vadd.f32 %v14343_v25, %v5641_v3  ;;  %8574 = vmatprep.subr.bf16.mxu1 %v9823_v36  ;;  %8686 = vmatprep.subr.bf16.mxu0 %v9824_v60  ;;  %v9841_v3 = vld [vmem:[%s15887_s10 + $0x30] sm:$0xff]  }
0x1056   :  { %6020 = vmatmul.mubr.bf16.gmra.mrb[216].mxu1 %v5703_v57  ;;  %6213 = vmatmul.mubr.bf16.gmra.mrb[216].mxu0 %v5703_v57  ;;  %v14509_v32 = vadd.f32 %v14343_v25, %v5642_v45  ;;  %v9839_v57 = vld [vmem:[%s15887_s10 + $0x70] sm:$0xff]  }
0x1057   :  { %6029 = vmatprep.mubr.bf16.mxu1 %v16425_v35  ;;  %6222 = vmatprep.mubr.bf16.mxu0 %v16425_v35  ;;  %16501 = vst [vmem:[#allocation34_spill] sm:$0xff] %v14518_v42  ;;  %v9840_v45 = vld [vmem:[%s15887_s10 + $0xf0] sm:$0xff]  }
0x1058   :  { %16500 = vst [vmem:[#allocation33_spill] sm:$0xff] %v14509_v32  ;;  %v5704_v33 = vpack.c.bf16 %v14509_v32, %v14518_v42  ;;  %8575 = vmatpush3.bf16.msra.mxu1 %v9825_v16  ;;  %8687 = vmatpush3.bf16.msra.mxu0 %v9826_v23  ;;  %v9843_v23 = vld [vmem:[%s15887_s10 + $0x78] sm:$0xff]  }
0x1059   :  { %8576 = vmatprep.subr.bf16.mxu1 %v9827_v44  ;;  %8688 = vmatprep.subr.bf16.mxu0 %v9828_v2  ;;  %v9845_v2 = vld [vmem:[%s15887_s10 + $0x38] sm:$0xff]  }
0x105c   :  { %8577 = vmatpush3.bf16.msra.mxu1 %v9829_v37  ;;  %8689 = vmatpush3.bf16.msra.mxu0 %v9830_v15  ;;  %v9846_v37 = vld [vmem:[%s15887_s10 + $0xb8] sm:$0xff]  }
0x105d   :  { %8578 = vmatprep.subr.bf16.mxu1 %v9831_v21  ;;  %8690 = vmatprep.subr.bf16.mxu0 %v9832_v51 }
0x105e   :  { %6030 = vmatmul.mubr.bf16.gmra.mrb[220].mxu1 %v5704_v33  ;;  %6223 = vmatmul.mubr.bf16.gmra.mrb[220].mxu0 %v5704_v33  ;;  %v9844_v33 = vld [vmem:[%s15887_s10 + $0xf8] sm:$0xff]  }
0x105f   :  { %6039 = vmatprep.mubr.bf16.mxu1 %v16425_v35  ;;  %6232 = vmatprep.mubr.bf16.mxu0 %v16425_v35 }
0x1060   :  { %8579 = vmatpush3.bf16.msra.mxu1 %v9833_v61  ;;  %8691 = vmatpush3.bf16.msra.mxu0 %v9834_v0 }
0x1061   :  { %8580 = vmatprep.subr.bf16.mxu1 %v9835_v48  ;;  %8692 = vmatprep.subr.bf16.mxu0 %v9836_v20 }
0x1064   :  { %8581 = vmatpush3.bf16.msra.mxu1 %v9837_v54  ;;  %8693 = vmatpush3.bf16.msra.mxu0 %v9838_v5 }
0x1065   :  { %8582 = vmatprep.subr.bf16.mxu1 %v9839_v57  ;;  %8694 = vmatprep.subr.bf16.mxu0 %v9840_v45 }
0x1068   :  { %8583 = vmatpush3.bf16.msra.mxu1 %v9841_v3  ;;  %8695 = vmatpush3.bf16.msra.mxu0 %v9842_v39 }
0x1069   :  { %8584 = vmatprep.subr.bf16.mxu1 %v9843_v23  ;;  %8696 = vmatprep.subr.bf16.mxu0 %v9844_v33 }
0x106c   :  { %8585 = vmatpush3.bf16.msra.mxu1 %v9845_v2  ;;  %8697 = vmatpush3.bf16.msra.mxu0 %v9846_v37 }
0x1074   :  { %v5462_v52 = vpop.xlane.xlu0 %5461 }
0x1075   :  { %v5509_v1 = vmul.f32 0.0078125, %v5462_v52 }
0x1076   :  { %v5464_v55 = vpop.xlane.xlu1 %5463 }
0x1077   :  { %v5541_v56 = vadd.f32 1e-12, %v5509_v1  ;;  %v5510_v11 = vmul.f32 0.0078125, %v5464_v55 }
0x1078   :  { %v5466_v10 = vpop.xlane.xlu0 %5465 }
0x1079   :  { %10391 = vrsqrt.f32 %v5541_v56  ;;  %v5542_v24 = vadd.f32 1e-12, %v5510_v11  ;;  %v5511_v40 = vmul.f32 0.0078125, %v5466_v10 }
0x107a   :  { %v5468_v36 = vpop.xlane.xlu1 %5467 }
0x107b   :  { %10393 = vrsqrt.f32 %v5542_v24  ;;  %v5543_v60 = vadd.f32 1e-12, %v5511_v40  ;;  %v5512_v16 = vmul.f32 0.0078125, %v5468_v36 }
0x107d   :  { %10395 = vrsqrt.f32 %v5543_v60  ;;  %v5544_v44 = vadd.f32 1e-12, %v5512_v16 }
0x107f   :  { %10397 = vrsqrt.f32 %v5544_v44 }
0x1080   :  { %v5470_v15 = vpop.xlane.xlu0 %5469 }
0x1081   :  { %v5513_v21 = vmul.f32 0.0078125, %v5470_v15 }
0x1082   :  { %v5472_v51 = vpop.xlane.xlu1 %5471 }
0x1083   :  { %v10392_v61 = vpop.eup %10391  ;;  %v5545_v0 = vadd.f32 1e-12, %v5513_v21  ;;  %v5514_v48 = vmul.f32 0.0078125, %v5472_v51 }
0x1084   :  { %v5605_v20 = vmul.f32 %v10392_v61, %v14293_v31 }
0x1085   :  { %v10394_v54 = vpop.eup %10393  ;;  %10399 = vrsqrt.f32 %v5545_v0  ;;  %v5546_v5 = vadd.f32 1e-12, %v5514_v48 }
0x1086   :  { %v5606_v52 = vmul.f32 %v10394_v54, %v14296_v30  ;;  %v5643_v1 = vmul.f32 %v14325_v59, %v5605_v20 }
0x1087   :  { %v10396_v55 = vpop.eup %10395  ;;  %10401 = vrsqrt.f32 %v5546_v5 }
0x1088   :  { %v5474_v56 = vpop.xlane.xlu0 %5473  ;;  %v5644_v11 = vmul.f32 %v14325_v59, %v5606_v52  ;;  %v14595_v24 = vadd.f32 %v14343_v25, %v5643_v1  ;;  %v5607_v40 = vmul.f32 %v10396_v55, %v14301_v62 }
0x1089   :  { %v10398_v10 = vpop.eup %10397  ;;  %v5515_v57 = vmul.f32 0.0078125, %v5474_v56 }
0x108a   :  { %v5476_v45 = vpop.xlane.xlu1 %5475  ;;  %16502 = vst [vmem:[#allocation40_spill] sm:$0xff] %v14595_v24  ;;  %v14598_v31 = vadd.f32 %v14343_v25, %v5644_v11  ;;  %v5608_v30 = vmul.f32 %v10398_v10, %v14306_v26  ;;  %v5645_v23 = vmul.f32 %v14325_v59, %v5607_v40 }
0x108b   :  { %v5547_v3 = vadd.f32 1e-12, %v5515_v57  ;;  %v5516_v39 = vmul.f32 0.0078125, %v5476_v45 }
0x108c   :  { %16503 = vst [vmem:[#allocation36_spill] sm:$0xff] %v14598_v31  ;;  %v5705_v36 = vpack.c.bf16 %v14598_v31, %v14595_v24  ;;  %v5646_v60 = vmul.f32 %v14325_v59, %v5608_v30  ;;  %v14612_v44 = vadd.f32 %v14343_v25, %v5645_v23 }
0x108d   :  { %10403 = vrsqrt.f32 %v5547_v3  ;;  %v5548_v16 = vadd.f32 1e-12, %v5516_v39 }
0x108e   :  { %6040 = vmatmul.mubr.bf16.gmra.mrb[224].mxu1 %v5705_v36  ;;  %6233 = vmatmul.mubr.bf16.gmra.mrb[224].mxu0 %v5705_v36  ;;  %v14609_v62 = vadd.f32 %v14343_v25, %v5646_v60  ;;  %16505 = vst [vmem:[#allocation35_spill] sm:$0xff] %v14612_v44 }
0x108f   :  { %v10400_v33 = vpop.eup %10399  ;;  %10405 = vrsqrt.f32 %v5548_v16  ;;  %6049 = vmatprep.mubr.bf16.mxu1 %v16425_v35  ;;  %6242 = vmatprep.mubr.bf16.mxu0 %v16425_v35 }
0x1090   :  { %16504 = vst [vmem:[#allocation39_spill] sm:$0xff] %v14609_v62  ;;  %v5609_v2 = vmul.f32 %v10400_v33, %v14313_v28  ;;  %v5706_v15 = vpack.c.bf16 %v14609_v62, %v14612_v44 }
0x1091   :  { %v10402_v26 = vpop.eup %10401 }
0x1092   :  { %v5610_v37 = vmul.f32 %v10402_v26, %v14316_v4  ;;  %v5647_v51 = vmul.f32 %v14325_v59, %v5609_v2 }
0x1094   :  { %v5648_v21 = vmul.f32 %v14325_v59, %v5610_v37  ;;  %v14626_v4 = vadd.f32 %v14343_v25, %v5647_v51 }
0x1096   :  { %6050 = vmatmul.mubr.bf16.gmra.mrb[228].mxu1 %v5706_v15  ;;  %6243 = vmatmul.mubr.bf16.gmra.mrb[228].mxu0 %v5706_v15  ;;  %v14623_v0 = vadd.f32 %v14343_v25, %v5648_v21  ;;  %16507 = vst [vmem:[#allocation42_spill] sm:$0xff] %v14626_v4 }
0x1097   :  { %v10404_v61 = vpop.eup %10403  ;;  %6059 = vmatprep.mubr.bf16.mxu1 %v16425_v35  ;;  %6252 = vmatprep.mubr.bf16.mxu0 %v16425_v35 }
0x1098   :  { %16506 = vst [vmem:[#allocation41_spill] sm:$0xff] %v14623_v0  ;;  %v5611_v48 = vmul.f32 %v10404_v61, %v14328_v50  ;;  %v5707_v54 = vpack.c.bf16 %v14623_v0, %v14626_v4 }
0x1099   :  { %v10406_v28 = vpop.eup %10405 }
0x109a   :  { %v5612_v20 = vmul.f32 %v10406_v28, %v14332_v13  ;;  %v5649_v52 = vmul.f32 %v14325_v59, %v5611_v48 }
0x109c   :  { %v5650_v5 = vmul.f32 %v14325_v59, %v5612_v20  ;;  %v14640_v50 = vadd.f32 %v14343_v25, %v5649_v52 }
0x109e   :  { %6060 = vmatmul.mubr.bf16.gmra.mrb[232].mxu1 %v5707_v54  ;;  %6253 = vmatmul.mubr.bf16.gmra.mrb[232].mxu0 %v5707_v54  ;;  %v14637_v1 = vadd.f32 %v14343_v25, %v5650_v5  ;;  %16509 = vst [vmem:[#allocation44_spill] sm:$0xff] %v14640_v50 }
0x109f   :  { %6069 = vmatprep.mubr.bf16.mxu1 %v16425_v35  ;;  %6262 = vmatprep.mubr.bf16.mxu0 %v16425_v35 }
0x10a0   :  { %16508 = vst [vmem:[#allocation43_spill] sm:$0xff] %v14637_v1  ;;  %v5708_v13 = vpack.c.bf16 %v14637_v1, %v14640_v50 }
0x10a6   :  { %6070 = vmatmul.mubr.bf16.gmra.mrb[236].mxu1 %v5708_v13  ;;  %6263 = vmatmul.mubr.bf16.gmra.mrb[236].mxu0 %v5708_v13 }
0x10a7   :  { %6079 = vmatprep.mubr.bf16.mxu1 %v16425_v35  ;;  %6272 = vmatprep.mubr.bf16.mxu0 %v16425_v35 }
0x10b4   :  { %v5478_v55 = vpop.xlane.xlu0 %5477 }
0x10b5   :  { %v5517_v56 = vmul.f32 0.0078125, %v5478_v55 }
0x10b6   :  { %v5480_v11 = vpop.xlane.xlu1 %5479 }
0x10b7   :  { %v5549_v10 = vadd.f32 1e-12, %v5517_v56  ;;  %v5518_v57 = vmul.f32 0.0078125, %v5480_v11 }
0x10b9   :  { %10407 = vrsqrt.f32 %v5549_v10  ;;  %v5550_v45 = vadd.f32 1e-12, %v5518_v57  ;;  %v5745_v10 = vld [vmem:[%s15888_s9] sm:$0xf] }
0x10ba   :  { %v16512_v57 = vld [vmem:[#allocation2_spill] sm:$0xff] }
0x10bb   :  { %10409 = vrsqrt.f32 %v5550_v45  ;;  %v5761_v45 = vsub.s32 3, %v16512_v57 }
0x10bc   :  { %v5482_v40 = vpop.xlane.xlu0 %5481 }
0x10bd   :  { %v5519_v30 = vmul.f32 0.0078125, %v5482_v40 }
0x10be   :  { %v5484_v3 = vpop.xlane.xlu1 %5483 }
0x10bf   :  { %v5551_v39 = vadd.f32 1e-12, %v5519_v30  ;;  %v5520_v36 = vmul.f32 0.0078125, %v5484_v3  ;;  %v16513_v3 = vld [vmem:[#allocation3_spill] sm:$0xff] }
0x10c1   :  { %10411 = vrsqrt.f32 %v5551_v39  ;;  %v5552_v60 = vadd.f32 1e-12, %v5520_v36  ;;  %v14669_v39 = vrot.slane %v5745_v10, %v16513_v3 }
0x10c3   :  { %v10408_v16 = vpop.eup %10407  ;;  %10413 = vrsqrt.f32 %v5552_v60 }
0x10c4   :  { %v5486_v23 = vpop.xlane.xlu0 %5485  ;;  %v5613_v33 = vmul.f32 %v10408_v16, %v14385_v12 }
0x10c5   :  { %v10410_v26 = vpop.eup %10409  ;;  %v5521_v2 = vmul.f32 0.0078125, %v5486_v23  ;;  %v16517_v23 = vsub.s32 1, %v16512_v57 }
0x10c6   :  { %v5488_v37 = vpop.xlane.xlu1 %5487  ;;  %v5614_v15 = vmul.f32 %v10410_v26, %v14388_v34  ;;  %v5651_v21 = vmul.f32 %v14325_v59, %v5613_v33  ;;  %v14685_v26 = vrot.slane %v5745_v10, %v5761_v45 }
0x10c7   :  { %v5553_v51 = vadd.f32 1e-12, %v5521_v2  ;;  %v5522_v61 = vmul.f32 0.0078125, %v5488_v37  ;;  %v14683_v33 = vrot.slane %v5745_v10, %v16517_v23 }
0x10c8   :  { %v5652_v28 = vmul.f32 %v14325_v59, %v5614_v15  ;;  %v14651_v20 = vadd.f32 %v14343_v25, %v5651_v21 }
0x10c9   :  { %v5554_v48 = vadd.f32 1e-12, %v5522_v61  ;;  %10415 = vrsqrt.f32 %v5553_v51 }
0x10ca   :  { %16510 = vst [vmem:[#allocation46_spill] sm:$0xff] %v14651_v20  ;;  %v14654_v54 = vadd.f32 %v14343_v25, %v5652_v28 }
0x10cb   :  { %v10412_v12 = vpop.eup %10411  ;;  %10417 = vrsqrt.f32 %v5554_v48 }
0x10cc   :  { %16511 = vst [vmem:[#allocation48_spill] sm:$0xff] %v14654_v54  ;;  %v5709_v5 = vpack.c.bf16 %v14654_v54, %v14651_v20  ;;  %v5615_v34 = vmul.f32 %v10412_v12, %v14395_v7  ;;  %v5490_v13 = vpop.xlane.xlu0 %5489 }
0x10cd   :  { %v10414_v52 = vpop.eup %10413  ;;  %v5523_v7 = vmul.f32 0.0078125, %v5490_v13 }
0x10ce   :  { %v5492_v55 = vpop.xlane.xlu1 %5491  ;;  %6080 = vmatmul.mubr.bf16.gmra.mrb[240].mxu1 %v5709_v5  ;;  %6273 = vmatmul.mubr.bf16.gmra.mrb[240].mxu0 %v5709_v5  ;;  %v5616_v56 = vmul.f32 %v10414_v52, %v14398_v19  ;;  %v5653_v11 = vmul.f32 %v14325_v59, %v5615_v34  ;;  %v16514_v19 = vsub.s32 2, %v16512_v57 }
0x10cf   :  { %6089 = vmatprep.mubr.bf16.mxu1 %v16425_v35  ;;  %6282 = vmatprep.mubr.bf16.mxu0 %v16425_v35  ;;  %v5524_v30 = vmul.f32 0.0078125, %v5492_v55  ;;  %v5555_v37 = vadd.f32 1e-12, %v5523_v7 }
0x10d0   :  { %v5654_v40 = vmul.f32 %v14325_v59, %v5616_v56  ;;  %v14673_v36 = vrot.slane %v5745_v10, %v16514_v19  ;;  %v14676_v60 = vadd.f32 %v14343_v25, %v5653_v11 }
0x10d1   :  { %v5556_v51 = vadd.f32 1e-12, %v5524_v30  ;;  %10419 = vrsqrt.f32 %v5555_v37 }
0x10d2   :  { %16515 = vst [vmem:[#allocation47_spill] sm:$0xff] %v14676_v60  ;;  %v14679_v16 = vadd.f32 %v14343_v25, %v5654_v40 }
0x10d3   :  { %v10416_v2 = vpop.eup %10415  ;;  %10421 = vrsqrt.f32 %v5556_v51 }
0x10d4   :  { %16516 = vst [vmem:[#allocation45_spill] sm:$0xff] %v14679_v16  ;;  %v5710_v15 = vpack.c.bf16 %v14679_v16, %v14676_v60  ;;  %v5617_v45 = vmul.f32 %v10416_v2, %v14405_v8 }
0x10d5   :  { %v10418_v21 = vpop.eup %10417  ;;  %v5961_v61 = vpop.f32.mrb[192].mxu1 }
0x10d6   :  { %v6154_v28 = vpop.f32.mrb[192].mxu0  ;;  %v5962_v48 = vadd.f32 %v5961_v61, %v14669_v39  ;;  %v5963_v5 = vpop.f32.mrb[193].mxu1  ;;  %6090 = vmatmul.mubr.bf16.gmra.mrb[244].mxu1 %v5710_v15  ;;  %6283 = vmatmul.mubr.bf16.gmra.mrb[244].mxu0 %v5710_v15  ;;  %v5618_v11 = vmul.f32 %v10418_v21, %v14409_v18  ;;  %v5655_v8 = vmul.f32 %v14325_v59, %v5617_v45 }
0x10d7   :  { %v6155_v12 = vadd.f32 %v6154_v28, %v14673_v36  ;;  %v6156_v34 = vpop.f32.mrb[193].mxu0  ;;  %v5964_v52 = vadd.f32 %v5963_v5, %v14683_v33  ;;  %v5965_v55 = vpop.f32.mrb[194].mxu1  ;;  %6099 = vmatprep.mubr.bf16.mxu1 %v16425_v35  ;;  %6292 = vmatprep.mubr.bf16.mxu0 %v16425_v35 }
0x10d8   :  { %v6157_v13 = vadd.f32 %v6156_v34, %v14685_v26  ;;  %v6158_v56 = vpop.f32.mrb[194].mxu0  ;;  %v6441_v10 = vmul.f32 0.70710677, %v5962_v48  ;;  %v5966_v30 = vadd.f32 %v5965_v55, %v14669_v39  ;;  %v5967_v19 = vpop.f32.mrb[195].mxu1  ;;  %v5656_v37 = vmul.f32 %v14325_v59, %v5618_v11 }
0x10d9   :  { %v6443_v57 = vmul.f32 0.70710677, %v6155_v12  ;;  %v6442_v7 = vmul.f32 0.70710677, %v5964_v52  ;;  %v6159_v3 = vadd.f32 %v6158_v56, %v14673_v36  ;;  %v6160_v23 = vpop.f32.mrb[195].mxu0  ;;  %v5968_v15 = vadd.f32 %v5967_v19, %v14683_v33 }
0x10da   :  { %v6444_v40 = vmul.f32 0.70710677, %v6157_v13  ;;  %10423 = verf.f32 %v6441_v10  ;;  %v6161_v18 = vadd.f32 %v6160_v23, %v14685_v26  ;;  %v6445_v21 = vmul.f32 0.70710677, %v5966_v30 }
0x10db   :  { %10425 = verf.f32 %v6443_v57  ;;  %v14703_v2 = vmul.f32 0.5, %v5962_v48  ;;  %v6447_v51 = vmul.f32 0.70710677, %v6159_v3  ;;  %v6446_v61 = vmul.f32 0.70710677, %v5968_v15 }
0x10dc   :  { %10427 = verf.f32 %v6442_v7  ;;  %v14705_v5 = vmul.f32 0.5, %v6155_v12  ;;  %v6448_v34 = vmul.f32 0.70710677, %v6161_v18  ;;  %v14711_v59 = vadd.f32 %v14343_v25, %v5656_v37  ;;  %v10420_v37 = vpop.eup %10419 }
0x10dd   :  { %10429 = verf.f32 %v6444_v40  ;;  %v5971_v28 = vpop.f32.mrb[196].mxu1  ;;  %v6164_v56 = vpop.f32.mrb[196].mxu0  ;;  %v14714_v12 = vadd.f32 %v14343_v25, %v5655_v8  ;;  %v6319_v60 = vmul.f32 0.5, %v6159_v3  ;;  %v14730_v54 = vmul.f32 0.5, %v6161_v18 }
0x10de   :  { %10431 = verf.f32 %v6445_v21  ;;  %v5972_v55 = vadd.f32 %v5971_v28, %v14669_v39  ;;  %v5973_v10 = vpop.f32.mrb[197].mxu1  ;;  %v6165_v11 = vadd.f32 %v6164_v56, %v14673_v36  ;;  %16518 = vst [vmem:[#allocation50_spill] sm:$0xff] %v14711_v59  ;;  %v6166_v48 = vpop.f32.mrb[197].mxu0  ;;  %v14717_v21 = vmul.f32 0.5, %v5964_v52 }
0x10df   :  { %10433 = verf.f32 %v6447_v51  ;;  %v5974_v57 = vadd.f32 %v5973_v10, %v14683_v33  ;;  %v5975_v45 = vpop.f32.mrb[198].mxu1  ;;  %16519 = vst [vmem:[#allocation49_spill] sm:$0xff] %v14714_v12  ;;  %v6167_v40 = vadd.f32 %v6166_v48, %v14685_v26  ;;  %v6168_v19 = vpop.f32.mrb[198].mxu0  ;;  %v14719_v51 = vmul.f32 0.5, %v6157_v13 }
0x10e0   :  { %10435 = verf.f32 %v6446_v61  ;;  %v6449_v7 = vmul.f32 0.70710677, %v5972_v55  ;;  %v5977_v23 = vpop.f32.mrb[199].mxu1  ;;  %v6451_v28 = vmul.f32 0.70710677, %v6165_v11  ;;  %v6170_v56 = vpop.f32.mrb[199].mxu0  ;;  %v5711_v61 = vpack.c.bf16 %v14711_v59, %v14714_v12 }
0x10e1   :  { %10437 = verf.f32 %v6448_v34  ;;  %v6317_v10 = vmul.f32 0.5, %v5966_v30  ;;  %v6450_v16 = vmul.f32 0.70710677, %v5974_v57  ;;  %v14723_v25 = vpop.eup %10421  ;;  %v6452_v8 = vmul.f32 0.70710677, %v6167_v40 }
0x10e2   :  { %10439 = verf.f32 %v6449_v7  ;;  %v5976_v48 = vadd.f32 %v5975_v45, %v14669_v39  ;;  %v6169_v52 = vadd.f32 %v6168_v19, %v14673_v36  ;;  %v14727_v34 = vmul.f32 0.5, %v5968_v15  ;;  %6100 = vmatmul.mubr.bf16.gmra.mrb[248].mxu1 %v5711_v61  ;;  %6293 = vmatmul.mubr.bf16.gmra.mrb[248].mxu0 %v5711_v61 }
0x10e3   :  { %10441 = verf.f32 %v6451_v28  ;;  %v5978_v30 = vadd.f32 %v5977_v23, %v14683_v33  ;;  %v6171_v28 = vadd.f32 %v6170_v56, %v14685_v26  ;;  %6109 = vmatprep.mubr.bf16.mxu1 %v16425_v35  ;;  %6302 = vmatprep.mubr.bf16.mxu0 %v16425_v35  ;;  %v6323_v19 = vmul.f32 0.5, %v6165_v11 }
0x10e4   :  { %v10424_v13 = vpop.eup %10423  ;;  %10443 = verf.f32 %v6450_v16  ;;  %v6453_v59 = vmul.f32 0.70710677, %v5976_v48  ;;  %v6321_v16 = vmul.f32 0.5, %v5972_v55  ;;  %v6455_v61 = vmul.f32 0.70710677, %v6169_v52 }
0x10e5   :  { %v10426_v7 = vpop.eup %10425  ;;  %10445 = verf.f32 %v6452_v8  ;;  %v5981_v12 = vpop.f32.mrb[200].mxu1  ;;  %v6697_v15 = vadd.f32 1.0, %v10424_v13  ;;  %v14735_v1 = vmul.f32 0.5, %v5974_v57  ;;  %v14737_v18 = vmul.f32 0.5, %v6167_v40 }
0x10e6   :  { %v6174_v45 = vpop.f32.mrb[200].mxu0  ;;  %v10428_v3 = vpop.eup %10427  ;;  %10447 = verf.f32 %v6453_v59  ;;  %v6454_v8 = vmul.f32 0.70710677, %v5978_v30  ;;  %v6699_v4 = vadd.f32 1.0, %v10426_v7  ;;  %v6325_v62 = vmul.f32 0.5, %v5976_v48 }
0x10e7   :  { %v5983_v20 = vpop.f32.mrb[201].mxu1  ;;  %v10430_v23 = vpop.eup %10429  ;;  %10449 = verf.f32 %v6455_v61  ;;  %v5619_v35 = vmul.f32 %v10420_v37, %v14425_v49  ;;  %v6327_v44 = vmul.f32 0.5, %v6169_v52  ;;  %v6456_v40 = vmul.f32 0.70710677, %v6171_v28 }
0x10e8   :  { %v6176_v56 = vpop.f32.mrb[201].mxu0  ;;  %v14739_v50 = vpop.f32.mrb[202].mxu1  ;;  %10451 = verf.f32 %v6454_v8  ;;  %v14749_v24 = vmul.f32 %v6697_v15, %v14703_v2  ;;  %v6698_v7 = vadd.f32 1.0, %v10428_v3  ;;  %v14752_v61 = vadd.f32 %v5981_v12, %v14669_v39 }
0x10e9   :  { %v10432_v0 = vpop.eup %10431  ;;  %v14742_v55 = vpop.f32.mrb[202].mxu0  ;;  %v6700_v37 = vadd.f32 1.0, %v10430_v23  ;;  %10453 = verf.f32 %v6456_v40  ;;  %v14757_v52 = vmul.f32 %v6699_v4, %v14705_v5  ;;  %v6328_v5 = vmul.f32 0.5, %v6171_v28 }
0x10ea   :  { %v14744_v11 = vpop.f32.mrb[203].mxu1  ;;  %v10434_v13 = vpop.eup %10433  ;;  %v6701_v57 = vadd.f32 1.0, %v10432_v0  ;;  %v6457_v2 = vmul.f32 0.70710677, %v14752_v61  ;;  %v6826_v40 = vmul.f32 %v6698_v7, %v14717_v21  ;;  %v10775_v21 = vld [vmem:[%s15885_s6] ss:$0 sm:$0xff] }
0x10eb   :  { %v14746_v59 = vpop.f32.mrb[203].mxu0  ;;  %v10436_v31 = vpop.eup %10435  ;;  %v6703_v48 = vadd.f32 1.0, %v10434_v13  ;;  %v6326_v13 = vmul.f32 0.5, %v5978_v30 }
0x10ec   :  { %v10438_v49 = vpop.eup %10437  ;;  %v14754_v32 = vmul.f32 %v6701_v57, %v6317_v10  ;;  %v6702_v42 = vadd.f32 1.0, %v10436_v31  ;;  %v14765_v10 = vadd.f32 %v6174_v45, %v14673_v36  ;;  %10455 = verf.f32 %v6457_v2 }
0x10ed   :  { %v10440_v0 = vpop.eup %10439  ;;  %v14759_v8 = vmul.f32 %v6703_v48, %v6319_v60  ;;  %v6704_v22 = vadd.f32 1.0, %v10438_v49  ;;  %v14770_v60 = vadd.f32 %v5983_v20, %v14683_v33  ;;  %v6828_v48 = vmul.f32 %v6700_v37, %v14719_v51  ;;  %v10776_v37 = vld [vmem:[%s15886_s7] ss:$0 sm:$0xff] }
0x10ee   :  { %v10442_v3 = vpop.eup %10441  ;;  %v6953_v12 = vpack.c.bf16 %v14754_v32, %v14749_v24  ;;  %v6705_v15 = vadd.f32 1.0, %v10440_v0  ;;  %v6830_v49 = vmul.f32 %v6702_v42, %v14727_v34  ;;  %v6459_v20 = vmul.f32 0.70710677, %v14765_v10 }
0x10ef   :  { %v10444_v31 = vpop.eup %10443  ;;  %v6707_v4 = vadd.f32 1.0, %v10442_v3  ;;  %v6832_v45 = vmul.f32 %v6704_v22, %v14730_v54  ;;  %v5620_v3 = vmul.f32 %v14723_v25, %v14431_v27  ;;  %v5657_v51 = vmul.f32 %v10775_v21, %v5619_v35 }
0x10f0   :  { %v10446_v57 = vpop.eup %10445  ;;  %v6706_v30 = vadd.f32 1.0, %v10444_v31  ;;  %v14776_v0 = vmul.f32 %v6705_v15, %v6321_v16  ;;  %v14787_v42 = vadd.f32 %v6176_v56, %v14685_v26  ;;  %v6458_v16 = vmul.f32 0.70710677, %v14770_v60 }
0x10f1   :  { %v10448_v28 = vpop.eup %10447  ;;  %v14780_v23 = vmul.f32 %v6707_v4, %v6323_v19  ;;  %v6708_v54 = vadd.f32 1.0, %v10446_v57  ;;  %v5658_v7 = vmul.f32 %v10775_v21, %v5620_v3  ;;  %v14794_v2 = vadd.f32 %v10776_v37, %v5657_v51 }
0x10f2   :  { %v10450_v22 = vpop.eup %10449  ;;  %v6709_v34 = vadd.f32 1.0, %v10448_v28  ;;  %v6834_v25 = vmul.f32 %v6706_v30, %v14735_v1  ;;  %v6460_v35 = vmul.f32 0.70710677, %v14787_v42  ;;  %v5986_v4 = vadd.f32 %v14739_v50, %v14669_v39 }
0x10f3   :  { %v10452_v27 = vpop.eup %10451  ;;  %v6711_v19 = vadd.f32 1.0, %v10450_v22  ;;  %16520 = vst [vmem:[#allocation85_spill] sm:$0xff] %v14794_v2  ;;  %v14799_v31 = vadd.f32 %v10776_v37, %v5658_v7  ;;  %10457 = verf.f32 %v6459_v20  ;;  %v6179_v1 = vadd.f32 %v14742_v55, %v14673_v36 }
0x10f4   :  { %v14797_v56 = vmul.f32 %v6709_v34, %v6325_v62  ;;  %v6710_v15 = vadd.f32 1.0, %v10452_v27  ;;  %v10454_v57 = vpop.eup %10453  ;;  %v5988_v30 = vadd.f32 %v14744_v11, %v14683_v33  ;;  %v6836_v50 = vmul.f32 %v6708_v54, %v14737_v18 }
0x10f5   :  { %16521 = vst [vmem:[#allocation15_spill] sm:$0xff] %v14799_v31  ;;  %v14803_v3 = vmul.f32 %v6711_v19, %v6327_v44  ;;  %v6712_v21 = vadd.f32 1.0, %v10454_v57  ;;  %v5712_v51 = vpack.c.bf16 %v14799_v31, %v14794_v2  ;;  %10459 = verf.f32 %v6458_v16 }
0x10f6   :  { %v6957_v62 = vpack.c.bf16 %v14797_v56, %v14776_v0  ;;  %v6838_v28 = vmul.f32 %v6710_v15, %v6326_v13  ;;  %v6461_v20 = vmul.f32 0.70710677, %v5986_v4  ;;  %10461 = verf.f32 %v6460_v35  ;;  %v10456_v34 = vpop.eup %10455 }
0x10f7   :  { %v6959_v44 = vpack.c.bf16 %v14803_v3, %v14780_v23  ;;  %v6840_v22 = vmul.f32 %v6712_v21, %v6328_v5  ;;  %6110 = vmatmul.mubr.bf16.gmra.mrb[252].mxu1 %v5712_v51  ;;  %6303 = vmatmul.mubr.bf16.gmra.mrb[252].mxu0 %v5712_v51  ;;  %v6463_v55 = vmul.f32 0.70710677, %v6179_v1  ;;  %v6462_v11 = vmul.f32 0.70710677, %v5988_v30 }
0x10f8   :  { %10463 = verf.f32 %v6461_v20  ;;  %v6181_v13 = vadd.f32 %v14746_v59, %v14685_v26  ;;  %v6954_v0 = vpack.c.bf16 %v6830_v49, %v6826_v40  ;;  %v6956_v7 = vpack.c.bf16 %v6832_v45, %v6828_v48 }
0x10f9   :  { %10465 = verf.f32 %v6463_v55  ;;  %v6958_v18 = vpack.c.bf16 %v6838_v28, %v6834_v25  ;;  %v6960_v54 = vpack.c.bf16 %v6840_v22, %v6836_v50  ;;  %v16522_v16 = vpack.c.bf16 %v14759_v8, %v14757_v52 }
0x10fa   :  { %10467 = verf.f32 %v6462_v11  ;;  %v6464_v23 = vmul.f32 0.70710677, %v6181_v13  ;;  %7312 = vmatprep.mubr.bf16.mxu1 %v6954_v0  ;;  %7473 = vmatprep.mubr.bf16.mxu0 %v6956_v7  ;;  %v6713_v48 = vadd.f32 1.0, %v10456_v34  ;;  %v6329_v45 = vmul.f32 0.5, %v14752_v61 }
0x10fb   :  { %v6331_v19 = vmul.f32 0.5, %v14765_v10  ;;  %v6333_v35 = vmul.f32 0.5, %v5986_v4  ;;  %v6335_v52 = vmul.f32 0.5, %v6179_v1  ;;  %v6334_v56 = vmul.f32 0.5, %v5988_v30 }
0x10fc   :  { %10469 = verf.f32 %v6464_v23  ;;  %v6841_v15 = vmul.f32 %v6713_v48, %v6329_v45  ;;  %v6332_v61 = vmul.f32 0.5, %v14787_v42  ;;  %v6336_v20 = vmul.f32 0.5, %v6181_v13 }
0x10fd   :  { %v10458_v5 = vpop.eup %10457 }
0x10fe   :  { %v6715_v27 = vadd.f32 1.0, %v10458_v5 }
0x10ff   :  { %7313 = vmatmul.mubr.bf16.vlgmr.msra.gmra.mrb[0].mxu1 %v6953_v12  ;;  %7474 = vmatmul.mubr.bf16.vlgmr.msra.gmra.mrb[0].mxu0 %v16522_v16  ;;  %v10460_v59 = vpop.eup %10459  ;;  %v6330_v12 = vmul.f32 0.5, %v14770_v60 }
0x1100   :  { %7320 = vmatprep.mubr.bf16.mxu1 %v6958_v18  ;;  %7481 = vmatprep.mubr.bf16.mxu0 %v6960_v54  ;;  %v10462_v40 = vpop.eup %10461  ;;  %v6714_v37 = vadd.f32 1.0, %v10460_v59  ;;  %v6843_v51 = vmul.f32 %v6715_v27, %v6331_v19 }
0x1101   :  { %v6716_v57 = vadd.f32 1.0, %v10462_v40 }
0x1102   :  { %v10464_v49 = vpop.eup %10463  ;;  %v6842_v10 = vmul.f32 %v6714_v37, %v6330_v12 }
0x1103   :  { %v10466_v25 = vpop.eup %10465  ;;  %v6717_v32 = vadd.f32 1.0, %v10464_v49  ;;  %v6844_v1 = vmul.f32 %v6716_v57, %v6332_v61 }
0x1104   :  { %v10468_v24 = vpop.eup %10467  ;;  %v6719_v8 = vadd.f32 1.0, %v10466_v25 }
0x1105   :  { %v6845_v3 = vmul.f32 %v6717_v32, %v6333_v35  ;;  %v6718_v28 = vadd.f32 1.0, %v10468_v24 }
0x1106   :  { %v10470_v21 = vpop.eup %10469  ;;  %v6847_v50 = vmul.f32 %v6719_v8, %v6335_v52 }
0x1107   :  { %v6961_v22 = vpack.c.bf16 %v6845_v3, %v6841_v15  ;;  %v6846_v4 = vmul.f32 %v6718_v28, %v6334_v56  ;;  %v6720_v55 = vadd.f32 1.0, %v10470_v21  ;;  %7321 = vmatmul.mubr.bf16.gmra.mrb[4].mxu1 %v6957_v62  ;;  %7482 = vmatmul.mubr.bf16.gmra.mrb[4].mxu0 %v6959_v44 }
0x1108   :  { %v6963_v60 = vpack.c.bf16 %v6847_v50, %v6843_v51 }
0x1109   :  { %v6848_v11 = vmul.f32 %v6720_v55, %v6336_v20  ;;  %v6962_v30 = vpack.c.bf16 %v6846_v4, %v6842_v10 }
0x110b   :  { %7328 = vmatprep.mubr.bf16.mxu1 %v6962_v30  ;;  %v6964_v0 = vpack.c.bf16 %v6848_v11, %v6844_v1 }
0x110d   :  { %7489 = vmatprep.mubr.bf16.mxu0 %v6964_v0 }
0x110f   :  { %7329 = vmatmul.mubr.bf16.gmra.mrb[8].mxu1 %v6961_v22  ;;  %7490 = vmatmul.mubr.bf16.gmra.mrb[8].mxu0 %v6963_v60 }
0x1111   :  { %v5991_v34 = vpop.f32.mrb[204].mxu1  ;;  %v6184_v7 = vpop.f32.mrb[204].mxu0 }
0x1112   :  { %v5992_v42 = vadd.f32 %v5991_v34, %v14669_v39  ;;  %v6185_v13 = vadd.f32 %v6184_v7, %v14673_v36  ;;  %v5993_v18 = vpop.f32.mrb[205].mxu1  ;;  %v6186_v54 = vpop.f32.mrb[205].mxu0 }
0x1113   :  { %v5994_v62 = vadd.f32 %v5993_v18, %v14683_v33  ;;  %v6187_v44 = vadd.f32 %v6186_v54, %v14685_v26  ;;  %v5995_v23 = vpop.f32.mrb[206].mxu1  ;;  %v6188_v5 = vpop.f32.mrb[206].mxu0 }
0x1114   :  { %v6465_v16 = vmul.f32 0.70710677, %v5992_v42  ;;  %v6467_v59 = vmul.f32 0.70710677, %v6185_v13  ;;  %v5996_v49 = vadd.f32 %v5995_v23, %v14669_v39  ;;  %v6189_v45 = vadd.f32 %v6188_v5, %v14673_v36  ;;  %v5997_v27 = vpop.f32.mrb[207].mxu1  ;;  %v6190_v25 = vpop.f32.mrb[207].mxu0 }
0x1115   :  { %v6466_v40 = vmul.f32 0.70710677, %v5994_v62  ;;  %v6468_v48 = vmul.f32 0.70710677, %v6187_v44  ;;  %v5998_v19 = vadd.f32 %v5997_v27, %v14683_v33  ;;  %v6191_v37 = vadd.f32 %v6190_v25, %v14685_v26 }
0x1116   :  { %10471 = verf.f32 %v6465_v16  ;;  %v6469_v35 = vmul.f32 0.70710677, %v5996_v49  ;;  %v6471_v32 = vmul.f32 0.70710677, %v6189_v45  ;;  %v6337_v10 = vmul.f32 0.5, %v5992_v42 }
0x1117   :  { %10473 = verf.f32 %v6467_v59  ;;  %v6470_v24 = vmul.f32 0.70710677, %v5998_v19  ;;  %v6472_v52 = vmul.f32 0.70710677, %v6191_v37  ;;  %v6339_v55 = vmul.f32 0.5, %v6185_v13 }
0x1118   :  { %10475 = verf.f32 %v6466_v40  ;;  %v14843_v7 = vmul.f32 0.5, %v5994_v62  ;;  %v14845_v18 = vmul.f32 0.5, %v6187_v44  ;;  %v6341_v42 = vmul.f32 0.5, %v5996_v49 }
0x1119   :  { %10477 = verf.f32 %v6468_v48  ;;  %v6001_v12 = vpop.f32.mrb[208].mxu1  ;;  %v6194_v56 = vpop.f32.mrb[208].mxu0  ;;  %v6343_v54 = vmul.f32 0.5, %v6189_v45  ;;  %v6342_v25 = vmul.f32 0.5, %v5998_v19 }
0x111a   :  { %10479 = verf.f32 %v6469_v35  ;;  %v6002_v8 = vadd.f32 %v6001_v12, %v14669_v39  ;;  %v6003_v15 = vpop.f32.mrb[209].mxu1  ;;  %v6195_v57 = vadd.f32 %v6194_v56, %v14673_v36  ;;  %v6196_v28 = vpop.f32.mrb[209].mxu0 }
0x111b   :  { %10481 = verf.f32 %v6471_v32  ;;  %v6004_v3 = vadd.f32 %v6003_v15, %v14683_v33  ;;  %v6005_v21 = vpop.f32.mrb[210].mxu1  ;;  %v6197_v61 = vadd.f32 %v6196_v28, %v14685_v26  ;;  %v6198_v50 = vpop.f32.mrb[210].mxu0 }
0x111c   :  { %10483 = verf.f32 %v6470_v24  ;;  %v6473_v51 = vmul.f32 0.70710677, %v6002_v8  ;;  %v6007_v20 = vpop.f32.mrb[211].mxu1  ;;  %v6475_v22 = vmul.f32 0.70710677, %v6195_v57  ;;  %v6200_v4 = vpop.f32.mrb[211].mxu0  ;;  %v6006_v11 = vadd.f32 %v6005_v21, %v14669_v39 }
0x111d   :  { %10485 = verf.f32 %v6472_v52  ;;  %v6474_v60 = vmul.f32 0.70710677, %v6004_v3  ;;  %v6476_v1 = vmul.f32 0.70710677, %v6197_v61  ;;  %v6199_v30 = vadd.f32 %v6198_v50, %v14673_v36 }
0x111e   :  { %10487 = verf.f32 %v6473_v51  ;;  %v6008_v0 = vadd.f32 %v6007_v20, %v14683_v33  ;;  %v6477_v13 = vmul.f32 0.70710677, %v6006_v11  ;;  %v6201_v16 = vadd.f32 %v6200_v4, %v14685_v26 }
0x111f   :  { %10489 = verf.f32 %v6475_v22  ;;  %v6479_v35 = vmul.f32 0.70710677, %v6199_v30  ;;  %v14848_v24 = vmul.f32 0.5, %v6191_v37  ;;  %v14850_v44 = vmul.f32 0.5, %v6002_v8 }
0x1120   :  { %v10472_v34 = vpop.eup %10471  ;;  %10491 = verf.f32 %v6474_v60  ;;  %v6478_v49 = vmul.f32 0.70710677, %v6008_v0  ;;  %v14852_v56 = vmul.f32 0.5, %v6195_v57  ;;  %v14854_v15 = vmul.f32 0.5, %v6004_v3 }
0x1121   :  { %v10474_v23 = vpop.eup %10473  ;;  %v6721_v5 = vadd.f32 1.0, %v10472_v34  ;;  %v6011_v59 = vpop.f32.mrb[212].mxu1  ;;  %10493 = verf.f32 %v6476_v1  ;;  %v14856_v28 = vmul.f32 0.5, %v6197_v61  ;;  %v6349_v50 = vmul.f32 0.5, %v6006_v11 }
0x1122   :  { %v6204_v40 = vpop.f32.mrb[212].mxu0  ;;  %v10476_v48 = vpop.eup %10475  ;;  %v6723_v27 = vadd.f32 1.0, %v10474_v23  ;;  %10495 = verf.f32 %v6477_v13  ;;  %v6480_v20 = vmul.f32 0.70710677, %v6201_v16  ;;  %v6012_v61 = vadd.f32 %v6011_v59, %v14669_v39 }
0x1123   :  { %v6013_v32 = vpop.f32.mrb[213].mxu1  ;;  %v10478_v62 = vpop.eup %10477  ;;  %10497 = verf.f32 %v6479_v35  ;;  %v14860_v37 = vmul.f32 %v6721_v5, %v6337_v10  ;;  %v6722_v57 = vadd.f32 1.0, %v10476_v48  ;;  %v6205_v10 = vadd.f32 %v6204_v40, %v14673_v36 }
0x1124   :  { %v6206_v45 = vpop.f32.mrb[213].mxu0  ;;  %v6015_v12 = vpop.f32.mrb[214].mxu1  ;;  %v14864_v60 = vmul.f32 %v6723_v27, %v6339_v55  ;;  %v6724_v34 = vadd.f32 1.0, %v10478_v62  ;;  %10499 = verf.f32 %v6478_v49  ;;  %v6481_v35 = vmul.f32 0.70710677, %v6012_v61 }
0x1125   :  { %v10480_v52 = vpop.eup %10479  ;;  %v6208_v19 = vpop.f32.mrb[214].mxu0  ;;  %10501 = verf.f32 %v6480_v20  ;;  %v6351_v48 = vmul.f32 0.5, %v6199_v30  ;;  %v14874_v27 = vmul.f32 0.5, %v6008_v0  ;;  %v6014_v59 = vadd.f32 %v6013_v32, %v14683_v33 }
0x1126   :  { %v14858_v21 = vpop.f32.mrb[215].mxu1  ;;  %v10482_v51 = vpop.eup %10481  ;;  %v6725_v8 = vadd.f32 1.0, %v10480_v52  ;;  %10503 = verf.f32 %v6481_v35  ;;  %v14888_v30 = vmul.f32 %v6722_v57, %v14843_v7  ;;  %v14891_v0 = vmul.f32 %v6724_v34, %v14845_v18 }
0x1127   :  { %v14862_v22 = vpop.f32.mrb[215].mxu0  ;;  %v10484_v4 = vpop.eup %10483  ;;  %v6727_v3 = vadd.f32 1.0, %v10482_v51  ;;  %v14893_v32 = vmul.f32 0.5, %v6201_v16  ;;  %v14901_v55 = vmul.f32 0.5, %v6012_v61  ;;  %v6207_v31 = vadd.f32 %v6206_v45, %v14685_v26 }
0x1128   :  { %v10486_v1 = vpop.eup %10485  ;;  %v14867_v23 = vmul.f32 %v6725_v8, %v6341_v42  ;;  %v6726_v11 = vadd.f32 1.0, %v10484_v4  ;;  %v6483_v4 = vmul.f32 0.70710677, %v6205_v10  ;;  %v14908_v16 = vmul.f32 0.5, %v6205_v10 }
0x1129   :  { %v10488_v5 = vpop.eup %10487  ;;  %v14870_v13 = vmul.f32 %v6727_v3, %v6343_v54  ;;  %v14877_v42 = vpop.f32.mrb[216].mxu1  ;;  %v6728_v40 = vadd.f32 1.0, %v10486_v1  ;;  %v6482_v34 = vmul.f32 0.70710677, %v6014_v59  ;;  %v6016_v2 = vadd.f32 %v6015_v12, %v14669_v39 }
0x112a   :  { %v10490_v52 = vpop.eup %10489  ;;  %v14879_v62 = vpop.f32.mrb[216].mxu0  ;;  %v6729_v49 = vadd.f32 1.0, %v10488_v5  ;;  %v14899_v5 = vmul.f32 %v6726_v11, %v6342_v25  ;;  %v6209_v47 = vadd.f32 %v6208_v19, %v14673_v36  ;;  %10505 = verf.f32 %v6483_v4 }
0x112b   :  { %v14883_v51 = vpop.f32.mrb[217].mxu1  ;;  %v14885_v8 = vpop.f32.mrb[217].mxu0  ;;  %v6731_v35 = vadd.f32 1.0, %v10490_v52  ;;  %v14913_v25 = vmul.f32 %v6728_v40, %v14848_v24  ;;  %v6485_v58 = vmul.f32 0.70710677, %v6016_v2  ;;  %10507 = verf.f32 %v6482_v34 }
0x112c   :  { %v10492_v20 = vpop.eup %10491  ;;  %v14895_v3 = vpop.f32.mrb[218].mxu1  ;;  %v14916_v61 = vmul.f32 %v6729_v49, %v14850_v44  ;;  %v6484_v12 = vmul.f32 0.70710677, %v6207_v31  ;;  %v6487_v19 = vmul.f32 0.70710677, %v6209_v47  ;;  %v6018_v24 = vadd.f32 %v14858_v21, %v14683_v33 }
0x112d   :  { %v14897_v54 = vpop.f32.mrb[218].mxu0  ;;  %v10494_v1 = vpop.eup %10493  ;;  %v6730_v45 = vadd.f32 1.0, %v10492_v20  ;;  %v14919_v10 = vmul.f32 %v6731_v35, %v14852_v56  ;;  %v6211_v44 = vadd.f32 %v14862_v22, %v14685_v26  ;;  %10509 = verf.f32 %v6485_v58 }
0x112e   :  { %v14904_v7 = vpop.f32.mrb[219].mxu1  ;;  %v14906_v57 = vpop.f32.mrb[219].mxu0  ;;  %v6732_v52 = vadd.f32 1.0, %v10494_v1  ;;  %10511 = verf.f32 %v6487_v19  ;;  %v6486_v4 = vmul.f32 0.70710677, %v6018_v24  ;;  %v14963_v19 = vmul.f32 0.5, %v6207_v31 }
0x112f   :  { %v10496_v18 = vpop.eup %10495  ;;  %10513 = verf.f32 %v6484_v12  ;;  %v6488_v58 = vmul.f32 0.70710677, %v6211_v44  ;;  %v6217_v12 = vadd.f32 %v14885_v8, %v14685_v26  ;;  %v6357_v20 = vmul.f32 0.5, %v6016_v2 }
0x1130   :  { %v10498_v14 = vpop.eup %10497  ;;  %v6733_v11 = vadd.f32 1.0, %v10496_v18  ;;  %v14945_v22 = vmul.f32 %v6732_v52, %v14856_v28  ;;  %v6022_v18 = vadd.f32 %v14877_v42, %v14669_v39  ;;  %10515 = verf.f32 %v6486_v4 }
0x1131   :  { %v6735_v17 = vadd.f32 1.0, %v10498_v14  ;;  %v10500_v53 = vpop.eup %10499  ;;  %v14929_v14 = vpop.f32.mrb[220].mxu1  ;;  %v6024_v52 = vadd.f32 %v14883_v51, %v14683_v33  ;;  %10517 = verf.f32 %v6488_v58  ;;  %v6359_v49 = vmul.f32 0.5, %v6209_v47 }
0x1132   :  { %v14921_v46 = vmul.f32 %v6733_v11, %v6349_v50  ;;  %v14931_v40 = vpop.f32.mrb[220].mxu0  ;;  %v10502_v56 = vpop.eup %10501  ;;  %v14934_v50 = vmul.f32 %v6730_v45, %v14854_v15  ;;  %v6215_v11 = vadd.f32 %v14879_v62, %v14673_v36  ;;  %v14970_v4 = vmul.f32 0.5, %v6018_v24 }
0x1133   :  { %v14923_v43 = vmul.f32 %v6735_v17, %v6351_v48  ;;  %v14938_v17 = vmul.f32 0.5, %v6014_v59  ;;  %v14940_v48 = vpop.f32.mrb[221].mxu1  ;;  %v14942_v21 = vpop.f32.mrb[221].mxu0  ;;  %v6734_v59 = vadd.f32 1.0, %v10500_v53  ;;  %v6736_v45 = vadd.f32 1.0, %v10502_v56 }
0x1134   :  { %v14949_v15 = vpop.f32.mrb[222].mxu1  ;;  %v14951_v1 = vpop.f32.mrb[222].mxu0  ;;  %v6489_v53 = vmul.f32 0.70710677, %v6022_v18  ;;  %v6491_v38 = vmul.f32 0.70710677, %v6215_v11  ;;  %v6966_v8 = vpack.c.bf16 %v14899_v5, %v14888_v30  ;;  %v6968_v47 = vpack.c.bf16 %v14913_v25, %v14891_v0 }
0x1135   :  { %v10504_v35 = vpop.eup %10503  ;;  %v14955_v34 = vpop.f32.mrb[223].mxu1  ;;  %v14968_v56 = vmul.f32 %v6734_v59, %v14874_v27  ;;  %v6490_v62 = vmul.f32 0.70710677, %v6024_v52  ;;  %v14973_v31 = vmul.f32 %v6736_v45, %v14893_v32  ;;  %v6492_v51 = vmul.f32 0.70710677, %v6217_v12 }
0x1136   :  { %v14957_v28 = vpop.f32.mrb[223].mxu0  ;;  %v6737_v42 = vadd.f32 1.0, %v10504_v35  ;;  %10519 = verf.f32 %v6489_v53  ;;  %v10506_v29 = vpop.eup %10505  ;;  %v14977_v35 = vmul.f32 0.5, %v6211_v44  ;;  %v6026_v2 = vadd.f32 %v14895_v3, %v14669_v39  ;;  %7336 = vmatprep.mubr.bf16.mxu1 %v6966_v8  ;;  %7497 = vmatprep.mubr.bf16.mxu0 %v6968_v47 }
0x1137   :  { %10521 = verf.f32 %v6491_v38  ;;  %v10508_v27 = vpop.eup %10507  ;;  %v6361_v32 = vmul.f32 0.5, %v6022_v18  ;;  %v6219_v38 = vadd.f32 %v14897_v54, %v14673_v36  ;;  %v6028_v30 = vadd.f32 %v14904_v7, %v14683_v33 }
0x1138   :  { %10523 = verf.f32 %v6490_v62  ;;  %v14984_v24 = vmul.f32 %v6737_v42, %v14901_v55  ;;  %v10510_v5 = vpop.eup %10509  ;;  %v6739_v44 = vadd.f32 1.0, %v10506_v29  ;;  %v6493_v0 = vmul.f32 0.70710677, %v6026_v2 }
0x1139   :  { %10525 = verf.f32 %v6492_v51  ;;  %v16523_v3 = vpack.c.bf16 %v14867_v23, %v14860_v37  ;;  %v6221_v55 = vadd.f32 %v14906_v57, %v14685_v26  ;;  %v10512_v25 = vpop.eup %10511  ;;  %v6741_v59 = vadd.f32 1.0, %v10510_v5 }
0x113a   :  { %v6363_v58 = vmul.f32 0.5, %v6215_v11  ;;  %v6362_v18 = vmul.f32 0.5, %v6024_v52  ;;  %v6495_v54 = vmul.f32 0.70710677, %v6219_v38  ;;  %v16524_v7 = vpack.c.bf16 %v14870_v13, %v14864_v60  ;;  %v10514_v29 = vpop.eup %10513 }
0x113b   :  { %7337 = vmatmul.mubr.bf16.gmra.mrb[12].mxu1 %v16523_v3  ;;  %v6738_v45 = vadd.f32 1.0, %v10508_v27  ;;  %v6743_v53 = vadd.f32 1.0, %v10512_v25  ;;  %10527 = verf.f32 %v6493_v0  ;;  %v6494_v42 = vmul.f32 0.70710677, %v6028_v30  ;;  %v10516_v62 = vpop.eup %10515 }
0x113c   :  { %7498 = vmatmul.mubr.bf16.gmra.mrb[12].mxu0 %v16524_v7  ;;  %v14998_v37 = vmul.f32 %v6741_v59, %v6357_v20  ;;  %v15000_v23 = vmul.f32 0.5, %v6217_v12  ;;  %10529 = verf.f32 %v6495_v54  ;;  %v6496_v57 = vmul.f32 0.70710677, %v6221_v55  ;;  %v10518_v51 = vpop.eup %10517 }
0x113d   :  { %v15003_v11 = vmul.f32 %v6739_v44, %v14908_v16  ;;  %v15005_v52 = vmul.f32 %v6743_v53, %v6359_v49  ;;  %10531 = verf.f32 %v6494_v42  ;;  %v15009_v60 = vadd.f32 %v14929_v14, %v14669_v39 }
0x113e   :  { %v6740_v13 = vadd.f32 1.0, %v10514_v29  ;;  %v6973_v20 = vpack.c.bf16 %v14998_v37, %v14984_v24  ;;  %10533 = verf.f32 %v6496_v57  ;;  %v15015_v12 = vadd.f32 %v14931_v40, %v14673_v36 }
0x113f   :  { %v15018_v16 = vmul.f32 %v6738_v45, %v14938_v17  ;;  %v6975_v49 = vpack.c.bf16 %v15005_v52, %v15003_v11  ;;  %v6742_v47 = vadd.f32 1.0, %v10516_v62  ;;  %v6744_v27 = vadd.f32 1.0, %v10518_v51 }
0x1140   :  { %v10520_v8 = vpop.eup %10519  ;;  %v6365_v44 = vmul.f32 0.5, %v6026_v2  ;;  %v6367_v0 = vmul.f32 0.5, %v6219_v38  ;;  %v6497_v3 = vmul.f32 0.70710677, %v15009_v60  ;;  %v6499_v40 = vmul.f32 0.70710677, %v15015_v12 }
0x1141   :  { %v10522_v14 = vpop.eup %10521  ;;  %v6745_v5 = vadd.f32 1.0, %v10520_v8  ;;  %v15026_v54 = vadd.f32 %v14940_v48, %v14683_v33  ;;  %v15030_v17 = vadd.f32 %v14942_v21, %v14685_v26  ;;  %v6868_v7 = vmul.f32 %v6740_v13, %v14963_v19 }
0x1142   :  { %v10524_v25 = vpop.eup %10523  ;;  %v6747_v59 = vadd.f32 1.0, %v10522_v14  ;;  %v6366_v45 = vmul.f32 0.5, %v6028_v30  ;;  %v6970_v2 = vpack.c.bf16 %v14968_v56, %v14934_v50  ;;  %v6870_v53 = vmul.f32 %v6742_v47, %v14970_v4 }
0x1143   :  { %v6746_v29 = vadd.f32 1.0, %v10524_v25  ;;  %v10526_v38 = vpop.eup %10525  ;;  %v6872_v42 = vmul.f32 %v6744_v27, %v14977_v35  ;;  %v6368_v62 = vmul.f32 0.5, %v6221_v55  ;;  %v6498_v48 = vmul.f32 0.70710677, %v15026_v54 }
0x1144   :  { %v15038_v57 = vmul.f32 %v6745_v5, %v6361_v32  ;;  %10535 = verf.f32 %v6497_v3  ;;  %v6500_v21 = vmul.f32 0.70710677, %v15030_v17  ;;  %7344 = vmatprep.mubr.bf16.mxu1 %v6970_v2  ;;  %v6972_v19 = vpack.c.bf16 %v14973_v31, %v14945_v22 }
0x1145   :  { %v10528_v30 = vpop.eup %10527  ;;  %v15043_v51 = vmul.f32 %v6747_v59, %v6363_v58  ;;  %10537 = verf.f32 %v6499_v40  ;;  %v6036_v50 = vadd.f32 %v14949_v15, %v14669_v39  ;;  %v6229_v56 = vadd.f32 %v14951_v1, %v14673_v36 }
0x1146   :  { %v16525_v4 = vpack.c.bf16 %v14921_v46, %v14916_v61  ;;  %v10530_v35 = vpop.eup %10529  ;;  %v6874_v32 = vmul.f32 %v6746_v29, %v6362_v18  ;;  %v6748_v55 = vadd.f32 1.0, %v10526_v38  ;;  %v6749_v13 = vadd.f32 1.0, %v10528_v30  ;;  %7505 = vmatprep.mubr.bf16.mxu0 %v6972_v19 }
0x1147   :  { %v6038_v22 = vadd.f32 %v14955_v34, %v14683_v33  ;;  %v10532_v31 = vpop.eup %10531  ;;  %v6751_v58 = vadd.f32 1.0, %v10530_v35  ;;  %10539 = verf.f32 %v6498_v48  ;;  %v6501_v8 = vmul.f32 0.70710677, %v6036_v50 }
0x1148   :  { %7345 = vmatmul.mubr.bf16.gmra.mrb[16].mxu1 %v16525_v4  ;;  %v16526_v15 = vpack.c.bf16 %v14923_v43, %v14919_v10  ;;  %v6231_v46 = vadd.f32 %v14957_v28, %v14685_v26  ;;  %v10534_v61 = vpop.eup %10533  ;;  %v6877_v1 = vmul.f32 %v6749_v13, %v6365_v44  ;;  %v6750_v18 = vadd.f32 1.0, %v10532_v31 }
0x1149   :  { %10541 = verf.f32 %v6500_v21  ;;  %v6503_v47 = vmul.f32 0.70710677, %v6229_v56  ;;  %v6879_v27 = vmul.f32 %v6751_v58, %v6367_v0  ;;  %v6752_v14 = vadd.f32 1.0, %v10534_v61 }
0x114a   :  { %7506 = vmatmul.mubr.bf16.gmra.mrb[16].mxu0 %v16526_v15  ;;  %10543 = verf.f32 %v6501_v8  ;;  %v6502_v34 = vmul.f32 0.70710677, %v6038_v22  ;;  %v6876_v5 = vmul.f32 %v6748_v55, %v15000_v23  ;;  %v6977_v3 = vpack.c.bf16 %v6877_v1, %v15038_v57 }
0x114b   :  { %v6878_v25 = vmul.f32 %v6750_v18, %v6366_v45  ;;  %10545 = verf.f32 %v6503_v47  ;;  %v6979_v43 = vpack.c.bf16 %v6879_v27, %v15043_v51  ;;  %v6880_v10 = vmul.f32 %v6752_v14, %v6368_v62 }
0x114c   :  { %10547 = verf.f32 %v6502_v34  ;;  %v6504_v28 = vmul.f32 0.70710677, %v6231_v46  ;;  %v6974_v44 = vpack.c.bf16 %v6870_v53, %v15018_v16  ;;  %v6976_v59 = vpack.c.bf16 %v6872_v42, %v6868_v7 }
0x114d   :  { %v6978_v40 = vpack.c.bf16 %v6878_v25, %v6874_v32  ;;  %v6980_v0 = vpack.c.bf16 %v6880_v10, %v6876_v5  ;;  %v6369_v38 = vmul.f32 0.5, %v15009_v60  ;;  %v6371_v62 = vmul.f32 0.5, %v15015_v12 }
0x114e   :  { %10549 = verf.f32 %v6504_v28  ;;  %v10536_v29 = vpop.eup %10535  ;;  %7352 = vmatprep.mubr.bf16.mxu1 %v6974_v44  ;;  %7513 = vmatprep.mubr.bf16.mxu0 %v6976_v59  ;;  %v6373_v57 = vmul.f32 0.5, %v6036_v50  ;;  %v6375_v11 = vmul.f32 0.5, %v6229_v56  ;;  %v6372_v60 = vmul.f32 0.5, %v15030_v17 }
0x114f   :  { %v10538_v2 = vpop.eup %10537  ;;  %v6753_v7 = vadd.f32 1.0, %v10536_v29  ;;  %v6376_v55 = vmul.f32 0.5, %v6231_v46 }
0x1150   :  { %7353 = vmatmul.mubr.bf16.gmra.mrb[20].mxu1 %v6973_v20  ;;  %v6755_v53 = vadd.f32 1.0, %v10538_v2  ;;  %v6370_v20 = vmul.f32 0.5, %v15026_v54 }
0x1151   :  { %7360 = vmatprep.mubr.bf16.mxu1 %v6978_v40  ;;  %v10540_v23 = vpop.eup %10539  ;;  %v6881_v21 = vmul.f32 %v6753_v7, %v6369_v38 }
0x1152   :  { %7514 = vmatmul.mubr.bf16.gmra.mrb[20].mxu0 %v6975_v49  ;;  %v6754_v48 = vadd.f32 1.0, %v10540_v23  ;;  %v6374_v49 = vmul.f32 0.5, %v6038_v22  ;;  %v6883_v35 = vmul.f32 %v6755_v53, %v6371_v62 }
0x1153   :  { %7521 = vmatprep.mubr.bf16.mxu0 %v6980_v0  ;;  %v10542_v16 = vpop.eup %10541 }
0x1154   :  { %v10544_v45 = vpop.eup %10543  ;;  %v6756_v19 = vadd.f32 1.0, %v10542_v16  ;;  %v6882_v12 = vmul.f32 %v6754_v48, %v6370_v20 }
0x1155   :  { %v10546_v42 = vpop.eup %10545  ;;  %v6757_v24 = vadd.f32 1.0, %v10544_v45 }
0x1156   :  { %v10548_v37 = vpop.eup %10547  ;;  %v6759_v52 = vadd.f32 1.0, %v10546_v42  ;;  %v6884_v56 = vmul.f32 %v6756_v19, %v6372_v60 }
0x1157   :  { %v6885_v30 = vmul.f32 %v6757_v24, %v6373_v57  ;;  %v6758_v51 = vadd.f32 1.0, %v10548_v37 }
0x1158   :  { %v10550_v4 = vpop.eup %10549  ;;  %v6887_v32 = vmul.f32 %v6759_v52, %v6375_v11  ;;  %7361 = vmatmul.mubr.bf16.gmra.mrb[24].mxu1 %v6977_v3 }
0x1159   :  { %v6981_v50 = vpack.c.bf16 %v6885_v30, %v6881_v21  ;;  %v6886_v13 = vmul.f32 %v6758_v51, %v6374_v49  ;;  %v6760_v31 = vadd.f32 1.0, %v10550_v4 }
0x115a   :  { %7522 = vmatmul.mubr.bf16.gmra.mrb[24].mxu0 %v6979_v43  ;;  %v6983_v54 = vpack.c.bf16 %v6887_v32, %v6883_v35 }
0x115b   :  { %v6888_v58 = vmul.f32 %v6760_v31, %v6376_v55  ;;  %v6982_v22 = vpack.c.bf16 %v6886_v13, %v6882_v12 }
0x115d   :  { %7368 = vmatprep.mubr.bf16.mxu1 %v6982_v22  ;;  %v6984_v8 = vpack.c.bf16 %v6888_v58, %v6884_v56 }
0x115f   :  { %7529 = vmatprep.mubr.bf16.mxu0 %v6984_v8 }
0x1160   :  { %7369 = vmatmul.mubr.bf16.gmra.mrb[28].mxu1 %v6981_v50 }
0x1161   :  { %v6041_v15 = vpop.f32.mrb[224].mxu1  ;;  %v6234_v61 = vpop.f32.mrb[224].mxu0 }
0x1162   :  { %7530 = vmatmul.mubr.bf16.gmra.mrb[28].mxu0 %v6983_v54  ;;  %v6042_v17 = vadd.f32 %v6041_v15, %v14669_v39  ;;  %v6235_v46 = vadd.f32 %v6234_v61, %v14673_v36  ;;  %v6043_v1 = vpop.f32.mrb[225].mxu1  ;;  %v6236_v18 = vpop.f32.mrb[225].mxu0 }
0x1163   :  { %v6044_v47 = vadd.f32 %v6043_v1, %v14683_v33  ;;  %v6237_v27 = vadd.f32 %v6236_v18, %v14685_v26  ;;  %v6045_v14 = vpop.f32.mrb[226].mxu1  ;;  %v6238_v34 = vpop.f32.mrb[226].mxu0 }
0x1164   :  { %v6505_v5 = vmul.f32 0.70710677, %v6042_v17  ;;  %v6507_v3 = vmul.f32 0.70710677, %v6235_v46  ;;  %v6046_v10 = vadd.f32 %v6045_v14, %v14669_v39  ;;  %v6239_v28 = vadd.f32 %v6238_v34, %v14673_v36  ;;  %v6047_v44 = vpop.f32.mrb[227].mxu1  ;;  %v6240_v59 = vpop.f32.mrb[227].mxu0 }
0x1165   :  { %v6506_v25 = vmul.f32 0.70710677, %v6044_v47  ;;  %v6508_v43 = vmul.f32 0.70710677, %v6237_v27  ;;  %v6048_v40 = vadd.f32 %v6047_v44, %v14683_v33  ;;  %v6241_v29 = vadd.f32 %v6240_v59, %v14685_v26 }
0x1166   :  { %10551 = verf.f32 %v6505_v5  ;;  %v6509_v0 = vmul.f32 0.70710677, %v6046_v10  ;;  %v6511_v2 = vmul.f32 0.70710677, %v6239_v28  ;;  %v6377_v21 = vmul.f32 0.5, %v6042_v17 }
0x1167   :  { %10553 = verf.f32 %v6507_v3  ;;  %v6510_v23 = vmul.f32 0.70710677, %v6048_v40  ;;  %v6512_v57 = vmul.f32 0.70710677, %v6241_v29  ;;  %v6379_v19 = vmul.f32 0.5, %v6235_v46 }
0x1168   :  { %10555 = verf.f32 %v6506_v25  ;;  %v15090_v32 = vmul.f32 0.5, %v6044_v47  ;;  %v15092_v55 = vmul.f32 0.5, %v6237_v27  ;;  %v6381_v31 = vmul.f32 0.5, %v6046_v10 }
0x1169   :  { %10557 = verf.f32 %v6508_v43  ;;  %v6051_v16 = vpop.f32.mrb[228].mxu1  ;;  %v6244_v45 = vpop.f32.mrb[228].mxu0  ;;  %v6383_v61 = vmul.f32 0.5, %v6239_v28  ;;  %v15096_v18 = vmul.f32 0.5, %v6048_v40  ;;  %v15098_v47 = vmul.f32 0.5, %v6241_v29 }
0x116a   :  { %10559 = verf.f32 %v6509_v0  ;;  %v6052_v7 = vadd.f32 %v6051_v16, %v14669_v39  ;;  %v6053_v38 = vpop.f32.mrb[229].mxu1  ;;  %v6245_v53 = vadd.f32 %v6244_v45, %v14673_v36  ;;  %v6246_v62 = vpop.f32.mrb[229].mxu0 }
0x116b   :  { %10561 = verf.f32 %v6511_v2  ;;  %v6054_v42 = vadd.f32 %v6053_v38, %v14683_v33  ;;  %v6055_v48 = vpop.f32.mrb[230].mxu1  ;;  %v15085_v37 = vadd.f32 %v6246_v62, %v14685_v26  ;;  %v6248_v20 = vpop.f32.mrb[230].mxu0 }
0x116c   :  { %v6513_v24 = vmul.f32 0.70710677, %v6052_v7  ;;  %v6057_v11 = vpop.f32.mrb[231].mxu1  ;;  %10563 = verf.f32 %v6510_v23  ;;  %v6515_v52 = vmul.f32 0.70710677, %v6245_v53  ;;  %v6250_v49 = vpop.f32.mrb[231].mxu0  ;;  %v6056_v51 = vadd.f32 %v6055_v48, %v14669_v39 }
0x116d   :  { %v6514_v30 = vmul.f32 0.70710677, %v6054_v42  ;;  %v6249_v4 = vadd.f32 %v6248_v20, %v14673_v36  ;;  %v6058_v35 = vadd.f32 %v6057_v11, %v14683_v33  ;;  %v6516_v12 = vmul.f32 0.70710677, %v15085_v37 }
0x116e   :  { %10565 = verf.f32 %v6513_v24  ;;  %v6517_v54 = vmul.f32 0.70710677, %v6056_v51  ;;  %v6251_v56 = vadd.f32 %v6250_v49, %v14685_v26  ;;  %v15100_v3 = vmul.f32 0.5, %v6052_v7 }
0x116f   :  { %10567 = verf.f32 %v6515_v52  ;;  %v6519_v17 = vmul.f32 0.70710677, %v6249_v4  ;;  %v6518_v27 = vmul.f32 0.70710677, %v6058_v35  ;;  %v15102_v25 = vmul.f32 0.5, %v6245_v53 }
0x1170   :  { %v10552_v60 = vpop.eup %10551  ;;  %10569 = verf.f32 %v6512_v57  ;;  %v15104_v43 = vmul.f32 0.5, %v6054_v42  ;;  %v6520_v0 = vmul.f32 0.70710677, %v6251_v56  ;;  %v15124_v52 = vmul.f32 0.5, %v15085_v37 }
0x1171   :  { %v10554_v50 = vpop.eup %10553  ;;  %v6761_v13 = vadd.f32 1.0, %v10552_v60  ;;  %v6061_v58 = vpop.f32.mrb[232].mxu1  ;;  %10571 = verf.f32 %v6514_v30  ;;  %v6389_v49 = vmul.f32 0.5, %v6056_v51 }
0x1172   :  { %v6254_v22 = vpop.f32.mrb[232].mxu0  ;;  %v10556_v8 = vpop.eup %10555  ;;  %v6763_v15 = vadd.f32 1.0, %v10554_v50  ;;  %10573 = verf.f32 %v6517_v54  ;;  %v6062_v7 = vadd.f32 %v6061_v58, %v14669_v39 }
0x1173   :  { %v6063_v46 = vpop.f32.mrb[233].mxu1  ;;  %v10558_v1 = vpop.eup %10557  ;;  %10575 = verf.f32 %v6519_v17  ;;  %v15108_v59 = vmul.f32 %v6761_v13, %v6377_v21  ;;  %v6762_v23 = vadd.f32 1.0, %v10556_v8  ;;  %v6255_v42 = vadd.f32 %v6254_v22, %v14673_v36 }
0x1174   :  { %v6256_v14 = vpop.f32.mrb[233].mxu0  ;;  %v6065_v34 = vpop.f32.mrb[234].mxu1  ;;  %10577 = verf.f32 %v6516_v12  ;;  %v15112_v2 = vmul.f32 %v6763_v15, %v6379_v19  ;;  %v6764_v38 = vadd.f32 1.0, %v10558_v1  ;;  %v6521_v57 = vmul.f32 0.70710677, %v6062_v7 }
0x1175   :  { %v10560_v5 = vpop.eup %10559  ;;  %v6258_v10 = vpop.f32.mrb[234].mxu0  ;;  %10579 = verf.f32 %v6518_v27  ;;  %v6064_v24 = vadd.f32 %v6063_v46, %v14683_v33  ;;  %v6391_v21 = vmul.f32 0.5, %v6249_v4  ;;  %v15128_v13 = vmul.f32 0.5, %v6058_v35 }
0x1176   :  { %v15106_v28 = vpop.f32.mrb[235].mxu1  ;;  %v10562_v44 = vpop.eup %10561  ;;  %v6765_v40 = vadd.f32 1.0, %v10560_v5  ;;  %10581 = verf.f32 %v6520_v0  ;;  %v15133_v22 = vmul.f32 %v6762_v23, %v15090_v32  ;;  %v6523_v51 = vmul.f32 0.70710677, %v6255_v42 }
0x1177   :  { %v15110_v29 = vpop.f32.mrb[235].mxu0  ;;  %v6767_v16 = vadd.f32 1.0, %v10562_v44  ;;  %v10564_v45 = vpop.eup %10563  ;;  %10583 = verf.f32 %v6521_v57  ;;  %v6522_v17 = vmul.f32 0.70710677, %v6064_v24  ;;  %v6066_v5 = vadd.f32 %v6065_v34, %v14669_v39 }
0x1178   :  { %v15115_v53 = vmul.f32 %v6765_v40, %v6381_v31  ;;  %v10566_v62 = vpop.eup %10565  ;;  %v6766_v50 = vadd.f32 1.0, %v10564_v45  ;;  %v15130_v31 = vmul.f32 0.5, %v6251_v56  ;;  %v6257_v56 = vadd.f32 %v6256_v14, %v14685_v26 }
0x1179   :  { %v15118_v48 = vmul.f32 %v6767_v16, %v6383_v61  ;;  %v10568_v20 = vpop.eup %10567  ;;  %v6071_v19 = vpop.f32.mrb[236].mxu1  ;;  %v6769_v37 = vadd.f32 1.0, %v10566_v62  ;;  %v15140_v61 = vmul.f32 %v6764_v38, %v15092_v55  ;;  %10585 = verf.f32 %v6523_v51 }
0x117a   :  { %v6985_v11 = vpack.c.bf16 %v15115_v53, %v15108_v59  ;;  %v6264_v30 = vpop.f32.mrb[236].mxu0  ;;  %v10570_v60 = vpop.eup %10569  ;;  %v6771_v35 = vadd.f32 1.0, %v10568_v20  ;;  %v6259_v44 = vadd.f32 %v6258_v10, %v14673_v36  ;;  %v6894_v0 = vmul.f32 %v6766_v50, %v15096_v18 }
0x117b   :  { %v6987_v12 = vpack.c.bf16 %v15118_v48, %v15112_v2  ;;  %v6073_v54 = vpop.f32.mrb[237].mxu1  ;;  %v6266_v58 = vpop.f32.mrb[237].mxu0  ;;  %v6768_v27 = vadd.f32 1.0, %v10570_v60  ;;  %v15150_v23 = vmul.f32 0.5, %v6062_v7  ;;  %v15152_v16 = vmul.f32 0.5, %v6255_v42 }
0x117c   :  { %v15135_v4 = vpop.f32.mrb[238].mxu1  ;;  %v15137_v8 = vpop.f32.mrb[238].mxu0  ;;  %v15155_v45 = vmul.f32 %v6769_v37, %v15100_v3  ;;  %v6524_v62 = vmul.f32 0.70710677, %v6257_v56  ;;  %v6525_v57 = vmul.f32 0.70710677, %v6066_v5  ;;  %v15158_v20 = vmul.f32 %v6771_v35, %v15102_v25 }
0x117d   :  { %v10572_v15 = vpop.eup %10571  ;;  %v15143_v46 = vpop.f32.mrb[239].mxu1  ;;  %10587 = verf.f32 %v6522_v17  ;;  %v6527_v10 = vmul.f32 0.70710677, %v6259_v44  ;;  %v6068_v7 = vadd.f32 %v15106_v28, %v14683_v33  ;;  %v6261_v3 = vadd.f32 %v15110_v29, %v14685_v26 }
0x117e   :  { %v15145_v1 = vpop.f32.mrb[239].mxu0  ;;  %v10574_v32 = vpop.eup %10573  ;;  %10589 = verf.f32 %v6524_v62  ;;  %v6896_v50 = vmul.f32 %v6768_v27, %v15098_v47  ;;  %v6770_v37 = vadd.f32 1.0, %v10572_v15  ;;  %v15173_v17 = vmul.f32 0.5, %v6064_v24 }
0x117f   :  { %v10576_v40 = vpop.eup %10575  ;;  %v6773_v55 = vadd.f32 1.0, %v10574_v32  ;;  %10591 = verf.f32 %v6525_v57  ;;  %v6526_v51 = vmul.f32 0.70710677, %v6068_v7  ;;  %v6528_v28 = vmul.f32 0.70710677, %v6261_v3 }
0x1180   :  { %v10578_v14 = vpop.eup %10577  ;;  %v6775_v38 = vadd.f32 1.0, %v10576_v40  ;;  %10593 = verf.f32 %v6527_v10  ;;  %v15176_v29 = vadd.f32 %v6071_v19, %v14669_v39  ;;  %v15179_v15 = vadd.f32 %v6264_v30, %v14673_v36 }
0x1181   :  { %v15160_v34 = vmul.f32 %v6773_v55, %v6389_v49  ;;  %v10580_v18 = vpop.eup %10579  ;;  %v6772_v49 = vadd.f32 1.0, %v10578_v14  ;;  %10595 = verf.f32 %v6526_v51  ;;  %v15182_v27 = vadd.f32 %v6073_v54, %v14683_v33 }
0x1182   :  { %v15162_v60 = vmul.f32 %v6775_v38, %v6391_v21  ;;  %v10582_v42 = vpop.eup %10581  ;;  %v6774_v35 = vadd.f32 1.0, %v10580_v18  ;;  %v6898_v40 = vmul.f32 %v6770_v37, %v15104_v43  ;;  %10597 = verf.f32 %v6528_v28 }
0x1183   :  { %v6989_v25 = vpack.c.bf16 %v15160_v34, %v15155_v45  ;;  %v10584_v32 = vpop.eup %10583  ;;  %v6776_v47 = vadd.f32 1.0, %v10582_v42  ;;  %v6529_v55 = vmul.f32 0.70710677, %v15176_v29  ;;  %v15187_v24 = vadd.f32 %v6266_v58, %v14685_v26 }
0x1184   :  { %v6991_v21 = vpack.c.bf16 %v15162_v60, %v15158_v20  ;;  %v10586_v14 = vpop.eup %10585  ;;  %v6900_v19 = vmul.f32 %v6772_v49, %v15124_v52  ;;  %v6396_v38 = vmul.f32 0.5, %v6257_v56  ;;  %v6397_v62 = vmul.f32 0.5, %v6066_v5 }
0x1185   :  { %v6531_v57 = vmul.f32 0.70710677, %v15179_v15  ;;  %v6902_v30 = vmul.f32 %v6774_v35, %v15128_v13  ;;  %v6777_v10 = vadd.f32 1.0, %v10584_v32  ;;  %v6399_v54 = vmul.f32 0.5, %v6259_v44 }
0x1186   :  { %v6530_v18 = vmul.f32 0.70710677, %v15182_v27  ;;  %v6904_v43 = vmul.f32 %v6776_v47, %v15130_v31  ;;  %v6398_v42 = vmul.f32 0.5, %v6068_v7  ;;  %v6532_v37 = vmul.f32 0.70710677, %v15187_v24 }
0x1187   :  { %v6986_v58 = vpack.c.bf16 %v6894_v0, %v15133_v22  ;;  %v10588_v51 = vpop.eup %10587  ;;  %v6779_v28 = vadd.f32 1.0, %v10586_v14  ;;  %10599 = verf.f32 %v6529_v55  ;;  %v6988_v52 = vpack.c.bf16 %v6896_v50, %v15140_v61 }
0x1188   :  { %v6076_v56 = vadd.f32 %v15135_v4, %v14669_v39  ;;  %v10590_v13 = vpop.eup %10589  ;;  %v6400_v5 = vmul.f32 0.5, %v6261_v3  ;;  %10601 = verf.f32 %v6531_v57  ;;  %v6269_v31 = vadd.f32 %v15137_v8, %v14673_v36 }
0x1189   :  { %7376 = vmatprep.mubr.bf16.mxu1 %v6986_v58  ;;  %v15203_v44 = vadd.f32 %v15143_v46, %v14683_v33  ;;  %v10592_v22 = vpop.eup %10591  ;;  %v15206_v0 = vmul.f32 %v6777_v10, %v15150_v23  ;;  %10603 = verf.f32 %v6530_v18  ;;  %7537 = vmatprep.mubr.bf16.mxu0 %v6988_v52  ;;  %v15213_v4 = vadd.f32 %v15145_v1, %v14685_v26 }
0x118a   :  { %v6533_v61 = vmul.f32 0.70710677, %v6076_v56  ;;  %7377 = vmatmul.mubr.bf16.gmra.mrb[32].mxu1 %v6985_v11  ;;  %v10594_v8 = vpop.eup %10593  ;;  %v6778_v7 = vadd.f32 1.0, %v10588_v51  ;;  %v6781_v3 = vadd.f32 1.0, %v10592_v22  ;;  %10605 = verf.f32 %v6532_v37  ;;  %7538 = vmatmul.mubr.bf16.gmra.mrb[32].mxu0 %v6987_v12 }
0x118b   :  { %v6535_v46 = vmul.f32 0.70710677, %v6269_v31  ;;  %v15219_v23 = vmul.f32 %v6779_v28, %v15152_v16  ;;  %v6783_v50 = vadd.f32 1.0, %v10594_v8  ;;  %v6534_v59 = vmul.f32 0.70710677, %v15203_v44  ;;  %v10596_v53 = vpop.eup %10595 }
0x118c   :  { %10607 = verf.f32 %v6533_v61  ;;  %v6780_v11 = vadd.f32 1.0, %v10590_v13  ;;  %v6909_v1 = vmul.f32 %v6781_v3, %v6397_v62  ;;  %v6536_v49 = vmul.f32 0.70710677, %v15213_v4  ;;  %v10598_v35 = vpop.eup %10597 }
0x118d   :  { %10609 = verf.f32 %v6535_v46  ;;  %v6911_v32 = vmul.f32 %v6783_v50, %v6399_v54  ;;  %v6782_v47 = vadd.f32 1.0, %v10596_v53  ;;  %v6990_v55 = vpack.c.bf16 %v6902_v30, %v6898_v40 }
0x118e   :  { %10611 = verf.f32 %v6534_v59  ;;  %v6993_v2 = vpack.c.bf16 %v6909_v1, %v15206_v0  ;;  %v6784_v48 = vadd.f32 1.0, %v10598_v35  ;;  %v6992_v12 = vpack.c.bf16 %v6904_v43, %v6900_v19 }
0x118f   :  { %10613 = verf.f32 %v6536_v49  ;;  %v6906_v16 = vmul.f32 %v6778_v7, %v15173_v17  ;;  %v6995_v14 = vpack.c.bf16 %v6911_v32, %v15219_v23  ;;  %v6910_v57 = vmul.f32 %v6782_v47, %v6398_v42  ;;  %7384 = vmatprep.mubr.bf16.mxu1 %v6990_v55 }
0x1190   :  { %v6908_v62 = vmul.f32 %v6780_v11, %v6396_v38  ;;  %v6912_v10 = vmul.f32 %v6784_v48, %v6400_v5  ;;  %7545 = vmatprep.mubr.bf16.mxu0 %v6992_v12  ;;  %v6401_v42 = vmul.f32 0.5, %v15176_v29  ;;  %v6403_v37 = vmul.f32 0.5, %v15179_v15 }
0x1191   :  { %v10600_v18 = vpop.eup %10599  ;;  %v6994_v40 = vpack.c.bf16 %v6910_v57, %v6906_v16  ;;  %v6402_v34 = vmul.f32 0.5, %v15182_v27  ;;  %v6405_v51 = vmul.f32 0.5, %v6076_v56  ;;  %v6404_v60 = vmul.f32 0.5, %v15187_v24 }
0x1192   :  { %7385 = vmatmul.mubr.bf16.gmra.mrb[36].mxu1 %v6989_v25  ;;  %v10602_v30 = vpop.eup %10601  ;;  %7546 = vmatmul.mubr.bf16.gmra.mrb[36].mxu0 %v6991_v21  ;;  %v6996_v19 = vpack.c.bf16 %v6912_v10, %v6908_v62  ;;  %v6785_v43 = vadd.f32 1.0, %v10600_v18  ;;  %v6407_v52 = vmul.f32 0.5, %v6269_v31  ;;  %v6406_v29 = vmul.f32 0.5, %v15203_v44 }
0x1193   :  { %v10604_v17 = vpop.eup %10603  ;;  %7392 = vmatprep.mubr.bf16.mxu1 %v6994_v40  ;;  %v6787_v58 = vadd.f32 1.0, %v10602_v30  ;;  %v6408_v7 = vmul.f32 0.5, %v15213_v4 }
0x1194   :  { %v10606_v54 = vpop.eup %10605  ;;  %7553 = vmatprep.mubr.bf16.mxu0 %v6996_v19  ;;  %v6786_v25 = vadd.f32 1.0, %v10604_v17  ;;  %v6913_v22 = vmul.f32 %v6785_v43, %v6401_v42 }
0x1195   :  { %v6788_v21 = vadd.f32 1.0, %v10606_v54  ;;  %v6915_v15 = vmul.f32 %v6787_v58, %v6403_v37 }
0x1196   :  { %v10608_v38 = vpop.eup %10607  ;;  %v6914_v56 = vmul.f32 %v6786_v25, %v6402_v34 }
0x1197   :  { %v10610_v45 = vpop.eup %10609  ;;  %v6789_v28 = vadd.f32 1.0, %v10608_v38  ;;  %v6916_v24 = vmul.f32 %v6788_v21, %v6404_v60 }
0x1198   :  { %v10612_v20 = vpop.eup %10611  ;;  %v6791_v13 = vadd.f32 1.0, %v10610_v45 }
0x1199   :  { %v10614_v5 = vpop.eup %10613  ;;  %v6917_v0 = vmul.f32 %v6789_v28, %v6405_v51  ;;  %v6790_v61 = vadd.f32 1.0, %v10612_v20 }
0x119a   :  { %v6919_v8 = vmul.f32 %v6791_v13, %v6407_v52  ;;  %v6792_v27 = vadd.f32 1.0, %v10614_v5  ;;  %7393 = vmatmul.mubr.bf16.gmra.mrb[40].mxu1 %v6993_v2  ;;  %7554 = vmatmul.mubr.bf16.gmra.mrb[40].mxu0 %v6995_v14 }
0x119b   :  { %v6997_v3 = vpack.c.bf16 %v6917_v0, %v6913_v22  ;;  %v6918_v46 = vmul.f32 %v6790_v61, %v6406_v29 }
0x119c   :  { %v6999_v23 = vpack.c.bf16 %v6919_v8, %v6915_v15  ;;  %v6920_v31 = vmul.f32 %v6792_v27, %v6408_v7 }
0x119d   :  { %v6998_v50 = vpack.c.bf16 %v6918_v46, %v6914_v56 }
0x119e   :  { %v7000_v59 = vpack.c.bf16 %v6920_v31, %v6916_v24 }
0x119f   :  { %7400 = vmatprep.mubr.bf16.mxu1 %v6998_v50 }
0x11a0   :  { %7561 = vmatprep.mubr.bf16.mxu0 %v7000_v59 }
0x11a1   :  { %v6081_v53 = vpop.f32.mrb[240].mxu1  ;;  %v6274_v11 = vpop.f32.mrb[240].mxu0 }
0x11a2   :  { %v6082_v44 = vadd.f32 %v6081_v53, %v14669_v39  ;;  %v6275_v1 = vadd.f32 %v6274_v11, %v14673_v36  ;;  %v6083_v4 = vpop.f32.mrb[241].mxu1  ;;  %v6276_v49 = vpop.f32.mrb[241].mxu0  ;;  %7401 = vmatmul.mubr.bf16.gmra.mrb[44].mxu1 %v6997_v3  ;;  %7562 = vmatmul.mubr.bf16.gmra.mrb[44].mxu0 %v6999_v23 }
0x11a3   :  { %v6084_v35 = vadd.f32 %v6083_v4, %v14683_v33  ;;  %v6277_v32 = vadd.f32 %v6276_v49, %v14685_v26  ;;  %v6085_v47 = vpop.f32.mrb[242].mxu1  ;;  %v6278_v55 = vpop.f32.mrb[242].mxu0 }
0x11a4   :  { %v6537_v2 = vmul.f32 0.70710677, %v6082_v44  ;;  %v6539_v48 = vmul.f32 0.70710677, %v6275_v1  ;;  %v6086_v14 = vadd.f32 %v6085_v47, %v14669_v39  ;;  %v6279_v57 = vadd.f32 %v6278_v55, %v14673_v36  ;;  %v6087_v62 = vpop.f32.mrb[243].mxu1  ;;  %v6280_v10 = vpop.f32.mrb[243].mxu0 }
0x11a5   :  { %v6538_v12 = vmul.f32 0.70710677, %v6084_v35  ;;  %v6540_v16 = vmul.f32 0.70710677, %v6277_v32  ;;  %v6088_v18 = vadd.f32 %v6087_v62, %v14683_v33  ;;  %v6281_v40 = vadd.f32 %v6280_v10, %v14685_v26 }
0x11a6   :  { %10615 = verf.f32 %v6537_v2  ;;  %v6541_v30 = vmul.f32 0.70710677, %v6086_v14  ;;  %v6543_v19 = vmul.f32 0.70710677, %v6279_v57  ;;  %v6409_v15 = vmul.f32 0.5, %v6082_v44 }
0x11a7   :  { %10617 = verf.f32 %v6539_v48  ;;  %v6542_v17 = vmul.f32 0.70710677, %v6088_v18  ;;  %v6544_v43 = vmul.f32 0.70710677, %v6281_v40  ;;  %v6411_v8 = vmul.f32 0.5, %v6275_v1 }
0x11a8   :  { %10619 = verf.f32 %v6538_v12  ;;  %v6410_v7 = vmul.f32 0.5, %v6084_v35  ;;  %v6412_v56 = vmul.f32 0.5, %v6277_v32  ;;  %v6413_v3 = vmul.f32 0.5, %v6086_v14 }
0x11a9   :  { %10621 = verf.f32 %v6540_v16  ;;  %v6091_v54 = vpop.f32.mrb[244].mxu1  ;;  %v6284_v42 = vpop.f32.mrb[244].mxu0  ;;  %v6415_v50 = vmul.f32 0.5, %v6279_v57  ;;  %v6414_v4 = vmul.f32 0.5, %v6088_v18  ;;  %v6416_v49 = vmul.f32 0.5, %v6281_v40 }
0x11aa   :  { %10623 = verf.f32 %v6541_v30  ;;  %v6092_v38 = vadd.f32 %v6091_v54, %v14669_v39  ;;  %v6093_v37 = vpop.f32.mrb[245].mxu1  ;;  %v6285_v58 = vadd.f32 %v6284_v42, %v14673_v36  ;;  %v6286_v34 = vpop.f32.mrb[245].mxu0 }
0x11ab   :  { %10625 = verf.f32 %v6543_v19  ;;  %v6094_v45 = vadd.f32 %v6093_v37, %v14683_v33  ;;  %v6095_v25 = vpop.f32.mrb[246].mxu1  ;;  %v6287_v28 = vadd.f32 %v6286_v34, %v14685_v26  ;;  %v6288_v20 = vpop.f32.mrb[246].mxu0 }
0x11ac   :  { %10627 = verf.f32 %v6542_v17  ;;  %v6545_v51 = vmul.f32 0.70710677, %v6092_v38  ;;  %v6097_v60 = vpop.f32.mrb[247].mxu1  ;;  %v6547_v21 = vmul.f32 0.70710677, %v6285_v58  ;;  %v6290_v52 = vpop.f32.mrb[247].mxu0  ;;  %v6096_v22 = vadd.f32 %v6095_v25, %v14669_v39 }
0x11ad   :  { %10629 = verf.f32 %v6544_v43  ;;  %v6546_v13 = vmul.f32 0.70710677, %v6094_v45  ;;  %v6548_v5 = vmul.f32 0.70710677, %v6287_v28  ;;  %v6289_v0 = vadd.f32 %v6288_v20, %v14673_v36 }
0x11ae   :  { %10631 = verf.f32 %v6545_v51  ;;  %v15253_v29 = vadd.f32 %v6097_v60, %v14683_v33  ;;  %v6549_v46 = vmul.f32 0.70710677, %v6096_v22  ;;  %v6291_v24 = vadd.f32 %v6290_v52, %v14685_v26 }
0x11af   :  { %10633 = verf.f32 %v6547_v21  ;;  %v6551_v59 = vmul.f32 0.70710677, %v6289_v0  ;;  %v6417_v35 = vmul.f32 0.5, %v6092_v38  ;;  %v6419_v47 = vmul.f32 0.5, %v6285_v58 }
0x11b0   :  { %v10616_v61 = vpop.eup %10615  ;;  %10635 = verf.f32 %v6546_v13  ;;  %v6550_v44 = vmul.f32 0.70710677, %v15253_v29  ;;  %v6418_v2 = vmul.f32 0.5, %v6094_v45  ;;  %v6552_v48 = vmul.f32 0.70710677, %v6291_v24 }
0x11b1   :  { %v10618_v27 = vpop.eup %10617  ;;  %v6793_v31 = vadd.f32 1.0, %v10616_v61  ;;  %10637 = verf.f32 %v6548_v5  ;;  %v15259_v62 = vmul.f32 0.5, %v6287_v28  ;;  %v6421_v28 = vmul.f32 0.5, %v6096_v22 }
0x11b2   :  { %v10620_v23 = vpop.eup %10619  ;;  %v6795_v11 = vadd.f32 1.0, %v10618_v27  ;;  %10639 = verf.f32 %v6549_v46  ;;  %v6422_v46 = vmul.f32 0.5, %v15253_v29 }
0x11b3   :  { %v10622_v53 = vpop.eup %10621  ;;  %10641 = verf.f32 %v6551_v59  ;;  %v15257_v16 = vmul.f32 %v6793_v31, %v6409_v15  ;;  %v6794_v14 = vadd.f32 1.0, %v10620_v23  ;;  %v6423_v15 = vmul.f32 0.5, %v6289_v0 }
0x11b4   :  { %v10624_v1 = vpop.eup %10623  ;;  %10643 = verf.f32 %v6550_v44  ;;  %v15261_v18 = vmul.f32 %v6795_v11, %v6411_v8  ;;  %v6796_v30 = vadd.f32 1.0, %v10622_v53  ;;  %v6424_v23 = vmul.f32 0.5, %v6291_v24 }
0x11b5   :  { %v10626_v32 = vpop.eup %10625  ;;  %v6797_v55 = vadd.f32 1.0, %v10624_v1  ;;  %10645 = verf.f32 %v6552_v48  ;;  %v6101_v19 = vpop.f32.mrb[248].mxu1 }
0x11b6   :  { %v10628_v12 = vpop.eup %10627  ;;  %v6799_v57 = vadd.f32 1.0, %v10626_v32  ;;  %v6294_v17 = vpop.f32.mrb[248].mxu0  ;;  %v15268_v42 = vadd.f32 %v6101_v19, %v14669_v39 }
0x11b7   :  { %v10630_v10 = vpop.eup %10629  ;;  %v15263_v40 = vmul.f32 %v6797_v55, %v6413_v3  ;;  %v6798_v38 = vadd.f32 1.0, %v10628_v12  ;;  %v15271_v37 = vadd.f32 %v6294_v17, %v14673_v36  ;;  %v6103_v58 = vpop.f32.mrb[249].mxu1  ;;  %v6922_v3 = vmul.f32 %v6794_v14, %v6410_v7 }
0x11b8   :  { %v10632_v54 = vpop.eup %10631  ;;  %v15265_v43 = vmul.f32 %v6799_v57, %v6415_v50  ;;  %v6296_v45 = vpop.f32.mrb[249].mxu0  ;;  %v6800_v51 = vadd.f32 1.0, %v10630_v10  ;;  %v15276_v20 = vadd.f32 %v6103_v58, %v14683_v33  ;;  %v6553_v22 = vmul.f32 0.70710677, %v15268_v42 }
0x11b9   :  { %v10634_v34 = vpop.eup %10633  ;;  %v7001_v25 = vpack.c.bf16 %v15263_v40, %v15257_v16  ;;  %v6105_v60 = vpop.f32.mrb[250].mxu1  ;;  %v6801_v5 = vadd.f32 1.0, %v10632_v54  ;;  %v6924_v50 = vmul.f32 %v6796_v30, %v6412_v56  ;;  %v6926_v59 = vmul.f32 %v6798_v38, %v6414_v4 }
0x11ba   :  { %v6298_v21 = vpop.f32.mrb[250].mxu0  ;;  %v10636_v52 = vpop.eup %10635  ;;  %v7003_v13 = vpack.c.bf16 %v15265_v43, %v15261_v18  ;;  %v6803_v61 = vadd.f32 1.0, %v10634_v34  ;;  %v6555_v11 = vmul.f32 0.70710677, %v15271_v37  ;;  %v6928_v1 = vmul.f32 %v6800_v51, %v6416_v49 }
0x11bb   :  { %v6107_v8 = vpop.f32.mrb[251].mxu1  ;;  %v6300_v27 = vpop.f32.mrb[251].mxu0  ;;  %v6802_v53 = vadd.f32 1.0, %v10636_v52  ;;  %10647 = verf.f32 %v6553_v22  ;;  %v6554_v32 = vmul.f32 0.70710677, %v15276_v20  ;;  %v6297_v0 = vadd.f32 %v6296_v45, %v14685_v26 }
0x11bc   :  { %v10638_v31 = vpop.eup %10637  ;;  %v15285_v7 = vmul.f32 %v6801_v5, %v6417_v35  ;;  %v15287_v29 = vmul.f32 %v6803_v61, %v6419_v47  ;;  %v6106_v48 = vadd.f32 %v6105_v60, %v14669_v39  ;;  %10649 = verf.f32 %v6555_v11 }
0x11bd   :  { %v10640_v44 = vpop.eup %10639  ;;  %v6804_v4 = vadd.f32 1.0, %v10638_v31  ;;  %v6556_v14 = vmul.f32 0.70710677, %v6297_v0  ;;  %v6930_v57 = vmul.f32 %v6802_v53, %v6418_v2  ;;  %10651 = verf.f32 %v6554_v32 }
0x11be   :  { %v10642_v55 = vpop.eup %10641  ;;  %v6805_v24 = vadd.f32 1.0, %v10640_v44  ;;  %v6557_v18 = vmul.f32 0.70710677, %v6106_v48  ;;  %v6299_v35 = vadd.f32 %v6298_v21, %v14673_v36  ;;  %v6108_v47 = vadd.f32 %v6107_v8, %v14683_v33 }
0x11bf   :  { %v10644_v56 = vpop.eup %10643  ;;  %v6807_v12 = vadd.f32 1.0, %v10642_v55  ;;  %v6932_v2 = vmul.f32 %v6804_v4, %v15259_v62  ;;  %v6301_v51 = vadd.f32 %v6300_v27, %v14685_v26  ;;  %v7004_v60 = vpack.c.bf16 %v6928_v1, %v6924_v50 }
0x11c0   :  { %v15290_v49 = vmul.f32 %v6805_v24, %v6421_v28  ;;  %v6806_v10 = vadd.f32 1.0, %v10644_v56  ;;  %v10646_v30 = vpop.eup %10645  ;;  %10653 = verf.f32 %v6557_v18  ;;  %v6559_v58 = vmul.f32 0.70710677, %v6299_v35 }
0x11c1   :  { %v15292_v19 = vmul.f32 %v6807_v12, %v6423_v15  ;;  %v6808_v43 = vadd.f32 1.0, %v10646_v30  ;;  %10655 = verf.f32 %v6556_v14  ;;  %v6558_v34 = vmul.f32 0.70710677, %v6108_v47  ;;  %7569 = vmatprep.mubr.bf16.mxu0 %v7004_v60 }
0x11c2   :  { %v7005_v17 = vpack.c.bf16 %v15290_v49, %v15285_v7  ;;  %v6934_v54 = vmul.f32 %v6806_v10, %v6422_v46  ;;  %v7002_v28 = vpack.c.bf16 %v6926_v59, %v6922_v3  ;;  %10657 = verf.f32 %v6559_v58  ;;  %7570 = vmatmul.mubr.bf16.gmra.mrb[48].mxu0 %v7003_v13 }
0x11c3   :  { %v7007_v38 = vpack.c.bf16 %v15292_v19, %v15287_v29  ;;  %v6936_v45 = vmul.f32 %v6808_v43, %v6424_v23  ;;  %10659 = verf.f32 %v6558_v34  ;;  %v6560_v52 = vmul.f32 0.70710677, %v6301_v51 }
0x11c4   :  { %v7006_v21 = vpack.c.bf16 %v6934_v54, %v6930_v57  ;;  %7408 = vmatprep.mubr.bf16.mxu1 %v7002_v28  ;;  %v6425_v27 = vmul.f32 0.5, %v15268_v42  ;;  %v6427_v3 = vmul.f32 0.5, %v15271_v37  ;;  %v6426_v46 = vmul.f32 0.5, %v15276_v20 }
0x11c5   :  { %v7008_v5 = vpack.c.bf16 %v6936_v45, %v6932_v2  ;;  %v10648_v61 = vpop.eup %10647  ;;  %7409 = vmatmul.mubr.bf16.gmra.mrb[48].mxu1 %v7001_v25  ;;  %10661 = verf.f32 %v6560_v52  ;;  %v6428_v23 = vmul.f32 0.5, %v6297_v0  ;;  %v6429_v16 = vmul.f32 0.5, %v6106_v48 }
0x11c6   :  { %7416 = vmatprep.mubr.bf16.mxu1 %v7006_v21  ;;  %v10650_v62 = vpop.eup %10649  ;;  %v6809_v15 = vadd.f32 1.0, %v10648_v61  ;;  %v6431_v44 = vmul.f32 0.5, %v6299_v35  ;;  %v6430_v55 = vmul.f32 0.5, %v6108_v47  ;;  %v6432_v7 = vmul.f32 0.5, %v6301_v51 }
0x11c7   :  { %7577 = vmatprep.mubr.bf16.mxu0 %v7008_v5  ;;  %v10652_v8 = vpop.eup %10651  ;;  %v6811_v59 = vadd.f32 1.0, %v10650_v62  ;;  %v15345_v62 = vld [vmem:[%s15889_s11] ss:$0 sm:$0xff] }
0x11c8   :  { %v15320_v0 = vmul.f32 %v6809_v15, %v6425_v27  ;;  %v6810_v4 = vadd.f32 1.0, %v10652_v8 }
0x11c9   :  { %v6939_v10 = vmul.f32 %v6811_v59, %v6427_v3 }
0x11ca   :  { %v6111_v22 = vpop.f32.mrb[252].mxu1  ;;  %v6304_v31 = vpop.f32.mrb[252].mxu0  ;;  %7578 = vmatmul.mubr.bf16.gmra.mrb[52].mxu0 %v7007_v38  ;;  %v6938_v45 = vmul.f32 %v6810_v4, %v6426_v46 }
0x11cb   :  { %v10654_v50 = vpop.eup %10653  ;;  %v15309_v40 = vadd.f32 %v6111_v22, %v14669_v39  ;;  %v15312_v25 = vadd.f32 %v6304_v31, %v14673_v36  ;;  %v6113_v13 = vpop.f32.mrb[253].mxu1 }
0x11cc   :  { %v6306_v53 = vpop.f32.mrb[253].mxu0  ;;  %v10656_v11 = vpop.eup %10655  ;;  %v6813_v42 = vadd.f32 1.0, %v10654_v50  ;;  %v15315_v37 = vadd.f32 %v6113_v13, %v14683_v33 }
0x11cd   :  { %v15318_v20 = vadd.f32 %v6306_v53, %v14685_v26  ;;  %v6115_v1 = vpop.f32.mrb[254].mxu1  ;;  %v6308_v32 = vpop.f32.mrb[254].mxu0  ;;  %v6561_v29 = vmul.f32 0.70710677, %v15309_v40  ;;  %v6563_v14 = vmul.f32 0.70710677, %v15312_v25  ;;  %7417 = vmatmul.mubr.bf16.gmra.mrb[52].mxu1 %v7005_v17 }
0x11ce   :  { %v6117_v24 = vpop.f32.mrb[255].mxu1  ;;  %v6310_v48 = vpop.f32.mrb[255].mxu0  ;;  %v6941_v12 = vmul.f32 %v6813_v42, %v6429_v16  ;;  %v6562_v57 = vmul.f32 0.70710677, %v15315_v37  ;;  %v6812_v18 = vadd.f32 1.0, %v10656_v11  ;;  %v15328_v54 = vadd.f32 %v6115_v1, %v14669_v39 }
0x11cf   :  { %v10658_v56 = vpop.eup %10657  ;;  %10663 = verf.f32 %v6561_v29  ;;  %v6564_v47 = vmul.f32 0.70710677, %v15318_v20  ;;  %v15331_v58 = vadd.f32 %v6308_v32, %v14673_v36  ;;  %v15334_v17 = vadd.f32 %v6117_v24, %v14683_v33 }
0x11d0   :  { %v10660_v49 = vpop.eup %10659  ;;  %v6815_v30 = vadd.f32 1.0, %v10658_v56  ;;  %v7009_v19 = vpack.c.bf16 %v6941_v12, %v15320_v0  ;;  %10665 = verf.f32 %v6563_v14  ;;  %v6940_v60 = vmul.f32 %v6812_v18, %v6428_v23 }
0x11d1   :  { %v6814_v35 = vadd.f32 1.0, %v10660_v49  ;;  %v10662_v43 = vpop.eup %10661  ;;  %10667 = verf.f32 %v6562_v57  ;;  %v6565_v39 = vmul.f32 0.70710677, %v15328_v54  ;;  %v6567_v52 = vmul.f32 0.70710677, %v15331_v58 }
0x11d2   :  { %v6943_v2 = vmul.f32 %v6815_v30, %v6431_v44  ;;  %v6816_v38 = vadd.f32 1.0, %v10662_v43  ;;  %v8586_v51 = vpop.f32.mrb[0].mxu1  ;;  %v8698_v28 = vpop.f32.mrb[0].mxu0  ;;  %10669 = verf.f32 %v6564_v47  ;;  %v6566_v36 = vmul.f32 0.70710677, %v15334_v17 }
0x11d3   :  { %v6942_v34 = vmul.f32 %v6814_v35, %v6430_v55  ;;  %v8587_v5 = vpop.f32.mrb[1].mxu1  ;;  %v15340_v33 = vadd.f32 %v6310_v48, %v14685_v26  ;;  %v8699_v15 = vpop.f32.mrb[1].mxu0  ;;  %10671 = verf.f32 %v6565_v39  ;;  %v6433_v48 = vmul.f32 0.5, %v15309_v40 }
0x11d4   :  { %v7011_v21 = vpack.c.bf16 %v6943_v2, %v6939_v10  ;;  %v6944_v61 = vmul.f32 %v6816_v38, %v6432_v7  ;;  %v8589_v8 = vpop.f32.mrb[2].mxu1  ;;  %v8588_v27 = vadd.f32 %v8587_v5, %v8586_v51  ;;  %v8700_v3 = vadd.f32 %v8699_v15, %v8698_v28  ;;  %v8701_v46 = vpop.f32.mrb[2].mxu0 }
0x11d5   :  { %v8590_v23 = vpop.f32.mrb[3].mxu1  ;;  %v7010_v22 = vpack.c.bf16 %v6942_v34, %v6938_v45  ;;  %10673 = verf.f32 %v6567_v52  ;;  %v6568_v31 = vmul.f32 0.70710677, %v15340_v33  ;;  %v8702_v59 = vpop.f32.mrb[3].mxu0  ;;  %v6435_v49 = vmul.f32 0.5, %v15312_v25 }
0x11d6   :  { %v8591_v50 = vadd.f32 %v8590_v23, %v8589_v8  ;;  %10675 = verf.f32 %v6566_v36  ;;  %v7315_v26 = vadd.f32 %v8588_v27, %v15345_v62  ;;  %v8703_v16 = vadd.f32 %v8702_v59, %v8701_v46 }
0x11d7   :  { %7424 = vmatprep.mubr.bf16.mxu1 %v7010_v22  ;;  %v7012_v13 = vpack.c.bf16 %v6944_v61, %v6940_v60  ;;  %10677 = verf.f32 %v6568_v31  ;;  %v6434_v10 = vmul.f32 0.5, %v15315_v37  ;;  %v6436_v35 = vmul.f32 0.5, %v15318_v20 }
0x11d8   :  { %v7318_v53 = vadd.f32 %v8591_v50, %v15345_v62  ;;  %7425 = vmatmul.mubr.bf16.gmra.mrb[56].mxu1 %v7009_v19  ;;  %v7476_v42 = vadd.f32 %v8700_v3, %v7315_v26  ;;  %v6437_v25 = vmul.f32 0.5, %v15328_v54  ;;  %v6439_v37 = vmul.f32 0.5, %v15331_v58 }
0x11d9   :  { %v10664_v11 = vpop.eup %10663  ;;  %7585 = vmatprep.mubr.bf16.mxu0 %v7012_v13  ;;  %v6440_v5 = vmul.f32 0.5, %v15340_v33 }
0x11da   :  { %v7479_v44 = vadd.f32 %v8703_v16, %v7318_v53  ;;  %v8592_v1 = vpop.f32.mrb[4].mxu1  ;;  %v8704_v32 = vpop.f32.mrb[4].mxu0  ;;  %7586 = vmatmul.mubr.bf16.gmra.mrb[56].mxu0 %v7011_v21  ;;  %v15351_v29 = vadd.f32 %v7476_v42, %v14347_v41  ;;  %v6817_v57 = vadd.f32 1.0, %v10664_v11 }
0x11db   :  { %v10666_v0 = vpop.eup %10665  ;;  %v8593_v55 = vpop.f32.mrb[5].mxu1 }
0x11dc   :  { %v8705_v7 = vpop.f32.mrb[5].mxu0  ;;  %v10668_v24 = vpop.eup %10667  ;;  %v8594_v56 = vadd.f32 %v8593_v55, %v8592_v1  ;;  %7636 = vadd.xlane.f32.xlu0 %v15351_v29  ;;  %v15358_v19 = vadd.f32 %v7479_v44, %v14350_v63  ;;  %v6819_v45 = vadd.f32 1.0, %v10666_v0  ;;  %v6438_v63 = vmul.f32 0.5, %v15334_v17 }
0x11dd   :  { %v8706_v4 = vadd.f32 %v8705_v7, %v8704_v32  ;;  %v8595_v12 = vpop.f32.mrb[6].mxu1  ;;  %v8707_v14 = vpop.f32.mrb[6].mxu0  ;;  %v6818_v34 = vadd.f32 1.0, %v10668_v24  ;;  %v6945_v21 = vmul.f32 %v6817_v57, %v6433_v48 }
0x11de   :  { %v8596_v18 = vpop.f32.mrb[7].mxu1  ;;  %v8708_v30 = vpop.f32.mrb[7].mxu0  ;;  %v7323_v40 = vadd.f32 %v8594_v56, %v15345_v62  ;;  %7638 = vadd.xlane.f32.xlu1 %v15358_v19  ;;  %v6947_v3 = vmul.f32 %v6819_v45, %v6435_v49 }
0x11df   :  { %v10670_v41 = vpop.eup %10669  ;;  %v8597_v47 = vadd.f32 %v8596_v18, %v8595_v12  ;;  %v8709_v43 = vadd.f32 %v8708_v30, %v8707_v14  ;;  %v6946_v17 = vmul.f32 %v6818_v34, %v6434_v10  ;;  %v16527_v12 = vld [vmem:[#allocation29_spill] sm:$0xff] }
0x11e0   :  { %v10672_v2 = vpop.eup %10671  ;;  %v7484_v28 = vadd.f32 %v8706_v4, %v7323_v40  ;;  %v6820_v39 = vadd.f32 1.0, %v10670_v41 }
0x11e1   :  { %v10674_v38 = vpop.eup %10673  ;;  %v6821_v51 = vadd.f32 1.0, %v10672_v2  ;;  %v7326_v20 = vadd.f32 %v8597_v47, %v15345_v62 }
0x11e2   :  { %v10676_v60 = vpop.eup %10675  ;;  %v6823_v52 = vadd.f32 1.0, %v10674_v38  ;;  %v8598_v58 = vpop.f32.mrb[8].mxu1  ;;  %v15369_v27 = vadd.f32 %v7484_v28, %v14361_v6  ;;  %v6948_v53 = vmul.f32 %v6820_v39, %v6436_v35 }
0x11e3   :  { %v10678_v61 = vpop.eup %10677  ;;  %v6949_v36 = vmul.f32 %v6821_v51, %v6437_v25  ;;  %v6822_v54 = vadd.f32 1.0, %v10676_v60  ;;  %v7487_v15 = vadd.f32 %v8709_v43, %v7326_v20  ;;  %v8710_v8 = vpop.f32.mrb[8].mxu0  ;;  %v16530_v20 = vld [vmem:[#allocation17_spill] sm:$0xff] }
0x11e4   :  { %v6951_v46 = vmul.f32 %v6823_v52, %v6439_v37  ;;  %v6824_v23 = vadd.f32 1.0, %v10678_v61  ;;  %v8599_v22 = vpop.f32.mrb[9].mxu1  ;;  %v8711_v31 = vpop.f32.mrb[9].mxu0  ;;  %7640 = vadd.xlane.f32.xlu0 %v15369_v27 }
0x11e5   :  { %v7013_v50 = vpack.c.bf16 %v6949_v36, %v6945_v21  ;;  %v6950_v59 = vmul.f32 %v6822_v54, %v6438_v63  ;;  %v8600_v26 = vadd.f32 %v8599_v22, %v8598_v58  ;;  %v8712_v16 = vadd.f32 %v8711_v31, %v8710_v8  ;;  %v8601_v33 = vpop.f32.mrb[10].mxu1  ;;  %v8713_v13 = vpop.f32.mrb[10].mxu0  ;;  %v16529_v63 = vld [vmem:[#allocation9_spill] sm:$0xff] }
0x11e6   :  { %v7015_v11 = vpack.c.bf16 %v6951_v46, %v6947_v3  ;;  %v6952_v42 = vmul.f32 %v6824_v23, %v6440_v5  ;;  %v8602_v44 = vpop.f32.mrb[11].mxu1  ;;  %v8714_v6 = vpop.f32.mrb[11].mxu0  ;;  %v15373_v1 = vadd.f32 %v7487_v15, %v14364_v9  ;;  %v16528_v9 = vld [vmem:[#allocation37_spill] sm:$0xff] }
0x11e7   :  { %v7014_v32 = vpack.c.bf16 %v6950_v59, %v6946_v17  ;;  %v7331_v0 = vadd.f32 %v8600_v26, %v15345_v62  ;;  %v8603_v55 = vadd.f32 %v8602_v44, %v8601_v33  ;;  %v8715_v7 = vadd.f32 %v8714_v6, %v8713_v13  ;;  %v16532_v33 = vld [vmem:[#allocation27_spill] sm:$0xff] }
0x11e8   :  { %v7016_v24 = vpack.c.bf16 %v6952_v42, %v6948_v53  ;;  %7642 = vadd.xlane.f32.xlu1 %v15373_v1 }
0x11e9   :  { %7432 = vmatprep.mubr.bf16.mxu1 %v7014_v32  ;;  %v7492_v48 = vadd.f32 %v8712_v16, %v7331_v0  ;;  %v7334_v56 = vadd.f32 %v8603_v55, %v15345_v62 }
0x11ea   :  { %7593 = vmatprep.mubr.bf16.mxu0 %v7016_v24  ;;  %7433 = vmatmul.mubr.bf16.gmra.mrb[60].mxu1 %v7013_v50  ;;  %v16531_v50 = vld [vmem:[#allocation21_spill] sm:$0xff] }
0x11eb   :  { %7594 = vmatmul.mubr.bf16.gmra.mrb[60].mxu0 %v7015_v11  ;;  %v7495_v4 = vadd.f32 %v8715_v7, %v7334_v56  ;;  %v15379_v14 = vadd.f32 %v7492_v48, %v16527_v12 }
0x11ed   :  { %7644 = vadd.xlane.f32.xlu0 %v15379_v14  ;;  %v15383_v57 = vadd.f32 %v7495_v4, %v16528_v9 }
0x11ef   :  { %7646 = vadd.xlane.f32.xlu1 %v15383_v57 }
0x120e   :  { %v8604_v49 = vpop.f32.mrb[12].mxu1 }
0x120f   :  { %v8716_v10 = vpop.f32.mrb[12].mxu0  ;;  %v8605_v18 = vpop.f32.mrb[13].mxu1 }
0x1210   :  { %v8606_v30 = vadd.f32 %v8605_v18, %v8604_v49  ;;  %v8717_v41 = vpop.f32.mrb[13].mxu0  ;;  %v8607_v35 = vpop.f32.mrb[14].mxu1 }
0x1211   :  { %v8718_v40 = vadd.f32 %v8717_v41, %v8716_v10  ;;  %v8719_v47 = vpop.f32.mrb[14].mxu0  ;;  %v8608_v43 = vpop.f32.mrb[15].mxu1  ;;  %v16533_v10 = vld [vmem:[#allocation31_spill] sm:$0xff] }
0x1212   :  { %v7339_v2 = vadd.f32 %v8606_v30, %v15345_v62  ;;  %v8609_v45 = vadd.f32 %v8608_v43, %v8607_v35  ;;  %v8720_v34 = vpop.f32.mrb[15].mxu0 }
0x1213   :  { %v8721_v25 = vadd.f32 %v8720_v34, %v8719_v47 }
0x1214   :  { %v7500_v37 = vadd.f32 %v8718_v40, %v7339_v2  ;;  %v7342_v38 = vadd.f32 %v8609_v45, %v15345_v62  ;;  %v16534_v2 = vld [vmem:[#allocation5_spill] sm:$0xff] }
0x1216   :  { %v7503_v51 = vadd.f32 %v8721_v25, %v7342_v38  ;;  %v15389_v28 = vadd.f32 %v7500_v37, %v16529_v63 }
0x1218   :  { %7648 = vadd.xlane.f32.xlu0 %v15389_v28  ;;  %v15393_v60 = vadd.f32 %v7503_v51, %v16530_v20 }
0x121a   :  { %7650 = vadd.xlane.f32.xlu1 %v15393_v60 }
0x121b   :  { %v8610_v21 = vpop.f32.mrb[16].mxu1 }
0x121c   :  { %v8611_v39 = vpop.f32.mrb[17].mxu1 }
0x121d   :  { %v8722_v52 = vpop.f32.mrb[16].mxu0  ;;  %v8612_v5 = vadd.f32 %v8611_v39, %v8610_v21  ;;  %v8613_v61 = vpop.f32.mrb[18].mxu1 }
0x121e   :  { %v8723_v36 = vpop.f32.mrb[17].mxu0  ;;  %v8614_v54 = vpop.f32.mrb[19].mxu1 }
0x121f   :  { %v7347_v15 = vadd.f32 %v8612_v5, %v15345_v62  ;;  %v8724_v58 = vadd.f32 %v8723_v36, %v8722_v52  ;;  %v8725_v8 = vpop.f32.mrb[18].mxu0  ;;  %v8615_v3 = vadd.f32 %v8614_v54, %v8613_v61  ;;  %v16535_v5 = vld [vmem:[#allocation13_spill] sm:$0xff] }
0x1220   :  { %v8726_v17 = vpop.f32.mrb[19].mxu0 }
0x1221   :  { %v7508_v46 = vadd.f32 %v8724_v58, %v7347_v15  ;;  %v7350_v23 = vadd.f32 %v8615_v3, %v15345_v62  ;;  %v8727_v22 = vadd.f32 %v8726_v17, %v8725_v8  ;;  %v16536_v17 = vld [vmem:[#allocation53_spill] sm:$0xff] }
0x1223   :  { %v7511_v31 = vadd.f32 %v8727_v22, %v7350_v23  ;;  %v15399_v59 = vadd.f32 %v7508_v46, %v16531_v50  ;;  %v8616_v26 = vpop.f32.mrb[20].mxu1 }
0x1224   :  { %v8617_v53 = vpop.f32.mrb[21].mxu1 }
0x1225   :  { %v8728_v16 = vpop.f32.mrb[20].mxu0  ;;  %7652 = vadd.xlane.f32.xlu0 %v15399_v59  ;;  %v15403_v13 = vadd.f32 %v7511_v31, %v16532_v33  ;;  %v8618_v42 = vadd.f32 %v8617_v53, %v8616_v26  ;;  %v8619_v6 = vpop.f32.mrb[22].mxu1 }
0x1226   :  { %v8729_v11 = vpop.f32.mrb[21].mxu0  ;;  %v8620_v0 = vpop.f32.mrb[23].mxu1 }
0x1227   :  { %v8730_v44 = vadd.f32 %v8729_v11, %v8728_v16  ;;  %v8731_v32 = vpop.f32.mrb[22].mxu0  ;;  %7654 = vadd.xlane.f32.xlu1 %v15403_v13  ;;  %v7355_v7 = vadd.f32 %v8618_v42, %v15345_v62  ;;  %v8621_v24 = vadd.f32 %v8620_v0, %v8619_v6  ;;  %v16537_v11 = vld [vmem:[#allocation34_spill] sm:$0xff] }
0x1228   :  { %v8732_v55 = vpop.f32.mrb[23].mxu0 }
0x1229   :  { %v8733_v48 = vadd.f32 %v8732_v55, %v8731_v32  ;;  %v7516_v56 = vadd.f32 %v8730_v44, %v7355_v7  ;;  %v7358_v4 = vadd.f32 %v8621_v24, %v15345_v62  ;;  %v16538_v44 = vld [vmem:[#allocation33_spill] sm:$0xff] }
0x122b   :  { %v7519_v12 = vadd.f32 %v8733_v48, %v7358_v4  ;;  %v8622_v9 = vpop.f32.mrb[24].mxu1  ;;  %v15409_v18 = vadd.f32 %v7516_v56, %v16533_v10 }
0x122c   :  { %v8623_v30 = vpop.f32.mrb[25].mxu1 }
0x122d   :  { %v8734_v49 = vpop.f32.mrb[24].mxu0  ;;  %v8624_v35 = vadd.f32 %v8623_v30, %v8622_v9  ;;  %v8625_v47 = vpop.f32.mrb[26].mxu1  ;;  %7656 = vadd.xlane.f32.xlu0 %v15409_v18  ;;  %v15413_v45 = vadd.f32 %v7519_v12, %v16534_v2 }
0x122e   :  { %v8735_v41 = vpop.f32.mrb[25].mxu0  ;;  %v8626_v34 = vpop.f32.mrb[27].mxu1 }
0x122f   :  { %v8736_v40 = vadd.f32 %v8735_v41, %v8734_v49  ;;  %v8737_v43 = vpop.f32.mrb[26].mxu0  ;;  %v7363_v37 = vadd.f32 %v8624_v35, %v15345_v62  ;;  %v8627_v38 = vadd.f32 %v8626_v34, %v8625_v47  ;;  %7658 = vadd.xlane.f32.xlu1 %v15413_v45 }
0x1230   :  { %v8738_v25 = vpop.f32.mrb[27].mxu0 }
0x1231   :  { %v8739_v51 = vadd.f32 %v8738_v25, %v8737_v43  ;;  %v7524_v63 = vadd.f32 %v8736_v40, %v7363_v37  ;;  %v7366_v20 = vadd.f32 %v8627_v38, %v15345_v62  ;;  %v16539_v43 = vld [vmem:[#allocation40_spill] sm:$0xff] }
0x1233   :  { %v7527_v21 = vadd.f32 %v8739_v51, %v7366_v20  ;;  %v8628_v39 = vpop.f32.mrb[28].mxu1  ;;  %v15419_v61 = vadd.f32 %v7524_v63, %v16535_v5  ;;  %v16540_v63 = vld [vmem:[#allocation36_spill] sm:$0xff] }
0x1234   :  { %v8629_v36 = vpop.f32.mrb[29].mxu1 }
0x1235   :  { %v8740_v52 = vpop.f32.mrb[28].mxu0  ;;  %v8630_v15 = vadd.f32 %v8629_v36, %v8628_v39  ;;  %v8631_v8 = vpop.f32.mrb[30].mxu1  ;;  %7660 = vadd.xlane.f32.xlu0 %v15419_v61  ;;  %v15423_v46 = vadd.f32 %v7527_v21, %v16536_v17 }
0x1236   :  { %v8741_v54 = vpop.f32.mrb[29].mxu0  ;;  %v8632_v23 = vpop.f32.mrb[31].mxu1 }
0x1237   :  { %v8742_v58 = vadd.f32 %v8741_v54, %v8740_v52  ;;  %v8743_v3 = vpop.f32.mrb[30].mxu0  ;;  %v7371_v31 = vadd.f32 %v8630_v15, %v15345_v62  ;;  %v8633_v50 = vadd.f32 %v8632_v23, %v8631_v8  ;;  %7662 = vadd.xlane.f32.xlu1 %v15423_v46  ;;  %v16541_v23 = vld [vmem:[#allocation35_spill] sm:$0xff] }
0x1238   :  { %v8744_v22 = vpop.f32.mrb[31].mxu0 }
0x1239   :  { %v8745_v26 = vadd.f32 %v8744_v22, %v8743_v3  ;;  %v7532_v16 = vadd.f32 %v8742_v58, %v7371_v31  ;;  %v7374_v33 = vadd.f32 %v8633_v50, %v15345_v62 }
0x123b   :  { %v7535_v53 = vadd.f32 %v8745_v26, %v7374_v33  ;;  %v15429_v42 = vadd.f32 %v7532_v16, %v16537_v11 }
0x123d   :  { %7664 = vadd.xlane.f32.xlu0 %v15429_v42  ;;  %v15433_v6 = vadd.f32 %v7535_v53, %v16538_v44  ;;  %v16542_v53 = vld [vmem:[#allocation39_spill] sm:$0xff] }
0x123f   :  { %7666 = vadd.xlane.f32.xlu1 %v15433_v6 }
0x125d   :  { %v8634_v32 = vpop.f32.mrb[32].mxu1  ;;  %v8746_v0 = vpop.f32.mrb[32].mxu0 }
0x125e   :  { %v8635_v55 = vpop.f32.mrb[33].mxu1  ;;  %v8747_v24 = vpop.f32.mrb[33].mxu0 }
0x125f   :  { %v8636_v7 = vadd.f32 %v8635_v55, %v8634_v32  ;;  %v8637_v48 = vpop.f32.mrb[34].mxu1  ;;  %v8748_v56 = vadd.f32 %v8747_v24, %v8746_v0  ;;  %v8749_v4 = vpop.f32.mrb[34].mxu0 }
0x1260   :  { %v8638_v12 = vpop.f32.mrb[35].mxu1  ;;  %v8750_v10 = vpop.f32.mrb[35].mxu0 }
0x1261   :  { %v7379_v9 = vadd.f32 %v8636_v7, %v15345_v62  ;;  %v8639_v49 = vadd.f32 %v8638_v12, %v8637_v48  ;;  %v8751_v30 = vadd.f32 %v8750_v10, %v8749_v4 }
0x1263   :  { %v7540_v41 = vadd.f32 %v8748_v56, %v7379_v9  ;;  %v7382_v35 = vadd.f32 %v8639_v49, %v15345_v62  ;;  %v16543_v49 = vld [vmem:[#allocation42_spill] sm:$0xff] }
0x1265   :  { %v7543_v40 = vadd.f32 %v8751_v30, %v7382_v35  ;;  %v8640_v47 = vpop.f32.mrb[36].mxu1  ;;  %v15439_v2 = vadd.f32 %v7540_v41, %v16539_v43  ;;  %v8752_v34 = vpop.f32.mrb[36].mxu0  ;;  %v16544_v43 = vld [vmem:[#allocation41_spill] sm:$0xff] }
0x1266   :  { %v8641_v25 = vpop.f32.mrb[37].mxu1  ;;  %v8753_v38 = vpop.f32.mrb[37].mxu0 }
0x1267   :  { %v8642_v37 = vadd.f32 %v8641_v25, %v8640_v47  ;;  %v8643_v51 = vpop.f32.mrb[38].mxu1  ;;  %7668 = vadd.xlane.f32.xlu0 %v15439_v2  ;;  %v15443_v20 = vadd.f32 %v7543_v40, %v16540_v63  ;;  %v8754_v21 = vadd.f32 %v8753_v38, %v8752_v34  ;;  %v8755_v39 = vpop.f32.mrb[38].mxu0 }
0x1268   :  { %v8644_v52 = vpop.f32.mrb[39].mxu1  ;;  %v8756_v54 = vpop.f32.mrb[39].mxu0 }
0x1269   :  { %v7387_v5 = vadd.f32 %v8642_v37, %v15345_v62  ;;  %v8645_v36 = vadd.f32 %v8644_v52, %v8643_v51  ;;  %7670 = vadd.xlane.f32.xlu1 %v15443_v20  ;;  %v8757_v15 = vadd.f32 %v8756_v54, %v8755_v39  ;;  %v16545_v54 = vld [vmem:[#allocation44_spill] sm:$0xff] }
0x126b   :  { %v7548_v58 = vadd.f32 %v8754_v21, %v7387_v5  ;;  %v7390_v8 = vadd.f32 %v8645_v36, %v15345_v62 }
0x126d   :  { %v7551_v3 = vadd.f32 %v8757_v15, %v7390_v8  ;;  %v8646_v17 = vpop.f32.mrb[40].mxu1  ;;  %v15449_v22 = vadd.f32 %v7548_v58, %v16541_v23  ;;  %v8758_v31 = vpop.f32.mrb[40].mxu0  ;;  %v16546_v58 = vld [vmem:[#allocation43_spill] sm:$0xff] }
0x126e   :  { %v8647_v50 = vpop.f32.mrb[41].mxu1  ;;  %v8759_v16 = vpop.f32.mrb[41].mxu0 }
0x126f   :  { %v8648_v26 = vadd.f32 %v8647_v50, %v8646_v17  ;;  %v8649_v33 = vpop.f32.mrb[42].mxu1  ;;  %7672 = vadd.xlane.f32.xlu0 %v15449_v22  ;;  %v15453_v11 = vadd.f32 %v7551_v3, %v16542_v53  ;;  %v8760_v44 = vadd.f32 %v8759_v16, %v8758_v31  ;;  %v8761_v32 = vpop.f32.mrb[42].mxu0 }
0x1270   :  { %v8650_v0 = vpop.f32.mrb[43].mxu1  ;;  %v8762_v24 = vpop.f32.mrb[43].mxu0 }
0x1271   :  { %v7395_v55 = vadd.f32 %v8648_v26, %v15345_v62  ;;  %v8651_v7 = vadd.f32 %v8650_v0, %v8649_v33  ;;  %7674 = vadd.xlane.f32.xlu1 %v15453_v11  ;;  %v8763_v48 = vadd.f32 %v8762_v24, %v8761_v32 }
0x1273   :  { %v7556_v56 = vadd.f32 %v8760_v44, %v7395_v55  ;;  %v7398_v4 = vadd.f32 %v8651_v7, %v15345_v62 }
0x1275   :  { %v7559_v12 = vadd.f32 %v8763_v48, %v7398_v4  ;;  %v8652_v9 = vpop.f32.mrb[44].mxu1  ;;  %v15459_v10 = vadd.f32 %v7556_v56, %v16543_v49  ;;  %v8764_v30 = vpop.f32.mrb[44].mxu0  ;;  %v16547_v4 = vld [vmem:[#allocation46_spill] sm:$0xff] }
0x1276   :  { %v8653_v41 = vpop.f32.mrb[45].mxu1  ;;  %v8765_v40 = vpop.f32.mrb[45].mxu0 }
0x1277   :  { %v8654_v35 = vadd.f32 %v8653_v41, %v8652_v9  ;;  %v8655_v47 = vpop.f32.mrb[46].mxu1  ;;  %7676 = vadd.xlane.f32.xlu0 %v15459_v10  ;;  %v15463_v34 = vadd.f32 %v7559_v12, %v16544_v43  ;;  %v8766_v25 = vadd.f32 %v8765_v40, %v8764_v30  ;;  %v8767_v37 = vpop.f32.mrb[46].mxu0  ;;  %v16548_v40 = vld [vmem:[#allocation48_spill] sm:$0xff] }
0x1278   :  { %v8656_v38 = vpop.f32.mrb[47].mxu1  ;;  %v8768_v21 = vpop.f32.mrb[47].mxu0 }
0x1279   :  { %v7403_v51 = vadd.f32 %v8654_v35, %v15345_v62  ;;  %v8657_v63 = vadd.f32 %v8656_v38, %v8655_v47  ;;  %7678 = vadd.xlane.f32.xlu1 %v15463_v34  ;;  %v8769_v39 = vadd.f32 %v8768_v21, %v8767_v37 }
0x127b   :  { %v7564_v52 = vadd.f32 %v8766_v25, %v7403_v51  ;;  %v7406_v5 = vadd.f32 %v8657_v63, %v15345_v62 }
0x127d   :  { %v7567_v36 = vadd.f32 %v8769_v39, %v7406_v5  ;;  %v15469_v15 = vadd.f32 %v7564_v52, %v16545_v54 }
0x127f   :  { %7680 = vadd.xlane.f32.xlu0 %v15469_v15  ;;  %v15473_v8 = vadd.f32 %v7567_v36, %v16546_v58  ;;  %v16549_v36 = vld [vmem:[#allocation47_spill] sm:$0xff] }
0x1281   :  { %7682 = vadd.xlane.f32.xlu1 %v15473_v8 }
0x1295   :  { %v8770_v17 = vpop.f32.mrb[48].mxu0 }
0x1296   :  { %v8771_v50 = vpop.f32.mrb[49].mxu0 }
0x1297   :  { %v8772_v16 = vadd.f32 %v8771_v50, %v8770_v17  ;;  %v8773_v33 = vpop.f32.mrb[50].mxu0 }
0x1298   :  { %v8658_v3 = vpop.f32.mrb[48].mxu1  ;;  %v8774_v0 = vpop.f32.mrb[51].mxu0 }
0x1299   :  { %v8659_v23 = vpop.f32.mrb[49].mxu1  ;;  %v8775_v55 = vadd.f32 %v8774_v0, %v8773_v33 }
0x129a   :  { %v8660_v31 = vadd.f32 %v8659_v23, %v8658_v3  ;;  %v8661_v26 = vpop.f32.mrb[50].mxu1  ;;  %v16550_v3 = vld [vmem:[#allocation45_spill] sm:$0xff] }
0x129b   :  { %v8662_v53 = vpop.f32.mrb[51].mxu1 }
0x129c   :  { %v7411_v44 = vadd.f32 %v8660_v31, %v15345_v62  ;;  %v8663_v32 = vadd.f32 %v8662_v53, %v8661_v26 }
0x129d   :  { %v8776_v9 = vpop.f32.mrb[52].mxu0 }
0x129e   :  { %v7572_v7 = vadd.f32 %v8772_v16, %v7411_v44  ;;  %v7414_v24 = vadd.f32 %v8663_v32, %v15345_v62  ;;  %v8777_v41 = vpop.f32.mrb[53].mxu0 }
0x129f   :  { %v8778_v43 = vadd.f32 %v8777_v41, %v8776_v9  ;;  %v8779_v25 = vpop.f32.mrb[54].mxu0  ;;  %v7637_v41 = vpop.xlane.xlu0 %7636 }
0x12a0   :  { %v7575_v48 = vadd.f32 %v8775_v55, %v7414_v24  ;;  %v8664_v56 = vpop.f32.mrb[52].mxu1  ;;  %v15479_v12 = vadd.f32 %v7572_v7, %v16547_v4  ;;  %v8780_v63 = vpop.f32.mrb[55].mxu0  ;;  %v16551_v4 = vld [vmem:[#allocation49_spill] sm:$0xff] }
0x12a1   :  { %v8665_v49 = vpop.f32.mrb[53].mxu1  ;;  %v8781_v21 = vadd.f32 %v8780_v63, %v8779_v25 }
0x12a2   :  { %v8666_v30 = vadd.f32 %v8665_v49, %v8664_v56  ;;  %v8667_v35 = vpop.f32.mrb[54].mxu1  ;;  %7684 = vadd.xlane.f32.xlu0 %v15479_v12  ;;  %v15483_v47 = vadd.f32 %v7575_v48, %v16548_v40  ;;  %v16552_v49 = vld [vmem:[#allocation50_spill] sm:$0xff]  ;;  %v7639_v40 = vpop.xlane.xlu1 %7638 }
0x12a3   :  { %v8668_v37 = vpop.f32.mrb[55].mxu1 }
0x12a4   :  { %v7419_v38 = vadd.f32 %v8666_v30, %v15345_v62  ;;  %v8669_v51 = vadd.f32 %v8668_v37, %v8667_v35  ;;  %7686 = vadd.xlane.f32.xlu1 %v15483_v47 }
0x12a6   :  { %v7580_v39 = vadd.f32 %v8778_v43, %v7419_v38  ;;  %v7422_v52 = vadd.f32 %v8669_v51, %v15345_v62 }
0x12a8   :  { %v7583_v5 = vadd.f32 %v8781_v21, %v7422_v52  ;;  %v15489_v54 = vadd.f32 %v7580_v39, %v16549_v36 }
0x12aa   :  { %7688 = vadd.xlane.f32.xlu0 %v15489_v54  ;;  %v15493_v17 = vadd.f32 %v7583_v5, %v16550_v3  ;;  %v7700_v5 = vmul.f32 0.0078125, %v7637_v41 }
0x12ab   :  { %v8670_v58 = vpop.f32.mrb[56].mxu1 }
0x12ac   :  { %v8671_v23 = vpop.f32.mrb[57].mxu1  ;;  %7690 = vadd.xlane.f32.xlu1 %v15493_v17 }
0x12ad   :  { %v8782_v31 = vpop.f32.mrb[56].mxu0  ;;  %v8672_v50 = vadd.f32 %v8671_v23, %v8670_v58  ;;  %v8673_v26 = vpop.f32.mrb[58].mxu1 }
0x12ae   :  { %v8783_v16 = vpop.f32.mrb[57].mxu0  ;;  %v8674_v33 = vpop.f32.mrb[59].mxu1 }
0x12af   :  { %v7427_v53 = vadd.f32 %v8672_v50, %v15345_v62  ;;  %v8784_v44 = vadd.f32 %v8783_v16, %v8782_v31  ;;  %v8785_v32 = vpop.f32.mrb[58].mxu0  ;;  %v8675_v0 = vadd.f32 %v8674_v33, %v8673_v26  ;;  %v7641_v23 = vpop.xlane.xlu0 %7640  ;;  %v7701_v31 = vmul.f32 0.0078125, %v7639_v40 }
0x12b0   :  { %v8786_v55 = vpop.f32.mrb[59].mxu0  ;;  %v7643_v16 = vpop.xlane.xlu1 %7642  ;;  %v15509_v33 = vsub.f32 %v15351_v29, %v7700_v5 }
0x12b1   :  { %v7588_v7 = vadd.f32 %v8784_v44, %v7427_v53  ;;  %v7430_v24 = vadd.f32 %v8675_v0, %v15345_v62  ;;  %v8787_v48 = vadd.f32 %v8786_v55, %v8785_v32  ;;  %v7702_v53 = vmul.f32 0.0078125, %v7641_v23  ;;  %v16553_v32 = vld [vmem:[#allocation85_spill] sm:$0xff] }
0x12b3   :  { %v7591_v56 = vadd.f32 %v8787_v48, %v7430_v24  ;;  %v15499_v9 = vadd.f32 %v7588_v7, %v16551_v4  ;;  %v7645_v55 = vpop.xlane.xlu0 %7644  ;;  %v15515_v7 = vsub.f32 %v15358_v19, %v7701_v31  ;;  %v7703_v24 = vmul.f32 0.0078125, %v7643_v16  ;;  %v16554_v48 = vld [vmem:[#allocation15_spill] sm:$0xff] }
0x12b4   :  { %v15522_v4 = vsub.f32 %v15369_v27, %v7702_v53  ;;  %v7704_v29 = vmul.f32 0.0078125, %v7645_v55 }
0x12b5   :  { %7692 = vadd.xlane.f32.xlu0 %v15499_v9  ;;  %v15503_v30 = vadd.f32 %v7591_v56, %v16552_v49  ;;  %v7764_v49 = vmul.f32 %v15509_v33, %v15509_v33  ;;  %v15528_v19 = vsub.f32 %v15373_v1, %v7703_v24  ;;  %v7765_v40 = vmul.f32 %v15515_v7, %v15515_v7 }
0x12b7   :  { %7694 = vadd.xlane.f32.xlu1 %v15503_v30  ;;  %v7649_v41 = vpop.xlane.xlu0 %7648 }
0x12b8   :  { %v7706_v27 = vmul.f32 0.0078125, %v7649_v41 }
0x12bd   :  { %v8676_v35 = vpop.f32.mrb[60].mxu1 }
0x12be   :  { %v8788_v43 = vpop.f32.mrb[60].mxu0  ;;  %v8677_v37 = vpop.f32.mrb[61].mxu1 }
0x12bf   :  { %v8789_v25 = vpop.f32.mrb[61].mxu0  ;;  %v8678_v51 = vadd.f32 %v8677_v37, %v8676_v35  ;;  %v8679_v21 = vpop.f32.mrb[62].mxu1  ;;  %v7766_v37 = vmul.f32 %v15522_v4, %v15522_v4 }
0x12c0   :  { %v8790_v38 = vadd.f32 %v8789_v25, %v8788_v43  ;;  %v8791_v63 = vpop.f32.mrb[62].mxu0  ;;  %v8680_v39 = vpop.f32.mrb[63].mxu1  ;;  %v15533_v25 = vsub.f32 %v15379_v14, %v7704_v29 }
0x12c1   :  { %v8792_v52 = vpop.f32.mrb[63].mxu0  ;;  %v7435_v36 = vadd.f32 %v8678_v51, %v15345_v62  ;;  %v8681_v58 = vadd.f32 %v8680_v39, %v8679_v21  ;;  %v15543_v39 = vsub.f32 %v15389_v28, %v7706_v27 }
0x12c2   :  { %v8793_v3 = vadd.f32 %v8792_v52, %v8791_v63  ;;  %v7767_v63 = vmul.f32 %v15528_v19, %v15528_v19  ;;  %v7768_v52 = vmul.f32 %v15533_v25, %v15533_v25 }
0x12c3   :  { %v7596_v50 = vadd.f32 %v8790_v38, %v7435_v36  ;;  %v7438_v26 = vadd.f32 %v8681_v58, %v15345_v62  ;;  %v7647_v62 = vpop.xlane.xlu1 %7646  ;;  %v7653_v38 = vpop.xlane.xlu0 %7652  ;;  %v7770_v31 = vmul.f32 %v15543_v39, %v15543_v39 }
0x12c4   :  { %v7705_v35 = vmul.f32 0.0078125, %v7647_v62  ;;  %v7708_v14 = vmul.f32 0.0078125, %v7653_v38 }
0x12c5   :  { %v7599_v44 = vadd.f32 %v8793_v3, %v7438_v26  ;;  %v15512_v0 = vadd.f32 %v7596_v50, %v16553_v32 }
0x12c6   :  { %v15538_v51 = vsub.f32 %v15383_v57, %v7705_v35  ;;  %v15553_v23 = vsub.f32 %v15399_v59, %v7708_v14 }
0x12c7   :  { %7696 = vadd.xlane.f32.xlu0 %v15512_v0  ;;  %v15519_v56 = vadd.f32 %v7599_v44, %v16554_v48  ;;  %v7651_v43 = vpop.xlane.xlu1 %7650  ;;  %v7657_v5 = vpop.xlane.xlu0 %7656 }
0x12c8   :  { %v7707_v1 = vmul.f32 0.0078125, %v7651_v43  ;;  %v7769_v58 = vmul.f32 %v15538_v51, %v15538_v51  ;;  %v7710_v28 = vmul.f32 0.0078125, %v7657_v5  ;;  %v7772_v32 = vmul.f32 %v15553_v23, %v15553_v23 }
0x12c9   :  { %7698 = vadd.xlane.f32.xlu1 %v15519_v56 }
0x12ca   :  { %v15548_v36 = vsub.f32 %v15393_v60, %v7707_v1  ;;  %v15563_v44 = vsub.f32 %v15409_v18, %v7710_v28 }
0x12cb   :  { %7796 = vadd.xlane.f32.xlu0 %v7764_v49  ;;  %v7655_v21 = vpop.xlane.xlu1 %7654  ;;  %v7661_v50 = vpop.xlane.xlu0 %7660 }
0x12cc   :  { %v7709_v57 = vmul.f32 0.0078125, %v7655_v21  ;;  %v7771_v16 = vmul.f32 %v15548_v36, %v15548_v36  ;;  %v7712_v59 = vmul.f32 0.0078125, %v7661_v50  ;;  %v7774_v49 = vmul.f32 %v15563_v44, %v15563_v44 }
0x12cd   :  { %7798 = vadd.xlane.f32.xlu1 %v7765_v40 }
0x12ce   :  { %v15558_v26 = vsub.f32 %v15403_v13, %v7709_v57  ;;  %v15573_v29 = vsub.f32 %v15419_v61, %v7712_v59 }
0x12cf   :  { %7800 = vadd.xlane.f32.xlu0 %v7766_v37  ;;  %v7659_v3 = vpop.xlane.xlu1 %7658  ;;  %v7665_v55 = vpop.xlane.xlu0 %7664 }
0x12d0   :  { %v7711_v60 = vmul.f32 0.0078125, %v7659_v3  ;;  %v7773_v48 = vmul.f32 %v15558_v26, %v15558_v26  ;;  %v7714_v18 = vmul.f32 0.0078125, %v7665_v55  ;;  %v7776_v61 = vmul.f32 %v15573_v29, %v15573_v29 }
0x12d1   :  { %7802 = vadd.xlane.f32.xlu1 %v7767_v63 }
0x12d2   :  { %v15568_v24 = vsub.f32 %v15413_v45, %v7711_v60  ;;  %v15583_v40 = vsub.f32 %v15429_v42, %v7714_v18 }
0x12d3   :  { %7804 = vadd.xlane.f32.xlu0 %v7768_v52  ;;  %v7663_v53 = vpop.xlane.xlu1 %7662 }
0x12d4   :  { %v7713_v13 = vmul.f32 0.0078125, %v7663_v53  ;;  %v7775_v45 = vmul.f32 %v15568_v24, %v15568_v24  ;;  %v7778_v27 = vmul.f32 %v15583_v40, %v15583_v40 }
0x12d5   :  { %7806 = vadd.xlane.f32.xlu1 %v7769_v58 }
0x12d6   :  { %v15578_v41 = vsub.f32 %v15423_v46, %v7713_v13 }
0x12d7   :  { %7808 = vadd.xlane.f32.xlu0 %v7770_v31  ;;  %v7667_v62 = vpop.xlane.xlu1 %7666 }
0x12d8   :  { %v7715_v35 = vmul.f32 0.0078125, %v7667_v62  ;;  %v7777_v46 = vmul.f32 %v15578_v41, %v15578_v41 }
0x12d9   :  { %7810 = vadd.xlane.f32.xlu1 %v7771_v16 }
0x12da   :  { %v15588_v43 = vsub.f32 %v15433_v6, %v7715_v35 }
0x12db   :  { %7812 = vadd.xlane.f32.xlu0 %v7772_v32 }
0x12dc   :  { %v7779_v42 = vmul.f32 %v15588_v43, %v15588_v43 }
0x12dd   :  { %7814 = vadd.xlane.f32.xlu1 %v7773_v48 }
0x12df   :  { %7816 = vadd.xlane.f32.xlu0 %v7774_v49 }
0x12e1   :  { %7818 = vadd.xlane.f32.xlu1 %v7775_v45 }
0x12e3   :  { %7820 = vadd.xlane.f32.xlu0 %v7776_v61 }
0x12e5   :  { %7822 = vadd.xlane.f32.xlu1 %v7777_v46 }
0x12e7   :  { %7824 = vadd.xlane.f32.xlu0 %v7778_v27 }
0x12e9   :  { %7826 = vadd.xlane.f32.xlu1 %v7779_v42 }
0x12f4   :  { %v7669_v37 = vpop.xlane.xlu0 %7668 }
0x12f5   :  { %v7716_v38 = vmul.f32 0.0078125, %v7669_v37 }
0x12f6   :  { %v7671_v1 = vpop.xlane.xlu1 %7670 }
0x12f7   :  { %v15597_v63 = vsub.f32 %v15439_v2, %v7716_v38  ;;  %v7717_v6 = vmul.f32 0.0078125, %v7671_v1 }
0x12f9   :  { %v15600_v21 = vsub.f32 %v15443_v20, %v7717_v6  ;;  %v7780_v14 = vmul.f32 %v15597_v63, %v15597_v63 }
0x12fb   :  { %7828 = vadd.xlane.f32.xlu0 %v7780_v14  ;;  %v7781_v52 = vmul.f32 %v15600_v21, %v15600_v21 }
0x12fc   :  { %v7673_v5 = vpop.xlane.xlu0 %7672 }
0x12fd   :  { %v7718_v57 = vmul.f32 0.0078125, %v7673_v5  ;;  %7830 = vadd.xlane.f32.xlu1 %v7781_v52 }
0x12fe   :  { %v7675_v58 = vpop.xlane.xlu1 %7674 }
0x12ff   :  { %v15607_v3 = vsub.f32 %v15449_v22, %v7718_v57  ;;  %v7719_v2 = vmul.f32 0.0078125, %v7675_v58 }
0x1301   :  { %v15610_v28 = vsub.f32 %v15453_v11, %v7719_v2  ;;  %v7782_v20 = vmul.f32 %v15607_v3, %v15607_v3 }
0x1303   :  { %7832 = vadd.xlane.f32.xlu0 %v7782_v20  ;;  %v7783_v31 = vmul.f32 %v15610_v28, %v15610_v28 }
0x1304   :  { %v7677_v50 = vpop.xlane.xlu0 %7676 }
0x1305   :  { %v7720_v60 = vmul.f32 0.0078125, %v7677_v50  ;;  %7834 = vadd.xlane.f32.xlu1 %v7783_v31 }
0x1306   :  { %v7679_v16 = vpop.xlane.xlu1 %7678 }
0x1307   :  { %v15617_v53 = vsub.f32 %v15459_v10, %v7720_v60  ;;  %v7721_v22 = vmul.f32 0.0078125, %v7679_v16 }
0x1309   :  { %v15620_v59 = vsub.f32 %v15463_v34, %v7721_v22  ;;  %v7784_v11 = vmul.f32 %v15617_v53, %v15617_v53 }
0x130b   :  { %7836 = vadd.xlane.f32.xlu0 %v7784_v11  ;;  %v7785_v32 = vmul.f32 %v15620_v59, %v15620_v59 }
0x130c   :  { %v7681_v55 = vpop.xlane.xlu0 %7680 }
0x130d   :  { %v7722_v13 = vmul.f32 0.0078125, %v7681_v55  ;;  %7838 = vadd.xlane.f32.xlu1 %v7785_v32 }
0x130e   :  { %v7683_v48 = vpop.xlane.xlu1 %7682 }
0x130f   :  { %v15627_v62 = vsub.f32 %v15469_v15, %v7722_v13  ;;  %v7723_v10 = vmul.f32 0.0078125, %v7683_v48 }
0x1311   :  { %v15630_v18 = vsub.f32 %v15473_v8, %v7723_v10  ;;  %v7786_v34 = vmul.f32 %v15627_v62, %v15627_v62 }
0x1313   :  { %7840 = vadd.xlane.f32.xlu0 %v7786_v34  ;;  %v7787_v49 = vmul.f32 %v15630_v18, %v15630_v18 }
0x1315   :  { %7842 = vadd.xlane.f32.xlu1 %v7787_v49 }
0x132f   :  { %v7685_v35 = vpop.xlane.xlu0 %7684 }
0x1330   :  { %v7724_v45 = vmul.f32 0.0078125, %v7685_v35 }
0x1331   :  { %v7687_v61 = vpop.xlane.xlu1 %7686 }
0x1332   :  { %v15637_v46 = vsub.f32 %v15479_v12, %v7724_v45  ;;  %v7725_v15 = vmul.f32 0.0078125, %v7687_v61 }
0x1334   :  { %v15640_v27 = vsub.f32 %v15483_v47, %v7725_v15  ;;  %v7788_v8 = vmul.f32 %v15637_v46, %v15637_v46 }
0x1336   :  { %7844 = vadd.xlane.f32.xlu0 %v7788_v8  ;;  %v7789_v42 = vmul.f32 %v15640_v27, %v15640_v27 }
0x1337   :  { %v7689_v37 = vpop.xlane.xlu0 %7688 }
0x1338   :  { %v7726_v38 = vmul.f32 0.0078125, %v7689_v37  ;;  %7846 = vadd.xlane.f32.xlu1 %v7789_v42 }
0x1339   :  { %v7691_v1 = vpop.xlane.xlu1 %7690 }
0x133a   :  { %v15647_v6 = vsub.f32 %v15489_v54, %v7726_v38  ;;  %v7727_v12 = vmul.f32 0.0078125, %v7691_v1 }
0x133c   :  { %v15650_v14 = vsub.f32 %v15493_v17, %v7727_v12  ;;  %v7790_v47 = vmul.f32 %v15647_v6, %v15647_v6 }
0x133e   :  { %7848 = vadd.xlane.f32.xlu0 %v7790_v47  ;;  %v7791_v52 = vmul.f32 %v15650_v14, %v15650_v14 }
0x1340   :  { %7850 = vadd.xlane.f32.xlu1 %v7791_v52 }
0x1342   :  { %v7693_v5 = vpop.xlane.xlu0 %7692 }
0x1343   :  { %v7728_v57 = vmul.f32 0.0078125, %v7693_v5 }
0x1344   :  { %v7695_v58 = vpop.xlane.xlu1 %7694 }
0x1345   :  { %v15657_v2 = vsub.f32 %v15499_v9, %v7728_v57  ;;  %v7729_v54 = vmul.f32 0.0078125, %v7695_v58  ;;  %v15679_v58 = vld [vmem:[%s15890_s12] ss:$0 sm:$0xff] }
0x1347   :  { %v15660_v20 = vsub.f32 %v15503_v30, %v7729_v54  ;;  %v7792_v17 = vmul.f32 %v15657_v2, %v15657_v2 }
0x1349   :  { %7852 = vadd.xlane.f32.xlu0 %v7792_v17  ;;  %v7793_v31 = vmul.f32 %v15660_v20, %v15660_v20 }
0x134b   :  { %7854 = vadd.xlane.f32.xlu1 %v7793_v31 }
0x1354   :  { %v7697_v50 = vpop.xlane.xlu0 %7696 }
0x1355   :  { %v7730_v60 = vmul.f32 0.0078125, %v7697_v50 }
0x1356   :  { %v7699_v16 = vpop.xlane.xlu1 %7698 }
0x1357   :  { %v15667_v22 = vsub.f32 %v15512_v0, %v7730_v60  ;;  %v7731_v9 = vmul.f32 0.0078125, %v7699_v16  ;;  %v15685_v16 = vld [vmem:[%s15891_s13] ss:$0 sm:$0xff] }
0x1358   :  { %v7797_v11 = vpop.xlane.xlu0 %7796 }
0x1359   :  { %v15670_v32 = vsub.f32 %v15519_v56, %v7731_v9  ;;  %v7860_v30 = vmul.f32 0.0078125, %v7797_v11  ;;  %v7794_v55 = vmul.f32 %v15667_v22, %v15667_v22 }
0x135a   :  { %v7799_v13 = vpop.xlane.xlu1 %7798 }
0x135b   :  { %v7892_v48 = vadd.f32 1e-12, %v7860_v30  ;;  %v7861_v10 = vmul.f32 0.0078125, %v7799_v13  ;;  %7856 = vadd.xlane.f32.xlu0 %v7794_v55  ;;  %v7795_v34 = vmul.f32 %v15670_v32, %v15670_v32 }
0x135c   :  { %v7801_v49 = vpop.xlane.xlu0 %7800 }
0x135d   :  { %10679 = vrsqrt.f32 %v7892_v48  ;;  %v7893_v0 = vadd.f32 1e-12, %v7861_v10  ;;  %v7862_v35 = vmul.f32 0.0078125, %v7801_v49  ;;  %7858 = vadd.xlane.f32.xlu1 %v7795_v34 }
0x135e   :  { %v7803_v45 = vpop.xlane.xlu1 %7802 }
0x135f   :  { %10681 = vrsqrt.f32 %v7893_v0  ;;  %v7894_v56 = vadd.f32 1e-12, %v7862_v35  ;;  %v7863_v61 = vmul.f32 0.0078125, %v7803_v45 }
0x1360   :  { %v7805_v15 = vpop.xlane.xlu0 %7804 }
0x1361   :  { %10683 = vrsqrt.f32 %v7894_v56  ;;  %v7895_v8 = vadd.f32 1e-12, %v7863_v61  ;;  %v7864_v42 = vmul.f32 0.0078125, %v7805_v15 }
0x1362   :  { %v7807_v37 = vpop.xlane.xlu1 %7806 }
0x1363   :  { %10685 = vrsqrt.f32 %v7895_v8  ;;  %v7896_v38 = vadd.f32 1e-12, %v7864_v42  ;;  %v7865_v1 = vmul.f32 0.0078125, %v7807_v37 }
0x1364   :  { %v7809_v12 = vpop.xlane.xlu0 %7808 }
0x1365   :  { %10687 = vrsqrt.f32 %v7896_v38  ;;  %v7897_v47 = vadd.f32 1e-12, %v7865_v1  ;;  %v7866_v52 = vmul.f32 0.0078125, %v7809_v12 }
0x1366   :  { %v7811_v5 = vpop.xlane.xlu1 %7810 }
0x1367   :  { %v10680_v57 = vpop.eup %10679  ;;  %10689 = vrsqrt.f32 %v7897_v47  ;;  %v7898_v54 = vadd.f32 1e-12, %v7866_v52  ;;  %v7867_v17 = vmul.f32 0.0078125, %v7811_v5 }
0x1368   :  { %v7956_v31 = vmul.f32 %v10680_v57, %v15509_v33  ;;  %v7813_v50 = vpop.xlane.xlu0 %7812 }
0x1369   :  { %v10682_v60 = vpop.eup %10681  ;;  %10691 = vrsqrt.f32 %v7898_v54  ;;  %v7899_v9 = vadd.f32 1e-12, %v7867_v17  ;;  %v7868_v11 = vmul.f32 0.0078125, %v7813_v50 }
0x136a   :  { %v7994_v30 = vmul.f32 %v15679_v58, %v7956_v31  ;;  %v7957_v55 = vmul.f32 %v10682_v60, %v15515_v7  ;;  %v7815_v13 = vpop.xlane.xlu1 %7814 }
0x136b   :  { %v10684_v48 = vpop.eup %10683  ;;  %10693 = vrsqrt.f32 %v7899_v9  ;;  %v7900_v10 = vadd.f32 1e-12, %v7868_v11  ;;  %v7869_v34 = vmul.f32 0.0078125, %v7815_v13 }
0x136c   :  { %v8032_v33 = vadd.f32 %v15685_v16, %v7994_v30  ;;  %v7995_v49 = vmul.f32 %v15679_v58, %v7957_v55  ;;  %v7958_v0 = vmul.f32 %v10684_v48, %v15522_v4  ;;  %v7817_v35 = vpop.xlane.xlu0 %7816 }
0x136d   :  { %v10686_v45 = vpop.eup %10685  ;;  %10695 = vrsqrt.f32 %v7900_v10  ;;  %v7901_v56 = vadd.f32 1e-12, %v7869_v34  ;;  %v7870_v61 = vmul.f32 0.0078125, %v7817_v35 }
0x136e   :  { %8064 = vst [vmem:[%s15892_s14] sm:$0xff] %v8032_v33  ;;  %v8033_v7 = vadd.f32 %v15685_v16, %v7995_v49  ;;  %v7996_v15 = vmul.f32 %v15679_v58, %v7958_v0  ;;  %v7959_v8 = vmul.f32 %v10686_v45, %v15528_v19  ;;  %v7819_v42 = vpop.xlane.xlu1 %7818 }
0x136f   :  { %v10688_v37 = vpop.eup %10687  ;;  %10697 = vrsqrt.f32 %v7901_v56  ;;  %v7902_v38 = vadd.f32 1e-12, %v7870_v61  ;;  %v7871_v4 = vmul.f32 0.0078125, %v7819_v42 }
0x1370   :  { %8065 = vst [vmem:[%s15892_s14 + $0x8] sm:$0xff] %v8033_v7  ;;  %v8034_v1 = vadd.f32 %v15685_v16, %v7996_v15  ;;  %v7997_v12 = vmul.f32 %v15679_v58, %v7959_v8  ;;  %v7960_v47 = vmul.f32 %v10688_v37, %v15533_v25  ;;  %v7821_v52 = vpop.xlane.xlu0 %7820 }
0x1371   :  { %v10690_v5 = vpop.eup %10689  ;;  %10699 = vrsqrt.f32 %v7902_v38  ;;  %v7903_v57 = vadd.f32 1e-12, %v7871_v4  ;;  %v7872_v19 = vmul.f32 0.0078125, %v7821_v52 }
0x1372   :  { %8066 = vst [vmem:[%s15892_s14 + $0x10] sm:$0xff] %v8034_v1  ;;  %v8035_v54 = vadd.f32 %v15685_v16, %v7997_v12  ;;  %v7998_v17 = vmul.f32 %v15679_v58, %v7960_v47  ;;  %v7961_v31 = vmul.f32 %v10690_v5, %v15538_v51  ;;  %v7823_v50 = vpop.xlane.xlu1 %7822 }
0x1373   :  { %v10692_v60 = vpop.eup %10691  ;;  %10701 = vrsqrt.f32 %v7903_v57  ;;  %v7904_v9 = vadd.f32 1e-12, %v7872_v19  ;;  %v7873_v25 = vmul.f32 0.0078125, %v7823_v50 }
0x1374   :  { %8067 = vst [vmem:[%s15892_s14 + $0x18] sm:$0xff] %v8035_v54  ;;  %v8036_v11 = vadd.f32 %v15685_v16, %v7998_v17  ;;  %v7999_v30 = vmul.f32 %v15679_v58, %v7961_v31  ;;  %v7962_v55 = vmul.f32 %v10692_v60, %v15543_v39  ;;  %v7825_v13 = vpop.xlane.xlu0 %7824 }
0x1375   :  { %v10694_v48 = vpop.eup %10693  ;;  %10703 = vrsqrt.f32 %v7904_v9  ;;  %v7905_v10 = vadd.f32 1e-12, %v7873_v25  ;;  %v7874_v51 = vmul.f32 0.0078125, %v7825_v13 }
0x1376   :  { %8068 = vst [vmem:[%s15892_s14 + $0x20] sm:$0xff] %v8036_v11  ;;  %v8037_v34 = vadd.f32 %v15685_v16, %v7999_v30  ;;  %v8000_v33 = vmul.f32 %v15679_v58, %v7962_v55  ;;  %v7963_v49 = vmul.f32 %v10694_v48, %v15548_v36  ;;  %v7827_v0 = vpop.xlane.xlu1 %7826 }
0x1377   :  { %v10696_v35 = vpop.eup %10695  ;;  %10705 = vrsqrt.f32 %v7905_v10  ;;  %v7906_v45 = vadd.f32 1e-12, %v7874_v51  ;;  %v7875_v39 = vmul.f32 0.0078125, %v7827_v0 }
0x1378   :  { %8069 = vst [vmem:[%s15892_s14 + $0x28] sm:$0xff] %v8037_v34  ;;  %v8038_v56 = vadd.f32 %v15685_v16, %v8000_v33  ;;  %v8001_v61 = vmul.f32 %v15679_v58, %v7963_v49  ;;  %v7964_v7 = vmul.f32 %v10696_v35, %v15553_v23 }
0x1379   :  { %v10698_v15 = vpop.eup %10697  ;;  %10707 = vrsqrt.f32 %v7906_v45  ;;  %v7907_v8 = vadd.f32 1e-12, %v7875_v39 }
0x137a   :  { %8070 = vst [vmem:[%s15892_s14 + $0x30] sm:$0xff] %v8038_v56  ;;  %v8039_v36 = vadd.f32 %v15685_v16, %v8001_v61  ;;  %v8002_v42 = vmul.f32 %v15679_v58, %v7964_v7  ;;  %v7965_v37 = vmul.f32 %v10698_v15, %v15558_v26 }
0x137b   :  { %v10700_v38 = vpop.eup %10699  ;;  %10709 = vrsqrt.f32 %v7907_v8 }
0x137c   :  { %8071 = vst [vmem:[%s15892_s14 + $0x38] sm:$0xff] %v8039_v36  ;;  %v8040_v23 = vadd.f32 %v15685_v16, %v8002_v42  ;;  %v8003_v4 = vmul.f32 %v15679_v58, %v7965_v37  ;;  %v7966_v1 = vmul.f32 %v10700_v38, %v15563_v44 }
0x137d   :  { %v10702_v12 = vpop.eup %10701 }
0x137e   :  { %8072 = vst [vmem:[%s15892_s14 + $0x40] sm:$0xff] %v8040_v23  ;;  %v8041_v47 = vadd.f32 %v15685_v16, %v8003_v4  ;;  %v8004_v26 = vmul.f32 %v15679_v58, %v7966_v1  ;;  %v7967_v52 = vmul.f32 %v10702_v12, %v15568_v24 }
0x137f   :  { %v10704_v5 = vpop.eup %10703 }
0x1380   :  { %8073 = vst [vmem:[%s15892_s14 + $0x48] sm:$0xff] %v8041_v47  ;;  %v8042_v57 = vadd.f32 %v15685_v16, %v8004_v26  ;;  %v8005_v44 = vmul.f32 %v15679_v58, %v7967_v52  ;;  %v7968_v19 = vmul.f32 %v10704_v5, %v15573_v29 }
0x1381   :  { %v10706_v54 = vpop.eup %10705 }
0x1382   :  { %8074 = vst [vmem:[%s15892_s14 + $0x50] sm:$0xff] %v8042_v57  ;;  %v8043_v17 = vadd.f32 %v15685_v16, %v8005_v44  ;;  %v8006_v24 = vmul.f32 %v15679_v58, %v7968_v19  ;;  %v7969_v31 = vmul.f32 %v10706_v54, %v15578_v41 }
0x1383   :  { %v10708_v50 = vpop.eup %10707 }
0x1384   :  { %8075 = vst [vmem:[%s15892_s14 + $0x58] sm:$0xff] %v8043_v17  ;;  %v8044_v60 = vadd.f32 %v15685_v16, %v8006_v24  ;;  %v8007_v29 = vmul.f32 %v15679_v58, %v7969_v31  ;;  %v7970_v9 = vmul.f32 %v10708_v50, %v15583_v40 }
0x1385   :  { %v10710_v25 = vpop.eup %10709 }
0x1386   :  { %8076 = vst [vmem:[%s15892_s14 + $0x60] sm:$0xff] %v8044_v60  ;;  %v8045_v11 = vadd.f32 %v15685_v16, %v8007_v29  ;;  %v8008_v41 = vmul.f32 %v15679_v58, %v7970_v9  ;;  %v7971_v30 = vmul.f32 %v10710_v25, %v15588_v43 }
0x1388   :  { %8077 = vst [vmem:[%s15892_s14 + $0x68] sm:$0xff] %v8045_v11  ;;  %v8046_v55 = vadd.f32 %v15685_v16, %v8008_v41  ;;  %v8009_v13 = vmul.f32 %v15679_v58, %v7971_v30  ;;  %v7829_v40 = vpop.xlane.xlu0 %7828 }
0x1389   :  { %v7876_v10 = vmul.f32 0.0078125, %v7829_v40 }
0x138a   :  { %8078 = vst [vmem:[%s15892_s14 + $0x70] sm:$0xff] %v8046_v55  ;;  %v8047_v48 = vadd.f32 %v15685_v16, %v8009_v13  ;;  %v7831_v51 = vpop.xlane.xlu1 %7830 }
0x138b   :  { %v7908_v43 = vadd.f32 1e-12, %v7876_v10  ;;  %v7877_v34 = vmul.f32 0.0078125, %v7831_v51 }
0x138c   :  { %8079 = vst [vmem:[%s15892_s14 + $0x78] sm:$0xff] %v8047_v48 }
0x138d   :  { %10711 = vrsqrt.f32 %v7908_v43  ;;  %v7909_v33 = vadd.f32 1e-12, %v7877_v34 }
0x138f   :  { %10713 = vrsqrt.f32 %v7909_v33 }
0x1390   :  { %v7833_v49 = vpop.xlane.xlu0 %7832 }
0x1391   :  { %v7878_v0 = vmul.f32 0.0078125, %v7833_v49 }
0x1392   :  { %v7835_v35 = vpop.xlane.xlu1 %7834 }
0x1393   :  { %v7910_v45 = vadd.f32 1e-12, %v7878_v0  ;;  %v7879_v39 = vmul.f32 0.0078125, %v7835_v35 }
0x1395   :  { %10715 = vrsqrt.f32 %v7910_v45  ;;  %v7911_v56 = vadd.f32 1e-12, %v7879_v39 }
0x1397   :  { %v10712_v61 = vpop.eup %10711  ;;  %10717 = vrsqrt.f32 %v7911_v56 }
0x1398   :  { %v7972_v7 = vmul.f32 %v10712_v61, %v15597_v63  ;;  %v7837_v15 = vpop.xlane.xlu0 %7836 }
0x1399   :  { %v10714_v8 = vpop.eup %10713  ;;  %v7880_v36 = vmul.f32 0.0078125, %v7837_v15 }
0x139a   :  { %v8010_v42 = vmul.f32 %v15679_v58, %v7972_v7  ;;  %v7973_v37 = vmul.f32 %v10714_v8, %v15600_v21  ;;  %v7839_v38 = vpop.xlane.xlu1 %7838 }
0x139b   :  { %v7912_v23 = vadd.f32 1e-12, %v7880_v36  ;;  %v7881_v4 = vmul.f32 0.0078125, %v7839_v38 }
0x139c   :  { %v8048_v1 = vadd.f32 %v15685_v16, %v8010_v42  ;;  %v8011_v12 = vmul.f32 %v15679_v58, %v7973_v37 }
0x139d   :  { %10719 = vrsqrt.f32 %v7912_v23  ;;  %v7913_v47 = vadd.f32 1e-12, %v7881_v4 }
0x139e   :  { %8080 = vst [vmem:[%s15892_s14 + $0x80] sm:$0xff] %v8048_v1  ;;  %v8049_v63 = vadd.f32 %v15685_v16, %v8011_v12 }
0x139f   :  { %v10716_v26 = vpop.eup %10715  ;;  %10721 = vrsqrt.f32 %v7913_v47 }
0x13a0   :  { %8081 = vst [vmem:[%s15892_s14 + $0x88] sm:$0xff] %v8049_v63  ;;  %v7974_v21 = vmul.f32 %v10716_v26, %v15607_v3  ;;  %v7841_v52 = vpop.xlane.xlu0 %7840 }
0x13a1   :  { %v10718_v5 = vpop.eup %10717  ;;  %v7882_v57 = vmul.f32 0.0078125, %v7841_v52 }
0x13a2   :  { %v8012_v44 = vmul.f32 %v15679_v58, %v7974_v21  ;;  %v7975_v19 = vmul.f32 %v10718_v5, %v15610_v28  ;;  %v7843_v54 = vpop.xlane.xlu1 %7842 }
0x13a3   :  { %v7914_v17 = vadd.f32 1e-12, %v7882_v57  ;;  %v7883_v24 = vmul.f32 0.0078125, %v7843_v54 }
0x13a4   :  { %v8050_v31 = vadd.f32 %v15685_v16, %v8012_v44  ;;  %v8013_v50 = vmul.f32 %v15679_v58, %v7975_v19 }
0x13a5   :  { %10723 = vrsqrt.f32 %v7914_v17  ;;  %v7915_v60 = vadd.f32 1e-12, %v7883_v24 }
0x13a6   :  { %8082 = vst [vmem:[%s15892_s14 + $0x90] sm:$0xff] %v8050_v31  ;;  %v8051_v3 = vadd.f32 %v15685_v16, %v8013_v50 }
0x13a7   :  { %v10720_v29 = vpop.eup %10719  ;;  %10725 = vrsqrt.f32 %v7915_v60 }
0x13a8   :  { %8083 = vst [vmem:[%s15892_s14 + $0x98] sm:$0xff] %v8051_v3  ;;  %v7976_v28 = vmul.f32 %v10720_v29, %v15617_v53 }
0x13a9   :  { %v10722_v9 = vpop.eup %10721 }
0x13aa   :  { %v8014_v25 = vmul.f32 %v15679_v58, %v7976_v28  ;;  %v7977_v11 = vmul.f32 %v10722_v9, %v15620_v59 }
0x13ac   :  { %v8052_v41 = vadd.f32 %v15685_v16, %v8014_v25  ;;  %v8015_v30 = vmul.f32 %v15679_v58, %v7977_v11 }
0x13ae   :  { %8084 = vst [vmem:[%s15892_s14 + $0xa0] sm:$0xff] %v8052_v41  ;;  %v8053_v55 = vadd.f32 %v15685_v16, %v8015_v30 }
0x13af   :  { %v10724_v13 = vpop.eup %10723 }
0x13b0   :  { %8085 = vst [vmem:[%s15892_s14 + $0xa8] sm:$0xff] %v8053_v55  ;;  %v7978_v53 = vmul.f32 %v10724_v13, %v15627_v62 }
0x13b1   :  { %v10726_v40 = vpop.eup %10725 }
0x13b2   :  { %v8016_v59 = vmul.f32 %v15679_v58, %v7978_v53  ;;  %v7979_v48 = vmul.f32 %v10726_v40, %v15630_v18 }
0x13b4   :  { %v8054_v10 = vadd.f32 %v15685_v16, %v8016_v59  ;;  %v8017_v51 = vmul.f32 %v15679_v58, %v7979_v48 }
0x13b6   :  { %8086 = vst [vmem:[%s15892_s14 + $0xb0] sm:$0xff] %v8054_v10  ;;  %v8055_v43 = vadd.f32 %v15685_v16, %v8017_v51 }
0x13b8   :  { %8087 = vst [vmem:[%s15892_s14 + $0xb8] sm:$0xff] %v8055_v43 }
0x13c3   :  { %v7845_v62 = vpop.xlane.xlu0 %7844 }
0x13c4   :  { %v7884_v34 = vmul.f32 0.0078125, %v7845_v62 }
0x13c5   :  { %v7847_v33 = vpop.xlane.xlu1 %7846 }
0x13c6   :  { %v7916_v49 = vadd.f32 1e-12, %v7884_v34  ;;  %v7885_v0 = vmul.f32 0.0078125, %v7847_v33 }
0x13c8   :  { %10727 = vrsqrt.f32 %v7916_v49  ;;  %v7917_v18 = vadd.f32 1e-12, %v7885_v0 }
0x13ca   :  { %10729 = vrsqrt.f32 %v7917_v18 }
0x13cb   :  { %v7849_v35 = vpop.xlane.xlu0 %7848 }
0x13cc   :  { %v7886_v45 = vmul.f32 0.0078125, %v7849_v35 }
0x13cd   :  { %v7851_v39 = vpop.xlane.xlu1 %7850 }
0x13ce   :  { %v7918_v56 = vadd.f32 1e-12, %v7886_v45  ;;  %v7887_v61 = vmul.f32 0.0078125, %v7851_v39 }
0x13d0   :  { %10731 = vrsqrt.f32 %v7918_v56  ;;  %v7919_v7 = vadd.f32 1e-12, %v7887_v61 }
0x13d2   :  { %v10728_v15 = vpop.eup %10727  ;;  %10733 = vrsqrt.f32 %v7919_v7 }
0x13d3   :  { %v7980_v8 = vmul.f32 %v10728_v15, %v15637_v46 }
0x13d4   :  { %v10730_v36 = vpop.eup %10729 }
0x13d5   :  { %v8018_v42 = vmul.f32 %v15679_v58, %v7980_v8  ;;  %v7981_v37 = vmul.f32 %v10730_v36, %v15640_v27 }
0x13d6   :  { %v7853_v38 = vpop.xlane.xlu0 %7852 }
0x13d7   :  { %v7888_v23 = vmul.f32 0.0078125, %v7853_v38  ;;  %v8056_v4 = vadd.f32 %v15685_v16, %v8018_v42  ;;  %v8019_v1 = vmul.f32 %v15679_v58, %v7981_v37 }
0x13d8   :  { %v7855_v12 = vpop.xlane.xlu1 %7854 }
0x13d9   :  { %v7920_v47 = vadd.f32 1e-12, %v7888_v23  ;;  %v7889_v63 = vmul.f32 0.0078125, %v7855_v12  ;;  %8088 = vst [vmem:[%s15892_s14 + $0xc0] sm:$0xff] %v8056_v4  ;;  %v8057_v46 = vadd.f32 %v15685_v16, %v8019_v1 }
0x13da   :  { %v10732_v26 = vpop.eup %10731 }
0x13db   :  { %10735 = vrsqrt.f32 %v7920_v47  ;;  %v7921_v21 = vadd.f32 1e-12, %v7889_v63  ;;  %8089 = vst [vmem:[%s15892_s14 + $0xc8] sm:$0xff] %v8057_v46  ;;  %v7982_v27 = vmul.f32 %v10732_v26, %v15647_v6 }
0x13dc   :  { %v10734_v52 = vpop.eup %10733 }
0x13dd   :  { %10737 = vrsqrt.f32 %v7921_v21  ;;  %v8020_v5 = vmul.f32 %v15679_v58, %v7982_v27  ;;  %v7983_v57 = vmul.f32 %v10734_v52, %v15650_v14 }
0x13df   :  { %v8058_v44 = vadd.f32 %v15685_v16, %v8020_v5  ;;  %v8021_v19 = vmul.f32 %v15679_v58, %v7983_v57 }
0x13e1   :  { %8090 = vst [vmem:[%s15892_s14 + $0xd0] sm:$0xff] %v8058_v44  ;;  %v8059_v54 = vadd.f32 %v15685_v16, %v8021_v19 }
0x13e3   :  { %8091 = vst [vmem:[%s15892_s14 + $0xd8] sm:$0xff] %v8059_v54 }
0x13e5   :  { %v10736_v6 = vpop.eup %10735 }
0x13e6   :  { %v7984_v17 = vmul.f32 %v10736_v6, %v15657_v2 }
0x13e7   :  { %v10738_v24 = vpop.eup %10737 }
0x13e8   :  { %v8022_v14 = vmul.f32 %v15679_v58, %v7984_v17  ;;  %v7985_v31 = vmul.f32 %v10738_v24, %v15660_v20  ;;  %v7857_v50 = vpop.xlane.xlu0 %7856 }
0x13e9   :  { %v7890_v60 = vmul.f32 0.0078125, %v7857_v50 }
0x13ea   :  { %v8060_v3 = vadd.f32 %v15685_v16, %v8022_v14  ;;  %v8023_v29 = vmul.f32 %v15679_v58, %v7985_v31  ;;  %v7859_v28 = vpop.xlane.xlu1 %7858 }
0x13eb   :  { %v7922_v9 = vadd.f32 1e-12, %v7890_v60  ;;  %v7891_v25 = vmul.f32 0.0078125, %v7859_v28 }
0x13ec   :  { %8092 = vst [vmem:[%s15892_s14 + $0xe0] sm:$0xff] %v8060_v3  ;;  %v8061_v2 = vadd.f32 %v15685_v16, %v8023_v29 }
0x13ed   :  { %10739 = vrsqrt.f32 %v7922_v9  ;;  %v7923_v11 = vadd.f32 1e-12, %v7891_v25 }
0x13ee   :  { %8093 = vst [vmem:[%s15892_s14 + $0xe8] sm:$0xff] %v8061_v2 }
0x13ef   :  { %10741 = vrsqrt.f32 %v7923_v11 }
0x13f7   :  { %v10740_v20 = vpop.eup %10739 }
0x13f8   :  { %v7986_v41 = vmul.f32 %v10740_v20, %v15667_v22 }
0x13f9   :  { %v10742_v30 = vpop.eup %10741 }
0x13fa   :  { %v8024_v55 = vmul.f32 %v15679_v58, %v7986_v41  ;;  %v7987_v13 = vmul.f32 %v10742_v30, %v15670_v32 }
0x13fc   :  { %v8062_v53 = vadd.f32 %v15685_v16, %v8024_v55  ;;  %v8025_v40 = vmul.f32 %v15679_v58, %v7987_v13 }
0x13fe   :  { %8094 = vst [vmem:[%s15892_s14 + $0xf0] sm:$0xff] %v8062_v53  ;;  %v8063_v59 = vadd.f32 %v15685_v16, %v8025_v40 }
0x1400   :  { %8095 = vst [vmem:[%s15892_s14 + $0xf8] sm:$0xff] %v8063_v59 }

</bundles_post_ra>
